<compile_context>
chip_gen: v7x
topology: tpu7x:2x2x1
jax: 0.10.0
libtpu: 0.0.40
codegen_flags: <defaults>
</compile_context>

<pallas_src>
import math

import jax
import jax.numpy as jnp
import numpy as np
from jax.experimental import pallas as pl
from jax.experimental.pallas import tpu as pltpu

# ---- module hyper-parameters (OccnetWidthDecoderAdabins defaults) ----
DIM = 3            # query point dimension
C_DIM = 32         # latent code dim (decoder c_dim = 2 * C_DIM after pos-enc concat)
HIDDEN = 32        # OccnetDecoderFC hidden_size (per decoder; packed hidden = 64)
N_BLOCKS = 5       # number of ResnetBlockFC blocks
NC_QUAL = 12       # decoder_qual n_classes
NC_WIDTH = 20      # decoder_width n_classes (== num_bins)
NUM_BINS = 20
MIN_VAL = 0.0
MAX_VAL = 0.08

H2 = 2 * HIDDEN            # packed hidden width (qual | width)
NC_PACK = NC_QUAL + NC_WIDTH


# --------------------------------------------------------------------------
# Pallas kernel
# --------------------------------------------------------------------------
def adabins_kernel(net0_ref, c_ref, w0_ref, b0_ref, w1_ref, b1_ref,
                   wo_ref, bo_ref, bins_ref, out_ref):
    """One grid step: NB latents x T_TILE query points through the fused MLP.

    net0_ref : (T_TILE, H2)   f32   hoisted fc_p(pts) + bias  (packed)
    c_ref    : (NB, N_BLOCKS, H2) f32 hoisted fc_c[i](latent) + bias (packed)
    w0/w1    : (N_BLOCKS, H2, H2)   block-diagonal resnet weights (f32 or bf16)
    b0/b1    : (N_BLOCKS, 1, H2)    f32
    wo       : (H2, NC_PACK) block-diagonal fc_out weights, bo : (1, NC_PACK) f32
    bins     : (1, NUM_BINS) f32
    out_ref  : (NB, T_TILE, NC_QUAL + 1)
    """
    nb, tt, _ = out_ref.shape
    h2 = net0_ref.shape[-1]
    mdt = w0_ref.dtype     # matmul input dtype (f32 or bf16); accumulation is f32

    net0 = net0_ref[...]                                     # (tt, H2)
    c = c_ref[...]                                           # (nb, N_BLOCKS, H2)
    net = jnp.broadcast_to(net0[None, :, :], (nb, tt, h2))   # (nb, tt, H2) f32

    for i in range(N_BLOCKS):
        # net = net + fc_c[i](latent)   (hoisted; broadcast over the T tile)
        net = net + c[:, i:i + 1, :]
        # ResnetBlockFC (size_in == size_out -> identity shortcut), fused 64-wide
        x = jnp.maximum(net, 0.0).reshape(nb * tt, h2).astype(mdt)
        h = jnp.dot(x, w0_ref[i], preferred_element_type=jnp.float32) + b0_ref[i]
        y = jnp.maximum(h, 0.0).astype(mdt)
        dx = jnp.dot(y, w1_ref[i], preferred_element_type=jnp.float32) + b1_ref[i]
        net = net + dx.reshape(nb, tt, h2)

    # fused fc_out: columns 0:12 = qual logits, 12:32 = width-bin logits
    xo = jnp.maximum(net, 0.0).reshape(nb * tt, h2).astype(mdt)
    logits = (jnp.dot(xo, wo_ref[...], preferred_element_type=jnp.float32)
              + bo_ref[...]).reshape(nb, tt, NC_PACK)

    qual = logits[:, :, :NC_QUAL]
    wlog = logits[:, :, NC_QUAL:]

    # width = sum(bins * softmax(width_bins, -1), -1, keepdims=True)  (all f32)
    m = jnp.max(wlog, axis=-1, keepdims=True)
    e = jnp.exp(wlog - m)
    width = (jnp.sum(bins_ref[...] * e, axis=-1, keepdims=True)
             / jnp.sum(e, axis=-1, keepdims=True))

    # split stores instead of an in-kernel concatenate
    out_ref[:, :, 0:NC_QUAL] = qual
    out_ref[:, :, NC_QUAL:NC_QUAL + 1] = width


# --------------------------------------------------------------------------
# Parameter packing (fuse the two decoders into one 64-wide decoder)
# --------------------------------------------------------------------------
def _block_diag(a, b):
    """[..., m, p] , [..., m, q]  ->  [..., 2m, p+q] block-diagonal."""
    za = jnp.zeros(a.shape[:-1] + (b.shape[-1],), a.dtype)
    zb = jnp.zeros(b.shape[:-1] + (a.shape[-1],), b.dtype)
    top = jnp.concatenate([a, za], axis=-1)
    bot = jnp.concatenate([zb, b], axis=-1)
    return jnp.concatenate([top, bot], axis=-2)


def pack_decoder_params(params_q, params_w):
    wp_q, bp_q, wc_q, bc_q, w0_q, b0_q, w1_q, b1_q, wo_q, bo_q = params_q
    wp_w, bp_w, wc_w, bc_w, w0_w, b0_w, w1_w, b1_w, wo_w, bo_w = params_w

    wp_p = jnp.concatenate([wp_q, wp_w], axis=-1)      # (DIM, H2)
    bp_p = jnp.concatenate([bp_q, bp_w], axis=-1)      # (1, H2)
    wc_p = jnp.concatenate([wc_q, wc_w], axis=-1)      # (N_BLOCKS, 2*C_DIM, H2)
    bc_p = jnp.concatenate([bc_q, bc_w], axis=-1)      # (N_BLOCKS, 1, H2)
    w0_p = _block_diag(w0_q, w0_w)                     # (N_BLOCKS, H2, H2)
    b0_p = jnp.concatenate([b0_q, b0_w], axis=-1)      # (N_BLOCKS, 1, H2)
    w1_p = _block_diag(w1_q, w1_w)                     # (N_BLOCKS, H2, H2)
    b1_p = jnp.concatenate([b1_q, b1_w], axis=-1)      # (N_BLOCKS, 1, H2)
    wo_p = _block_diag(wo_q, wo_w)                     # (H2, NC_PACK)
    bo_p = jnp.concatenate([bo_q, bo_w], axis=-1)      # (1, NC_PACK)
    return wp_p, bp_p, wc_p, bc_p, w0_p, b0_p, w1_p, b1_p, wo_p, bo_p


# --------------------------------------------------------------------------
# Wrapper
# --------------------------------------------------------------------------
def occnet_width_decoder_adabins(query_points, latent, query_pos_enc,
                                 params_q, params_w, bins,
                                 *, latent_block=8, t_tile=256,
                                 matmul_dtype=jnp.float32):
    # NOTE: torch broadcasting in OccnetDecoderFC requires query_points batch == 1
    # (repeat_interleave over latent.shape[0]); we share one point block across
    # all N latent codes, which is exactly equivalent.
    # TODO(synk): q_sim / scale / with_pos / with_scale branches are disabled by
    # the module defaults and are not implemented in the kernel.
    assert query_points.shape[0] == 1, "query_points batch must be 1"
    N = latent.shape[0]
    T = query_points.shape[1]

    (wp_p, bp_p, wc_p, bc_p, w0_p, b0_p,
     w1_p, b1_p, wo_p, bo_p) = pack_decoder_params(params_q, params_w)

    lat = jnp.concatenate([latent, query_pos_enc], axis=-1).astype(jnp.float32)[:, 0, :]
    pts = query_points[0].astype(jnp.float32)                         # (T, DIM)

    # Hoisted out of the serial grid loop:
    #   fc_p(pts)         -> one (T, DIM) x (DIM, H2) matmul
    #   fc_c[i](latent)   -> one batched (N, 2C) x (N_BLOCKS, 2C, H2) matmul
    net0 = pts @ wp_p + bp_p                                          # (T, H2)
    c_all = (jnp.einsum('nk,bkh->nbh', lat, wc_p)
             + bc_p[None, :, 0, :])                                   # (N, N_BLOCKS, H2)

    # Tile sizes; pad N / T so the grid divides evenly (padded rows dropped later).
    nb = max(1, min(latent_block, N))
    tt = max(8, min(t_tile, pl.cdiv(T, 8) * 8))
    n_pad = pl.cdiv(N, nb) * nb
    t_pad = pl.cdiv(T, tt) * tt
    net0 = jnp.pad(net0, ((0, t_pad - T), (0, 0)))
    c_all = jnp.pad(c_all, ((0, n_pad - N), (0, 0), (0, 0)))

    # MXU inputs optionally in bf16 (recommended on v6e/v7x); accumulation and
    # all VPU/EUP math (biases, ReLU, softmax, width reduction) stay f32.
    w0m = w0_p.astype(matmul_dtype)
    w1m = w1_p.astype(matmul_dtype)
    wom = wo_p.astype(matmul_dtype)

    bins2d = bins.reshape(1, NUM_BINS).astype(jnp.float32)

    grid = (n_pad // nb, t_pad // tt)

    def fixed(arr):
        nd = arr.ndim
        return pl.BlockSpec(arr.shape, lambda n, t, _nd=nd: (0,) * _nd)

    in_specs = [
        pl.BlockSpec((tt, H2), lambda n, t: (t, 0)),              # net0 (per T tile)
        pl.BlockSpec((nb, N_BLOCKS, H2), lambda n, t: (n, 0, 0)), # c_all (per latent block)
        fixed(w0m), fixed(b0_p),
        fixed(w1m), fixed(b1_p),
        fixed(wom), fixed(bo_p),
        fixed(bins2d),
    ]
    out_specs = pl.BlockSpec((nb, tt, NC_QUAL + 1), lambda n, t: (n, t, 0))

    out = pl.pallas_call(
        adabins_kernel,
        out_shape=jax.ShapeDtypeStruct((n_pad, t_pad, NC_QUAL + 1), jnp.float32),
        grid_spec=pltpu.PrefetchScalarGridSpec(
            num_scalar_prefetch=0,
            grid=grid,
            in_specs=in_specs,
            out_specs=out_specs,
        ),
        compiler_params=pltpu.CompilerParams(
            dimension_semantics=("parallel", "parallel")),
    )(net0, c_all, w0m, b0_p, w1m, b1_p, wom, bo_p, bins2d)

    return out[:N, :T, :]


# --------------------------------------------------------------------------
# Deterministic parameter init (synthetic; no checkpoint loading)
# --------------------------------------------------------------------------
def _init_linear(key, fan_in, fan_out):
    k1, k2 = jax.random.split(key)
    w = jax.random.normal(k1, (fan_in, fan_out), jnp.float32) / math.sqrt(fan_in)
    b = jax.random.normal(k2, (1, fan_out), jnp.float32) * 0.01
    return w, b


def init_decoder(key, dim, c_in, hidden, n_blocks, n_classes):
    keys = jax.random.split(key, 2 + 3 * n_blocks)
    wp, bp = _init_linear(keys[0], dim, hidden)
    wc_l, bc_l, w0_l, b0_l, w1_l, b1_l = [], [], [], [], [], []
    for i in range(n_blocks):
        wci, bci = _init_linear(keys[1 + 3 * i], c_in, hidden)
        w0i, b0i = _init_linear(keys[2 + 3 * i], hidden, hidden)
        w1i, b1i = _init_linear(keys[3 + 3 * i], hidden, hidden)
        wc_l.append(wci); bc_l.append(bci)
        w0_l.append(w0i); b0_l.append(b0i)
        w1_l.append(w1i); b1_l.append(b1i)
    wo, bo = _init_linear(keys[1 + 3 * n_blocks], hidden, n_classes)
    return [wp, bp,
            jnp.stack(wc_l), jnp.stack(bc_l),
            jnp.stack(w0_l), jnp.stack(b0_l),
            jnp.stack(w1_l), jnp.stack(b1_l),
            wo, bo]


# --------------------------------------------------------------------------
# Pure-JAX reference (mirrors the PyTorch forward) for correctness check
# --------------------------------------------------------------------------
def ref_forward(query_points, latent, query_pos_enc, params_q, params_w, bins):
    lat = jnp.concatenate([latent, query_pos_enc], axis=-1)          # (N,1,2C)
    N = lat.shape[0]
    qp = jnp.repeat(query_points, N, axis=0).astype(jnp.float32)     # (N,T,DIM)

    def dec(p):
        wp, bp, wc, bc, w0, b0, w1, b1, wo, bo = p
        net = qp @ wp + bp
        for i in range(N_BLOCKS):
            net = net + (lat @ wc[i] + bc[i])
            h = jnp.maximum(net, 0.0) @ w0[i] + b0[i]
            dx = jnp.maximum(h, 0.0) @ w1[i] + b1[i]
            net = net + dx
        return jnp.maximum(net, 0.0) @ wo + bo

    qual = dec(params_q)
    wlog = dec(params_w)
    p = jax.nn.softmax(wlog, axis=-1)
    width = jnp.sum(bins.reshape(-1) * p, axis=-1, keepdims=True)
    return jnp.concatenate([qual, width], axis=-1)


# --------------------------------------------------------------------------
if __name__ == "__main__":
    key = jax.random.PRNGKey(0)
    kq, kw, k1, k2, k3 = jax.random.split(key, 5)

    params_q = init_decoder(kq, DIM, 2 * C_DIM, HIDDEN, N_BLOCKS, NC_QUAL)
    params_w = init_decoder(kw, DIM, 2 * C_DIM, HIDDEN, N_BLOCKS, NC_WIDTH)
    bins = jnp.linspace(MIN_VAL, MAX_VAL, NUM_BINS, dtype=jnp.float32)

    N = 6     # number of latent codes (objects) — not a multiple of latent_block
    T = 256   # number of query points
    query_points = jax.random.uniform(k1, (1, T, DIM), jnp.float32, -0.5, 0.5)
    latent = jax.random.normal(k2, (N, 1, C_DIM), jnp.float32)
    query_pos_enc = jax.random.normal(k3, (N, 1, C_DIM), jnp.float32)

    ref = ref_forward(query_points, latent, query_pos_enc, params_q, params_w, bins)

    # f32 matmul path: exact-semantics check (2x2 grid -> exercises padding,
    # latent blocking and both parallel grid axes).
    out = occnet_width_decoder_adabins(query_points, latent, query_pos_enc,
                                       params_q, params_w, bins,
                                       latent_block=4, t_tile=128,
                                       matmul_dtype=jnp.float32)
    out = jax.block_until_ready(out)
    np.testing.assert_allclose(np.asarray(out), np.asarray(ref), rtol=2e-4, atol=2e-5)

    # bf16-weight MXU path (recommended on v6e/v7x); f32 accumulation keeps the
    # result within a loose band of the f32 reference (sanity check only).
    out_bf16 = occnet_width_decoder_adabins(query_points, latent, query_pos_enc,
                                            params_q, params_w, bins,
                                            latent_block=4, t_tile=128,
                                            matmul_dtype=jnp.bfloat16)
    out_bf16 = jax.block_until_ready(out_bf16)
    np.testing.assert_allclose(np.asarray(out_bf16), np.asarray(ref),
                               rtol=0.3, atol=0.3)

    print("KERNEL_OK")
</pallas_src>

<mosaic_0001>
module attributes {stable_mosaic.version = 11 : i64} {
  func.func @adabins_kernel(%arg0: i32, %arg1: i32, %arg2: memref<128x64xf32, #tpu.memory_space<vmem>>, %arg3: memref<4x5x64xf32, #tpu.memory_space<vmem>>, %arg4: memref<5x64x64xf32, #tpu.memory_space<vmem>>, %arg5: memref<5x1x64xf32, #tpu.memory_space<vmem>>, %arg6: memref<5x64x64xf32, #tpu.memory_space<vmem>>, %arg7: memref<5x1x64xf32, #tpu.memory_space<vmem>>, %arg8: memref<64x32xf32, #tpu.memory_space<vmem>>, %arg9: memref<1x32xf32, #tpu.memory_space<vmem>>, %arg10: memref<1x20xf32, #tpu.memory_space<vmem>>, %arg11: memref<4x128x13xf32, #tpu.memory_space<vmem>>) attributes {dimension_semantics = [#tpu.dimension_semantics<parallel>, #tpu.dimension_semantics<parallel>], iteration_bounds = array<i64: 2, 2>, scalar_prefetch = 0 : i64, scratch_operands = 0 : i64, tpu.core_type = #tpu.core_type<tc>, window_params = [{transform_indices = @transform_0, window_bounds = array<i64: 128, 64>}, {transform_indices = @transform_1, window_bounds = array<i64: 4, 5, 64>}, {pipeline_mode = #tpu.pipeline_mode<synchronous>, transform_indices = @transform_2, window_bounds = array<i64: 5, 64, 64>}, {pipeline_mode = #tpu.pipeline_mode<synchronous>, transform_indices = @transform_3, window_bounds = array<i64: 5, 1, 64>}, {pipeline_mode = #tpu.pipeline_mode<synchronous>, transform_indices = @transform_4, window_bounds = array<i64: 5, 64, 64>}, {pipeline_mode = #tpu.pipeline_mode<synchronous>, transform_indices = @transform_5, window_bounds = array<i64: 5, 1, 64>}, {pipeline_mode = #tpu.pipeline_mode<synchronous>, transform_indices = @transform_6, window_bounds = array<i64: 64, 32>}, {pipeline_mode = #tpu.pipeline_mode<synchronous>, transform_indices = @transform_7, window_bounds = array<i64: 1, 32>}, {pipeline_mode = #tpu.pipeline_mode<synchronous>, transform_indices = @transform_8, window_bounds = array<i64: 1, 20>}, {transform_indices = @transform_9, window_bounds = array<i64: 4, 128, 13>}]} {
    %c0 = arith.constant 0 : index
    %c0_0 = arith.constant 0 : index
    %0 = vector.load %arg2[%c0, %c0_0] : memref<128x64xf32, #tpu.memory_space<vmem>>, vector<128x64xf32>
    %c0_1 = arith.constant 0 : index
    %c0_2 = arith.constant 0 : index
    %c0_3 = arith.constant 0 : index
    %1 = vector.load %arg3[%c0_1, %c0_2, %c0_3] : memref<4x5x64xf32, #tpu.memory_space<vmem>>, vector<4x5x64xf32>
    %2 = vector.shape_cast %0 : vector<128x64xf32> to vector<1x128x64xf32>
    %3 = vector.shape_cast %2 : vector<1x128x64xf32> to vector<1x128x64xf32>
    %4 = vector.broadcast %3 : vector<1x128x64xf32> to vector<4x128x64xf32>
    %5 = vector.extract_strided_slice %1 {offsets = [0, 0, 0], sizes = [4, 1, 64], strides = [1, 1, 1]} : vector<4x5x64xf32> to vector<4x1x64xf32>
    %6 = vector.broadcast %5 : vector<4x1x64xf32> to vector<4x128x64xf32>
    %7 = arith.addf %4, %6 : vector<4x128x64xf32>
    %cst = arith.constant 0.000000e+00 : f32
    %8 = vector.broadcast %cst : f32 to vector<4x128x64xf32>
    %9 = arith.maximumf %7, %8 : vector<4x128x64xf32>
    %10 = vector.shape_cast %9 : vector<4x128x64xf32> to vector<512x64xf32>
    %c0_4 = arith.constant 0 : index
    %c0_5 = arith.constant 0 : index
    %c0_6 = arith.constant 0 : index
    %11 = vector.load %arg4[%c0_4, %c0_5, %c0_6] : memref<5x64x64xf32, #tpu.memory_space<vmem>>, vector<1x64x64xf32>
    %12 = vector.shape_cast %11 : vector<1x64x64xf32> to vector<64x64xf32>
    %cst_7 = arith.constant dense<0.000000e+00> : vector<512x64xf32>
    %13 = tpu.matmul %10, %12, %cst_7 {dimension_numbers = #tpu.dot_dimension_numbers<[1], [0], [0], [1], [0, 0, 1, 1], [], []>} : vector<512x64xf32>, vector<64x64xf32>, vector<512x64xf32> -> vector<512x64xf32>
    %c0_8 = arith.constant 0 : index
    %c0_9 = arith.constant 0 : index
    %c0_10 = arith.constant 0 : index
    %14 = vector.load %arg5[%c0_8, %c0_9, %c0_10] : memref<5x1x64xf32, #tpu.memory_space<vmem>>, vector<1x1x64xf32>
    %15 = vector.shape_cast %14 : vector<1x1x64xf32> to vector<1x64xf32>
    %16 = vector.broadcast %15 : vector<1x64xf32> to vector<512x64xf32>
    %17 = arith.addf %13, %16 : vector<512x64xf32>
    %cst_11 = arith.constant 0.000000e+00 : f32
    %18 = vector.broadcast %cst_11 : f32 to vector<512x64xf32>
    %19 = arith.maximumf %17, %18 : vector<512x64xf32>
    %c0_12 = arith.constant 0 : index
    %c0_13 = arith.constant 0 : index
    %c0_14 = arith.constant 0 : index
    %20 = vector.load %arg6[%c0_12, %c0_13, %c0_14] : memref<5x64x64xf32, #tpu.memory_space<vmem>>, vector<1x64x64xf32>
    %21 = vector.shape_cast %20 : vector<1x64x64xf32> to vector<64x64xf32>
    %cst_15 = arith.constant dense<0.000000e+00> : vector<512x64xf32>
    %22 = tpu.matmul %19, %21, %cst_15 {dimension_numbers = #tpu.dot_dimension_numbers<[1], [0], [0], [1], [0, 0, 1, 1], [], []>} : vector<512x64xf32>, vector<64x64xf32>, vector<512x64xf32> -> vector<512x64xf32>
    %c0_16 = arith.constant 0 : index
    %c0_17 = arith.constant 0 : index
    %c0_18 = arith.constant 0 : index
    %23 = vector.load %arg7[%c0_16, %c0_17, %c0_18] : memref<5x1x64xf32, #tpu.memory_space<vmem>>, vector<1x1x64xf32>
    %24 = vector.shape_cast %23 : vector<1x1x64xf32> to vector<1x64xf32>
    %25 = vector.broadcast %24 : vector<1x64xf32> to vector<512x64xf32>
    %26 = arith.addf %22, %25 : vector<512x64xf32>
    %27 = vector.shape_cast %26 : vector<512x64xf32> to vector<4x128x64xf32>
    %28 = arith.addf %7, %27 : vector<4x128x64xf32>
    %29 = vector.extract_strided_slice %1 {offsets = [0, 1, 0], sizes = [4, 1, 64], strides = [1, 1, 1]} : vector<4x5x64xf32> to vector<4x1x64xf32>
    %30 = vector.broadcast %29 : vector<4x1x64xf32> to vector<4x128x64xf32>
    %31 = arith.addf %28, %30 : vector<4x128x64xf32>
    %cst_19 = arith.constant 0.000000e+00 : f32
    %32 = vector.broadcast %cst_19 : f32 to vector<4x128x64xf32>
    %33 = arith.maximumf %31, %32 : vector<4x128x64xf32>
    %34 = vector.shape_cast %33 : vector<4x128x64xf32> to vector<512x64xf32>
    %c1 = arith.constant 1 : index
    %c0_20 = arith.constant 0 : index
    %c0_21 = arith.constant 0 : index
    %35 = vector.load %arg4[%c1, %c0_20, %c0_21] : memref<5x64x64xf32, #tpu.memory_space<vmem>>, vector<1x64x64xf32>
    %36 = vector.shape_cast %35 : vector<1x64x64xf32> to vector<64x64xf32>
    %cst_22 = arith.constant dense<0.000000e+00> : vector<512x64xf32>
    %37 = tpu.matmul %34, %36, %cst_22 {dimension_numbers = #tpu.dot_dimension_numbers<[1], [0], [0], [1], [0, 0, 1, 1], [], []>} : vector<512x64xf32>, vector<64x64xf32>, vector<512x64xf32> -> vector<512x64xf32>
    %c1_23 = arith.constant 1 : index
    %c0_24 = arith.constant 0 : index
    %c0_25 = arith.constant 0 : index
    %38 = vector.load %arg5[%c1_23, %c0_24, %c0_25] : memref<5x1x64xf32, #tpu.memory_space<vmem>>, vector<1x1x64xf32>
    %39 = vector.shape_cast %38 : vector<1x1x64xf32> to vector<1x64xf32>
    %40 = vector.broadcast %39 : vector<1x64xf32> to vector<512x64xf32>
    %41 = arith.addf %37, %40 : vector<512x64xf32>
    %cst_26 = arith.constant 0.000000e+00 : f32
    %42 = vector.broadcast %cst_26 : f32 to vector<512x64xf32>
    %43 = arith.maximumf %41, %42 : vector<512x64xf32>
    %c1_27 = arith.constant 1 : index
    %c0_28 = arith.constant 0 : index
    %c0_29 = arith.constant 0 : index
    %44 = vector.load %arg6[%c1_27, %c0_28, %c0_29] : memref<5x64x64xf32, #tpu.memory_space<vmem>>, vector<1x64x64xf32>
    %45 = vector.shape_cast %44 : vector<1x64x64xf32> to vector<64x64xf32>
    %cst_30 = arith.constant dense<0.000000e+00> : vector<512x64xf32>
    %46 = tpu.matmul %43, %45, %cst_30 {dimension_numbers = #tpu.dot_dimension_numbers<[1], [0], [0], [1], [0, 0, 1, 1], [], []>} : vector<512x64xf32>, vector<64x64xf32>, vector<512x64xf32> -> vector<512x64xf32>
    %c1_31 = arith.constant 1 : index
    %c0_32 = arith.constant 0 : index
    %c0_33 = arith.constant 0 : index
    %47 = vector.load %arg7[%c1_31, %c0_32, %c0_33] : memref<5x1x64xf32, #tpu.memory_space<vmem>>, vector<1x1x64xf32>
    %48 = vector.shape_cast %47 : vector<1x1x64xf32> to vector<1x64xf32>
    %49 = vector.broadcast %48 : vector<1x64xf32> to vector<512x64xf32>
    %50 = arith.addf %46, %49 : vector<512x64xf32>
    %51 = vector.shape_cast %50 : vector<512x64xf32> to vector<4x128x64xf32>
    %52 = arith.addf %31, %51 : vector<4x128x64xf32>
    %53 = vector.extract_strided_slice %1 {offsets = [0, 2, 0], sizes = [4, 1, 64], strides = [1, 1, 1]} : vector<4x5x64xf32> to vector<4x1x64xf32>
    %54 = vector.broadcast %53 : vector<4x1x64xf32> to vector<4x128x64xf32>
    %55 = arith.addf %52, %54 : vector<4x128x64xf32>
    %cst_34 = arith.constant 0.000000e+00 : f32
    %56 = vector.broadcast %cst_34 : f32 to vector<4x128x64xf32>
    %57 = arith.maximumf %55, %56 : vector<4x128x64xf32>
    %58 = vector.shape_cast %57 : vector<4x128x64xf32> to vector<512x64xf32>
    %c2 = arith.constant 2 : index
    %c0_35 = arith.constant 0 : index
    %c0_36 = arith.constant 0 : index
    %59 = vector.load %arg4[%c2, %c0_35, %c0_36] : memref<5x64x64xf32, #tpu.memory_space<vmem>>, vector<1x64x64xf32>
    %60 = vector.shape_cast %59 : vector<1x64x64xf32> to vector<64x64xf32>
    %cst_37 = arith.constant dense<0.000000e+00> : vector<512x64xf32>
    %61 = tpu.matmul %58, %60, %cst_37 {dimension_numbers = #tpu.dot_dimension_numbers<[1], [0], [0], [1], [0, 0, 1, 1], [], []>} : vector<512x64xf32>, vector<64x64xf32>, vector<512x64xf32> -> vector<512x64xf32>
    %c2_38 = arith.constant 2 : index
    %c0_39 = arith.constant 0 : index
    %c0_40 = arith.constant 0 : index
    %62 = vector.load %arg5[%c2_38, %c0_39, %c0_40] : memref<5x1x64xf32, #tpu.memory_space<vmem>>, vector<1x1x64xf32>
    %63 = vector.shape_cast %62 : vector<1x1x64xf32> to vector<1x64xf32>
    %64 = vector.broadcast %63 : vector<1x64xf32> to vector<512x64xf32>
    %65 = arith.addf %61, %64 : vector<512x64xf32>
    %cst_41 = arith.constant 0.000000e+00 : f32
    %66 = vector.broadcast %cst_41 : f32 to vector<512x64xf32>
    %67 = arith.maximumf %65, %66 : vector<512x64xf32>
    %c2_42 = arith.constant 2 : index
    %c0_43 = arith.constant 0 : index
    %c0_44 = arith.constant 0 : index
    %68 = vector.load %arg6[%c2_42, %c0_43, %c0_44] : memref<5x64x64xf32, #tpu.memory_space<vmem>>, vector<1x64x64xf32>
    %69 = vector.shape_cast %68 : vector<1x64x64xf32> to vector<64x64xf32>
    %cst_45 = arith.constant dense<0.000000e+00> : vector<512x64xf32>
    %70 = tpu.matmul %67, %69, %cst_45 {dimension_numbers = #tpu.dot_dimension_numbers<[1], [0], [0], [1], [0, 0, 1, 1], [], []>} : vector<512x64xf32>, vector<64x64xf32>, vector<512x64xf32> -> vector<512x64xf32>
    %c2_46 = arith.constant 2 : index
    %c0_47 = arith.constant 0 : index
    %c0_48 = arith.constant 0 : index
    %71 = vector.load %arg7[%c2_46, %c0_47, %c0_48] : memref<5x1x64xf32, #tpu.memory_space<vmem>>, vector<1x1x64xf32>
    %72 = vector.shape_cast %71 : vector<1x1x64xf32> to vector<1x64xf32>
    %73 = vector.broadcast %72 : vector<1x64xf32> to vector<512x64xf32>
    %74 = arith.addf %70, %73 : vector<512x64xf32>
    %75 = vector.shape_cast %74 : vector<512x64xf32> to vector<4x128x64xf32>
    %76 = arith.addf %55, %75 : vector<4x128x64xf32>
    %77 = vector.extract_strided_slice %1 {offsets = [0, 3, 0], sizes = [4, 1, 64], strides = [1, 1, 1]} : vector<4x5x64xf32> to vector<4x1x64xf32>
    %78 = vector.broadcast %77 : vector<4x1x64xf32> to vector<4x128x64xf32>
    %79 = arith.addf %76, %78 : vector<4x128x64xf32>
    %cst_49 = arith.constant 0.000000e+00 : f32
    %80 = vector.broadcast %cst_49 : f32 to vector<4x128x64xf32>
    %81 = arith.maximumf %79, %80 : vector<4x128x64xf32>
    %82 = vector.shape_cast %81 : vector<4x128x64xf32> to vector<512x64xf32>
    %c3 = arith.constant 3 : index
    %c0_50 = arith.constant 0 : index
    %c0_51 = arith.constant 0 : index
    %83 = vector.load %arg4[%c3, %c0_50, %c0_51] : memref<5x64x64xf32, #tpu.memory_space<vmem>>, vector<1x64x64xf32>
    %84 = vector.shape_cast %83 : vector<1x64x64xf32> to vector<64x64xf32>
    %cst_52 = arith.constant dense<0.000000e+00> : vector<512x64xf32>
    %85 = tpu.matmul %82, %84, %cst_52 {dimension_numbers = #tpu.dot_dimension_numbers<[1], [0], [0], [1], [0, 0, 1, 1], [], []>} : vector<512x64xf32>, vector<64x64xf32>, vector<512x64xf32> -> vector<512x64xf32>
    %c3_53 = arith.constant 3 : index
    %c0_54 = arith.constant 0 : index
    %c0_55 = arith.constant 0 : index
    %86 = vector.load %arg5[%c3_53, %c0_54, %c0_55] : memref<5x1x64xf32, #tpu.memory_space<vmem>>, vector<1x1x64xf32>
    %87 = vector.shape_cast %86 : vector<1x1x64xf32> to vector<1x64xf32>
    %88 = vector.broadcast %87 : vector<1x64xf32> to vector<512x64xf32>
    %89 = arith.addf %85, %88 : vector<512x64xf32>
    %cst_56 = arith.constant 0.000000e+00 : f32
    %90 = vector.broadcast %cst_56 : f32 to vector<512x64xf32>
    %91 = arith.maximumf %89, %90 : vector<512x64xf32>
    %c3_57 = arith.constant 3 : index
    %c0_58 = arith.constant 0 : index
    %c0_59 = arith.constant 0 : index
    %92 = vector.load %arg6[%c3_57, %c0_58, %c0_59] : memref<5x64x64xf32, #tpu.memory_space<vmem>>, vector<1x64x64xf32>
    %93 = vector.shape_cast %92 : vector<1x64x64xf32> to vector<64x64xf32>
    %cst_60 = arith.constant dense<0.000000e+00> : vector<512x64xf32>
    %94 = tpu.matmul %91, %93, %cst_60 {dimension_numbers = #tpu.dot_dimension_numbers<[1], [0], [0], [1], [0, 0, 1, 1], [], []>} : vector<512x64xf32>, vector<64x64xf32>, vector<512x64xf32> -> vector<512x64xf32>
    %c3_61 = arith.constant 3 : index
    %c0_62 = arith.constant 0 : index
    %c0_63 = arith.constant 0 : index
    %95 = vector.load %arg7[%c3_61, %c0_62, %c0_63] : memref<5x1x64xf32, #tpu.memory_space<vmem>>, vector<1x1x64xf32>
    %96 = vector.shape_cast %95 : vector<1x1x64xf32> to vector<1x64xf32>
    %97 = vector.broadcast %96 : vector<1x64xf32> to vector<512x64xf32>
    %98 = arith.addf %94, %97 : vector<512x64xf32>
    %99 = vector.shape_cast %98 : vector<512x64xf32> to vector<4x128x64xf32>
    %100 = arith.addf %79, %99 : vector<4x128x64xf32>
    %101 = vector.extract_strided_slice %1 {offsets = [0, 4, 0], sizes = [4, 1, 64], strides = [1, 1, 1]} : vector<4x5x64xf32> to vector<4x1x64xf32>
    %102 = vector.broadcast %101 : vector<4x1x64xf32> to vector<4x128x64xf32>
    %103 = arith.addf %100, %102 : vector<4x128x64xf32>
    %cst_64 = arith.constant 0.000000e+00 : f32
    %104 = vector.broadcast %cst_64 : f32 to vector<4x128x64xf32>
    %105 = arith.maximumf %103, %104 : vector<4x128x64xf32>
    %106 = vector.shape_cast %105 : vector<4x128x64xf32> to vector<512x64xf32>
    %c4 = arith.constant 4 : index
    %c0_65 = arith.constant 0 : index
    %c0_66 = arith.constant 0 : index
    %107 = vector.load %arg4[%c4, %c0_65, %c0_66] : memref<5x64x64xf32, #tpu.memory_space<vmem>>, vector<1x64x64xf32>
    %108 = vector.shape_cast %107 : vector<1x64x64xf32> to vector<64x64xf32>
    %cst_67 = arith.constant dense<0.000000e+00> : vector<512x64xf32>
    %109 = tpu.matmul %106, %108, %cst_67 {dimension_numbers = #tpu.dot_dimension_numbers<[1], [0], [0], [1], [0, 0, 1, 1], [], []>} : vector<512x64xf32>, vector<64x64xf32>, vector<512x64xf32> -> vector<512x64xf32>
    %c4_68 = arith.constant 4 : index
    %c0_69 = arith.constant 0 : index
    %c0_70 = arith.constant 0 : index
    %110 = vector.load %arg5[%c4_68, %c0_69, %c0_70] : memref<5x1x64xf32, #tpu.memory_space<vmem>>, vector<1x1x64xf32>
    %111 = vector.shape_cast %110 : vector<1x1x64xf32> to vector<1x64xf32>
    %112 = vector.broadcast %111 : vector<1x64xf32> to vector<512x64xf32>
    %113 = arith.addf %109, %112 : vector<512x64xf32>
    %cst_71 = arith.constant 0.000000e+00 : f32
    %114 = vector.broadcast %cst_71 : f32 to vector<512x64xf32>
    %115 = arith.maximumf %113, %114 : vector<512x64xf32>
    %c4_72 = arith.constant 4 : index
    %c0_73 = arith.constant 0 : index
    %c0_74 = arith.constant 0 : index
    %116 = vector.load %arg6[%c4_72, %c0_73, %c0_74] : memref<5x64x64xf32, #tpu.memory_space<vmem>>, vector<1x64x64xf32>
    %117 = vector.shape_cast %116 : vector<1x64x64xf32> to vector<64x64xf32>
    %cst_75 = arith.constant dense<0.000000e+00> : vector<512x64xf32>
    %118 = tpu.matmul %115, %117, %cst_75 {dimension_numbers = #tpu.dot_dimension_numbers<[1], [0], [0], [1], [0, 0, 1, 1], [], []>} : vector<512x64xf32>, vector<64x64xf32>, vector<512x64xf32> -> vector<512x64xf32>
    %c4_76 = arith.constant 4 : index
    %c0_77 = arith.constant 0 : index
    %c0_78 = arith.constant 0 : index
    %119 = vector.load %arg7[%c4_76, %c0_77, %c0_78] : memref<5x1x64xf32, #tpu.memory_space<vmem>>, vector<1x1x64xf32>
    %120 = vector.shape_cast %119 : vector<1x1x64xf32> to vector<1x64xf32>
    %121 = vector.broadcast %120 : vector<1x64xf32> to vector<512x64xf32>
    %122 = arith.addf %118, %121 : vector<512x64xf32>
    %123 = vector.shape_cast %122 : vector<512x64xf32> to vector<4x128x64xf32>
    %124 = arith.addf %103, %123 : vector<4x128x64xf32>
    %cst_79 = arith.constant 0.000000e+00 : f32
    %125 = vector.broadcast %cst_79 : f32 to vector<4x128x64xf32>
    %126 = arith.maximumf %124, %125 : vector<4x128x64xf32>
    %127 = vector.shape_cast %126 : vector<4x128x64xf32> to vector<512x64xf32>
    %c0_80 = arith.constant 0 : index
    %c0_81 = arith.constant 0 : index
    %128 = vector.load %arg8[%c0_80, %c0_81] : memref<64x32xf32, #tpu.memory_space<vmem>>, vector<64x32xf32>
    %cst_82 = arith.constant dense<0.000000e+00> : vector<512x32xf32>
    %129 = tpu.matmul %127, %128, %cst_82 {dimension_numbers = #tpu.dot_dimension_numbers<[1], [0], [0], [1], [0, 0, 1, 1], [], []>} : vector<512x64xf32>, vector<64x32xf32>, vector<512x32xf32> -> vector<512x32xf32>
    %c0_83 = arith.constant 0 : index
    %c0_84 = arith.constant 0 : index
    %130 = vector.load %arg9[%c0_83, %c0_84] : memref<1x32xf32, #tpu.memory_space<vmem>>, vector<1x32xf32>
    %131 = vector.broadcast %130 : vector<1x32xf32> to vector<512x32xf32>
    %132 = arith.addf %129, %131 : vector<512x32xf32>
    %133 = vector.shape_cast %132 : vector<512x32xf32> to vector<4x128x32xf32>
    %134 = vector.extract_strided_slice %133 {offsets = [0, 0, 0], sizes = [4, 128, 12], strides = [1, 1, 1]} : vector<4x128x32xf32> to vector<4x128x12xf32>
    %135 = vector.extract_strided_slice %133 {offsets = [0, 0, 12], sizes = [4, 128, 20], strides = [1, 1, 1]} : vector<4x128x32xf32> to vector<4x128x20xf32>
    %cst_85 = arith.constant dense<0xFF800000> : vector<4x128xf32>
    %136 = vector.multi_reduction <maximumf>, %135, %cst_85 [2] : vector<4x128x20xf32> to vector<4x128xf32>
    %137 = vector.shape_cast %136 : vector<4x128xf32> to vector<4x128x1xf32>
    %138 = vector.broadcast %137 : vector<4x128x1xf32> to vector<4x128x20xf32>
    %139 = arith.subf %135, %138 : vector<4x128x20xf32>
    %140 = math.exp %139 : vector<4x128x20xf32>
    %c0_86 = arith.constant 0 : index
    %c0_87 = arith.constant 0 : index
    %141 = vector.load %arg10[%c0_86, %c0_87] : memref<1x20xf32, #tpu.memory_space<vmem>>, vector<1x20xf32>
    %142 = vector.shape_cast %141 : vector<1x20xf32> to vector<1x1x20xf32>
    %143 = vector.broadcast %142 : vector<1x1x20xf32> to vector<4x128x20xf32>
    %144 = arith.mulf %143, %140 : vector<4x128x20xf32>
    %cst_88 = arith.constant dense<0.000000e+00> : vector<4x128xf32>
    %145 = vector.multi_reduction <add>, %144, %cst_88 [2] : vector<4x128x20xf32> to vector<4x128xf32>
    %146 = vector.shape_cast %145 : vector<4x128xf32> to vector<4x128x1xf32>
    %cst_89 = arith.constant dense<0.000000e+00> : vector<4x128xf32>
    %147 = vector.multi_reduction <add>, %140, %cst_89 [2] : vector<4x128x20xf32> to vector<4x128xf32>
    %148 = vector.shape_cast %147 : vector<4x128xf32> to vector<4x128x1xf32>
    %149 = arith.divf %146, %148 : vector<4x128x1xf32>
    %c0_90 = arith.constant 0 : index
    %c0_91 = arith.constant 0 : index
    %c0_92 = arith.constant 0 : index
    %150 = vector.load %arg11[%c0_90, %c0_91, %c0_92] : memref<4x128x13xf32, #tpu.memory_space<vmem>>, vector<4x128x12xf32>
    tpu.vector_store %arg11[%c0_90, %c0_91, %c0_92], %134 {strides = array<i32>} : memref<4x128x13xf32, #tpu.memory_space<vmem>>, vector<4x128x12xf32>,
    %c0_93 = arith.constant 0 : index
    %c0_94 = arith.constant 0 : index
    %c12 = arith.constant 12 : index
    %151 = vector.load %arg11[%c0_93, %c0_94, %c12] : memref<4x128x13xf32, #tpu.memory_space<vmem>>, vector<4x128x1xf32>
    tpu.vector_store %arg11[%c0_93, %c0_94, %c12], %149 {strides = array<i32>} : memref<4x128x13xf32, #tpu.memory_space<vmem>>, vector<4x128x1xf32>,
    return
  }
  func.func @transform_0(%arg0: i32, %arg1: i32) -> (i32, i32) {
    %c0_i32 = arith.constant 0 : i32
    %c0_i32_0 = arith.constant 0 : i32
    return %arg1, %c0_i32 : i32, i32
  }
  func.func @transform_1(%arg0: i32, %arg1: i32) -> (i32, i32, i32) {
    %c0_i32 = arith.constant 0 : i32
    %c0_i32_0 = arith.constant 0 : i32
    %c0_i32_1 = arith.constant 0 : i32
    return %arg0, %c0_i32, %c0_i32_0 : i32, i32, i32
  }
  func.func @transform_2(%arg0: i32, %arg1: i32) -> (i32, i32, i32) {
    %c0_i32 = arith.constant 0 : i32
    %c0_i32_0 = arith.constant 0 : i32
    %c0_i32_1 = arith.constant 0 : i32
    %c0_i32_2 = arith.constant 0 : i32
    return %c0_i32, %c0_i32_0, %c0_i32_1 : i32, i32, i32
  }
  func.func @transform_3(%arg0: i32, %arg1: i32) -> (i32, i32, i32) {
    %c0_i32 = arith.constant 0 : i32
    %c0_i32_0 = arith.constant 0 : i32
    %c0_i32_1 = arith.constant 0 : i32
    %c0_i32_2 = arith.constant 0 : i32
    return %c0_i32, %c0_i32_0, %c0_i32_1 : i32, i32, i32
  }
  func.func @transform_4(%arg0: i32, %arg1: i32) -> (i32, i32, i32) {
    %c0_i32 = arith.constant 0 : i32
    %c0_i32_0 = arith.constant 0 : i32
    %c0_i32_1 = arith.constant 0 : i32
    %c0_i32_2 = arith.constant 0 : i32
    return %c0_i32, %c0_i32_0, %c0_i32_1 : i32, i32, i32
  }
  func.func @transform_5(%arg0: i32, %arg1: i32) -> (i32, i32, i32) {
    %c0_i32 = arith.constant 0 : i32
    %c0_i32_0 = arith.constant 0 : i32
    %c0_i32_1 = arith.constant 0 : i32
    %c0_i32_2 = arith.constant 0 : i32
    return %c0_i32, %c0_i32_0, %c0_i32_1 : i32, i32, i32
  }
  func.func @transform_6(%arg0: i32, %arg1: i32) -> (i32, i32) {
    %c0_i32 = arith.constant 0 : i32
    %c0_i32_0 = arith.constant 0 : i32
    %c0_i32_1 = arith.constant 0 : i32
    return %c0_i32, %c0_i32_0 : i32, i32
  }
  func.func @transform_7(%arg0: i32, %arg1: i32) -> (i32, i32) {
    %c0_i32 = arith.constant 0 : i32
    %c0_i32_0 = arith.constant 0 : i32
    %c0_i32_1 = arith.constant 0 : i32
    return %c0_i32, %c0_i32_0 : i32, i32
  }
  func.func @transform_8(%arg0: i32, %arg1: i32) -> (i32, i32) {
    %c0_i32 = arith.constant 0 : i32
    %c0_i32_0 = arith.constant 0 : i32
    %c0_i32_1 = arith.constant 0 : i32
    return %c0_i32, %c0_i32_0 : i32, i32
  }
  func.func @transform_9(%arg0: i32, %arg1: i32) -> (i32, i32, i32) {
    %c0_i32 = arith.constant 0 : i32
    %c0_i32_0 = arith.constant 0 : i32
    return %arg0, %arg1, %c0_i32 : i32, i32, i32
  }
}

</mosaic_0001>

<bundles_post_ra>
// kernel: tpu_custom_call.1
= control target key start
LH: loop header
LB: loop body
LE: loop exit
PB: predicated region body
PF: predicated region fallthrough
CT: control target
= control target key end

     0   :  { %s18497_s0 = inlined_call_operand.vmem [shape: f32[256,64], index: 0, kind: input, shape index: {}]   ;;  %s18498_s1 = inlined_call_operand.vmem [shape: f32[8,5,64], index: 1, kind: input, shape index: {}]   ;;  %s18499_s2 = inlined_call_operand.vmem [shape: f32[5,64,64], index: 2, kind: input, shape index: {}]   ;;  %s18500_s3 = inlined_call_operand.vmem [shape: f32[5,1,64], index: 3, kind: input, shape index: {}]   ;;  %s18501_s4 = inlined_call_operand.hbm [shape: f32[5,64,64], index: 4, kind: input, shape index: {}]   ;;  %s18502_s5 = inlined_call_operand.vmem [shape: f32[5,1,64], index: 5, kind: input, shape index: {}]   ;;  %s18503_s6 = inlined_call_operand.vmem [shape: f32[64,32], index: 6, kind: input, shape index: {}]   ;;  %s18504_s7 = inlined_call_operand.vmem [shape: f32[1,32], index: 7, kind: input, shape index: {}]   ;;  %s18505_s8 = inlined_call_operand.vmem [shape: f32[1,20], index: 8, kind: input, shape index: {}]   ;;  %s18506_s9 = inlined_call_operand.vmem [shape: f32[8,256,13], index: 9, kind: output, shape index: {}]  }
   0x1   :  { %18647 = sst [smem:[#allocation51_spill]] %s18501_s4 }
   0x2   :  { %14 = vsyncpa [#allocation3], 0  ;;  %s13565_s30 = smov 0   ;;  %s13567_s10 = smov 0  }
   0x3   :  { %s13569_s11 = smov 0   ;;  %s13571_s12 = smov 0  }
   0x4   :  { %s13573_s13 = smov 0   ;;  %s13575_s14 = smov 0  }
   0x5   :  { %s13577_s15 = smov 0  }
   0x6 LB: > { %18648 = sst [smem:[#allocation6_spill]] %s13505_s14  ;;  %s10096_s16 = sadd.s32 4294967295, %s13509_s15   ;;  %s13509_s15 = sphi %s13577_s15, %s20_s15   ;;  %s13505_s14 = sphi %s13575_s14, %s18928_s14   ;;  %s13501_s13 = sphi %s13573_s13, %s18932_s13   ;;  %s13497_s12 = sphi %s13571_s12, %s18926_s12   ;;  %s13493_s11 = sphi %s13569_s11, %s18931_s11   ;;  %s13489_s10 = sphi %s13567_s10, %s18930_s10   ;;  %s13485_s30 = sphi %s13565_s30, %s18929_s30  }
   0x7   : > { %s29_s17 = sadd.s32 1, %s13501_s13  ;;  %s32_s18 = sadd.s32 1, %s13505_s14 }
   0x8   : > { %p30_p0 = scmp.ge.s32.totalorder %s29_s17, 2  ;;  %s240_s19 = sadd.s32 1, %s13489_s10 }
   0x9   : > { %p250_p1 = scmp.ne.s32.totalorder %s13489_s10, %s13485_s30  ;;  %p251_p2 = scmp.eq.s32.totalorder %s10096_s16, 3 }
   0xa   : > { %s18934_s17 = smov (%p30_p0, %s29_s17), 0  ;;  %s18936_s18 = smov (!%p30_p0, %s32_s18), %s13505_s14 }
   0xb   : > { %18649 = sst [smem:[#allocation7_spill]] %s18934_s17  ;;  %s236_s20 = ssub.s32 %s13501_s13, %s18934_s17 }
   0xc   : > { %p34_p3 = scmp.ge.s32.totalorder %s18936_s18, 2  ;;  %p10098_p4 = scmp.ge.s32.totalorder %s13509_s15, 1 }
   0xd   : > { %p13612_p5 = por %p251_p2, %p250_p1  ;;  %p264_p6 = scmp.lt.s32.totalorder %s13509_s15, 5 }
   0xe   : > { %s18938_s18 = smov (%p34_p3, %s18936_s18), 0  ;;  %p13625_p8 = scmp.eq.s32.totalorder %s10096_s16, 0 }
   0xf   : > { %s18650_s21 = scalar_select %p13612_p5, 1, 0 }
  0x10   : > { %18651 = sst [smem:[#allocation8_spill]] %s18938_s18  ;;  %p13619_p7 = pnand %p10098_p4, %p264_p6 }
  0x11   : > { %s235_s23 = ssub.s32 %s13505_s14, %s18938_s18  ;;  %s13511_s26 = smov [#allocation2]  }
  0x12   : > { %s18652_s22 = scalar_select %p13619_p7, 1, 0 }
  0x13   : > { %s18653_s24 = scalar_select %p13625_p8, 1, 0 }
  0x14   : > { %s237_s25 = sor.u32 %s236_s20, %s235_s23  ;;  %p13084_p9 = pneg %p13619_p7 }
  0x15   : > { %p238_p10 = scmp.eq.s32.totalorder %s237_s25, 0  ;;  %s282_s27 = sshll.u32 %s13511_s26, 4  ;;  %s283_s27 = int_to_ptr.vmem [resolvable:$true] %s282_s27 }
  0x16   : > { %p13633_p11 = pnand %p13625_p8, %p13084_p9  ;;  %s18655_s4 = sld [smem:[#allocation51_spill]] }
  0x17   : > { %s13638_s29 = scalar_select %p238_p10, %s13489_s10, %s240_s19  }
  0x18   : > { %p13425_p13 = pneg %p13633_p11 }
  0x1c   : > { %s13423_s17 = scalar_lea.hbm %s18655_s4, 5120 }
  0x1d   : > { %p13424_p12 = scmp.ne.s32.totalorder %s18655_s4, %s13423_s17  ;;  %p13430_p2 = scmp.lt.u32.totalorder %s13423_s17, %s18655_s4 }
  0x1f   : > { %p13426_p0 = pnand %p13425_p13, %p13424_p12 }
  0x21   : > { %p13427_p1 = pneg %p13426_p0 }
  0x23   : > { %p13432_p3 = pnand %p13430_p2, %p13427_p1 }
  0x25   : > { %13435 = shalt.err (!%p13432_p3)
}
  0x26   : > { %s13436_s19 = scalar_lea.vmem %s283_s27, 5120  ;;  %p13444_p10 = scmp.lt.s32.totalorder %s283_s27, %s283_s27 }
  0x27   : > { %p13437_p4 = scmp.ne.s32.totalorder %s283_s27, %s13436_s19  ;;  %p13445_p5 = scmp.lt.s32.totalorder %s13436_s19, %s13436_s19 }
  0x29   : > { %p13439_p6 = pnand %p13437_p4, %p13425_p13  ;;  %p13446_p8 = por %p13445_p5, %p13444_p10 }
  0x2b   : > { %p13440_p9 = pneg %p13439_p6 }
  0x2d   : > { %p13447_p7 = pnand %p13446_p8, %p13440_p9 }
  0x2f   : > { %13450 = shalt.err (!%p13447_p7)
}
  0x30   : > { %s13512_s14 = smov 128   ;;  %s13513_s18 = smov 8  }
  0x31   : > { %13087 = dma.hbm_to_vmem [thread:$0]  (!%p13633_p11), %s18655_s4, 5120, %s283_s27, [#allocation3], %s13512_s14, %s13512_s14, %s13513_s18  }
  0x32   : > { %p18656_p12 = scmp.ne.s32.totalorder %s18652_s22, 0 }
  0x34   : > { %328 = sbr.rel (%p18656_p12) target bundleno = 3318 (0xcf6), region = 56 }
  0x3b   : > { %p18657_p0 = scmp.ne.s32.totalorder %s18653_s24, 0 }
  0x3d   : > { %13480 = dma.done.wait (%p18657_p0), [#allocation3], 5120  }
  0x3e   : > { %13482 = vsyncadd (%p18657_p0), [#allocation3], 4294962176  ;;  %s13663_s17 = sshll.u32 %s13493_s11, 4  ;;  %s10106_s28 = sshll.u32 %s13497_s12, 2  ;;  %v402_v0 = vlaneseq  ;;  %v546_v2 = vld [vmem:[%s18499_s2] sm:$0xff]  ;;  %v547_v3 = vld [vmem:[%s18499_s2 + $0x8] sm:$0xff] }
  0x3f   : > { %p369_p5 = scmp.lt.s32.totalorder %s13663_s17, 31  ;;  %p375_p7 = scmp.lt.s32.totalorder %s10106_s28, 7  ;;  %v548_v4 = vld [vmem:[%s18499_s2 + $0x10] sm:$0xff]  ;;  %v12896_v6 = vpack.c.bf16 %v547_v3, %v546_v2  ;;  %v549_v7 = vld [vmem:[%s18499_s2 + $0x18] sm:$0xff]  ;;  %v550_v9 = vld [vmem:[%s18499_s2 + $0x20] sm:$0xff]  ;;  %vm561_vm0 = vcmask 523264  }
  0x40   : > { %v13668_v1 = vshrl.u32 %v402_v0, 7  ;;  %v12900_v8 = vpack.c.bf16 %v549_v7, %v548_v4  ;;  %v551_v10 = vld [vmem:[%s18499_s2 + $0x28] sm:$0xff]  ;;  %v552_v15 = vld [vmem:[%s18499_s2 + $0x30] sm:$0xff]  ;;  %v553_v16 = vld [vmem:[%s18499_s2 + $0x38] sm:$0xff]  ;;  %vm9580_vm1 = vcmask 97280   ;;  %vm8355_vm2 = vcmask 261216  }
  0x41   : > { %s370_s27 = scalar_select %p369_p5, %s13663_s17, 31  ;;  %12897 = vmatprep.subr.bf16.mxu0 %v12896_v6  ;;  %13072 = vmatprep.subr.bf16.mxu1 %v12896_v6  ;;  %v12904_v14 = vpack.c.bf16 %v551_v10, %v550_v9  ;;  %v12908_v20 = vpack.c.bf16 %v553_v16, %v552_v15  ;;  %v1203_v23 = vld [vmem:[#allocation2] sm:$0xff]  ;;  %v1204_v24 = vld [vmem:[#allocation2 + $0x8] sm:$0xff]  ;;  %v1205_v51 = vld [vmem:[#allocation2 + $0x10] sm:$0xff]  ;;  %vm9067_vm3 = vcmask 162816   ;;  %vm9645_vm4 = vcmask 105568  }
  0x42   : > { %18658 = vst [vmem:[#allocation9_spill] sm:$0xff] %v13668_v1  ;;  %s18940_s28 = smov (!%p375_p7, %s10106_s28), 7  ;;  %v13690_v5 = vsub.s32 0, %v13668_v1  ;;  %12899 = vmatpush3.bf16.msra.mxu0 %v12896_v6  ;;  %13076 = vmatpush3.bf16.msra.mxu1 %v12896_v6  ;;  %v12912_v28 = vpack.c.bf16 %v1204_v24, %v1203_v23  ;;  %v1206_v52 = vld [vmem:[#allocation2 + $0x18] sm:$0xff]  ;;  %v1207_v2 = vld [vmem:[#allocation2 + $0x20] sm:$0xff]  ;;  %v1208_v3 = vld [vmem:[#allocation2 + $0x28] sm:$0xff] }
  0x43   : > { %s10105_s22 = sshll.u32 %s370_s27, 3  ;;  %s10107_s20 = sshll.u32 %s18940_s28, 3  ;;  %12901 = vmatprep.subr.bf16.mxu0 %v12900_v8  ;;  %13073 = vmatprep.subr.bf16.mxu1 %v12900_v8  ;;  %v12916_v61 = vpack.c.bf16 %v1206_v52, %v1205_v51  ;;  %v1210_v23 = vld [vmem:[#allocation2 + $0x38] sm:$0xff] }
  0x44   : > { %s13682_s16 = scalar_lea.vmem %s18497_s0, %s10105_s22  ;;  %s13687_s28 = scalar_lea.vmem %s18498_s1, %s10107_s20 }
  0x45   : > { %v13702_v11 = vld [vmem:[%s13682_s16] sm:$0xff]  ;;  %v13720_v19 = vld [vmem:[%s13682_s16 + $0x8] sm:$0xff]  ;;  %v13723_v21 = vld [vmem:[%s13682_s16 + $0x10] sm:$0xff]  ;;  %s365_s22 = sand.u32 1, %s13485_s30   ;;  %s13514_s30 = smov 116  }
  0x46   : > { %v398_v12 = vld [vmem:[%s13687_s28] sm:$0x1f]  ;;  %12903 = vmatpush3.bf16.msra.mxu0 %v12900_v8  ;;  %13077 = vmatpush3.bf16.msra.mxu1 %v12900_v8  ;;  %v13735_v26 = vld [vmem:[%s13682_s16 + $0x18] sm:$0xff]  ;;  %v13751_v33 = vld [vmem:[%s13682_s16 + $0x28] sm:$0xff]  ;;  %s10103_s11 = sshll.u32 %s365_s22, 9  ;;  %p18925_p8 = scmp.ne.s32.totalorder %s18650_s21, 0 }
  0x47   : > { %v13706_v13 = vrot.slane %v398_v12, %v13690_v5  ;;  %12905 = vmatprep.subr.bf16.mxu0 %v12904_v14  ;;  %13074 = vmatprep.subr.bf16.mxu1 %v12904_v14  ;;  %v13738_v27 = vld [vmem:[%s13682_s16 + $0x20] sm:$0xff]  ;;  %v13754_v34 = vld [vmem:[%s13682_s16 + $0x30] sm:$0xff]  ;;  %v13770_v40 = vld [vmem:[%s13682_s16 + $0x38] sm:$0xff]  ;;  %s17133_s14 = scalar_lea.vmem [#allocation4], %s10103_s11  ;;  %s10871_s27 = sshll.u32 (%p18925_p8), %s13497_s12, 7 }
  0x48   : > { %v400_v35 = vld [vmem:[%s13687_s28 + $0x10] sm:$0x1f]  ;;  %v13776_v42 = vld [vmem:[%s13682_s16 + $0x40] sm:$0xff]  ;;  %v13791_v47 = vld [vmem:[%s13682_s16 + $0x48] sm:$0xff]  ;;  %s9720_s21 = sadd.s32 (%p18925_p8), %s10871_s27, %s13663_s17 }
  0x49   : > { %v13716_v17 = vadd.f32 %v13706_v13, %v13702_v11  ;;  %v13728_v22 = vadd.f32 %v13706_v13, %v13720_v19  ;;  %v13732_v25 = vadd.f32 %v13706_v13, %v13723_v21  ;;  %v13743_v30 = vadd.f32 %v13706_v13, %v13735_v26  ;;  %v13806_v53 = vld [vmem:[%s13682_s16 + $0x50] sm:$0xff]  ;;  %v13832_v0 = vld [vmem:[%s13682_s16 + $0x58] sm:$0xff]  ;;  %v13836_v4 = vld [vmem:[%s13682_s16 + $0x60] sm:$0xff]  ;;  %s10868_s23 = sshll.u32 (%p18925_p8), %s9720_s21, 3 }
  0x4a   : > { %12907 = vmatpush3.bf16.msra.mxu0 %v12904_v14  ;;  %13078 = vmatpush3.bf16.msra.mxu1 %v12904_v14  ;;  %v13748_v32 = vadd.f32 %v13706_v13, %v13738_v27  ;;  %v13761_v37 = vadd.f32 %v13706_v13, %v13751_v33  ;;  %v13765_v38 = vadd.f32 %v13706_v13, %v13754_v34  ;;  %v13866_v24 = vld [vmem:[%s13682_s16 + $0x70] sm:$0xff]  ;;  %s18355_s19 = scalar_lea.vmem (%p18925_p8), %s18506_s9, %s10868_s23 }
  0x4b   : > { %v482_v18 = vmax.f32 %v13716_v17, 0.0  ;;  %12909 = vmatprep.subr.bf16.mxu0 %v12908_v20  ;;  %13075 = vmatprep.subr.bf16.mxu1 %v12908_v20  ;;  %v483_v29 = vmax.f32 %v13728_v22, 0.0  ;;  %v484_v31 = vmax.f32 %v13732_v25, 0.0  ;;  %v485_v36 = vmax.f32 %v13743_v30, 0.0 }
  0x4c   : > { %v486_v39 = vmax.f32 %v13748_v32, 0.0  ;;  %v13773_v41 = vrot.slane %v400_v35, %v13690_v5  ;;  %v487_v43 = vmax.f32 %v13761_v37, 0.0  ;;  %v488_v44 = vmax.f32 %v13765_v38, 0.0 }
  0x4d   : > { %11680 = vmatprep.mubr.msk.f32.mxu0 %vm561_vm0, %v482_v18  ;;  %v13783_v45 = vadd.f32 %v13706_v13, %v13770_v40  ;;  %v13788_v46 = vadd.f32 %v13706_v13, %v13776_v42  ;;  %v13823_v60 = vadd.f32 %v13706_v13, %v13791_v47  ;;  %v13829_v63 = vadd.f32 %v13706_v13, %v13806_v53  ;;  %v13863_v18 = vld [vmem:[%s13682_s16 + $0x68] sm:$0xff] }
  0x4e   : > { %12911 = vmatpush3.bf16.msra.mxu0 %v12908_v20  ;;  %13079 = vmatpush3.bf16.msra.mxu1 %v12908_v20  ;;  %v13795_v48 = vadd.f32 %v13773_v41, %v13702_v11  ;;  %v13799_v49 = vadd.f32 %v13773_v41, %v13720_v19  ;;  %v13803_v50 = vadd.f32 %v13773_v41, %v13723_v21  ;;  %v1209_v20 = vld [vmem:[#allocation2 + $0x30] sm:$0xff] }
  0x4f   : > { %12913 = vmatprep.subr.bf16.mxu1 %v12912_v28  ;;  %v13810_v54 = vadd.f32 %v13773_v41, %v13735_v26  ;;  %v13817_v58 = vadd.f32 %v13773_v41, %v13738_v27  ;;  %v489_v59 = vmax.f32 %v13783_v45, 0.0  ;;  %v490_v62 = vmax.f32 %v13788_v46, 0.0 }
  0x50   : > { %18659 = vst [vmem:[#allocation10_spill] sm:$0xff] %v13795_v48  ;;  %18660 = vst [vmem:[#allocation11_spill] sm:$0xff] %v13799_v49  ;;  %v514_v55 = vmax.f32 %v13795_v48, 0.0  ;;  %v515_v56 = vmax.f32 %v13799_v49, 0.0  ;;  %v516_v57 = vmax.f32 %v13803_v50, 0.0  ;;  %v13842_v7 = vadd.f32 %v13773_v41, %v13751_v33 }
  0x51   : > { %11681 = vmatmul.mubr.msk.f32.vlgmr.msra.gmra.mrb[0].mxu0 %vm561_vm0, %v483_v29  ;;  %18661 = vst [vmem:[#allocation12_spill] sm:$0xff] %v13803_v50  ;;  %18662 = vst [vmem:[#allocation13_spill] sm:$0xff] %v13810_v54  ;;  %v517_v6 = vmax.f32 %v13810_v54, 0.0  ;;  %v518_v8 = vmax.f32 %v13817_v58, 0.0  ;;  %v13848_v9 = vadd.f32 %v13773_v41, %v13754_v34  ;;  %v491_v10 = vmax.f32 %v13823_v60, 0.0 }
  0x52   : > { %11683 = vmatprep.mubr.msk.f32.mxu0 %vm561_vm0, %v484_v31  ;;  %18663 = vst [vmem:[#allocation14_spill] sm:$0xff] %v13817_v58  ;;  %11728 = vmatprep.mubr.msk.f32.mxu1 %vm561_vm0, %v514_v55  ;;  %18664 = vst [vmem:[#allocation15_spill] sm:$0xff] %v13842_v7  ;;  %v13854_v12 = vadd.f32 %v13706_v13, %v13832_v0  ;;  %v12920_v14 = vpack.c.bf16 %v1208_v3, %v1207_v2  ;;  %v492_v15 = vmax.f32 %v13829_v63, 0.0  ;;  %v13894_v55 = vld [vmem:[%s13682_s16 + $0x78] sm:$0xff] }
  0x53   : > { %11729 = vmatmul.mubr.msk.f32.vlgmr.msra.gmra.mrb[0].mxu1 %vm561_vm0, %v515_v56  ;;  %18665 = vst [vmem:[#allocation16_spill] sm:$0xff] %v13848_v9  ;;  %v13860_v16 = vadd.f32 %v13706_v13, %v13836_v4  ;;  %v519_v29 = vmax.f32 %v13842_v7, 0.0  ;;  %v13873_v31 = vadd.f32 %v13773_v41, %v13770_v40  ;;  %v520_v35 = vmax.f32 %v13848_v9, 0.0 }
  0x54   : > { %11731 = vmatprep.mubr.msk.f32.mxu1 %vm561_vm0, %v516_v57  ;;  %12915 = vmatpush3.bf16.msra.mxu1 %v12912_v28  ;;  %v399_v28 = vld [vmem:[%s13687_s28 + $0x8] sm:$0x1f]  ;;  %v13891_v52 = vadd.f32 %v13706_v13, %v13866_v24  ;;  %v13915_v3 = vadd.f32 %v13706_v13, %v13894_v55 }
  0x55   : > { %11684 = vmatmul.mubr.msk.f32.gmra.mrb[2].mxu0 %vm561_vm0, %v485_v36  ;;  %12917 = vmatprep.subr.bf16.mxu1 %v12916_v61  ;;  %18666 = vst [vmem:[#allocation17_spill] sm:$0xff] %v13873_v31  ;;  %v13879_v36 = vadd.f32 %v13773_v41, %v13776_v42  ;;  %v494_v51 = vmax.f32 %v13860_v16, 0.0  ;;  %v13897_v56 = vrot.slane %v399_v28, %v13690_v5  ;;  %v521_v57 = vmax.f32 %v13873_v31, 0.0  ;;  %v401_v28 = vld [vmem:[%s13687_s28 + $0x18] sm:$0x1f] }
  0x56   : > { %11686 = vmatprep.mubr.msk.f32.mxu0 %vm561_vm0, %v486_v39  ;;  %v493_v39 = vmax.f32 %v13854_v12, 0.0 }
  0x57   : > { %11732 = vmatmul.mubr.msk.f32.gmra.mrb[2].mxu1 %vm561_vm0, %v517_v6  ;;  %18667 = vst [vmem:[#allocation18_spill] sm:$0xff] %v13879_v36  ;;  %v496_v6 = vmax.f32 %v13891_v52, 0.0 }
  0x58   : > { %11734 = vmatprep.mubr.msk.f32.mxu1 %vm561_vm0, %v518_v8  ;;  %12919 = vmatpush3.bf16.msra.mxu1 %v12916_v61  ;;  %v522_v61 = vmax.f32 %v13879_v36, 0.0  ;;  %v13921_v8 = vadd.f32 %v13897_v56, %v13702_v11 }
  0x59   : > { %11687 = vmatmul.mubr.msk.f32.gmra.mrb[4].mxu0 %vm561_vm0, %v487_v43  ;;  %v13885_v43 = vadd.f32 %v13706_v13, %v13863_v18  ;;  %12921 = vmatprep.subr.bf16.mxu1 %v12920_v14 }
  0x5a   : > { %11689 = vmatprep.mubr.msk.f32.mxu0 %vm561_vm0, %v488_v44  ;;  %v12924_v44 = vpack.c.bf16 %v1210_v23, %v1209_v20  ;;  %v497_v20 = vmax.f32 %v13915_v3, 0.0  ;;  %v13939_v23 = vadd.f32 %v13897_v56, %v13720_v19 }
  0x5b   : > { %11735 = vmatmul.mubr.msk.f32.gmra.mrb[4].mxu1 %vm561_vm0, %v519_v29  ;;  %v495_v2 = vmax.f32 %v13885_v43, 0.0  ;;  %v498_v29 = vmax.f32 %v13921_v8, 0.0 }
  0x5c   : > { %11737 = vmatprep.mubr.msk.f32.mxu1 %vm561_vm0, %v520_v35  ;;  %12923 = vmatpush3.bf16.msra.mxu1 %v12920_v14  ;;  %v13927_v14 = vadd.f32 %v13773_v41, %v13832_v0  ;;  %v13946_v35 = vadd.f32 %v13897_v56, %v13723_v21 }
  0x5d   : > { %11690 = vmatmul.mubr.msk.f32.gmra.mrb[6].mxu0 %vm561_vm0, %v489_v59  ;;  %v13903_v59 = vadd.f32 %v13773_v41, %v13791_v47  ;;  %12925 = vmatprep.subr.bf16.mxu1 %v12924_v44 }
  0x5e   : > { %11692 = vmatprep.mubr.msk.f32.mxu0 %vm561_vm0, %v490_v62  ;;  %v13909_v62 = vadd.f32 %v13773_v41, %v13806_v53  ;;  %18670 = vst [vmem:[#allocation21_spill] sm:$0xff] %v13927_v14 }
  0x5f   : > { %18668 = vst [vmem:[#allocation19_spill] sm:$0xff] %v13903_v59  ;;  %11738 = vmatmul.mubr.msk.f32.gmra.mrb[6].mxu1 %vm561_vm0, %v521_v57  ;;  %v13958_v57 = vadd.f32 %v13773_v41, %v13866_v24 }
  0x60   : > { %18669 = vst [vmem:[#allocation20_spill] sm:$0xff] %v13909_v62  ;;  %11740 = vmatprep.mubr.msk.f32.mxu1 %vm561_vm0, %v522_v61  ;;  %v524_v13 = vmax.f32 %v13909_v62, 0.0  ;;  %12927 = vmatpush3.bf16.msra.mxu1 %v12924_v44  ;;  %v13952_v44 = vadd.f32 %v13773_v41, %v13863_v18  ;;  %v13961_v61 = vrot.slane %v401_v28, %v13690_v5 }
  0x61   : > { %11693 = vmatmul.mubr.msk.f32.gmra.mrb[8].mxu0 %vm561_vm0, %v491_v10  ;;  %v523_v10 = vmax.f32 %v13903_v59, 0.0  ;;  %18673 = vst [vmem:[#allocation24_spill] sm:$0xff] %v13958_v57  ;;  %v528_v28 = vmax.f32 %v13958_v57, 0.0 }
  0x62   : > { %11695 = vmatprep.mubr.msk.f32.mxu0 %vm561_vm0, %v492_v15  ;;  %v13933_v15 = vadd.f32 %v13773_v41, %v13836_v4  ;;  %18672 = vst [vmem:[#allocation23_spill] sm:$0xff] %v13952_v44  ;;  %v527_v5 = vmax.f32 %v13952_v44, 0.0 }
  0x63   : > { %11741 = vmatmul.mubr.msk.f32.gmra.mrb[8].mxu1 %vm561_vm0, %v523_v10  ;;  %v500_v10 = vmax.f32 %v13946_v35, 0.0 }
  0x64   : > { %18671 = vst [vmem:[#allocation22_spill] sm:$0xff] %v13933_v15  ;;  %11743 = vmatprep.mubr.msk.f32.mxu1 %vm561_vm0, %v524_v13  ;;  %v13973_v13 = vadd.f32 %v13897_v56, %v13738_v27 }
  0x65   : > { %11696 = vmatmul.mubr.msk.f32.gmra.mrb[10].mxu0 %vm561_vm0, %v493_v39  ;;  %v525_v39 = vmax.f32 %v13927_v14, 0.0 }
  0x66   : > { %11698 = vmatprep.mubr.msk.f32.mxu0 %vm561_vm0, %v494_v51  ;;  %v526_v51 = vmax.f32 %v13933_v15, 0.0 }
  0x67   : > { %11744 = vmatmul.mubr.msk.f32.gmra.mrb[10].mxu1 %vm561_vm0, %v525_v39  ;;  %v13991_v39 = vadd.f32 %v13897_v56, %v13751_v33 }
  0x68   : > { %11746 = vmatprep.mubr.msk.f32.mxu1 %vm561_vm0, %v526_v51  ;;  %v13997_v51 = vadd.f32 %v13897_v56, %v13754_v34 }
  0x69   : > { %11699 = vmatmul.mubr.msk.f32.gmra.mrb[12].mxu0 %vm561_vm0, %v495_v2  ;;  %v499_v2 = vmax.f32 %v13939_v23, 0.0  ;;  %v503_v44 = vmax.f32 %v13991_v39, 0.0 }
  0x6a   : > { %11701 = vmatprep.mubr.msk.f32.mxu0 %vm561_vm0, %v496_v6  ;;  %v13967_v6 = vadd.f32 %v13897_v56, %v13735_v26  ;;  %18676 = vst [vmem:[#allocation27_spill] sm:$0xff] %v13997_v51 }
  0x6b   : > { %11747 = vmatmul.mubr.msk.f32.gmra.mrb[12].mxu1 %vm561_vm0, %v527_v5  ;;  %v14015_v5 = vadd.f32 %v13897_v56, %v13770_v40 }
  0x6c   : > { %v501_v15 = vmax.f32 %v13967_v6, 0.0  ;;  %11749 = vmatprep.mubr.msk.f32.mxu1 %vm561_vm0, %v528_v28  ;;  %v14021_v28 = vadd.f32 %v13897_v56, %v13776_v42 }
  0x6d   : > { %11702 = vmatmul.mubr.msk.f32.gmra.mrb[14].mxu0 %vm561_vm0, %v497_v20  ;;  %v13979_v20 = vadd.f32 %v13773_v41, %v13894_v55  ;;  %v502_v41 = vmax.f32 %v13973_v13, 0.0 }
  0x6e   : > { %11704 = vmatprep.mubr.msk.f32.mxu0 %vm561_vm0, %v498_v29  ;;  %v13985_v29 = vadd.f32 %v13961_v61, %v13702_v11  ;;  %18679 = vst [vmem:[#allocation30_spill] sm:$0xff] %v14021_v28 }
  0x6f   : > { %18674 = vst [vmem:[#allocation25_spill] sm:$0xff] %v13979_v20  ;;  %v529_v11 = vmax.f32 %v13979_v20, 0.0  ;;  %v505_v20 = vmax.f32 %v14015_v5, 0.0 }
  0x70   : > { %18675 = vst [vmem:[#allocation26_spill] sm:$0xff] %v13985_v29  ;;  %v530_v57 = vmax.f32 %v13985_v29, 0.0 }
  0x71   : > { %11705 = vmatmul.mubr.msk.f32.gmra.mrb[16].mxu0 %vm561_vm0, %v499_v2  ;;  %v14003_v2 = vadd.f32 %v13961_v61, %v13720_v19  ;;  %v504_v19 = vmax.f32 %v13997_v51, 0.0  ;;  %11750 = vmatmul.mubr.msk.f32.gmra.mrb[14].mxu1 %vm561_vm0, %v529_v11  ;;  %v14039_v11 = vadd.f32 %v13897_v56, %v13791_v47 }
  0x72   : > { %11707 = vmatprep.mubr.msk.f32.mxu0 %vm561_vm0, %v500_v10  ;;  %v14009_v10 = vadd.f32 %v13961_v61, %v13723_v21  ;;  %11752 = vmatprep.mubr.msk.f32.mxu1 %vm561_vm0, %v530_v57  ;;  %v14045_v57 = vadd.f32 %v13897_v56, %v13806_v53 }
  0x73   : > { %18677 = vst [vmem:[#allocation28_spill] sm:$0xff] %v14003_v2  ;;  %v531_v21 = vmax.f32 %v14003_v2, 0.0  ;;  %18682 = vst [vmem:[#allocation33_spill] sm:$0xff] %v14039_v11  ;;  %v507_v2 = vmax.f32 %v14039_v11, 0.0 }
  0x74   : > { %18678 = vst [vmem:[#allocation29_spill] sm:$0xff] %v14009_v10  ;;  %v532_v29 = vmax.f32 %v14009_v10, 0.0  ;;  %18683 = vst [vmem:[#allocation34_spill] sm:$0xff] %v14045_v57 }
  0x75   : > { %11708 = vmatmul.mubr.msk.f32.gmra.mrb[18].mxu0 %vm561_vm0, %v501_v15  ;;  %v14027_v15 = vadd.f32 %v13961_v61, %v13735_v26  ;;  %v506_v26 = vmax.f32 %v14021_v28, 0.0  ;;  %11753 = vmatmul.mubr.msk.f32.gmra.mrb[16].mxu1 %vm561_vm0, %v531_v21  ;;  %v14063_v21 = vadd.f32 %v13897_v56, %v13832_v0 }
  0x76   : > { %11710 = vmatprep.mubr.msk.f32.mxu0 %vm561_vm0, %v502_v41  ;;  %v14033_v41 = vadd.f32 %v13961_v61, %v13738_v27  ;;  %11755 = vmatprep.mubr.msk.f32.mxu1 %vm561_vm0, %v532_v29  ;;  %v14069_v29 = vadd.f32 %v13897_v56, %v13836_v4 }
  0x77   : > { %18680 = vst [vmem:[#allocation31_spill] sm:$0xff] %v14027_v15  ;;  %v533_v27 = vmax.f32 %v14027_v15, 0.0  ;;  %18686 = vst [vmem:[#allocation37_spill] sm:$0xff] %v14063_v21  ;;  %v509_v15 = vmax.f32 %v14063_v21, 0.0 }
  0x78   : > { %18681 = vst [vmem:[#allocation32_spill] sm:$0xff] %v14033_v41  ;;  %v534_v10 = vmax.f32 %v14033_v41, 0.0  ;;  %18687 = vst [vmem:[#allocation38_spill] sm:$0xff] %v14069_v29 }
  0x79   : > { %11711 = vmatmul.mubr.msk.f32.gmra.mrb[20].mxu0 %vm561_vm0, %v503_v44  ;;  %v14051_v44 = vadd.f32 %v13961_v61, %v13751_v33  ;;  %v508_v33 = vmax.f32 %v14045_v57, 0.0  ;;  %11756 = vmatmul.mubr.msk.f32.gmra.mrb[18].mxu1 %vm561_vm0, %v533_v27  ;;  %v14087_v27 = vadd.f32 %v13897_v56, %v13863_v18 }
  0x7a   : > { %11713 = vmatprep.mubr.msk.f32.mxu0 %vm561_vm0, %v504_v19  ;;  %v14057_v19 = vadd.f32 %v13961_v61, %v13754_v34  ;;  %11758 = vmatprep.mubr.msk.f32.mxu1 %vm561_vm0, %v534_v10  ;;  %v14093_v10 = vadd.f32 %v13897_v56, %v13866_v24 }
  0x7b   : > { %18684 = vst [vmem:[#allocation35_spill] sm:$0xff] %v14051_v44  ;;  %v535_v34 = vmax.f32 %v14051_v44, 0.0  ;;  %18690 = vst [vmem:[#allocation41_spill] sm:$0xff] %v14087_v27  ;;  %v511_v44 = vmax.f32 %v14087_v27, 0.0 }
  0x7c   : > { %18685 = vst [vmem:[#allocation36_spill] sm:$0xff] %v14057_v19  ;;  %v536_v41 = vmax.f32 %v14057_v19, 0.0  ;;  %18691 = vst [vmem:[#allocation42_spill] sm:$0xff] %v14093_v10 }
  0x7d   : > { %11714 = vmatmul.mubr.msk.f32.gmra.mrb[22].mxu0 %vm561_vm0, %v505_v20  ;;  %v14075_v20 = vadd.f32 %v13961_v61, %v13770_v40  ;;  %v510_v40 = vmax.f32 %v14069_v29, 0.0  ;;  %11759 = vmatmul.mubr.msk.f32.gmra.mrb[20].mxu1 %vm561_vm0, %v535_v34  ;;  %v14111_v34 = vadd.f32 %v13897_v56, %v13894_v55  ;;  %v14125_v56 = vadd.f32 %v13961_v61, %v13836_v4 }
  0x7e   : > { %11716 = vmatprep.mubr.msk.f32.mxu0 %vm561_vm0, %v506_v26  ;;  %v14081_v26 = vadd.f32 %v13961_v61, %v13776_v42  ;;  %11761 = vmatprep.mubr.msk.f32.mxu1 %vm561_vm0, %v536_v41  ;;  %v14140_v4 = vadd.f32 %v13961_v61, %v13866_v24  ;;  %v14158_v24 = vld [vmem:[%s18500_s3] ss:$0 sm:$0xff] }
  0x7f   : > { %18688 = vst [vmem:[#allocation39_spill] sm:$0xff] %v14075_v20  ;;  %v537_v42 = vmax.f32 %v14075_v20, 0.0  ;;  %18694 = vst [vmem:[#allocation45_spill] sm:$0xff] %v14111_v34 }
  0x80   : > { %18689 = vst [vmem:[#allocation40_spill] sm:$0xff] %v14081_v26  ;;  %v538_v19 = vmax.f32 %v14081_v26, 0.0  ;;  %18696 = vst [vmem:[#allocation47_spill] sm:$0xff] %v14125_v56  ;;  %v10244_v26 = vld [vmem:[%s18499_s2 + $0x70] sm:$0xff] }
  0x81   : > { %11717 = vmatmul.mubr.msk.f32.gmra.mrb[24].mxu0 %vm561_vm0, %v507_v2  ;;  %v14099_v2 = vadd.f32 %v13961_v61, %v13791_v47  ;;  %v512_v47 = vmax.f32 %v14093_v10, 0.0  ;;  %11762 = vmatmul.mubr.msk.f32.gmra.mrb[22].mxu1 %vm561_vm0, %v537_v42  ;;  %18698 = vst [vmem:[#allocation49_spill] sm:$0xff] %v14140_v4 }
  0x82   : > { %11719 = vmatprep.mubr.msk.f32.mxu0 %vm561_vm0, %v508_v33  ;;  %v14105_v33 = vadd.f32 %v13961_v61, %v13806_v53  ;;  %v14119_v53 = vadd.f32 %v13961_v61, %v13832_v0  ;;  %11764 = vmatprep.mubr.msk.f32.mxu1 %vm561_vm0, %v538_v19  ;;  %v14134_v0 = vadd.f32 %v13961_v61, %v13863_v18  ;;  %v542_v19 = vmax.f32 %v14125_v56, 0.0 }
  0x83   : > { %18692 = vst [vmem:[#allocation43_spill] sm:$0xff] %v14099_v2  ;;  %v539_v41 = vmax.f32 %v14099_v2, 0.0  ;;  %v544_v18 = vmax.f32 %v14140_v4, 0.0 }
  0x84   : > { %18693 = vst [vmem:[#allocation44_spill] sm:$0xff] %v14105_v33  ;;  %18695 = vst [vmem:[#allocation46_spill] sm:$0xff] %v14119_v53  ;;  %v541_v42 = vmax.f32 %v14119_v53, 0.0  ;;  %v10243_v53 = vld [vmem:[%s18499_s2 + $0x68] sm:$0xff] }
  0x85   : > { %11720 = vmatmul.mubr.msk.f32.gmra.mrb[26].mxu0 %vm561_vm0, %v509_v15  ;;  %v540_v15 = vmax.f32 %v14105_v33, 0.0  ;;  %11765 = vmatmul.mubr.msk.f32.gmra.mrb[24].mxu1 %vm561_vm0, %v539_v41  ;;  %18697 = vst [vmem:[#allocation48_spill] sm:$0xff] %v14134_v0  ;;  %v10242_v33 = vld [vmem:[%s18499_s2 + $0x60] sm:$0xff] }
  0x86   : > { %11722 = vmatprep.mubr.msk.f32.mxu0 %vm561_vm0, %v510_v40  ;;  %v513_v40 = vmax.f32 %v14111_v34, 0.0 }
  0x87   : > { %11767 = vmatprep.mubr.msk.f32.mxu1 %vm561_vm0, %v540_v15 }
  0x89   : > { %11723 = vmatmul.mubr.msk.f32.gmra.mrb[28].mxu0 %vm561_vm0, %v511_v44  ;;  %11768 = vmatmul.mubr.msk.f32.gmra.mrb[26].mxu1 %vm561_vm0, %v541_v42  ;;  %v543_v44 = vmax.f32 %v14134_v0, 0.0  ;;  %v10238_v42 = vld [vmem:[%s18499_s2 + $0x40] sm:$0xff] }
  0x8a   : > { %11725 = vmatprep.mubr.msk.f32.mxu0 %vm561_vm0, %v512_v47  ;;  %v14147_v47 = vadd.f32 %v13961_v61, %v13894_v55  ;;  %11770 = vmatprep.mubr.msk.f32.mxu1 %vm561_vm0, %v542_v19  ;;  %v10239_v19 = vld [vmem:[%s18499_s2 + $0x48] sm:$0xff] }
  0x8b   : > { %v12928_v4 = vpack.c.bf16 %v10239_v19, %v10238_v42  ;;  %v12936_v19 = vpack.c.bf16 %v10243_v53, %v10242_v33 }
  0x8c   : > { %18699 = vst [vmem:[#allocation50_spill] sm:$0xff] %v14147_v47  ;;  %v545_v41 = vmax.f32 %v14147_v47, 0.0 }
  0x8d   : > { %11726 = vmatmul.mubr.msk.f32.gmra.mrb[30].mxu0 %vm561_vm0, %v513_v40  ;;  %11771 = vmatmul.mubr.msk.f32.gmra.mrb[28].mxu1 %vm561_vm0, %v543_v44  ;;  %v10240_v44 = vld [vmem:[%s18499_s2 + $0x50] sm:$0xff] }
  0x8e   : > { %11773 = vmatprep.mubr.msk.f32.mxu1 %vm561_vm0, %v544_v18  ;;  %12929 = vmatprep.subr.bf16.mxu0 %v12928_v4 }
  0x8f   : > { %12931 = vmatpush3.bf16.msra.mxu0 %v12928_v4 }
  0x91   : > { %11774 = vmatmul.mubr.msk.f32.gmra.mrb[30].mxu1 %vm561_vm0, %v545_v41 }
 0x124   : > { %v11682_v15 = vpop.f32.mrb[0].mxu0 }
 0x125   : > { %v826_v55 = vadd.f32 %v11682_v15, %v14158_v24  ;;  %v820_v61 = vpop.f32.mrb[1].mxu0  ;;  %v10241_v15 = vld [vmem:[%s18499_s2 + $0x58] sm:$0xff] }
 0x126   : > { %v821_v40 = vadd.f32 %v14158_v24, %v820_v61  ;;  %v12932_v0 = vpack.c.bf16 %v10241_v15, %v10240_v44  ;;  %v14193_v4 = vpop.f32.mrb[0].mxu1 }
 0x127   : > { %v1140_v61 = vmax.f32 %v826_v55, 0.0  ;;  %v14196_v33 = vpop.f32.mrb[1].mxu1 }
 0x128   : > { %v1139_v18 = vmax.f32 %v821_v40, 0.0  ;;  %v11685_v41 = vpop.f32.mrb[2].mxu0  ;;  %12933 = vmatprep.subr.bf16.mxu0 %v12932_v0 }
 0x129   : > { %v836_v47 = vadd.f32 %v11685_v41, %v14158_v24  ;;  %v830_v56 = vpop.f32.mrb[3].mxu0  ;;  %12935 = vmatpush3.bf16.msra.mxu0 %v12932_v0 }
 0x12a   : > { %v831_v40 = vadd.f32 %v14158_v24, %v830_v56  ;;  %11792 = vmatprep.mubr.msk.f32.mxu1 %vm561_vm0, %v1139_v18  ;;  %v10245_v56 = vld [vmem:[%s18499_s2 + $0x78] sm:$0xff]  ;;  %12937 = vmatprep.subr.bf16.mxu0 %v12936_v19 }
 0x12b   : > { %11793 = vmatmul.mubr.msk.f32.vlgmr.msra.gmra.mrb[32].mxu1 %vm561_vm0, %v1140_v61  ;;  %v1142_v44 = vmax.f32 %v836_v47, 0.0  ;;  %v12940_v61 = vpack.c.bf16 %v10245_v56, %v10244_v26 }
 0x12c   : > { %v1141_v55 = vmax.f32 %v831_v40, 0.0  ;;  %v11688_v42 = vpop.f32.mrb[4].mxu0 }
 0x12d   : > { %v846_v41 = vadd.f32 %v11688_v42, %v14158_v24  ;;  %v840_v15 = vpop.f32.mrb[5].mxu0  ;;  %12939 = vmatpush3.bf16.msra.mxu0 %v12936_v19 }
 0x12e   : > { %v841_v18 = vadd.f32 %v14158_v24, %v840_v15  ;;  %11795 = vmatprep.mubr.msk.f32.mxu1 %vm561_vm0, %v1141_v55  ;;  %v14201_v55 = vpop.f32.mrb[2].mxu1  ;;  %12941 = vmatprep.subr.bf16.mxu0 %v12940_v61 }
 0x12f   : > { %11796 = vmatmul.mubr.msk.f32.gmra.mrb[34].mxu1 %vm561_vm0, %v1142_v44  ;;  %v1144_v40 = vmax.f32 %v846_v41, 0.0  ;;  %v14204_v44 = vpop.f32.mrb[3].mxu1 }
 0x130   : > { %v1143_v53 = vmax.f32 %v841_v18, 0.0  ;;  %v11691_v47 = vpop.f32.mrb[6].mxu0  ;;  %v991_v51 = vadd.f32 %v14158_v24, %v14204_v44  ;;  %v996_v44 = vadd.f32 %v14201_v55, %v14158_v24 }
 0x131   : > { %v856_v42 = vadd.f32 %v11691_v47, %v14158_v24  ;;  %v850_v2 = vpop.f32.mrb[7].mxu0  ;;  %12943 = vmatpush3.bf16.msra.mxu0 %v12940_v61 }
 0x132   : > { %v851_v20 = vadd.f32 %v14158_v24, %v850_v2  ;;  %11798 = vmatprep.mubr.msk.f32.mxu1 %vm561_vm0, %v1143_v53  ;;  %v14209_v2 = vpop.f32.mrb[4].mxu1 }
 0x133   : > { %11799 = vmatmul.mubr.msk.f32.gmra.mrb[36].mxu1 %vm561_vm0, %v1144_v40  ;;  %v1146_v18 = vmax.f32 %v856_v42, 0.0  ;;  %v14212_v53 = vpop.f32.mrb[5].mxu1 }
 0x134   : > { %v1145_v0 = vmax.f32 %v851_v20, 0.0  ;;  %v11694_v15 = vpop.f32.mrb[8].mxu0 }
 0x135   : > { %v866_v26 = vadd.f32 %v11694_v15, %v14158_v24  ;;  %v860_v41 = vpop.f32.mrb[9].mxu0 }
 0x136   : > { %v861_v56 = vadd.f32 %v14158_v24, %v860_v41  ;;  %11801 = vmatprep.mubr.msk.f32.mxu1 %vm561_vm0, %v1145_v0  ;;  %v14217_v41 = vpop.f32.mrb[6].mxu1 }
 0x137   : > { %11802 = vmatmul.mubr.msk.f32.gmra.mrb[38].mxu1 %vm561_vm0, %v1146_v18  ;;  %v1148_v20 = vmax.f32 %v866_v26, 0.0  ;;  %v14220_v0 = vpop.f32.mrb[7].mxu1 }
 0x138   : > { %v1147_v47 = vmax.f32 %v861_v56, 0.0  ;;  %v11697_v19 = vpop.f32.mrb[10].mxu0 }
 0x139   : > { %v876_v40 = vadd.f32 %v11697_v19, %v14158_v24  ;;  %v870_v42 = vpop.f32.mrb[11].mxu0  ;;  %v14225_v19 = vpop.f32.mrb[8].mxu1 }
 0x13a   : > { %v871_v15 = vadd.f32 %v14158_v24, %v870_v42  ;;  %11804 = vmatprep.mubr.msk.f32.mxu1 %vm561_vm0, %v1147_v47  ;;  %v14228_v47 = vpop.f32.mrb[9].mxu1 }
 0x13b   : > { %11805 = vmatmul.mubr.msk.f32.gmra.mrb[40].mxu1 %vm561_vm0, %v1148_v20  ;;  %v1150_v14 = vmax.f32 %v876_v40, 0.0  ;;  %v1021_v55 = vadd.f32 %v14158_v24, %v14228_v47 }
 0x13c   : > { %v1149_v18 = vmax.f32 %v871_v15, 0.0  ;;  %v11700_v62 = vpop.f32.mrb[12].mxu0 }
 0x13d   : > { %v886_v61 = vadd.f32 %v11700_v62, %v14158_v24  ;;  %v880_v56 = vpop.f32.mrb[13].mxu0  ;;  %v14233_v62 = vpop.f32.mrb[10].mxu1 }
 0x13e   : > { %v881_v26 = vadd.f32 %v14158_v24, %v880_v56  ;;  %11807 = vmatprep.mubr.msk.f32.mxu1 %vm561_vm0, %v1149_v18  ;;  %v14236_v18 = vpop.f32.mrb[11].mxu1 }
 0x13f   : > { %11808 = vmatmul.mubr.msk.f32.gmra.mrb[42].mxu1 %vm561_vm0, %v1150_v14  ;;  %v1152_v36 = vmax.f32 %v886_v61, 0.0 }
 0x140   : > { %v1151_v42 = vmax.f32 %v881_v26, 0.0  ;;  %v11703_v20 = vpop.f32.mrb[14].mxu0 }
 0x141   : > { %v896_v15 = vadd.f32 %v11703_v20, %v14158_v24  ;;  %v890_v59 = vpop.f32.mrb[15].mxu0  ;;  %v14241_v20 = vpop.f32.mrb[12].mxu1 }
 0x142   : > { %v891_v40 = vadd.f32 %v14158_v24, %v890_v59  ;;  %11810 = vmatprep.mubr.msk.f32.mxu1 %vm561_vm0, %v1151_v42  ;;  %v14244_v59 = vpop.f32.mrb[13].mxu1 }
 0x143   : > { %11811 = vmatmul.mubr.msk.f32.gmra.mrb[44].mxu1 %vm561_vm0, %v1152_v36  ;;  %v1154_v9 = vmax.f32 %v896_v15, 0.0 }
 0x144   : > { %v1153_v56 = vmax.f32 %v891_v40, 0.0  ;;  %v11706_v14 = vpop.f32.mrb[16].mxu0 }
 0x145   : > { %v906_v26 = vadd.f32 %v11706_v14, %v14158_v24  ;;  %v900_v31 = vpop.f32.mrb[17].mxu0  ;;  %v14249_v14 = vpop.f32.mrb[14].mxu1 }
 0x146   : > { %v901_v61 = vadd.f32 %v14158_v24, %v900_v31  ;;  %11813 = vmatprep.mubr.msk.f32.mxu1 %vm561_vm0, %v1153_v56  ;;  %v14252_v31 = vpop.f32.mrb[15].mxu1 }
 0x147   : > { %11814 = vmatmul.mubr.msk.f32.gmra.mrb[46].mxu1 %vm561_vm0, %v1154_v9  ;;  %v1156_v58 = vmax.f32 %v906_v26, 0.0 }
 0x148   : > { %v1155_v42 = vmax.f32 %v901_v61, 0.0  ;;  %v11709_v36 = vpop.f32.mrb[18].mxu0 }
 0x149   : > { %v916_v40 = vadd.f32 %v11709_v36, %v14158_v24  ;;  %v910_v7 = vpop.f32.mrb[19].mxu0  ;;  %v14257_v36 = vpop.f32.mrb[16].mxu1 }
 0x14a   : > { %v911_v15 = vadd.f32 %v14158_v24, %v910_v7  ;;  %11816 = vmatprep.mubr.msk.f32.mxu1 %vm561_vm0, %v1155_v42  ;;  %v14260_v7 = vpop.f32.mrb[17].mxu1 }
 0x14b   : > { %11817 = vmatmul.mubr.msk.f32.gmra.mrb[48].mxu1 %vm561_vm0, %v1156_v58  ;;  %v1158_v50 = vmax.f32 %v916_v40, 0.0 }
 0x14c   : > { %v1157_v56 = vmax.f32 %v911_v15, 0.0  ;;  %v11712_v9 = vpop.f32.mrb[20].mxu0 }
 0x14d   : > { %v926_v61 = vadd.f32 %v11712_v9, %v14158_v24  ;;  %v920_v54 = vpop.f32.mrb[21].mxu0  ;;  %v14265_v9 = vpop.f32.mrb[18].mxu1 }
 0x14e   : > { %v921_v26 = vadd.f32 %v14158_v24, %v920_v54  ;;  %11819 = vmatprep.mubr.msk.f32.mxu1 %vm561_vm0, %v1157_v56  ;;  %v14268_v54 = vpop.f32.mrb[19].mxu1 }
 0x14f   : > { %11820 = vmatmul.mubr.msk.f32.gmra.mrb[50].mxu1 %vm561_vm0, %v1158_v50  ;;  %v1160_v48 = vmax.f32 %v926_v61, 0.0 }
 0x150   : > { %v1159_v42 = vmax.f32 %v921_v26, 0.0  ;;  %v11715_v58 = vpop.f32.mrb[22].mxu0 }
 0x151   : > { %v936_v15 = vadd.f32 %v11715_v58, %v14158_v24  ;;  %v930_v49 = vpop.f32.mrb[23].mxu0  ;;  %v14273_v58 = vpop.f32.mrb[20].mxu1 }
 0x152   : > { %v931_v40 = vadd.f32 %v14158_v24, %v930_v49  ;;  %11822 = vmatprep.mubr.msk.f32.mxu1 %vm561_vm0, %v1159_v42  ;;  %v14276_v49 = vpop.f32.mrb[21].mxu1 }
 0x153   : > { %11823 = vmatmul.mubr.msk.f32.gmra.mrb[52].mxu1 %vm561_vm0, %v1160_v48  ;;  %v1162_v10 = vmax.f32 %v936_v15, 0.0 }
 0x154   : > { %v1161_v56 = vmax.f32 %v931_v40, 0.0  ;;  %v11718_v50 = vpop.f32.mrb[24].mxu0 }
 0x155   : > { %v946_v26 = vadd.f32 %v11718_v50, %v14158_v24  ;;  %v940_v34 = vpop.f32.mrb[25].mxu0  ;;  %v14281_v50 = vpop.f32.mrb[22].mxu1 }
 0x156   : > { %v941_v61 = vadd.f32 %v14158_v24, %v940_v34  ;;  %11825 = vmatprep.mubr.msk.f32.mxu1 %vm561_vm0, %v1161_v56  ;;  %v14284_v34 = vpop.f32.mrb[23].mxu1 }
 0x157   : > { %11826 = vmatmul.mubr.msk.f32.gmra.mrb[54].mxu1 %vm561_vm0, %v1162_v10  ;;  %v1164_v29 = vmax.f32 %v946_v26, 0.0 }
 0x158   : > { %v1163_v42 = vmax.f32 %v941_v61, 0.0  ;;  %v11721_v48 = vpop.f32.mrb[26].mxu0 }
 0x159   : > { %v956_v40 = vadd.f32 %v11721_v48, %v14158_v24  ;;  %v950_v27 = vpop.f32.mrb[27].mxu0  ;;  %v14289_v48 = vpop.f32.mrb[24].mxu1 }
 0x15a   : > { %v951_v15 = vadd.f32 %v14158_v24, %v950_v27  ;;  %11828 = vmatprep.mubr.msk.f32.mxu1 %vm561_vm0, %v1163_v42  ;;  %v14292_v27 = vpop.f32.mrb[25].mxu1 }
 0x15b   : > { %11829 = vmatmul.mubr.msk.f32.gmra.mrb[56].mxu1 %vm561_vm0, %v1164_v29  ;;  %v1166_v57 = vmax.f32 %v956_v40, 0.0 }
 0x15c   : > { %v1165_v56 = vmax.f32 %v951_v15, 0.0  ;;  %v11724_v10 = vpop.f32.mrb[28].mxu0  ;;  %v981_v15 = vadd.f32 %v14158_v24, %v14196_v33 }
 0x15d   : > { %v966_v61 = vadd.f32 %v11724_v10, %v14158_v24  ;;  %v960_v21 = vpop.f32.mrb[29].mxu0 }
 0x15e   : > { %v961_v26 = vadd.f32 %v14158_v24, %v960_v21  ;;  %11831 = vmatprep.mubr.msk.f32.mxu1 %vm561_vm0, %v1165_v56  ;;  %v14299_v21 = vpop.f32.mrb[26].mxu1 }
 0x15f   : > { %11832 = vmatmul.mubr.msk.f32.gmra.mrb[58].mxu1 %vm561_vm0, %v1166_v57  ;;  %v1168_v28 = vmax.f32 %v966_v61, 0.0  ;;  %v14302_v57 = vpop.f32.mrb[27].mxu1  ;;  %v986_v61 = vadd.f32 %v14193_v4, %v14158_v24 }
 0x160   : > { %v1167_v42 = vmax.f32 %v961_v26, 0.0  ;;  %v11727_v29 = vpop.f32.mrb[30].mxu0  ;;  %v1171_v26 = vmax.f32 %v981_v15, 0.0 }
 0x161   : > { %v976_v40 = vadd.f32 %v11727_v29, %v14158_v24  ;;  %v970_v10 = vpop.f32.mrb[31].mxu0  ;;  %v14309_v29 = vpop.f32.mrb[28].mxu1  ;;  %v1172_v15 = vmax.f32 %v986_v61, 0.0  ;;  %v1016_v61 = vadd.f32 %v14217_v41, %v14158_v24  ;;  %v1041_v41 = vadd.f32 %v14158_v24, %v14244_v59 }
 0x162   : > { %v971_v11 = vadd.f32 %v14158_v24, %v970_v10  ;;  %11834 = vmatprep.mubr.msk.f32.mxu1 %vm561_vm0, %v1167_v42  ;;  %v14312_v42 = vpop.f32.mrb[29].mxu1 }
 0x163   : > { %11835 = vmatmul.mubr.msk.f32.gmra.mrb[60].mxu1 %vm561_vm0, %v1168_v28  ;;  %v1170_v33 = vmax.f32 %v976_v40, 0.0  ;;  %v1173_v28 = vmax.f32 %v991_v51, 0.0  ;;  %v1011_v51 = vadd.f32 %v14158_v24, %v14220_v0  ;;  %v1178_v0 = vmax.f32 %v1016_v61, 0.0 }
 0x164   : > { %v1169_v56 = vmax.f32 %v971_v11, 0.0  ;;  %v1001_v11 = vadd.f32 %v14158_v24, %v14212_v53  ;;  %v14319_v40 = vpop.f32.mrb[30].mxu1  ;;  %v1006_v53 = vadd.f32 %v14209_v2, %v14158_v24  ;;  %v1031_v2 = vadd.f32 %v14158_v24, %v14236_v18 }
 0x165   : > { %v14322_v4 = vpop.f32.mrb[31].mxu1  ;;  %v1076_v61 = vadd.f32 %v14265_v9, %v14158_v24  ;;  %v1101_v9 = vadd.f32 %v14158_v24, %v14292_v27 }
 0x166   : > { %11837 = vmatprep.mubr.msk.f32.mxu1 %vm561_vm0, %v1169_v56  ;;  %v1175_v10 = vmax.f32 %v1001_v11, 0.0  ;;  %v1174_v56 = vmax.f32 %v996_v44, 0.0  ;;  %v1026_v11 = vadd.f32 %v14225_v19, %v14158_v24  ;;  %v1036_v44 = vadd.f32 %v14233_v62, %v14158_v24 }
 0x167   : > { %11838 = vmatmul.mubr.msk.f32.gmra.mrb[62].mxu1 %vm561_vm0, %v1170_v33  ;;  %v1176_v33 = vmax.f32 %v1006_v53, 0.0  ;;  %v1051_v19 = vadd.f32 %v14158_v24, %v14252_v31  ;;  %v1061_v62 = vadd.f32 %v14158_v24, %v14260_v7  ;;  %v1056_v53 = vadd.f32 %v14249_v14, %v14158_v24 }
 0x168   : > { %11840 = vmatprep.mubr.msk.f32.mxu1 %vm561_vm0, %v1171_v26  ;;  %v1177_v26 = vmax.f32 %v1011_v51, 0.0  ;;  %v1180_v47 = vmax.f32 %v1026_v11, 0.0  ;;  %v1182_v18 = vmax.f32 %v1036_v44, 0.0  ;;  %v1046_v51 = vadd.f32 %v14241_v20, %v14158_v24 }
 0x169   : > { %v1071_v20 = vadd.f32 %v14158_v24, %v14268_v54  ;;  %v1186_v31 = vmax.f32 %v1056_v53, 0.0  ;;  %v1081_v14 = vadd.f32 %v14158_v24, %v14276_v49  ;;  %v1190_v54 = vmax.f32 %v1076_v61, 0.0  ;;  %v13406_v53 = vld [vmem:[%s13687_s28] sm:$0x1f] }
 0x16a   : > { %v1184_v59 = vmax.f32 %v1046_v51, 0.0  ;;  %v1096_v11 = vadd.f32 %v14281_v50, %v14158_v24  ;;  %v1121_v50 = vadd.f32 %v14158_v24, %v14312_v42  ;;  %v1116_v44 = vadd.f32 %v14299_v21, %v14158_v24 }
 0x16b   : > { %11841 = vmatmul.mubr.msk.f32.gmra.mrb[64].mxu1 %vm561_vm0, %v1172_v15  ;;  %v1181_v15 = vmax.f32 %v1031_v2, 0.0  ;;  %v1086_v2 = vadd.f32 %v14273_v58, %v14158_v24  ;;  %v1111_v58 = vadd.f32 %v14158_v24, %v14302_v57  ;;  %v1126_v57 = vadd.f32 %v14309_v29, %v14158_v24  ;;  %v2662_v29 = vld [vmem:[#allocation2 + $0x40] sm:$0xff] }
 0x16c   : > { %11843 = vmatprep.mubr.msk.f32.mxu1 %vm561_vm0, %v1173_v28  ;;  %v1179_v28 = vmax.f32 %v1021_v55, 0.0  ;;  %v1066_v55 = vadd.f32 %v14257_v36, %v14158_v24  ;;  %v1091_v36 = vadd.f32 %v14158_v24, %v14284_v34  ;;  %v1194_v34 = vmax.f32 %v1096_v11, 0.0  ;;  %v2667_v11 = vld [vmem:[#allocation2 + $0x68] sm:$0xff] }
 0x16d   : > { %v1192_v49 = vmax.f32 %v1086_v2, 0.0  ;;  %v1136_v42 = vadd.f32 %v14319_v40, %v14158_v24 }
 0x16e   : > { %v1188_v7 = vmax.f32 %v1066_v55, 0.0 }
 0x16f   : > { %11844 = vmatmul.mubr.msk.f32.gmra.mrb[66].mxu1 %vm561_vm0, %v1174_v56  ;;  %v1185_v56 = vmax.f32 %v1051_v19, 0.0  ;;  %v1198_v19 = vmax.f32 %v1116_v44, 0.0  ;;  %v1202_v51 = vmax.f32 %v1136_v42, 0.0 }
 0x170   : > { %11846 = vmatprep.mubr.msk.f32.mxu1 %vm561_vm0, %v1175_v10  ;;  %v1183_v10 = vmax.f32 %v1041_v41, 0.0  ;;  %v1106_v41 = vadd.f32 %v14289_v48, %v14158_v24  ;;  %v1131_v48 = vadd.f32 %v14158_v24, %v14322_v4  ;;  %v2663_v4 = vld [vmem:[#allocation2 + $0x48] sm:$0xff]  ;;  %v14414_v24 = vld [vmem:[%s18502_s5] ss:$0 sm:$0xff] }
 0x172   : > { %v1196_v27 = vmax.f32 %v1106_v41, 0.0  ;;  %v1201_v21 = vmax.f32 %v1131_v48, 0.0 }
 0x173   : > { %11847 = vmatmul.mubr.msk.f32.gmra.mrb[68].mxu1 %vm561_vm0, %v1176_v33  ;;  %v1189_v33 = vmax.f32 %v1071_v20, 0.0 }
 0x174   : > { %11849 = vmatprep.mubr.msk.f32.mxu1 %vm561_vm0, %v1177_v26  ;;  %v1187_v26 = vmax.f32 %v1061_v62, 0.0  ;;  %v14409_v62 = vsub.s32 1, %v13668_v1 }
 0x177   : > { %11850 = vmatmul.mubr.msk.f32.gmra.mrb[70].mxu1 %vm561_vm0, %v1178_v0  ;;  %v1193_v0 = vmax.f32 %v1091_v36, 0.0 }
 0x178   : > { %11852 = vmatprep.mubr.msk.f32.mxu1 %vm561_vm0, %v1179_v28  ;;  %v1191_v28 = vmax.f32 %v1081_v14, 0.0  ;;  %v2665_v14 = vld [vmem:[#allocation2 + $0x58] sm:$0xff] }
 0x17b   : > { %11853 = vmatmul.mubr.msk.f32.gmra.mrb[72].mxu1 %vm561_vm0, %v1180_v47  ;;  %v1197_v47 = vmax.f32 %v1111_v58, 0.0 }
 0x17c   : > { %11855 = vmatprep.mubr.msk.f32.mxu1 %vm561_vm0, %v1181_v15  ;;  %v1195_v15 = vmax.f32 %v1101_v9, 0.0 }
 0x17f   : > { %11856 = vmatmul.mubr.msk.f32.gmra.mrb[74].mxu1 %vm561_vm0, %v1182_v18  ;;  %v1200_v18 = vmax.f32 %v1126_v57, 0.0 }
 0x180   : > { %11858 = vmatprep.mubr.msk.f32.mxu1 %vm561_vm0, %v1183_v10  ;;  %v1199_v10 = vmax.f32 %v1121_v50, 0.0 }
 0x183   : > { %11859 = vmatmul.mubr.msk.f32.gmra.mrb[76].mxu1 %vm561_vm0, %v1184_v59 }
 0x184   : > { %11861 = vmatprep.mubr.msk.f32.mxu1 %vm561_vm0, %v1185_v56  ;;  %v12944_v56 = vpack.c.bf16 %v2663_v4, %v2662_v29 }
 0x186   : > { %12945 = vmatprep.subr.bf16.mxu1 %v12944_v56 }
 0x187   : > { %11862 = vmatmul.mubr.msk.f32.gmra.mrb[78].mxu1 %vm561_vm0, %v1186_v31 }
 0x188   : > { %11864 = vmatprep.mubr.msk.f32.mxu1 %vm561_vm0, %v1187_v26  ;;  %12947 = vmatpush3.bf16.msra.mxu1 %v12944_v56  ;;  %v14419_v26 = vrot.slane %v13406_v53, %v14409_v62 }
 0x18b   : > { %11865 = vmatmul.mubr.msk.f32.gmra.mrb[80].mxu1 %vm561_vm0, %v1188_v7 }
 0x18c   : > { %11867 = vmatprep.mubr.msk.f32.mxu1 %vm561_vm0, %v1189_v33  ;;  %v2664_v33 = vld [vmem:[#allocation2 + $0x50] sm:$0xff] }
 0x18f   : > { %11868 = vmatmul.mubr.msk.f32.gmra.mrb[82].mxu1 %vm561_vm0, %v1190_v54 }
 0x190   : > { %11870 = vmatprep.mubr.msk.f32.mxu1 %vm561_vm0, %v1191_v28  ;;  %v12948_v28 = vpack.c.bf16 %v2665_v14, %v2664_v33 }
 0x192   : > { %12949 = vmatprep.subr.bf16.mxu1 %v12948_v28 }
 0x193   : > { %11871 = vmatmul.mubr.msk.f32.gmra.mrb[84].mxu1 %vm561_vm0, %v1192_v49  ;;  %v2666_v49 = vld [vmem:[#allocation2 + $0x60] sm:$0xff] }
 0x194   : > { %11873 = vmatprep.mubr.msk.f32.mxu1 %vm561_vm0, %v1193_v0  ;;  %12951 = vmatpush3.bf16.msra.mxu1 %v12948_v28  ;;  %v12952_v41 = vpack.c.bf16 %v2667_v11, %v2666_v49 }
 0x196   : > { %12953 = vmatprep.subr.bf16.mxu1 %v12952_v41 }
 0x197   : > { %11874 = vmatmul.mubr.msk.f32.gmra.mrb[86].mxu1 %vm561_vm0, %v1194_v34 }
 0x198   : > { %11876 = vmatprep.mubr.msk.f32.mxu1 %vm561_vm0, %v1195_v15  ;;  %12955 = vmatpush3.bf16.msra.mxu1 %v12952_v41 }
 0x19b   : > { %11877 = vmatmul.mubr.msk.f32.gmra.mrb[88].mxu1 %vm561_vm0, %v1196_v27 }
 0x19c   : > { %11879 = vmatprep.mubr.msk.f32.mxu1 %vm561_vm0, %v1197_v47  ;;  %v2669_v47 = vld [vmem:[#allocation2 + $0x78] sm:$0xff] }
 0x19f   : > { %11880 = vmatmul.mubr.msk.f32.gmra.mrb[90].mxu1 %vm561_vm0, %v1198_v19 }
 0x1a0   : > { %11882 = vmatprep.mubr.msk.f32.mxu1 %vm561_vm0, %v1199_v10 }
 0x1a3   : > { %11883 = vmatmul.mubr.msk.f32.gmra.mrb[92].mxu1 %vm561_vm0, %v1200_v18 }
 0x1a4   : > { %11885 = vmatprep.mubr.msk.f32.mxu1 %vm561_vm0, %v1201_v21 }
 0x1a7   : > { %11886 = vmatmul.mubr.msk.f32.gmra.mrb[94].mxu1 %vm561_vm0, %v1202_v51 }
 0x1fe   : > { %v11794_v40 = vpop.f32.mrb[32].mxu1 }
 0x1ff   : > { %v1482_v59 = vadd.f32 %v11794_v40, %v14414_v24  ;;  %v1476_v20 = vpop.f32.mrb[33].mxu1 }
 0x200   : > { %v1477_v31 = vadd.f32 %v14414_v24, %v1476_v20 }
 0x201   : > { %v1796_v55 = vadd.f32 %v1482_v59, %v13728_v22 }
 0x202   : > { %v1795_v7 = vadd.f32 %v1477_v31, %v13716_v17  ;;  %v11797_v61 = vpop.f32.mrb[34].mxu1  ;;  %v2668_v17 = vld [vmem:[#allocation2 + $0x70] sm:$0xff] }
 0x203   : > { %v14425_v36 = vadd.f32 %v14419_v26, %v1796_v55  ;;  %v1492_v54 = vadd.f32 %v11797_v61, %v14414_v24  ;;  %v1486_v2 = vpop.f32.mrb[35].mxu1 }
 0x204   : > { %v14429_v0 = vadd.f32 %v14419_v26, %v1795_v7  ;;  %v1487_v9 = vadd.f32 %v14414_v24, %v1486_v2 }
 0x205   : > { %v1798_v22 = vadd.f32 %v1492_v54, %v13743_v30  ;;  %v1940_v50 = vmax.f32 %v14425_v36, 0.0  ;;  %v12956_v30 = vpack.c.bf16 %v2669_v47, %v2668_v17 }
 0x206   : > { %v1797_v15 = vadd.f32 %v1487_v9, %v13732_v25  ;;  %v11800_v58 = vpop.f32.mrb[36].mxu1  ;;  %v1939_v34 = vmax.f32 %v14429_v0, 0.0 }
 0x207   : > { %v14437_v27 = vadd.f32 %v14419_v26, %v1798_v22  ;;  %v1502_v44 = vadd.f32 %v11800_v58, %v14414_v24  ;;  %v1496_v57 = vpop.f32.mrb[37].mxu1  ;;  %12957 = vmatprep.subr.bf16.mxu1 %v12956_v30 }
 0x208   : > { %v14441_v10 = vadd.f32 %v14419_v26, %v1797_v15  ;;  %v1497_v48 = vadd.f32 %v14414_v24, %v1496_v57  ;;  %11904 = vmatprep.mubr.msk.f32.mxu0 %vm561_vm0, %v1939_v34  ;;  %12959 = vmatpush3.bf16.msra.mxu1 %v12956_v30 }
 0x209   : > { %v1800_v25 = vadd.f32 %v1502_v44, %v13761_v37  ;;  %11905 = vmatmul.mubr.msk.f32.vlgmr.msra.gmra.mrb[32].mxu0 %vm561_vm0, %v1940_v50  ;;  %v1942_v4 = vmax.f32 %v14437_v27, 0.0 }
 0x20a   : > { %v1799_v19 = vadd.f32 %v1497_v48, %v13748_v32  ;;  %v11803_v18 = vpop.f32.mrb[38].mxu1  ;;  %v1941_v42 = vmax.f32 %v14441_v10, 0.0 }
 0x20b   : > { %v14450_v21 = vadd.f32 %v14419_v26, %v1800_v25  ;;  %v1512_v51 = vadd.f32 %v11803_v18, %v14414_v24  ;;  %v1506_v29 = vpop.f32.mrb[39].mxu1 }
 0x20c   : > { %v14455_v56 = vadd.f32 %v14419_v26, %v1799_v19  ;;  %v1507_v37 = vadd.f32 %v14414_v24, %v1506_v29  ;;  %11907 = vmatprep.mubr.msk.f32.mxu0 %vm561_vm0, %v1941_v42 }
 0x20d   : > { %v1802_v32 = vadd.f32 %v1512_v51, %v13783_v45  ;;  %11908 = vmatmul.mubr.msk.f32.gmra.mrb[34].mxu0 %vm561_vm0, %v1942_v4  ;;  %v1944_v33 = vmax.f32 %v14450_v21, 0.0 }
 0x20e   : > { %v1801_v40 = vadd.f32 %v1507_v37, %v13765_v38  ;;  %v11806_v59 = vpop.f32.mrb[40].mxu1  ;;  %v1943_v53 = vmax.f32 %v14455_v56, 0.0 }
 0x20f   : > { %v14464_v20 = vadd.f32 %v14419_v26, %v1802_v32  ;;  %v1522_v31 = vadd.f32 %v11806_v59, %v14414_v24  ;;  %v1516_v55 = vpop.f32.mrb[41].mxu1 }
 0x210   : > { %v14469_v14 = vadd.f32 %v14419_v26, %v1801_v40  ;;  %v1517_v45 = vadd.f32 %v14414_v24, %v1516_v55  ;;  %11910 = vmatprep.mubr.msk.f32.mxu0 %vm561_vm0, %v1943_v53  ;;  %v13407_v40 = vld [vmem:[%s13687_s28 + $0x8] sm:$0x1f] }
 0x211   : > { %v1804_v38 = vadd.f32 %v1522_v31, %v13823_v60  ;;  %11911 = vmatmul.mubr.msk.f32.gmra.mrb[36].mxu0 %vm561_vm0, %v1944_v33  ;;  %v1946_v22 = vmax.f32 %v14464_v20, 0.0  ;;  %v14525_v59 = vrot.slane %v13407_v40, %v14409_v62 }
 0x212   : > { %v1803_v7 = vadd.f32 %v1517_v45, %v13788_v46  ;;  %v11809_v61 = vpop.f32.mrb[42].mxu1  ;;  %v1945_v28 = vmax.f32 %v14469_v14, 0.0 }
 0x213   : > { %v14478_v54 = vadd.f32 %v14419_v26, %v1804_v38  ;;  %v1532_v2 = vadd.f32 %v11809_v61, %v14414_v24  ;;  %v1526_v9 = vpop.f32.mrb[43].mxu1 }
 0x214   : > { %v14483_v49 = vadd.f32 %v14419_v26, %v1803_v7  ;;  %v1527_v60 = vadd.f32 %v14414_v24, %v1526_v9  ;;  %11913 = vmatprep.mubr.msk.f32.mxu0 %vm561_vm0, %v1945_v28 }
 0x215   : > { %v1806_v46 = vadd.f32 %v1532_v2, %v13854_v12  ;;  %11914 = vmatmul.mubr.msk.f32.gmra.mrb[38].mxu0 %vm561_vm0, %v1946_v22  ;;  %v1948_v47 = vmax.f32 %v14478_v54, 0.0 }
 0x216   : > { %v1805_v11 = vadd.f32 %v1527_v60, %v13829_v63  ;;  %v11812_v17 = vpop.f32.mrb[44].mxu1  ;;  %v1947_v15 = vmax.f32 %v14483_v49, 0.0 }
 0x217   : > { %v14492_v58 = vadd.f32 %v14419_v26, %v1806_v46  ;;  %v1542_v34 = vadd.f32 %v11812_v17, %v14414_v24  ;;  %v1536_v41 = vpop.f32.mrb[45].mxu1 }
 0x218   : > { %v14497_v50 = vadd.f32 %v14419_v26, %v1805_v11  ;;  %v1537_v12 = vadd.f32 %v14414_v24, %v1536_v41  ;;  %11916 = vmatprep.mubr.msk.f32.mxu0 %vm561_vm0, %v1947_v15 }
 0x219   : > { %v1808_v63 = vadd.f32 %v1542_v34, %v13885_v43  ;;  %11917 = vmatmul.mubr.msk.f32.gmra.mrb[40].mxu0 %vm561_vm0, %v1948_v47  ;;  %v1950_v18 = vmax.f32 %v14492_v58, 0.0 }
 0x21a   : > { %v1807_v44 = vadd.f32 %v1537_v12, %v13860_v16  ;;  %v11815_v57 = vpop.f32.mrb[46].mxu1  ;;  %v1949_v30 = vmax.f32 %v14497_v50, 0.0 }
 0x21b   : > { %v14506_v48 = vadd.f32 %v14419_v26, %v1808_v63  ;;  %v1552_v25 = vadd.f32 %v11815_v57, %v14414_v24  ;;  %v1546_v19 = vpop.f32.mrb[47].mxu1 }
 0x21c   : > { %v14511_v42 = vadd.f32 %v14419_v26, %v1807_v44  ;;  %v1547_v43 = vadd.f32 %v14414_v24, %v1546_v19  ;;  %11919 = vmatprep.mubr.msk.f32.mxu0 %vm561_vm0, %v1949_v30  ;;  %v18700_v19 = vld [vmem:[#allocation27_spill] sm:$0xff] }
 0x21d   : > { %v1810_v16 = vadd.f32 %v1552_v25, %v13915_v3  ;;  %11920 = vmatmul.mubr.msk.f32.gmra.mrb[42].mxu0 %vm561_vm0, %v1950_v18  ;;  %v1952_v31 = vmax.f32 %v14506_v48, 0.0 }
 0x21e   : > { %v1809_v51 = vadd.f32 %v1547_v43, %v13891_v52  ;;  %v11818_v29 = vpop.f32.mrb[48].mxu1  ;;  %v1951_v4 = vmax.f32 %v14511_v42, 0.0 }
 0x21f   : > { %v14520_v37 = vadd.f32 %v14419_v26, %v1810_v16  ;;  %v1562_v32 = vadd.f32 %v11818_v29, %v14414_v24  ;;  %v1556_v53 = vpop.f32.mrb[49].mxu1 }
 0x220   : > { %v14529_v3 = vadd.f32 %v14419_v26, %v1809_v51  ;;  %v1557_v52 = vadd.f32 %v14414_v24, %v1556_v53  ;;  %11922 = vmatprep.mubr.msk.f32.mxu0 %vm561_vm0, %v1951_v4  ;;  %v18701_v53 = vld [vmem:[#allocation33_spill] sm:$0xff] }
 0x221   : > { %v1812_v55 = vadd.f32 %v1562_v32, %v13939_v23  ;;  %11923 = vmatmul.mubr.msk.f32.gmra.mrb[44].mxu0 %vm561_vm0, %v1952_v31  ;;  %v1954_v28 = vmax.f32 %v14520_v37, 0.0 }
 0x222   : > { %v1811_v33 = vadd.f32 %v1557_v52, %v13921_v8  ;;  %v11821_v45 = vpop.f32.mrb[50].mxu1  ;;  %v1953_v38 = vmax.f32 %v14529_v3, 0.0  ;;  %v18702_v52 = vld [vmem:[#allocation30_spill] sm:$0xff] }
 0x223   : > { %v14538_v7 = vadd.f32 %v14525_v59, %v1812_v55  ;;  %v1572_v61 = vadd.f32 %v11821_v45, %v14414_v24  ;;  %v1566_v26 = vpop.f32.mrb[51].mxu1 }
 0x224   : > { %v14543_v2 = vadd.f32 %v14525_v59, %v1811_v33  ;;  %v1567_v23 = vadd.f32 %v14414_v24, %v1566_v26  ;;  %11925 = vmatprep.mubr.msk.f32.mxu0 %vm561_vm0, %v1953_v38 }
 0x225   : > { %v1814_v8 = vadd.f32 %v1572_v61, %v13967_v6  ;;  %11926 = vmatmul.mubr.msk.f32.gmra.mrb[46].mxu0 %vm561_vm0, %v1954_v28  ;;  %v1956_v15 = vmax.f32 %v14538_v7, 0.0 }
 0x226   : > { %v1813_v9 = vadd.f32 %v1567_v23, %v13946_v35  ;;  %v11824_v22 = vpop.f32.mrb[52].mxu1  ;;  %v1955_v60 = vmax.f32 %v14543_v2, 0.0 }
 0x227   : > { %v14552_v46 = vadd.f32 %v14525_v59, %v1814_v8  ;;  %v1582_v11 = vadd.f32 %v11824_v22, %v14414_v24  ;;  %v1576_v17 = vpop.f32.mrb[53].mxu1 }
 0x228   : > { %v14557_v34 = vadd.f32 %v14525_v59, %v1813_v9  ;;  %v1577_v6 = vadd.f32 %v14414_v24, %v1576_v17  ;;  %11928 = vmatprep.mubr.msk.f32.mxu0 %vm561_vm0, %v1955_v60  ;;  %v18703_v9 = vld [vmem:[#allocation37_spill] sm:$0xff]  ;;  %v18704_v60 = vld [vmem:[#allocation34_spill] sm:$0xff] }
 0x229   : > { %v1816_v35 = vadd.f32 %v1582_v11, %v13991_v39  ;;  %11929 = vmatmul.mubr.msk.f32.gmra.mrb[48].mxu0 %vm561_vm0, %v1956_v15  ;;  %v1958_v30 = vmax.f32 %v14552_v46, 0.0 }
 0x22a   : > { %v1815_v41 = vadd.f32 %v1577_v6, %v13973_v13  ;;  %v11827_v47 = vpop.f32.mrb[54].mxu1  ;;  %v1957_v12 = vmax.f32 %v14557_v34, 0.0 }
 0x22b   : > { %v14566_v63 = vadd.f32 %v14525_v59, %v1816_v35  ;;  %v1592_v44 = vadd.f32 %v11827_v47, %v14414_v24  ;;  %v1586_v57 = vpop.f32.mrb[55].mxu1 }
 0x22c   : > { %v14571_v25 = vadd.f32 %v14525_v59, %v1815_v41  ;;  %v1587_v39 = vadd.f32 %v14414_v24, %v1586_v57  ;;  %11931 = vmatprep.mubr.msk.f32.mxu0 %vm561_vm0, %v1957_v12  ;;  %v18705_v57 = vld [vmem:[#allocation41_spill] sm:$0xff] }
 0x22d   : > { %v1818_v13 = vadd.f32 %v1592_v44, %v14015_v5  ;;  %11932 = vmatmul.mubr.msk.f32.gmra.mrb[50].mxu0 %vm561_vm0, %v1958_v30  ;;  %v1960_v32 = vmax.f32 %v14566_v63, 0.0 }
 0x22e   : > { %v1817_v18 = vadd.f32 %v1587_v39, %v18700_v19  ;;  %v11830_v43 = vpop.f32.mrb[56].mxu1  ;;  %v1959_v16 = vmax.f32 %v14571_v25, 0.0  ;;  %v18706_v39 = vld [vmem:[#allocation38_spill] sm:$0xff] }
 0x22f   : > { %v14580_v51 = vadd.f32 %v14525_v59, %v1818_v13  ;;  %v1602_v29 = vadd.f32 %v11830_v43, %v14414_v24  ;;  %v1596_v4 = vpop.f32.mrb[57].mxu1 }
 0x230   : > { %v14585_v40 = vadd.f32 %v14525_v59, %v1817_v18  ;;  %v1597_v5 = vadd.f32 %v14414_v24, %v1596_v4  ;;  %11934 = vmatprep.mubr.msk.f32.mxu0 %vm561_vm0, %v1959_v16 }
 0x231   : > { %v1820_v31 = vadd.f32 %v1602_v29, %v18701_v53  ;;  %11935 = vmatmul.mubr.msk.f32.gmra.mrb[52].mxu0 %vm561_vm0, %v1960_v32  ;;  %v1962_v28 = vmax.f32 %v14580_v51, 0.0  ;;  %v18707_v53 = vld [vmem:[#allocation45_spill] sm:$0xff] }
 0x232   : > { %v1819_v55 = vadd.f32 %v1597_v5, %v18702_v52  ;;  %v11833_v33 = vpop.f32.mrb[58].mxu1  ;;  %v1961_v45 = vmax.f32 %v14585_v40, 0.0  ;;  %v18708_v52 = vld [vmem:[#allocation42_spill] sm:$0xff] }
 0x233   : > { %v14594_v38 = vadd.f32 %v14525_v59, %v1820_v31  ;;  %v1612_v61 = vadd.f32 %v11833_v33, %v14414_v24  ;;  %v1606_v26 = vpop.f32.mrb[59].mxu1 }
 0x234   : > { %v14599_v23 = vadd.f32 %v14525_v59, %v1819_v55  ;;  %v1607_v8 = vadd.f32 %v14414_v24, %v1606_v26  ;;  %11937 = vmatprep.mubr.msk.f32.mxu0 %vm561_vm0, %v1961_v45 }
 0x235   : > { %v1822_v22 = vadd.f32 %v1612_v61, %v18703_v9  ;;  %11938 = vmatmul.mubr.msk.f32.gmra.mrb[54].mxu0 %vm561_vm0, %v1962_v28  ;;  %v1964_v47 = vmax.f32 %v14594_v38, 0.0  ;;  %v13408_v28 = vld [vmem:[%s13687_s28 + $0x10] sm:$0x1f] }
 0x236   : > { %v1821_v11 = vadd.f32 %v1607_v8, %v18704_v60  ;;  %v11836_v17 = vpop.f32.mrb[60].mxu1  ;;  %v1963_v15 = vmax.f32 %v14599_v23, 0.0  ;;  %v14641_v8 = vrot.slane %v13408_v28, %v14409_v62  ;;  %v18713_v28 = vld [vmem:[#allocation15_spill] sm:$0xff] }
 0x237   : > { %v14608_v6 = vadd.f32 %v14525_v59, %v1822_v22  ;;  %v1622_v35 = vadd.f32 %v11836_v17, %v14414_v24  ;;  %v1616_v41 = vpop.f32.mrb[61].mxu1  ;;  %v18709_v17 = vld [vmem:[#allocation11_spill] sm:$0xff] }
 0x238   : > { %v14613_v12 = vadd.f32 %v14525_v59, %v1821_v11  ;;  %v1617_v44 = vadd.f32 %v14414_v24, %v1616_v41  ;;  %11940 = vmatprep.mubr.msk.f32.mxu0 %vm561_vm0, %v1963_v15 }
 0x239   : > { %v1824_v30 = vadd.f32 %v1622_v35, %v18705_v57  ;;  %11941 = vmatmul.mubr.msk.f32.gmra.mrb[56].mxu0 %vm561_vm0, %v1964_v47  ;;  %v1966_v4 = vmax.f32 %v14608_v6, 0.0  ;;  %v18710_v35 = vld [vmem:[#allocation10_spill] sm:$0xff] }
 0x23a   : > { %v1823_v13 = vadd.f32 %v1617_v44, %v18706_v39  ;;  %v11839_v19 = vpop.f32.mrb[62].mxu1  ;;  %v1965_v18 = vmax.f32 %v14613_v12, 0.0 }
 0x23b   : > { %v14622_v43 = vadd.f32 %v14525_v59, %v1824_v30  ;;  %v1632_v16 = vadd.f32 %v11839_v19, %v14414_v24  ;;  %v1626_v29 = vpop.f32.mrb[63].mxu1 }
 0x23c   : > { %v14627_v32 = vadd.f32 %v14525_v59, %v1823_v13  ;;  %v1627_v5 = vadd.f32 %v14414_v24, %v1626_v29  ;;  %11943 = vmatprep.mubr.msk.f32.mxu0 %vm561_vm0, %v1965_v18  ;;  %v18711_v18 = vld [vmem:[#allocation13_spill] sm:$0xff]  ;;  %v18712_v29 = vld [vmem:[#allocation12_spill] sm:$0xff] }
 0x23d   : > { %v1826_v31 = vadd.f32 %v1632_v16, %v18707_v53  ;;  %11944 = vmatmul.mubr.msk.f32.gmra.mrb[58].mxu0 %vm561_vm0, %v1966_v4  ;;  %v1968_v22 = vmax.f32 %v14622_v43, 0.0 }
 0x23e   : > { %v1825_v55 = vadd.f32 %v1627_v5, %v18708_v52  ;;  %v11842_v33 = vpop.f32.mrb[64].mxu1  ;;  %v1967_v45 = vmax.f32 %v14627_v32, 0.0 }
 0x23f   : > { %v14636_v61 = vadd.f32 %v14525_v59, %v1826_v31  ;;  %v1642_v26 = vadd.f32 %v11842_v33, %v14414_v24  ;;  %v1636_v9 = vpop.f32.mrb[65].mxu1 }
 0x240   : > { %v14645_v60 = vadd.f32 %v14525_v59, %v1825_v55  ;;  %v1637_v11 = vadd.f32 %v14414_v24, %v1636_v9  ;;  %11946 = vmatprep.mubr.msk.f32.mxu0 %vm561_vm0, %v1967_v45 }
 0x241   : > { %v1828_v15 = vadd.f32 %v1642_v26, %v18709_v17  ;;  %11947 = vmatmul.mubr.msk.f32.gmra.mrb[60].mxu0 %vm561_vm0, %v1968_v22  ;;  %v1970_v39 = vmax.f32 %v14636_v61, 0.0  ;;  %v18714_v22 = vld [vmem:[#allocation14_spill] sm:$0xff] }
 0x242   : > { %v1827_v41 = vadd.f32 %v1637_v11, %v18710_v35  ;;  %v11845_v47 = vpop.f32.mrb[66].mxu1  ;;  %v1969_v44 = vmax.f32 %v14645_v60, 0.0 }
 0x243   : > { %v14654_v57 = vadd.f32 %v14641_v8, %v1828_v15  ;;  %v1652_v30 = vadd.f32 %v11845_v47, %v14414_v24  ;;  %v1646_v59 = vpop.f32.mrb[67].mxu1 }
 0x244   : > { %v14659_v13 = vadd.f32 %v14641_v8, %v1827_v41  ;;  %v1647_v19 = vadd.f32 %v14414_v24, %v1646_v59  ;;  %11949 = vmatprep.mubr.msk.f32.mxu0 %vm561_vm0, %v1969_v44 }
 0x245   : > { %v1830_v16 = vadd.f32 %v1652_v30, %v18711_v18  ;;  %11950 = vmatmul.mubr.msk.f32.gmra.mrb[62].mxu0 %vm561_vm0, %v1970_v39  ;;  %v1972_v33 = vmax.f32 %v14654_v57, 0.0  ;;  %v18715_v39 = vld [vmem:[#allocation17_spill] sm:$0xff]  ;;  %v18716_v18 = vld [vmem:[#allocation16_spill] sm:$0xff] }
 0x246   : > { %v1829_v4 = vadd.f32 %v1647_v19, %v18712_v29  ;;  %v11848_v5 = vpop.f32.mrb[68].mxu1  ;;  %v1971_v53 = vmax.f32 %v14659_v13, 0.0 }
 0x247   : > { %v14668_v31 = vadd.f32 %v14641_v8, %v1830_v16  ;;  %v1662_v52 = vadd.f32 %v11848_v5, %v14414_v24  ;;  %v1656_v55 = vpop.f32.mrb[69].mxu1 }
 0x248   : > { %v14673_v45 = vadd.f32 %v14641_v8, %v1829_v4  ;;  %v1657_v26 = vadd.f32 %v14414_v24, %v1656_v55  ;;  %11952 = vmatprep.mubr.msk.f32.mxu0 %vm561_vm0, %v1971_v53 }
 0x249   : > { %v1832_v9 = vadd.f32 %v1662_v52, %v18713_v28  ;;  %11953 = vmatmul.mubr.msk.f32.gmra.mrb[64].mxu0 %vm561_vm0, %v1972_v33  ;;  %v1974_v44 = vmax.f32 %v14668_v31, 0.0  ;;  %v18717_v28 = vld [vmem:[#allocation19_spill] sm:$0xff] }
 0x24a   : > { %v1831_v11 = vadd.f32 %v1657_v26, %v18714_v22  ;;  %v11851_v17 = vpop.f32.mrb[70].mxu1  ;;  %v1973_v15 = vmax.f32 %v14673_v45, 0.0  ;;  %v18718_v22 = vld [vmem:[#allocation18_spill] sm:$0xff] }
 0x24b   : > { %v14682_v35 = vadd.f32 %v14641_v8, %v1832_v9  ;;  %v1672_v41 = vadd.f32 %v11851_v17, %v14414_v24  ;;  %v1666_v47 = vpop.f32.mrb[71].mxu1 }
 0x24c   : > { %v14687_v30 = vadd.f32 %v14641_v8, %v1831_v11  ;;  %v1667_v59 = vadd.f32 %v14414_v24, %v1666_v47  ;;  %11955 = vmatprep.mubr.msk.f32.mxu0 %vm561_vm0, %v1973_v15 }
 0x24d   : > { %v1834_v19 = vadd.f32 %v1672_v41, %v18715_v39  ;;  %11956 = vmatmul.mubr.msk.f32.gmra.mrb[66].mxu0 %vm561_vm0, %v1974_v44  ;;  %v1976_v55 = vmax.f32 %v14682_v35, 0.0 }
 0x24e   : > { %v1833_v16 = vadd.f32 %v1667_v59, %v18716_v18  ;;  %v11854_v29 = vpop.f32.mrb[72].mxu1  ;;  %v1975_v4 = vmax.f32 %v14687_v30, 0.0  ;;  %v18719_v18 = vld [vmem:[#allocation21_spill] sm:$0xff] }
 0x24f   : > { %v14696_v5 = vadd.f32 %v14641_v8, %v1834_v19  ;;  %v1682_v53 = vadd.f32 %v11854_v29, %v14414_v24  ;;  %v1676_v52 = vpop.f32.mrb[73].mxu1  ;;  %v18720_v29 = vld [vmem:[#allocation20_spill] sm:$0xff] }
 0x250   : > { %v14701_v33 = vadd.f32 %v14641_v8, %v1833_v16  ;;  %v1677_v26 = vadd.f32 %v14414_v24, %v1676_v52  ;;  %11958 = vmatprep.mubr.msk.f32.mxu0 %vm561_vm0, %v1975_v4 }
 0x251   : > { %v1836_v9 = vadd.f32 %v1682_v53, %v18717_v28  ;;  %11959 = vmatmul.mubr.msk.f32.gmra.mrb[68].mxu0 %vm561_vm0, %v1976_v55  ;;  %v1978_v59 = vmax.f32 %v14696_v5, 0.0 }
 0x252   : > { %v1835_v11 = vadd.f32 %v1677_v26, %v18718_v22  ;;  %v11857_v17 = vpop.f32.mrb[74].mxu1  ;;  %v1977_v15 = vmax.f32 %v14701_v33, 0.0 }
 0x253   : > { %v14710_v41 = vadd.f32 %v14641_v8, %v1836_v9  ;;  %v1692_v47 = vadd.f32 %v11857_v17, %v14414_v24  ;;  %v1686_v44 = vpop.f32.mrb[75].mxu1  ;;  %v18722_v17 = vld [vmem:[#allocation23_spill] sm:$0xff] }
 0x254   : > { %v14715_v39 = vadd.f32 %v14641_v8, %v1835_v11  ;;  %v1687_v19 = vadd.f32 %v14414_v24, %v1686_v44  ;;  %11961 = vmatprep.mubr.msk.f32.mxu0 %vm561_vm0, %v1977_v15 }
 0x255   : > { %v1838_v16 = vadd.f32 %v1692_v47, %v18719_v18  ;;  %11962 = vmatmul.mubr.msk.f32.gmra.mrb[70].mxu0 %vm561_vm0, %v1978_v59  ;;  %v1980_v9 = vmax.f32 %v14710_v41, 0.0  ;;  %v18723_v47 = vld [vmem:[#allocation22_spill] sm:$0xff] }
 0x256   : > { %v1837_v4 = vadd.f32 %v1687_v19, %v18720_v29  ;;  %v11860_v53 = vpop.f32.mrb[76].mxu1  ;;  %v1979_v52 = vmax.f32 %v14715_v39, 0.0 }
 0x257   : > { %v14724_v55 = vadd.f32 %v14641_v8, %v1838_v16  ;;  %v1702_v26 = vadd.f32 %v11860_v53, %v14414_v24  ;;  %v1696_v28 = vpop.f32.mrb[77].mxu1 }
 0x258   : > { %v14729_v22 = vadd.f32 %v14641_v8, %v1837_v4  ;;  %v1697_v11 = vadd.f32 %v14414_v24, %v1696_v28  ;;  %11964 = vmatprep.mubr.msk.f32.mxu0 %vm561_vm0, %v1979_v52 }
 0x259   : > { %v1840_v15 = vadd.f32 %v1702_v26, %v18722_v17  ;;  %11965 = vmatmul.mubr.msk.f32.gmra.mrb[72].mxu0 %vm561_vm0, %v1980_v9  ;;  %v1982_v4 = vmax.f32 %v14724_v55, 0.0  ;;  %v18725_v26 = vld [vmem:[#allocation25_spill] sm:$0xff]  ;;  %v18726_v9 = vld [vmem:[#allocation24_spill] sm:$0xff] }
 0x25a   : > { %18721 = vst [vmem:[#allocation27_spill] sm:$0xff] %v14729_v22  ;;  %v1839_v44 = vadd.f32 %v1697_v11, %v18723_v47  ;;  %v11863_v59 = vpop.f32.mrb[78].mxu1  ;;  %v1981_v19 = vmax.f32 %v14729_v22, 0.0 }
 0x25b   : > { %v14738_v18 = vadd.f32 %v14641_v8, %v1840_v15  ;;  %v1712_v16 = vadd.f32 %v11863_v59, %v14414_v24  ;;  %v1706_v29 = vpop.f32.mrb[79].mxu1 }
 0x25c   : > { %v14743_v53 = vadd.f32 %v14641_v8, %v1839_v44  ;;  %v1707_v52 = vadd.f32 %v14414_v24, %v1706_v29  ;;  %11967 = vmatprep.mubr.msk.f32.mxu0 %vm561_vm0, %v1981_v19  ;;  %v13409_v44 = vld [vmem:[%s13687_s28 + $0x18] sm:$0x1f] }
 0x25d   : > { %v1842_v28 = vadd.f32 %v1712_v16, %v18725_v26  ;;  %11968 = vmatmul.mubr.msk.f32.gmra.mrb[74].mxu0 %vm561_vm0, %v1982_v4  ;;  %v14757_v22 = vrot.slane %v13409_v44, %v14409_v62  ;;  %v1984_v19 = vmax.f32 %v14738_v18, 0.0 }
 0x25e   : > { %18724 = vst [vmem:[#allocation33_spill] sm:$0xff] %v14743_v53  ;;  %v1841_v11 = vadd.f32 %v1707_v52, %v18726_v9  ;;  %v11866_v17 = vpop.f32.mrb[80].mxu1  ;;  %v1983_v15 = vmax.f32 %v14743_v53, 0.0  ;;  %v18729_v52 = vld [vmem:[#allocation28_spill] sm:$0xff] }
 0x25f   : > { %v14752_v47 = vadd.f32 %v14641_v8, %v1842_v28  ;;  %v1722_v59 = vadd.f32 %v11866_v17, %v14414_v24  ;;  %v1716_v29 = vpop.f32.mrb[81].mxu1  ;;  %v18730_v28 = vld [vmem:[#allocation26_spill] sm:$0xff] }
 0x260   : > { %v14761_v16 = vadd.f32 %v14641_v8, %v1841_v11  ;;  %v1717_v4 = vadd.f32 %v14414_v24, %v1716_v29  ;;  %11970 = vmatprep.mubr.msk.f32.mxu0 %vm561_vm0, %v1983_v15 }
 0x261   : > { %18727 = vst [vmem:[#allocation30_spill] sm:$0xff] %v14752_v47  ;;  %v1844_v26 = vadd.f32 %v1722_v59, %v18729_v52  ;;  %11971 = vmatmul.mubr.msk.f32.gmra.mrb[76].mxu0 %vm561_vm0, %v1984_v19  ;;  %v1986_v11 = vmax.f32 %v14752_v47, 0.0  ;;  %v18733_v59 = vld [vmem:[#allocation31_spill] sm:$0xff] }
 0x262   : > { %18728 = vst [vmem:[#allocation37_spill] sm:$0xff] %v14761_v16  ;;  %v1843_v9 = vadd.f32 %v1717_v4, %v18730_v28  ;;  %v11869_v17 = vpop.f32.mrb[82].mxu1  ;;  %v1985_v62 = vmax.f32 %v14761_v16, 0.0  ;;  %v18734_v4 = vld [vmem:[#allocation29_spill] sm:$0xff] }
 0x263   : > { %v14770_v44 = vadd.f32 %v14757_v22, %v1844_v26  ;;  %v1732_v53 = vadd.f32 %v11869_v17, %v14414_v24  ;;  %v1726_v8 = vpop.f32.mrb[83].mxu1 }
 0x264   : > { %v14775_v29 = vadd.f32 %v14757_v22, %v1843_v9  ;;  %v1727_v15 = vadd.f32 %v14414_v24, %v1726_v8  ;;  %11973 = vmatprep.mubr.msk.f32.mxu0 %vm561_vm0, %v1985_v62  ;;  %v18737_v62 = vld [vmem:[#allocation35_spill] sm:$0xff] }
 0x265   : > { %18731 = vst [vmem:[#allocation34_spill] sm:$0xff] %v14770_v44  ;;  %v1846_v19 = vadd.f32 %v1732_v53, %v18733_v59  ;;  %11974 = vmatmul.mubr.msk.f32.gmra.mrb[78].mxu0 %vm561_vm0, %v1986_v11  ;;  %v1988_v47 = vmax.f32 %v14770_v44, 0.0 }
 0x266   : > { %18732 = vst [vmem:[#allocation41_spill] sm:$0xff] %v14775_v29  ;;  %v1845_v52 = vadd.f32 %v1727_v15, %v18734_v4  ;;  %v11872_v26 = vpop.f32.mrb[84].mxu1  ;;  %v1987_v28 = vmax.f32 %v14775_v29, 0.0  ;;  %v18738_v15 = vld [vmem:[#allocation32_spill] sm:$0xff] }
 0x267   : > { %v14784_v17 = vadd.f32 %v14757_v22, %v1846_v19  ;;  %v1742_v16 = vadd.f32 %v11872_v26, %v14414_v24  ;;  %v1736_v9 = vpop.f32.mrb[85].mxu1 }
 0x268   : > { %v14789_v8 = vadd.f32 %v14757_v22, %v1845_v52  ;;  %v1737_v53 = vadd.f32 %v14414_v24, %v1736_v9  ;;  %11976 = vmatprep.mubr.msk.f32.mxu0 %vm561_vm0, %v1987_v28 }
 0x269   : > { %18735 = vst [vmem:[#allocation38_spill] sm:$0xff] %v14784_v17  ;;  %v1848_v11 = vadd.f32 %v1742_v16, %v18737_v62  ;;  %11977 = vmatmul.mubr.msk.f32.gmra.mrb[80].mxu0 %vm561_vm0, %v1988_v47  ;;  %v1990_v44 = vmax.f32 %v14784_v17, 0.0  ;;  %v18741_v47 = vld [vmem:[#allocation39_spill] sm:$0xff] }
 0x26a   : > { %18736 = vst [vmem:[#allocation45_spill] sm:$0xff] %v14789_v8  ;;  %v1847_v59 = vadd.f32 %v1737_v53, %v18738_v15  ;;  %v11875_v19 = vpop.f32.mrb[86].mxu1  ;;  %v1989_v4 = vmax.f32 %v14789_v8, 0.0  ;;  %v18742_v53 = vld [vmem:[#allocation36_spill] sm:$0xff] }
 0x26b   : > { %v14798_v26 = vadd.f32 %v14757_v22, %v1848_v11  ;;  %v1752_v29 = vadd.f32 %v11875_v19, %v14414_v24  ;;  %v1746_v52 = vpop.f32.mrb[87].mxu1 }
 0x26c   : > { %v14803_v9 = vadd.f32 %v14757_v22, %v1847_v59  ;;  %v1747_v16 = vadd.f32 %v14414_v24, %v1746_v52  ;;  %11979 = vmatprep.mubr.msk.f32.mxu0 %vm561_vm0, %v1989_v4 }
 0x26d   : > { %18739 = vst [vmem:[#allocation42_spill] sm:$0xff] %v14798_v26  ;;  %v1850_v28 = vadd.f32 %v1752_v29, %v18741_v47  ;;  %11980 = vmatmul.mubr.msk.f32.gmra.mrb[82].mxu0 %vm561_vm0, %v1990_v44  ;;  %v1992_v17 = vmax.f32 %v14798_v26, 0.0  ;;  %v18745_v44 = vld [vmem:[#allocation43_spill] sm:$0xff] }
 0x26e   : > { %18740 = vst [vmem:[#allocation11_spill] sm:$0xff] %v14803_v9  ;;  %v1849_v62 = vadd.f32 %v1747_v16, %v18742_v53  ;;  %v11878_v11 = vpop.f32.mrb[88].mxu1  ;;  %v1991_v15 = vmax.f32 %v14803_v9, 0.0  ;;  %v18746_v16 = vld [vmem:[#allocation40_spill] sm:$0xff] }
 0x26f   : > { %v14812_v19 = vadd.f32 %v14757_v22, %v1850_v28  ;;  %v1762_v8 = vadd.f32 %v11878_v11, %v14414_v24  ;;  %v1756_v59 = vpop.f32.mrb[89].mxu1 }
 0x270   : > { %v14817_v52 = vadd.f32 %v14757_v22, %v1849_v62  ;;  %v1757_v29 = vadd.f32 %v14414_v24, %v1756_v59  ;;  %11982 = vmatprep.mubr.msk.f32.mxu0 %vm561_vm0, %v1991_v15 }
 0x271   : > { %18743 = vst [vmem:[#allocation10_spill] sm:$0xff] %v14812_v19  ;;  %v1852_v4 = vadd.f32 %v1762_v8, %v18745_v44  ;;  %11983 = vmatmul.mubr.msk.f32.gmra.mrb[84].mxu0 %vm561_vm0, %v1992_v17  ;;  %v1994_v26 = vmax.f32 %v14812_v19, 0.0  ;;  %v18749_v17 = vld [vmem:[#allocation46_spill] sm:$0xff] }
 0x272   : > { %18744 = vst [vmem:[#allocation13_spill] sm:$0xff] %v14817_v52  ;;  %v1851_v47 = vadd.f32 %v1757_v29, %v18746_v16  ;;  %v11881_v28 = vpop.f32.mrb[90].mxu1  ;;  %v1993_v53 = vmax.f32 %v14817_v52, 0.0  ;;  %v18750_v29 = vld [vmem:[#allocation44_spill] sm:$0xff] }
 0x273   : > { %v14826_v11 = vadd.f32 %v14757_v22, %v1852_v4  ;;  %v1772_v9 = vadd.f32 %v11881_v28, %v14414_v24  ;;  %v1766_v62 = vpop.f32.mrb[91].mxu1 }
 0x274   : > { %v14831_v59 = vadd.f32 %v14757_v22, %v1851_v47  ;;  %v1767_v8 = vadd.f32 %v14414_v24, %v1766_v62  ;;  %11985 = vmatprep.mubr.msk.f32.mxu0 %vm561_vm0, %v1993_v53 }
 0x275   : > { %18747 = vst [vmem:[#allocation12_spill] sm:$0xff] %v14826_v11  ;;  %v1854_v15 = vadd.f32 %v1772_v9, %v18749_v17  ;;  %11986 = vmatmul.mubr.msk.f32.gmra.mrb[86].mxu0 %vm561_vm0, %v1994_v26  ;;  %v1996_v19 = vmax.f32 %v14826_v11, 0.0  ;;  %v18752_v26 = vld [vmem:[#allocation48_spill] sm:$0xff] }
 0x276   : > { %18748 = vst [vmem:[#allocation15_spill] sm:$0xff] %v14831_v59  ;;  %v1853_v44 = vadd.f32 %v1767_v8, %v18750_v29  ;;  %v11884_v4 = vpop.f32.mrb[92].mxu1  ;;  %v1995_v16 = vmax.f32 %v14831_v59, 0.0  ;;  %v18753_v8 = vld [vmem:[#allocation47_spill] sm:$0xff] }
 0x277   : > { %v14840_v28 = vadd.f32 %v14757_v22, %v1854_v15  ;;  %v1782_v52 = vadd.f32 %v11884_v4, %v14414_v24  ;;  %v1776_v47 = vpop.f32.mrb[93].mxu1 }
 0x278   : > { %v14845_v62 = vadd.f32 %v14757_v22, %v1853_v44  ;;  %v1777_v9 = vadd.f32 %v14414_v24, %v1776_v47  ;;  %11988 = vmatprep.mubr.msk.f32.mxu0 %vm561_vm0, %v1995_v16 }
 0x279   : > { %v1856_v53 = vadd.f32 %v1782_v52, %v18752_v26  ;;  %11989 = vmatmul.mubr.msk.f32.gmra.mrb[88].mxu0 %vm561_vm0, %v1996_v19  ;;  %v1998_v11 = vmax.f32 %v14840_v28, 0.0  ;;  %v18756_v19 = vld [vmem:[#allocation50_spill] sm:$0xff]  ;;  %v18757_v26 = vld [vmem:[#allocation49_spill] sm:$0xff] }
 0x27a   : > { %18751 = vst [vmem:[#allocation14_spill] sm:$0xff] %v14845_v62  ;;  %v1855_v17 = vadd.f32 %v1777_v9, %v18753_v8  ;;  %v11887_v15 = vpop.f32.mrb[94].mxu1  ;;  %v1997_v29 = vmax.f32 %v14845_v62, 0.0  ;;  %v4129_v62 = vld [vmem:[#allocation2 + $0xb8] sm:$0xff] }
 0x27b   : > { %v14854_v4 = vadd.f32 %v14757_v22, %v1856_v53  ;;  %v1792_v59 = vadd.f32 %v11887_v15, %v14414_v24  ;;  %v1786_v44 = vpop.f32.mrb[95].mxu1 }
 0x27c   : > { %v14859_v47 = vadd.f32 %v14757_v22, %v1855_v17  ;;  %v1787_v52 = vadd.f32 %v14414_v24, %v1786_v44  ;;  %11991 = vmatprep.mubr.msk.f32.mxu0 %vm561_vm0, %v1997_v29  ;;  %v14889_v44 = vld [vmem:[%s18500_s3 + $0x1] ss:$0 sm:$0xff] }
 0x27d   : > { %18754 = vst [vmem:[#allocation17_spill] sm:$0xff] %v14854_v4  ;;  %v1858_v16 = vadd.f32 %v1792_v59, %v18756_v19  ;;  %11992 = vmatmul.mubr.msk.f32.gmra.mrb[90].mxu0 %vm561_vm0, %v1998_v11  ;;  %v2000_v9 = vmax.f32 %v14854_v4, 0.0  ;;  %v10378_v59 = vld [vmem:[%s18499_s2 + $0x80] sm:$0xff] }
 0x27e   : > { %18755 = vst [vmem:[#allocation16_spill] sm:$0xff] %v14859_v47  ;;  %v1857_v53 = vadd.f32 %v1787_v52, %v18757_v26  ;;  %v1999_v8 = vmax.f32 %v14859_v47, 0.0  ;;  %v10380_v26 = vld [vmem:[%s18499_s2 + $0x90] sm:$0xff]  ;;  %v10385_v47 = vld [vmem:[%s18499_s2 + $0xb8] sm:$0xff] }
 0x27f   : > { %v14869_v15 = vadd.f32 %v14757_v22, %v1858_v16 }
 0x280   : > { %v14872_v17 = vadd.f32 %v14757_v22, %v1857_v53  ;;  %11994 = vmatprep.mubr.msk.f32.mxu0 %vm561_vm0, %v1999_v8  ;;  %v10379_v22 = vld [vmem:[%s18499_s2 + $0x88] sm:$0xff]  ;;  %v10381_v53 = vld [vmem:[%s18499_s2 + $0x98] sm:$0xff]  ;;  %v10382_v8 = vld [vmem:[%s18499_s2 + $0xa0] sm:$0xff] }
 0x281   : > { %18758 = vst [vmem:[#allocation19_spill] sm:$0xff] %v14869_v15  ;;  %11995 = vmatmul.mubr.msk.f32.gmra.mrb[92].mxu0 %vm561_vm0, %v2000_v9  ;;  %v2002_v24 = vmax.f32 %v14869_v15, 0.0  ;;  %v12960_v29 = vpack.c.bf16 %v10379_v22, %v10378_v59  ;;  %v12964_v59 = vpack.c.bf16 %v10381_v53, %v10380_v26  ;;  %v10383_v22 = vld [vmem:[%s18499_s2 + $0xa8] sm:$0xff]  ;;  %v10384_v15 = vld [vmem:[%s18499_s2 + $0xb0] sm:$0xff] }
 0x282   : > { %18759 = vst [vmem:[#allocation18_spill] sm:$0xff] %v14872_v17  ;;  %v2001_v11 = vmax.f32 %v14872_v17, 0.0  ;;  %v12968_v17 = vpack.c.bf16 %v10383_v22, %v10382_v8  ;;  %v12972_v53 = vpack.c.bf16 %v10385_v47, %v10384_v15 }
 0x283   : > { %12961 = vmatprep.subr.bf16.mxu0 %v12960_v29 }
 0x284   : > { %11997 = vmatprep.mubr.msk.f32.mxu0 %vm561_vm0, %v2001_v11  ;;  %12963 = vmatpush3.bf16.msra.mxu0 %v12960_v29 }
 0x285   : > { %11998 = vmatmul.mubr.msk.f32.gmra.mrb[94].mxu0 %vm561_vm0, %v2002_v24  ;;  %12965 = vmatprep.subr.bf16.mxu0 %v12964_v59 }
 0x288   : > { %12967 = vmatpush3.bf16.msra.mxu0 %v12964_v59 }
 0x289   : > { %12969 = vmatprep.subr.bf16.mxu0 %v12968_v17 }
 0x28c   : > { %12971 = vmatpush3.bf16.msra.mxu0 %v12968_v17 }
 0x28d   : > { %12973 = vmatprep.subr.bf16.mxu0 %v12972_v53 }
 0x290   : > { %12975 = vmatpush3.bf16.msra.mxu0 %v12972_v53 }
 0x2dc   : > { %v11906_v52 = vpop.f32.mrb[32].mxu0 }
 0x2dd   : > { %v2284_v19 = vadd.f32 %v11906_v52, %v14889_v44  ;;  %v2278_v16 = vpop.f32.mrb[33].mxu0 }
 0x2de   : > { %v2279_v9 = vadd.f32 %v14889_v44, %v2278_v16 }
 0x2df   : > { %v2598_v29 = vmax.f32 %v2284_v19, 0.0 }
 0x2e0   : > { %v2597_v24 = vmax.f32 %v2279_v9, 0.0  ;;  %v11909_v11 = vpop.f32.mrb[34].mxu0 }
 0x2e1   : > { %v2294_v52 = vadd.f32 %v11909_v11, %v14889_v44  ;;  %v2288_v16 = vpop.f32.mrb[35].mxu0 }
 0x2e2   : > { %v2289_v9 = vadd.f32 %v14889_v44, %v2288_v16  ;;  %12016 = vmatprep.mubr.msk.f32.mxu1 %vm561_vm0, %v2597_v24 }
 0x2e3   : > { %12017 = vmatmul.mubr.msk.f32.vlgmr.msra.gmra.mrb[96].mxu1 %vm561_vm0, %v2598_v29  ;;  %v2600_v8 = vmax.f32 %v2294_v52, 0.0 }
 0x2e4   : > { %v2599_v19 = vmax.f32 %v2289_v9, 0.0  ;;  %v11912_v26 = vpop.f32.mrb[36].mxu0 }
 0x2e5   : > { %v2304_v11 = vadd.f32 %v11912_v26, %v14889_v44  ;;  %v2298_v22 = vpop.f32.mrb[37].mxu0 }
 0x2e6   : > { %v2299_v4 = vadd.f32 %v14889_v44, %v2298_v22  ;;  %12019 = vmatprep.mubr.msk.f32.mxu1 %vm561_vm0, %v2599_v19 }
 0x2e7   : > { %12020 = vmatmul.mubr.msk.f32.gmra.mrb[98].mxu1 %vm561_vm0, %v2600_v8  ;;  %v2602_v29 = vmax.f32 %v2304_v11, 0.0 }
 0x2e8   : > { %v2601_v24 = vmax.f32 %v2299_v4, 0.0  ;;  %v11915_v16 = vpop.f32.mrb[38].mxu0 }
 0x2e9   : > { %v2314_v59 = vadd.f32 %v11915_v16, %v14889_v44  ;;  %v2308_v9 = vpop.f32.mrb[39].mxu0 }
 0x2ea   : > { %v2309_v47 = vadd.f32 %v14889_v44, %v2308_v9  ;;  %12022 = vmatprep.mubr.msk.f32.mxu1 %vm561_vm0, %v2601_v24 }
 0x2eb   : > { %12023 = vmatmul.mubr.msk.f32.gmra.mrb[100].mxu1 %vm561_vm0, %v2602_v29  ;;  %v2604_v19 = vmax.f32 %v2314_v59, 0.0 }
 0x2ec   : > { %v2603_v15 = vmax.f32 %v2309_v47, 0.0  ;;  %v11918_v52 = vpop.f32.mrb[40].mxu0 }
 0x2ed   : > { %v2324_v26 = vadd.f32 %v11918_v52, %v14889_v44  ;;  %v2318_v17 = vpop.f32.mrb[41].mxu0 }
 0x2ee   : > { %v2319_v4 = vadd.f32 %v14889_v44, %v2318_v17  ;;  %12025 = vmatprep.mubr.msk.f32.mxu1 %vm561_vm0, %v2603_v15 }
 0x2ef   : > { %12026 = vmatmul.mubr.msk.f32.gmra.mrb[102].mxu1 %vm561_vm0, %v2604_v19  ;;  %v2606_v22 = vmax.f32 %v2324_v26, 0.0 }
 0x2f0   : > { %v2605_v8 = vmax.f32 %v2319_v4, 0.0  ;;  %v11921_v11 = vpop.f32.mrb[42].mxu0 }
 0x2f1   : > { %v2334_v24 = vadd.f32 %v11921_v11, %v14889_v44  ;;  %v2328_v16 = vpop.f32.mrb[43].mxu0 }
 0x2f2   : > { %v2329_v53 = vadd.f32 %v14889_v44, %v2328_v16  ;;  %12028 = vmatprep.mubr.msk.f32.mxu1 %vm561_vm0, %v2605_v8 }
 0x2f3   : > { %12029 = vmatmul.mubr.msk.f32.gmra.mrb[104].mxu1 %vm561_vm0, %v2606_v22  ;;  %v2608_v9 = vmax.f32 %v2334_v24, 0.0 }
 0x2f4   : > { %v2607_v29 = vmax.f32 %v2329_v53, 0.0  ;;  %v11924_v59 = vpop.f32.mrb[44].mxu0 }
 0x2f5   : > { %v2344_v47 = vadd.f32 %v11924_v59, %v14889_v44  ;;  %v2338_v15 = vpop.f32.mrb[45].mxu0 }
 0x2f6   : > { %v2339_v52 = vadd.f32 %v14889_v44, %v2338_v15  ;;  %12031 = vmatprep.mubr.msk.f32.mxu1 %vm561_vm0, %v2607_v29 }
 0x2f7   : > { %12032 = vmatmul.mubr.msk.f32.gmra.mrb[106].mxu1 %vm561_vm0, %v2608_v9  ;;  %v2610_v17 = vmax.f32 %v2344_v47, 0.0 }
 0x2f8   : > { %v2609_v19 = vmax.f32 %v2339_v52, 0.0  ;;  %v11927_v26 = vpop.f32.mrb[46].mxu0 }
 0x2f9   : > { %v2354_v4 = vadd.f32 %v11927_v26, %v14889_v44  ;;  %v2348_v8 = vpop.f32.mrb[47].mxu0 }
 0x2fa   : > { %v2349_v11 = vadd.f32 %v14889_v44, %v2348_v8  ;;  %12034 = vmatprep.mubr.msk.f32.mxu1 %vm561_vm0, %v2609_v19 }
 0x2fb   : > { %12035 = vmatmul.mubr.msk.f32.gmra.mrb[108].mxu1 %vm561_vm0, %v2610_v17  ;;  %v2612_v16 = vmax.f32 %v2354_v4, 0.0 }
 0x2fc   : > { %v2611_v22 = vmax.f32 %v2349_v11, 0.0  ;;  %v11930_v24 = vpop.f32.mrb[48].mxu0 }
 0x2fd   : > { %v2364_v53 = vadd.f32 %v11930_v24, %v14889_v44  ;;  %v2358_v29 = vpop.f32.mrb[49].mxu0 }
 0x2fe   : > { %v2359_v59 = vadd.f32 %v14889_v44, %v2358_v29  ;;  %12037 = vmatprep.mubr.msk.f32.mxu1 %vm561_vm0, %v2611_v22 }
 0x2ff   : > { %12038 = vmatmul.mubr.msk.f32.gmra.mrb[110].mxu1 %vm561_vm0, %v2612_v16  ;;  %v2614_v15 = vmax.f32 %v2364_v53, 0.0 }
 0x300   : > { %v2613_v9 = vmax.f32 %v2359_v59, 0.0  ;;  %v11933_v47 = vpop.f32.mrb[50].mxu0 }
 0x301   : > { %v2374_v52 = vadd.f32 %v11933_v47, %v14889_v44  ;;  %v2368_v19 = vpop.f32.mrb[51].mxu0 }
 0x302   : > { %v2369_v26 = vadd.f32 %v14889_v44, %v2368_v19  ;;  %12040 = vmatprep.mubr.msk.f32.mxu1 %vm561_vm0, %v2613_v9 }
 0x303   : > { %12041 = vmatmul.mubr.msk.f32.gmra.mrb[112].mxu1 %vm561_vm0, %v2614_v15  ;;  %v2616_v8 = vmax.f32 %v2374_v52, 0.0 }
 0x304   : > { %v2615_v17 = vmax.f32 %v2369_v26, 0.0  ;;  %v11936_v4 = vpop.f32.mrb[52].mxu0 }
 0x305   : > { %v2384_v11 = vadd.f32 %v11936_v4, %v14889_v44  ;;  %v2378_v22 = vpop.f32.mrb[53].mxu0 }
 0x306   : > { %v2379_v24 = vadd.f32 %v14889_v44, %v2378_v22  ;;  %12043 = vmatprep.mubr.msk.f32.mxu1 %vm561_vm0, %v2615_v17 }
 0x307   : > { %12044 = vmatmul.mubr.msk.f32.gmra.mrb[114].mxu1 %vm561_vm0, %v2616_v8  ;;  %v2618_v29 = vmax.f32 %v2384_v11, 0.0 }
 0x308   : > { %v2617_v16 = vmax.f32 %v2379_v24, 0.0  ;;  %v11939_v53 = vpop.f32.mrb[54].mxu0 }
 0x309   : > { %v2394_v59 = vadd.f32 %v11939_v53, %v14889_v44  ;;  %v2388_v9 = vpop.f32.mrb[55].mxu0 }
 0x30a   : > { %v2389_v47 = vadd.f32 %v14889_v44, %v2388_v9  ;;  %12046 = vmatprep.mubr.msk.f32.mxu1 %vm561_vm0, %v2617_v16 }
 0x30b   : > { %12047 = vmatmul.mubr.msk.f32.gmra.mrb[116].mxu1 %vm561_vm0, %v2618_v29  ;;  %v2620_v19 = vmax.f32 %v2394_v59, 0.0 }
 0x30c   : > { %v2619_v15 = vmax.f32 %v2389_v47, 0.0  ;;  %v11942_v52 = vpop.f32.mrb[56].mxu0 }
 0x30d   : > { %v2404_v26 = vadd.f32 %v11942_v52, %v14889_v44  ;;  %v2398_v17 = vpop.f32.mrb[57].mxu0 }
 0x30e   : > { %v2399_v4 = vadd.f32 %v14889_v44, %v2398_v17  ;;  %12049 = vmatprep.mubr.msk.f32.mxu1 %vm561_vm0, %v2619_v15 }
 0x30f   : > { %12050 = vmatmul.mubr.msk.f32.gmra.mrb[118].mxu1 %vm561_vm0, %v2620_v19  ;;  %v2622_v22 = vmax.f32 %v2404_v26, 0.0 }
 0x310   : > { %v2621_v8 = vmax.f32 %v2399_v4, 0.0  ;;  %v11945_v11 = vpop.f32.mrb[58].mxu0 }
 0x311   : > { %v2414_v24 = vadd.f32 %v11945_v11, %v14889_v44  ;;  %v2408_v16 = vpop.f32.mrb[59].mxu0 }
 0x312   : > { %v2409_v53 = vadd.f32 %v14889_v44, %v2408_v16  ;;  %12052 = vmatprep.mubr.msk.f32.mxu1 %vm561_vm0, %v2621_v8 }
 0x313   : > { %12053 = vmatmul.mubr.msk.f32.gmra.mrb[120].mxu1 %vm561_vm0, %v2622_v22  ;;  %v2624_v9 = vmax.f32 %v2414_v24, 0.0 }
 0x314   : > { %v2623_v29 = vmax.f32 %v2409_v53, 0.0  ;;  %v11948_v59 = vpop.f32.mrb[60].mxu0 }
 0x315   : > { %v2424_v47 = vadd.f32 %v11948_v59, %v14889_v44  ;;  %v2418_v15 = vpop.f32.mrb[61].mxu0 }
 0x316   : > { %v2419_v52 = vadd.f32 %v14889_v44, %v2418_v15  ;;  %12055 = vmatprep.mubr.msk.f32.mxu1 %vm561_vm0, %v2623_v29 }
 0x317   : > { %12056 = vmatmul.mubr.msk.f32.gmra.mrb[122].mxu1 %vm561_vm0, %v2624_v9  ;;  %v2626_v17 = vmax.f32 %v2424_v47, 0.0 }
 0x318   : > { %v2625_v19 = vmax.f32 %v2419_v52, 0.0  ;;  %v11951_v26 = vpop.f32.mrb[62].mxu0 }
 0x319   : > { %v2434_v4 = vadd.f32 %v11951_v26, %v14889_v44  ;;  %v2428_v8 = vpop.f32.mrb[63].mxu0 }
 0x31a   : > { %v2429_v11 = vadd.f32 %v14889_v44, %v2428_v8  ;;  %12058 = vmatprep.mubr.msk.f32.mxu1 %vm561_vm0, %v2625_v19 }
 0x31b   : > { %12059 = vmatmul.mubr.msk.f32.gmra.mrb[124].mxu1 %vm561_vm0, %v2626_v17  ;;  %v2628_v16 = vmax.f32 %v2434_v4, 0.0 }
 0x31c   : > { %v2627_v22 = vmax.f32 %v2429_v11, 0.0  ;;  %v11954_v24 = vpop.f32.mrb[64].mxu0 }
 0x31d   : > { %v2444_v53 = vadd.f32 %v11954_v24, %v14889_v44  ;;  %v2438_v29 = vpop.f32.mrb[65].mxu0 }
 0x31e   : > { %v2439_v59 = vadd.f32 %v14889_v44, %v2438_v29  ;;  %12061 = vmatprep.mubr.msk.f32.mxu1 %vm561_vm0, %v2627_v22 }
 0x31f   : > { %12062 = vmatmul.mubr.msk.f32.gmra.mrb[126].mxu1 %vm561_vm0, %v2628_v16  ;;  %v2630_v15 = vmax.f32 %v2444_v53, 0.0 }
 0x320   : > { %v2629_v9 = vmax.f32 %v2439_v59, 0.0  ;;  %v11957_v47 = vpop.f32.mrb[66].mxu0 }
 0x321   : > { %v2454_v52 = vadd.f32 %v11957_v47, %v14889_v44  ;;  %v2448_v19 = vpop.f32.mrb[67].mxu0 }
 0x322   : > { %v2449_v26 = vadd.f32 %v14889_v44, %v2448_v19  ;;  %12064 = vmatprep.mubr.msk.f32.mxu1 %vm561_vm0, %v2629_v9 }
 0x323   : > { %12065 = vmatmul.mubr.msk.f32.gmra.mrb[128].mxu1 %vm561_vm0, %v2630_v15  ;;  %v2632_v8 = vmax.f32 %v2454_v52, 0.0 }
 0x324   : > { %v2631_v17 = vmax.f32 %v2449_v26, 0.0  ;;  %v11960_v4 = vpop.f32.mrb[68].mxu0 }
 0x325   : > { %v2464_v11 = vadd.f32 %v11960_v4, %v14889_v44  ;;  %v2458_v22 = vpop.f32.mrb[69].mxu0 }
 0x326   : > { %v2459_v24 = vadd.f32 %v14889_v44, %v2458_v22  ;;  %12067 = vmatprep.mubr.msk.f32.mxu1 %vm561_vm0, %v2631_v17 }
 0x327   : > { %12068 = vmatmul.mubr.msk.f32.gmra.mrb[130].mxu1 %vm561_vm0, %v2632_v8  ;;  %v2634_v29 = vmax.f32 %v2464_v11, 0.0 }
 0x328   : > { %v2633_v16 = vmax.f32 %v2459_v24, 0.0  ;;  %v11963_v53 = vpop.f32.mrb[70].mxu0 }
 0x329   : > { %v2474_v59 = vadd.f32 %v11963_v53, %v14889_v44  ;;  %v2468_v9 = vpop.f32.mrb[71].mxu0 }
 0x32a   : > { %v2469_v47 = vadd.f32 %v14889_v44, %v2468_v9  ;;  %12070 = vmatprep.mubr.msk.f32.mxu1 %vm561_vm0, %v2633_v16 }
 0x32b   : > { %12071 = vmatmul.mubr.msk.f32.gmra.mrb[132].mxu1 %vm561_vm0, %v2634_v29  ;;  %v2636_v19 = vmax.f32 %v2474_v59, 0.0 }
 0x32c   : > { %v2635_v15 = vmax.f32 %v2469_v47, 0.0  ;;  %v11966_v52 = vpop.f32.mrb[72].mxu0 }
 0x32d   : > { %v2484_v26 = vadd.f32 %v11966_v52, %v14889_v44  ;;  %v2478_v17 = vpop.f32.mrb[73].mxu0 }
 0x32e   : > { %v2479_v4 = vadd.f32 %v14889_v44, %v2478_v17  ;;  %12073 = vmatprep.mubr.msk.f32.mxu1 %vm561_vm0, %v2635_v15 }
 0x32f   : > { %12074 = vmatmul.mubr.msk.f32.gmra.mrb[134].mxu1 %vm561_vm0, %v2636_v19  ;;  %v2638_v22 = vmax.f32 %v2484_v26, 0.0 }
 0x330   : > { %v2637_v8 = vmax.f32 %v2479_v4, 0.0  ;;  %v11969_v11 = vpop.f32.mrb[74].mxu0 }
 0x331   : > { %v2494_v24 = vadd.f32 %v11969_v11, %v14889_v44  ;;  %v2488_v16 = vpop.f32.mrb[75].mxu0 }
 0x332   : > { %v2489_v53 = vadd.f32 %v14889_v44, %v2488_v16  ;;  %12076 = vmatprep.mubr.msk.f32.mxu1 %vm561_vm0, %v2637_v8 }
 0x333   : > { %12077 = vmatmul.mubr.msk.f32.gmra.mrb[136].mxu1 %vm561_vm0, %v2638_v22  ;;  %v2640_v9 = vmax.f32 %v2494_v24, 0.0 }
 0x334   : > { %v2639_v29 = vmax.f32 %v2489_v53, 0.0  ;;  %v11972_v59 = vpop.f32.mrb[76].mxu0 }
 0x335   : > { %v2504_v47 = vadd.f32 %v11972_v59, %v14889_v44  ;;  %v2498_v15 = vpop.f32.mrb[77].mxu0 }
 0x336   : > { %v2499_v52 = vadd.f32 %v14889_v44, %v2498_v15  ;;  %12079 = vmatprep.mubr.msk.f32.mxu1 %vm561_vm0, %v2639_v29 }
 0x337   : > { %12080 = vmatmul.mubr.msk.f32.gmra.mrb[138].mxu1 %vm561_vm0, %v2640_v9  ;;  %v2642_v17 = vmax.f32 %v2504_v47, 0.0 }
 0x338   : > { %v2641_v19 = vmax.f32 %v2499_v52, 0.0  ;;  %v11975_v26 = vpop.f32.mrb[78].mxu0 }
 0x339   : > { %v2514_v4 = vadd.f32 %v11975_v26, %v14889_v44  ;;  %v2508_v8 = vpop.f32.mrb[79].mxu0 }
 0x33a   : > { %v2509_v11 = vadd.f32 %v14889_v44, %v2508_v8  ;;  %12082 = vmatprep.mubr.msk.f32.mxu1 %vm561_vm0, %v2641_v19 }
 0x33b   : > { %12083 = vmatmul.mubr.msk.f32.gmra.mrb[140].mxu1 %vm561_vm0, %v2642_v17  ;;  %v2644_v16 = vmax.f32 %v2514_v4, 0.0 }
 0x33c   : > { %v2643_v22 = vmax.f32 %v2509_v11, 0.0  ;;  %v11978_v24 = vpop.f32.mrb[80].mxu0 }
 0x33d   : > { %v2524_v53 = vadd.f32 %v11978_v24, %v14889_v44  ;;  %v2518_v29 = vpop.f32.mrb[81].mxu0 }
 0x33e   : > { %v2519_v59 = vadd.f32 %v14889_v44, %v2518_v29  ;;  %12085 = vmatprep.mubr.msk.f32.mxu1 %vm561_vm0, %v2643_v22 }
 0x33f   : > { %12086 = vmatmul.mubr.msk.f32.gmra.mrb[142].mxu1 %vm561_vm0, %v2644_v16  ;;  %v2646_v15 = vmax.f32 %v2524_v53, 0.0 }
 0x340   : > { %v2645_v9 = vmax.f32 %v2519_v59, 0.0  ;;  %v11981_v47 = vpop.f32.mrb[82].mxu0 }
 0x341   : > { %v2534_v52 = vadd.f32 %v11981_v47, %v14889_v44  ;;  %v2528_v19 = vpop.f32.mrb[83].mxu0 }
 0x342   : > { %v2529_v26 = vadd.f32 %v14889_v44, %v2528_v19  ;;  %12088 = vmatprep.mubr.msk.f32.mxu1 %vm561_vm0, %v2645_v9 }
 0x343   : > { %12089 = vmatmul.mubr.msk.f32.gmra.mrb[144].mxu1 %vm561_vm0, %v2646_v15  ;;  %v2648_v8 = vmax.f32 %v2534_v52, 0.0 }
 0x344   : > { %v2647_v17 = vmax.f32 %v2529_v26, 0.0  ;;  %v11984_v4 = vpop.f32.mrb[84].mxu0 }
 0x345   : > { %v2544_v11 = vadd.f32 %v11984_v4, %v14889_v44  ;;  %v2538_v22 = vpop.f32.mrb[85].mxu0 }
 0x346   : > { %v2539_v24 = vadd.f32 %v14889_v44, %v2538_v22  ;;  %12091 = vmatprep.mubr.msk.f32.mxu1 %vm561_vm0, %v2647_v17 }
 0x347   : > { %12092 = vmatmul.mubr.msk.f32.gmra.mrb[146].mxu1 %vm561_vm0, %v2648_v8  ;;  %v2650_v29 = vmax.f32 %v2544_v11, 0.0 }
 0x348   : > { %v2649_v16 = vmax.f32 %v2539_v24, 0.0  ;;  %v11987_v53 = vpop.f32.mrb[86].mxu0 }
 0x349   : > { %v2554_v59 = vadd.f32 %v11987_v53, %v14889_v44  ;;  %v2548_v9 = vpop.f32.mrb[87].mxu0 }
 0x34a   : > { %v2549_v47 = vadd.f32 %v14889_v44, %v2548_v9  ;;  %12094 = vmatprep.mubr.msk.f32.mxu1 %vm561_vm0, %v2649_v16 }
 0x34b   : > { %12095 = vmatmul.mubr.msk.f32.gmra.mrb[148].mxu1 %vm561_vm0, %v2650_v29  ;;  %v2652_v19 = vmax.f32 %v2554_v59, 0.0 }
 0x34c   : > { %v2651_v15 = vmax.f32 %v2549_v47, 0.0  ;;  %v11990_v52 = vpop.f32.mrb[88].mxu0 }
 0x34d   : > { %v2564_v26 = vadd.f32 %v11990_v52, %v14889_v44  ;;  %v2558_v17 = vpop.f32.mrb[89].mxu0 }
 0x34e   : > { %v2559_v4 = vadd.f32 %v14889_v44, %v2558_v17  ;;  %12097 = vmatprep.mubr.msk.f32.mxu1 %vm561_vm0, %v2651_v15 }
 0x34f   : > { %12098 = vmatmul.mubr.msk.f32.gmra.mrb[150].mxu1 %vm561_vm0, %v2652_v19  ;;  %v2654_v22 = vmax.f32 %v2564_v26, 0.0 }
 0x350   : > { %v2653_v8 = vmax.f32 %v2559_v4, 0.0  ;;  %v11993_v11 = vpop.f32.mrb[90].mxu0 }
 0x351   : > { %v2574_v24 = vadd.f32 %v11993_v11, %v14889_v44  ;;  %v2568_v16 = vpop.f32.mrb[91].mxu0 }
 0x352   : > { %v2569_v53 = vadd.f32 %v14889_v44, %v2568_v16  ;;  %12100 = vmatprep.mubr.msk.f32.mxu1 %vm561_vm0, %v2653_v8  ;;  %v4122_v16 = vld [vmem:[#allocation2 + $0x80] sm:$0xff] }
 0x353   : > { %12101 = vmatmul.mubr.msk.f32.gmra.mrb[152].mxu1 %vm561_vm0, %v2654_v22  ;;  %v2656_v9 = vmax.f32 %v2574_v24, 0.0 }
 0x354   : > { %v2655_v29 = vmax.f32 %v2569_v53, 0.0  ;;  %v11996_v59 = vpop.f32.mrb[92].mxu0  ;;  %v4123_v53 = vld [vmem:[#allocation2 + $0x88] sm:$0xff] }
 0x355   : > { %v2584_v47 = vadd.f32 %v11996_v59, %v14889_v44  ;;  %v2578_v15 = vpop.f32.mrb[93].mxu0  ;;  %v15038_v59 = vsub.s32 2, %v13668_v1 }
 0x356   : > { %v2579_v52 = vadd.f32 %v14889_v44, %v2578_v15  ;;  %12103 = vmatprep.mubr.msk.f32.mxu1 %vm561_vm0, %v2655_v29  ;;  %v12976_v29 = vpack.c.bf16 %v4123_v53, %v4122_v16  ;;  %v13410_v15 = vld [vmem:[%s13687_s28] sm:$0x1f] }
 0x357   : > { %v2658_v19 = vmax.f32 %v2584_v47, 0.0  ;;  %12104 = vmatmul.mubr.msk.f32.gmra.mrb[154].mxu1 %vm561_vm0, %v2656_v9 }
 0x358   : > { %v2657_v26 = vmax.f32 %v2579_v52, 0.0  ;;  %v11999_v17 = vpop.f32.mrb[94].mxu0  ;;  %12977 = vmatprep.subr.bf16.mxu1 %v12976_v29  ;;  %v15048_v52 = vrot.slane %v13410_v15, %v15038_v59 }
 0x359   : > { %v2594_v4 = vadd.f32 %v11999_v17, %v14889_v44  ;;  %v2588_v8 = vpop.f32.mrb[95].mxu0  ;;  %12979 = vmatpush3.bf16.msra.mxu1 %v12976_v29 }
 0x35a   : > { %v2589_v11 = vadd.f32 %v14889_v44, %v2588_v8  ;;  %12106 = vmatprep.mubr.msk.f32.mxu1 %vm561_vm0, %v2657_v26  ;;  %v15043_v44 = vld [vmem:[%s18502_s5 + $0x1] ss:$0 sm:$0xff] }
 0x35b   : > { %v2660_v22 = vmax.f32 %v2594_v4, 0.0  ;;  %12107 = vmatmul.mubr.msk.f32.gmra.mrb[156].mxu1 %vm561_vm0, %v2658_v19 }
 0x35c   : > { %v2659_v24 = vmax.f32 %v2589_v11, 0.0  ;;  %v4124_v11 = vld [vmem:[#allocation2 + $0x90] sm:$0xff] }
 0x35e   : > { %12109 = vmatprep.mubr.msk.f32.mxu1 %vm561_vm0, %v2659_v24 }
 0x35f   : > { %12110 = vmatmul.mubr.msk.f32.gmra.mrb[158].mxu1 %vm561_vm0, %v2660_v22  ;;  %v4125_v22 = vld [vmem:[#allocation2 + $0x98] sm:$0xff] }
 0x360   : > { %v12980_v29 = vpack.c.bf16 %v4125_v22, %v4124_v11 }
 0x362   : > { %12981 = vmatprep.subr.bf16.mxu1 %v12980_v29 }
 0x363   : > { %12983 = vmatpush3.bf16.msra.mxu1 %v12980_v29 }
 0x3b6   : > { %v12018_v9 = vpop.f32.mrb[96].mxu1 }
 0x3b7   : > { %v2942_v47 = vadd.f32 %v12018_v9, %v15043_v44  ;;  %v2936_v19 = vpop.f32.mrb[97].mxu1 }
 0x3b8   : > { %v2937_v26 = vadd.f32 %v15043_v44, %v2936_v19 }
 0x3b9   : > { %v3256_v17 = vadd.f32 %v2942_v47, %v14425_v36  ;;  %v4126_v36 = vld [vmem:[#allocation2 + $0xa0] sm:$0xff]  ;;  %v4128_v47 = vld [vmem:[#allocation2 + $0xb0] sm:$0xff] }
 0x3ba   : > { %v3255_v4 = vadd.f32 %v2937_v26, %v14429_v0  ;;  %v12021_v8 = vpop.f32.mrb[98].mxu1  ;;  %v4127_v0 = vld [vmem:[#allocation2 + $0xa8] sm:$0xff] }
 0x3bb   : > { %v15054_v24 = vadd.f32 %v15048_v52, %v3256_v17  ;;  %v2952_v16 = vadd.f32 %v12021_v8, %v15043_v44  ;;  %v2946_v53 = vpop.f32.mrb[99].mxu1  ;;  %v12984_v8 = vpack.c.bf16 %v4127_v0, %v4126_v36 }
 0x3bc   : > { %v15058_v9 = vadd.f32 %v15048_v52, %v3255_v4  ;;  %v2947_v15 = vadd.f32 %v15043_v44, %v2946_v53 }
 0x3bd   : > { %v3258_v19 = vadd.f32 %v2952_v16, %v14437_v27  ;;  %v3400_v11 = vmax.f32 %v15054_v24, 0.0  ;;  %v12988_v16 = vpack.c.bf16 %v4129_v62, %v4128_v47  ;;  %12985 = vmatprep.subr.bf16.mxu1 %v12984_v8 }
 0x3be   : > { %18760 = vst [vmem:[#allocation21_spill] sm:$0xff] %v15058_v9  ;;  %v3399_v26 = vmax.f32 %v15058_v9, 0.0  ;;  %v3257_v17 = vadd.f32 %v2947_v15, %v14441_v10  ;;  %v12024_v1 = vpop.f32.mrb[100].mxu1  ;;  %12987 = vmatpush3.bf16.msra.mxu1 %v12984_v8 }
 0x3bf   : > { %v15066_v4 = vadd.f32 %v15048_v52, %v3258_v19  ;;  %v2962_v22 = vadd.f32 %v12024_v1, %v15043_v44  ;;  %v2956_v27 = vpop.f32.mrb[101].mxu1  ;;  %12989 = vmatprep.subr.bf16.mxu1 %v12988_v16 }
 0x3c0   : > { %v15070_v53 = vadd.f32 %v15048_v52, %v3257_v17  ;;  %v2957_v9 = vadd.f32 %v15043_v44, %v2956_v27  ;;  %12128 = vmatprep.mubr.msk.f32.mxu0 %vm561_vm0, %v3399_v26 }
 0x3c1   : > { %v3260_v10 = vadd.f32 %v2962_v22, %v14450_v21  ;;  %12129 = vmatmul.mubr.msk.f32.vlgmr.msra.gmra.mrb[96].mxu0 %vm561_vm0, %v3400_v11  ;;  %v3402_v1 = vmax.f32 %v15066_v4, 0.0 }
 0x3c2   : > { %v3401_v29 = vmax.f32 %v15070_v53, 0.0  ;;  %v3259_v15 = vadd.f32 %v2957_v9, %v14455_v56  ;;  %v12027_v19 = vpop.f32.mrb[102].mxu1  ;;  %12991 = vmatpush3.bf16.msra.mxu1 %v12988_v16 }
 0x3c3   : > { %v15080_v62 = vadd.f32 %v15048_v52, %v3260_v10  ;;  %v2972_v36 = vadd.f32 %v12027_v19, %v15043_v44  ;;  %v2966_v0 = vpop.f32.mrb[103].mxu1 }
 0x3c4   : > { %v15084_v47 = vadd.f32 %v15048_v52, %v3259_v15  ;;  %v2967_v21 = vadd.f32 %v15043_v44, %v2966_v0  ;;  %12131 = vmatprep.mubr.msk.f32.mxu0 %vm561_vm0, %v3401_v29 }
 0x3c5   : > { %v3262_v56 = vadd.f32 %v2972_v36, %v14464_v20  ;;  %12132 = vmatmul.mubr.msk.f32.gmra.mrb[98].mxu0 %vm561_vm0, %v3402_v1  ;;  %v3404_v8 = vmax.f32 %v15080_v62, 0.0 }
 0x3c6   : > { %v3403_v9 = vmax.f32 %v15084_v47, 0.0  ;;  %v3261_v26 = vadd.f32 %v2967_v21, %v14469_v14  ;;  %v12030_v17 = vpop.f32.mrb[104].mxu1 }
 0x3c7   : > { %v15094_v11 = vadd.f32 %v15048_v52, %v3262_v56  ;;  %v2982_v22 = vadd.f32 %v12030_v17, %v15043_v44  ;;  %v2976_v27 = vpop.f32.mrb[105].mxu1 }
 0x3c8   : > { %v15098_v10 = vadd.f32 %v15048_v52, %v3261_v26  ;;  %v2977_v20 = vadd.f32 %v15043_v44, %v2976_v27  ;;  %12134 = vmatprep.mubr.msk.f32.mxu0 %vm561_vm0, %v3403_v9 }
 0x3c9   : > { %v3264_v29 = vadd.f32 %v2982_v22, %v14478_v54  ;;  %12135 = vmatmul.mubr.msk.f32.gmra.mrb[100].mxu0 %vm561_vm0, %v3404_v8  ;;  %v3406_v19 = vmax.f32 %v15094_v11, 0.0 }
 0x3ca   : > { %v3405_v14 = vmax.f32 %v15098_v10, 0.0  ;;  %v3263_v16 = vadd.f32 %v2977_v20, %v14483_v49  ;;  %v12033_v15 = vpop.f32.mrb[106].mxu1 }
 0x3cb   : > { %v15108_v1 = vadd.f32 %v15048_v52, %v3264_v29  ;;  %v2992_v36 = vadd.f32 %v12033_v15, %v15043_v44  ;;  %v2986_v0 = vpop.f32.mrb[107].mxu1 }
 0x3cc   : > { %v15112_v21 = vadd.f32 %v15048_v52, %v3263_v16  ;;  %v2987_v54 = vadd.f32 %v15043_v44, %v2986_v0  ;;  %12137 = vmatprep.mubr.msk.f32.mxu0 %vm561_vm0, %v3405_v14 }
 0x3cd   : > { %v3266_v56 = vadd.f32 %v2992_v36, %v14492_v58  ;;  %12138 = vmatmul.mubr.msk.f32.gmra.mrb[102].mxu0 %vm561_vm0, %v3406_v19  ;;  %v3408_v17 = vmax.f32 %v15108_v1, 0.0 }
 0x3ce   : > { %v3407_v49 = vmax.f32 %v15112_v21, 0.0  ;;  %v3265_v9 = vadd.f32 %v2987_v54, %v14497_v50  ;;  %v12036_v26 = vpop.f32.mrb[108].mxu1 }
 0x3cf   : > { %v15122_v8 = vadd.f32 %v15048_v52, %v3266_v56  ;;  %v3002_v22 = vadd.f32 %v12036_v26, %v15043_v44  ;;  %v2996_v27 = vpop.f32.mrb[109].mxu1 }
 0x3d0   : > { %v15126_v20 = vadd.f32 %v15048_v52, %v3265_v9  ;;  %v2997_v58 = vadd.f32 %v15043_v44, %v2996_v27  ;;  %12140 = vmatprep.mubr.msk.f32.mxu0 %vm561_vm0, %v3407_v49  ;;  %v13411_v27 = vld [vmem:[%s13687_s28 + $0x8] sm:$0x1f] }
 0x3d1   : > { %v3268_v29 = vadd.f32 %v3002_v22, %v14506_v48  ;;  %12141 = vmatmul.mubr.msk.f32.gmra.mrb[104].mxu0 %vm561_vm0, %v3408_v17  ;;  %v3410_v15 = vmax.f32 %v15122_v8, 0.0 }
 0x3d2   : > { %v3409_v50 = vmax.f32 %v15126_v20, 0.0  ;;  %v3267_v14 = vadd.f32 %v2997_v58, %v14511_v42  ;;  %v12039_v16 = vpop.f32.mrb[110].mxu1  ;;  %v15155_v58 = vrot.slane %v13411_v27, %v15038_v59 }
 0x3d3   : > { %v15136_v19 = vadd.f32 %v15048_v52, %v3268_v29  ;;  %v3012_v36 = vadd.f32 %v12039_v16, %v15043_v44  ;;  %v3006_v0 = vpop.f32.mrb[111].mxu1 }
 0x3d4   : > { %v15140_v54 = vadd.f32 %v15048_v52, %v3267_v14  ;;  %v3007_v48 = vadd.f32 %v15043_v44, %v3006_v0  ;;  %12143 = vmatprep.mubr.msk.f32.mxu0 %vm561_vm0, %v3409_v50 }
 0x3d5   : > { %v3270_v56 = vadd.f32 %v3012_v36, %v14520_v37  ;;  %12144 = vmatmul.mubr.msk.f32.gmra.mrb[106].mxu0 %vm561_vm0, %v3410_v15  ;;  %v3412_v26 = vmax.f32 %v15136_v19, 0.0 }
 0x3d6   : > { %v3411_v42 = vmax.f32 %v15140_v54, 0.0  ;;  %v3269_v49 = vadd.f32 %v3007_v48, %v14529_v3  ;;  %v12042_v9 = vpop.f32.mrb[112].mxu1 }
 0x3d7   : > { %v15150_v17 = vadd.f32 %v15048_v52, %v3270_v56  ;;  %v3022_v22 = vadd.f32 %v12042_v9, %v15043_v44  ;;  %v3016_v29 = vpop.f32.mrb[113].mxu1 }
 0x3d8   : > { %v15158_v37 = vadd.f32 %v15048_v52, %v3269_v49  ;;  %v3017_v50 = vadd.f32 %v15043_v44, %v3016_v29  ;;  %12146 = vmatprep.mubr.msk.f32.mxu0 %vm561_vm0, %v3411_v42 }
 0x3d9   : > { %v3272_v3 = vadd.f32 %v3022_v22, %v14538_v7  ;;  %12147 = vmatmul.mubr.msk.f32.gmra.mrb[108].mxu0 %vm561_vm0, %v3412_v26  ;;  %v3414_v36 = vmax.f32 %v15150_v17, 0.0 }
 0x3da   : > { %v3413_v14 = vmax.f32 %v15158_v37, 0.0  ;;  %v3271_v16 = vadd.f32 %v3017_v50, %v14543_v2  ;;  %v12045_v15 = vpop.f32.mrb[114].mxu1 }
 0x3db   : > { %v15168_v0 = vadd.f32 %v15155_v58, %v3272_v3  ;;  %v3032_v52 = vadd.f32 %v12045_v15, %v15043_v44  ;;  %v3026_v48 = vpop.f32.mrb[115].mxu1 }
 0x3dc   : > { %v15172_v56 = vadd.f32 %v15155_v58, %v3271_v16  ;;  %v3027_v7 = vadd.f32 %v15043_v44, %v3026_v48  ;;  %12149 = vmatprep.mubr.msk.f32.mxu0 %vm561_vm0, %v3413_v14 }
 0x3dd   : > { %v3274_v42 = vadd.f32 %v3032_v52, %v14552_v46  ;;  %12150 = vmatmul.mubr.msk.f32.gmra.mrb[110].mxu0 %vm561_vm0, %v3414_v36  ;;  %v3416_v26 = vmax.f32 %v15168_v0, 0.0 }
 0x3de   : > { %v3415_v2 = vmax.f32 %v15172_v56, 0.0  ;;  %v3273_v49 = vadd.f32 %v3027_v7, %v14557_v34  ;;  %v12048_v9 = vpop.f32.mrb[116].mxu1 }
 0x3df   : > { %v15182_v22 = vadd.f32 %v15155_v58, %v3274_v42  ;;  %v3042_v27 = vadd.f32 %v12048_v9, %v15043_v44  ;;  %v3036_v29 = vpop.f32.mrb[117].mxu1 }
 0x3e0   : > { %v15186_v50 = vadd.f32 %v15155_v58, %v3273_v49  ;;  %v3037_v46 = vadd.f32 %v15043_v44, %v3036_v29  ;;  %12152 = vmatprep.mubr.msk.f32.mxu0 %vm561_vm0, %v3415_v2 }
 0x3e1   : > { %v3276_v3 = vadd.f32 %v3042_v27, %v14566_v63  ;;  %12153 = vmatmul.mubr.msk.f32.gmra.mrb[112].mxu0 %vm561_vm0, %v3416_v26  ;;  %v3418_v15 = vmax.f32 %v15182_v22, 0.0 }
 0x3e2   : > { %v3417_v34 = vmax.f32 %v15186_v50, 0.0  ;;  %v3275_v14 = vadd.f32 %v3037_v46, %v14571_v25  ;;  %v12051_v16 = vpop.f32.mrb[118].mxu1 }
 0x3e3   : > { %v15196_v36 = vadd.f32 %v15155_v58, %v3276_v3  ;;  %v3052_v52 = vadd.f32 %v12051_v16, %v15043_v44  ;;  %v3046_v48 = vpop.f32.mrb[119].mxu1 }
 0x3e4   : > { %v15200_v7 = vadd.f32 %v15155_v58, %v3275_v14  ;;  %v3047_v63 = vadd.f32 %v15043_v44, %v3046_v48  ;;  %12155 = vmatprep.mubr.msk.f32.mxu0 %vm561_vm0, %v3417_v34 }
 0x3e5   : > { %v3278_v42 = vadd.f32 %v3052_v52, %v14580_v51  ;;  %12156 = vmatmul.mubr.msk.f32.gmra.mrb[114].mxu0 %vm561_vm0, %v3418_v15  ;;  %v3420_v9 = vmax.f32 %v15196_v36, 0.0 }
 0x3e6   : > { %v3419_v25 = vmax.f32 %v15200_v7, 0.0  ;;  %v3277_v2 = vadd.f32 %v3047_v63, %v14585_v40  ;;  %v12054_v49 = vpop.f32.mrb[120].mxu1 }
 0x3e7   : > { %v15210_v26 = vadd.f32 %v15155_v58, %v3278_v42  ;;  %v3062_v27 = vadd.f32 %v12054_v49, %v15043_v44  ;;  %v3056_v29 = vpop.f32.mrb[121].mxu1 }
 0x3e8   : > { %v15214_v46 = vadd.f32 %v15155_v58, %v3277_v2  ;;  %v3057_v51 = vadd.f32 %v15043_v44, %v3056_v29  ;;  %12158 = vmatprep.mubr.msk.f32.mxu0 %vm561_vm0, %v3419_v25 }
 0x3e9   : > { %v3280_v3 = vadd.f32 %v3062_v27, %v14594_v38  ;;  %12159 = vmatmul.mubr.msk.f32.gmra.mrb[116].mxu0 %vm561_vm0, %v3420_v9  ;;  %v3422_v16 = vmax.f32 %v15210_v26, 0.0 }
 0x3ea   : > { %v3421_v40 = vmax.f32 %v15214_v46, 0.0  ;;  %v3279_v34 = vadd.f32 %v3057_v51, %v14599_v23  ;;  %v12057_v14 = vpop.f32.mrb[122].mxu1 }
 0x3eb   : > { %v15224_v15 = vadd.f32 %v15155_v58, %v3280_v3  ;;  %v3072_v52 = vadd.f32 %v12057_v14, %v15043_v44  ;;  %v3066_v48 = vpop.f32.mrb[123].mxu1 }
 0x3ec   : > { %v15228_v63 = vadd.f32 %v15155_v58, %v3279_v34  ;;  %v3067_v38 = vadd.f32 %v15043_v44, %v3066_v48  ;;  %12161 = vmatprep.mubr.msk.f32.mxu0 %vm561_vm0, %v3421_v40 }
 0x3ed   : > { %v3282_v42 = vadd.f32 %v3072_v52, %v14608_v6  ;;  %12162 = vmatmul.mubr.msk.f32.gmra.mrb[118].mxu0 %vm561_vm0, %v3422_v16  ;;  %v3424_v49 = vmax.f32 %v15224_v15, 0.0 }
 0x3ee   : > { %v3423_v23 = vmax.f32 %v15228_v63, 0.0  ;;  %v3281_v25 = vadd.f32 %v3067_v38, %v14613_v12  ;;  %v12060_v2 = vpop.f32.mrb[124].mxu1 }
 0x3ef   : > { %v15238_v9 = vadd.f32 %v15155_v58, %v3282_v42  ;;  %v3082_v27 = vadd.f32 %v12060_v2, %v15043_v44  ;;  %v3076_v29 = vpop.f32.mrb[125].mxu1 }
 0x3f0   : > { %v15242_v51 = vadd.f32 %v15155_v58, %v3281_v25  ;;  %v3077_v6 = vadd.f32 %v15043_v44, %v3076_v29  ;;  %12164 = vmatprep.mubr.msk.f32.mxu0 %vm561_vm0, %v3423_v23  ;;  %v13412_v29 = vld [vmem:[%s13687_s28 + $0x10] sm:$0x1f] }
 0x3f1   : > { %v3284_v3 = vadd.f32 %v3082_v27, %v14622_v43  ;;  %12165 = vmatmul.mubr.msk.f32.gmra.mrb[120].mxu0 %vm561_vm0, %v3424_v49  ;;  %v3426_v14 = vmax.f32 %v15238_v9, 0.0 }
 0x3f2   : > { %v3425_v12 = vmax.f32 %v15242_v51, 0.0  ;;  %v3283_v40 = vadd.f32 %v3077_v6, %v14627_v32  ;;  %v12063_v34 = vpop.f32.mrb[126].mxu1  ;;  %v15271_v6 = vrot.slane %v13412_v29, %v15038_v59 }
 0x3f3   : > { %v15252_v16 = vadd.f32 %v15155_v58, %v3284_v3  ;;  %v3092_v52 = vadd.f32 %v12063_v34, %v15043_v44  ;;  %v3086_v48 = vpop.f32.mrb[127].mxu1 }
 0x3f4   : > { %v15256_v38 = vadd.f32 %v15155_v58, %v3283_v40  ;;  %v3087_v43 = vadd.f32 %v15043_v44, %v3086_v48  ;;  %12167 = vmatprep.mubr.msk.f32.mxu0 %vm561_vm0, %v3425_v12 }
 0x3f5   : > { %v3286_v42 = vadd.f32 %v3092_v52, %v14636_v61  ;;  %12168 = vmatmul.mubr.msk.f32.gmra.mrb[122].mxu0 %vm561_vm0, %v3426_v14  ;;  %v3428_v2 = vmax.f32 %v15252_v16, 0.0 }
 0x3f6   : > { %v3427_v32 = vmax.f32 %v15256_v38, 0.0  ;;  %v3285_v23 = vadd.f32 %v3087_v43, %v14645_v60  ;;  %v12066_v25 = vpop.f32.mrb[128].mxu1 }
 0x3f7   : > { %v15266_v49 = vadd.f32 %v15155_v58, %v3286_v42  ;;  %v3102_v27 = vadd.f32 %v12066_v25, %v15043_v44  ;;  %v3096_v3 = vpop.f32.mrb[129].mxu1 }
 0x3f8   : > { %v15274_v61 = vadd.f32 %v15155_v58, %v3285_v23  ;;  %v3097_v12 = vadd.f32 %v15043_v44, %v3096_v3  ;;  %12170 = vmatprep.mubr.msk.f32.mxu0 %vm561_vm0, %v3427_v32 }
 0x3f9   : > { %v3288_v60 = vadd.f32 %v3102_v27, %v14654_v57  ;;  %12171 = vmatmul.mubr.msk.f32.gmra.mrb[124].mxu0 %vm561_vm0, %v3428_v2  ;;  %v3430_v52 = vmax.f32 %v15266_v49, 0.0 }
 0x3fa   : > { %v3429_v40 = vmax.f32 %v15274_v61, 0.0  ;;  %v3287_v34 = vadd.f32 %v3097_v12, %v14659_v13  ;;  %v12069_v14 = vpop.f32.mrb[130].mxu1 }
 0x3fb   : > { %v15284_v48 = vadd.f32 %v15271_v6, %v3288_v60  ;;  %v3112_v58 = vadd.f32 %v12069_v14, %v15043_v44  ;;  %v3106_v43 = vpop.f32.mrb[131].mxu1 }
 0x3fc   : > { %v15288_v42 = vadd.f32 %v15271_v6, %v3287_v34  ;;  %v3107_v57 = vadd.f32 %v15043_v44, %v3106_v43  ;;  %12173 = vmatprep.mubr.msk.f32.mxu0 %vm561_vm0, %v3429_v40 }
 0x3fd   : > { %v3290_v32 = vadd.f32 %v3112_v58, %v14668_v31  ;;  %12174 = vmatmul.mubr.msk.f32.gmra.mrb[126].mxu0 %vm561_vm0, %v3430_v52  ;;  %v3432_v2 = vmax.f32 %v15284_v48, 0.0 }
 0x3fe   : > { %v3431_v13 = vmax.f32 %v15288_v42, 0.0  ;;  %v3289_v23 = vadd.f32 %v3107_v57, %v14673_v45  ;;  %v12072_v25 = vpop.f32.mrb[132].mxu1 }
 0x3ff   : > { %v15298_v27 = vadd.f32 %v15271_v6, %v3290_v32  ;;  %v3122_v29 = vadd.f32 %v12072_v25, %v15043_v44  ;;  %v3116_v3 = vpop.f32.mrb[133].mxu1 }
 0x400   : > { %v15302_v12 = vadd.f32 %v15271_v6, %v3289_v23  ;;  %v3117_v31 = vadd.f32 %v15043_v44, %v3116_v3  ;;  %12176 = vmatprep.mubr.msk.f32.mxu0 %vm561_vm0, %v3431_v13 }
 0x401   : > { %v3292_v60 = vadd.f32 %v3122_v29, %v14682_v35  ;;  %12177 = vmatmul.mubr.msk.f32.gmra.mrb[128].mxu0 %vm561_vm0, %v3432_v2  ;;  %v3434_v14 = vmax.f32 %v15298_v27, 0.0 }
 0x402   : > { %v3433_v45 = vmax.f32 %v15302_v12, 0.0  ;;  %v3291_v40 = vadd.f32 %v3117_v31, %v14687_v30  ;;  %v12075_v34 = vpop.f32.mrb[134].mxu1 }
 0x403   : > { %v15312_v52 = vadd.f32 %v15271_v6, %v3292_v60  ;;  %v3132_v58 = vadd.f32 %v12075_v34, %v15043_v44  ;;  %v3126_v43 = vpop.f32.mrb[135].mxu1 }
 0x404   : > { %v15316_v57 = vadd.f32 %v15271_v6, %v3291_v40  ;;  %v3127_v35 = vadd.f32 %v15043_v44, %v3126_v43  ;;  %12179 = vmatprep.mubr.msk.f32.mxu0 %vm561_vm0, %v3433_v45 }
 0x405   : > { %v3294_v32 = vadd.f32 %v3132_v58, %v14696_v5  ;;  %12180 = vmatmul.mubr.msk.f32.gmra.mrb[130].mxu0 %vm561_vm0, %v3434_v14  ;;  %v3436_v25 = vmax.f32 %v15312_v52, 0.0 }
 0x406   : > { %v3435_v30 = vmax.f32 %v15316_v57, 0.0  ;;  %v3293_v13 = vadd.f32 %v3127_v35, %v14701_v33  ;;  %v12078_v23 = vpop.f32.mrb[136].mxu1 }
 0x407   : > { %v15326_v2 = vadd.f32 %v15271_v6, %v3294_v32  ;;  %v3142_v29 = vadd.f32 %v12078_v23, %v15043_v44  ;;  %v3136_v3 = vpop.f32.mrb[137].mxu1 }
 0x408   : > { %v15330_v31 = vadd.f32 %v15271_v6, %v3293_v13  ;;  %v3137_v5 = vadd.f32 %v15043_v44, %v3136_v3  ;;  %12182 = vmatprep.mubr.msk.f32.mxu0 %vm561_vm0, %v3435_v30  ;;  %v18761_v30 = vld [vmem:[#allocation27_spill] sm:$0xff] }
 0x409   : > { %v3296_v60 = vadd.f32 %v3142_v29, %v14710_v41  ;;  %12183 = vmatmul.mubr.msk.f32.gmra.mrb[132].mxu0 %vm561_vm0, %v3436_v25  ;;  %v3438_v34 = vmax.f32 %v15326_v2, 0.0 }
 0x40a   : > { %v3437_v33 = vmax.f32 %v15330_v31, 0.0  ;;  %v3295_v45 = vadd.f32 %v3137_v5, %v14715_v39  ;;  %v12081_v40 = vpop.f32.mrb[138].mxu1 }
 0x40b   : > { %v15340_v14 = vadd.f32 %v15271_v6, %v3296_v60  ;;  %v3152_v58 = vadd.f32 %v12081_v40, %v15043_v44  ;;  %v3146_v43 = vpop.f32.mrb[139].mxu1  ;;  %v18762_v40 = vld [vmem:[#allocation33_spill] sm:$0xff] }
 0x40c   : > { %v15344_v35 = vadd.f32 %v15271_v6, %v3295_v45  ;;  %v3147_v41 = vadd.f32 %v15043_v44, %v3146_v43  ;;  %12185 = vmatprep.mubr.msk.f32.mxu0 %vm561_vm0, %v3437_v33 }
 0x40d   : > { %v3298_v32 = vadd.f32 %v3152_v58, %v14724_v55  ;;  %12186 = vmatmul.mubr.msk.f32.gmra.mrb[134].mxu0 %vm561_vm0, %v3438_v34  ;;  %v3440_v25 = vmax.f32 %v15340_v14, 0.0 }
 0x40e   : > { %v3439_v39 = vmax.f32 %v15344_v35, 0.0  ;;  %v3297_v13 = vadd.f32 %v3147_v41, %v18761_v30  ;;  %v12084_v23 = vpop.f32.mrb[140].mxu1 }
 0x40f   : > { %v15354_v29 = vadd.f32 %v15271_v6, %v3298_v32  ;;  %v3162_v3 = vadd.f32 %v12084_v23, %v15043_v44  ;;  %v3156_v5 = vpop.f32.mrb[141].mxu1 }
 0x410   : > { %v15358_v60 = vadd.f32 %v15271_v6, %v3297_v13  ;;  %v3157_v55 = vadd.f32 %v15043_v44, %v3156_v5  ;;  %12188 = vmatprep.mubr.msk.f32.mxu0 %vm561_vm0, %v3439_v39  ;;  %v18764_v13 = vld [vmem:[#allocation30_spill] sm:$0xff] }
 0x411   : > { %v3300_v33 = vadd.f32 %v3162_v3, %v14738_v18  ;;  %12189 = vmatmul.mubr.msk.f32.gmra.mrb[136].mxu0 %vm561_vm0, %v3440_v25  ;;  %v3442_v43 = vmax.f32 %v15354_v29, 0.0  ;;  %v18765_v3 = vld [vmem:[#allocation37_spill] sm:$0xff] }
 0x412   : > { %v3441_v45 = vmax.f32 %v15358_v60, 0.0  ;;  %v3299_v34 = vadd.f32 %v3157_v55, %v18762_v40  ;;  %v12087_v58 = vpop.f32.mrb[142].mxu1 }
 0x413   : > { %v15368_v41 = vadd.f32 %v15271_v6, %v3300_v33  ;;  %v3172_v32 = vadd.f32 %v12087_v58, %v15043_v44  ;;  %v3166_v30 = vpop.f32.mrb[143].mxu1  ;;  %v13413_v58 = vld [vmem:[%s13687_s28 + $0x18] sm:$0x1f] }
 0x414   : > { %v15372_v39 = vadd.f32 %v15271_v6, %v3299_v34  ;;  %v3167_v18 = vadd.f32 %v15043_v44, %v3166_v30  ;;  %12191 = vmatprep.mubr.msk.f32.mxu0 %vm561_vm0, %v3441_v45  ;;  %v15387_v30 = vrot.slane %v13413_v58, %v15038_v59 }
 0x415   : > { %v3302_v23 = vadd.f32 %v3172_v32, %v18764_v13  ;;  %12192 = vmatmul.mubr.msk.f32.gmra.mrb[138].mxu0 %vm561_vm0, %v3442_v43  ;;  %v3444_v33 = vmax.f32 %v15368_v41, 0.0 }
 0x416   : > { %18763 = vst [vmem:[#allocation20_spill] sm:$0xff] %v15372_v39  ;;  %v3443_v25 = vmax.f32 %v15372_v39, 0.0  ;;  %v3301_v5 = vadd.f32 %v3167_v18, %v18765_v3  ;;  %v12090_v55 = vpop.f32.mrb[144].mxu1  ;;  %v18768_v18 = vld [vmem:[#allocation34_spill] sm:$0xff]  ;;  %v18769_v3 = vld [vmem:[#allocation41_spill] sm:$0xff] }
 0x417   : > { %v15382_v40 = vadd.f32 %v15271_v6, %v3302_v23  ;;  %v3182_v34 = vadd.f32 %v12090_v55, %v15043_v44  ;;  %v3176_v45 = vpop.f32.mrb[145].mxu1 }
 0x418   : > { %v15390_v32 = vadd.f32 %v15271_v6, %v3301_v5  ;;  %v3177_v43 = vadd.f32 %v15043_v44, %v3176_v45  ;;  %12194 = vmatprep.mubr.msk.f32.mxu0 %vm561_vm0, %v3443_v25 }
 0x419   : > { %18766 = vst [vmem:[#allocation23_spill] sm:$0xff] %v15382_v40  ;;  %v3304_v13 = vadd.f32 %v3182_v34, %v18768_v18  ;;  %12195 = vmatmul.mubr.msk.f32.gmra.mrb[140].mxu0 %vm561_vm0, %v3444_v33  ;;  %v3446_v59 = vmax.f32 %v15382_v40, 0.0  ;;  %v18772_v33 = vld [vmem:[#allocation38_spill] sm:$0xff]  ;;  %v18773_v18 = vld [vmem:[#allocation45_spill] sm:$0xff] }
 0x41a   : > { %18767 = vst [vmem:[#allocation22_spill] sm:$0xff] %v15390_v32  ;;  %v3445_v23 = vmax.f32 %v15390_v32, 0.0  ;;  %v3303_v55 = vadd.f32 %v3177_v43, %v18769_v3  ;;  %v12093_v39 = vpop.f32.mrb[146].mxu1 }
 0x41b   : > { %v15400_v58 = vadd.f32 %v15387_v30, %v3304_v13  ;;  %v3192_v6 = vadd.f32 %v12093_v39, %v15043_v44  ;;  %v3186_v5 = vpop.f32.mrb[147].mxu1 }
 0x41c   : > { %v15404_v45 = vadd.f32 %v15387_v30, %v3303_v55  ;;  %v3187_v25 = vadd.f32 %v15043_v44, %v3186_v5  ;;  %12197 = vmatprep.mubr.msk.f32.mxu0 %vm561_vm0, %v3445_v23 }
 0x41d   : > { %18770 = vst [vmem:[#allocation25_spill] sm:$0xff] %v15400_v58  ;;  %v3306_v34 = vadd.f32 %v3192_v6, %v18772_v33  ;;  %12198 = vmatmul.mubr.msk.f32.gmra.mrb[142].mxu0 %vm561_vm0, %v3446_v59  ;;  %v3448_v32 = vmax.f32 %v15400_v58, 0.0  ;;  %v18776_v59 = vld [vmem:[#allocation42_spill] sm:$0xff]  ;;  %v18777_v33 = vld [vmem:[#allocation11_spill] sm:$0xff] }
 0x41e   : > { %18771 = vst [vmem:[#allocation24_spill] sm:$0xff] %v15404_v45  ;;  %v3447_v43 = vmax.f32 %v15404_v45, 0.0  ;;  %v3305_v3 = vadd.f32 %v3187_v25, %v18773_v18  ;;  %v12096_v13 = vpop.f32.mrb[148].mxu1 }
 0x41f   : > { %v15414_v39 = vadd.f32 %v15387_v30, %v3306_v34  ;;  %v3202_v55 = vadd.f32 %v12096_v13, %v15043_v44  ;;  %v3196_v40 = vpop.f32.mrb[149].mxu1 }
 0x420   : > { %v15418_v5 = vadd.f32 %v15387_v30, %v3305_v3  ;;  %v3197_v23 = vadd.f32 %v15043_v44, %v3196_v40  ;;  %12200 = vmatprep.mubr.msk.f32.mxu0 %vm561_vm0, %v3447_v43 }
 0x421   : > { %18774 = vst [vmem:[#allocation28_spill] sm:$0xff] %v15414_v39  ;;  %v3308_v6 = vadd.f32 %v3202_v55, %v18776_v59  ;;  %12201 = vmatmul.mubr.msk.f32.gmra.mrb[144].mxu0 %vm561_vm0, %v3448_v32  ;;  %v3450_v45 = vmax.f32 %v15414_v39, 0.0  ;;  %v18780_v32 = vld [vmem:[#allocation10_spill] sm:$0xff]  ;;  %v18781_v59 = vld [vmem:[#allocation13_spill] sm:$0xff] }
 0x422   : > { %18775 = vst [vmem:[#allocation26_spill] sm:$0xff] %v15418_v5  ;;  %v3449_v25 = vmax.f32 %v15418_v5, 0.0  ;;  %v3307_v18 = vadd.f32 %v3197_v23, %v18777_v33  ;;  %v12099_v34 = vpop.f32.mrb[150].mxu1 }
 0x423   : > { %v15428_v13 = vadd.f32 %v15387_v30, %v3308_v6  ;;  %v3212_v3 = vadd.f32 %v12099_v34, %v15043_v44  ;;  %v3206_v58 = vpop.f32.mrb[151].mxu1 }
 0x424   : > { %v15432_v40 = vadd.f32 %v15387_v30, %v3307_v18  ;;  %v3207_v43 = vadd.f32 %v15043_v44, %v3206_v58  ;;  %12203 = vmatprep.mubr.msk.f32.mxu0 %vm561_vm0, %v3449_v25 }
 0x425   : > { %18778 = vst [vmem:[#allocation31_spill] sm:$0xff] %v15428_v13  ;;  %v3310_v55 = vadd.f32 %v3212_v3, %v18780_v32  ;;  %12204 = vmatmul.mubr.msk.f32.gmra.mrb[146].mxu0 %vm561_vm0, %v3450_v45  ;;  %v3452_v5 = vmax.f32 %v15428_v13, 0.0  ;;  %v18784_v45 = vld [vmem:[#allocation12_spill] sm:$0xff]  ;;  %v18785_v32 = vld [vmem:[#allocation15_spill] sm:$0xff] }
 0x426   : > { %18779 = vst [vmem:[#allocation29_spill] sm:$0xff] %v15432_v40  ;;  %v3451_v23 = vmax.f32 %v15432_v40, 0.0  ;;  %v3309_v33 = vadd.f32 %v3207_v43, %v18781_v59  ;;  %v12102_v6 = vpop.f32.mrb[152].mxu1 }
 0x427   : > { %v15442_v34 = vadd.f32 %v15387_v30, %v3310_v55  ;;  %v3222_v18 = vadd.f32 %v12102_v6, %v15043_v44  ;;  %v3216_v39 = vpop.f32.mrb[153].mxu1 }
 0x428   : > { %v15446_v58 = vadd.f32 %v15387_v30, %v3309_v33  ;;  %v3217_v25 = vadd.f32 %v15043_v44, %v3216_v39  ;;  %12206 = vmatprep.mubr.msk.f32.mxu0 %vm561_vm0, %v3451_v23 }
 0x429   : > { %18782 = vst [vmem:[#allocation35_spill] sm:$0xff] %v15442_v34  ;;  %v3312_v3 = vadd.f32 %v3222_v18, %v18784_v45  ;;  %12207 = vmatmul.mubr.msk.f32.gmra.mrb[148].mxu0 %vm561_vm0, %v3452_v5  ;;  %v3454_v40 = vmax.f32 %v15442_v34, 0.0  ;;  %v5589_v34 = vld [vmem:[#allocation2 + $0xf8] sm:$0xff] }
 0x42a   : > { %18783 = vst [vmem:[#allocation32_spill] sm:$0xff] %v15446_v58  ;;  %v3453_v43 = vmax.f32 %v15446_v58, 0.0  ;;  %v3311_v59 = vadd.f32 %v3217_v25, %v18785_v32  ;;  %v12105_v55 = vpop.f32.mrb[154].mxu1  ;;  %v18788_v25 = vld [vmem:[#allocation14_spill] sm:$0xff] }
 0x42b   : > { %v15456_v6 = vadd.f32 %v15387_v30, %v3312_v3  ;;  %v3232_v33 = vadd.f32 %v12105_v55, %v15043_v44  ;;  %v3226_v13 = vpop.f32.mrb[155].mxu1 }
 0x42c   : > { %v15460_v39 = vadd.f32 %v15387_v30, %v3311_v59  ;;  %v3227_v23 = vadd.f32 %v15043_v44, %v3226_v13  ;;  %12209 = vmatprep.mubr.msk.f32.mxu0 %vm561_vm0, %v3453_v43 }
 0x42d   : > { %18786 = vst [vmem:[#allocation39_spill] sm:$0xff] %v15456_v6  ;;  %v3314_v5 = vadd.f32 %v3232_v33, %v14840_v28  ;;  %12210 = vmatmul.mubr.msk.f32.gmra.mrb[150].mxu0 %vm561_vm0, %v3454_v40  ;;  %v3456_v32 = vmax.f32 %v15456_v6, 0.0  ;;  %v18791_v40 = vld [vmem:[#allocation17_spill] sm:$0xff] }
 0x42e   : > { %18787 = vst [vmem:[#allocation36_spill] sm:$0xff] %v15460_v39  ;;  %v3455_v18 = vmax.f32 %v15460_v39, 0.0  ;;  %v3313_v45 = vadd.f32 %v3227_v23, %v18788_v25  ;;  %v12108_v3 = vpop.f32.mrb[156].mxu1  ;;  %v18792_v23 = vld [vmem:[#allocation16_spill] sm:$0xff] }
 0x42f   : > { %v15470_v55 = vadd.f32 %v15387_v30, %v3314_v5  ;;  %v3242_v59 = vadd.f32 %v12108_v3, %v15043_v44  ;;  %v3236_v58 = vpop.f32.mrb[157].mxu1 }
 0x430   : > { %v15474_v13 = vadd.f32 %v15387_v30, %v3313_v45  ;;  %v3237_v28 = vadd.f32 %v15043_v44, %v3236_v58  ;;  %12212 = vmatprep.mubr.msk.f32.mxu0 %vm561_vm0, %v3455_v18 }
 0x431   : > { %18789 = vst [vmem:[#allocation43_spill] sm:$0xff] %v15470_v55  ;;  %v3316_v43 = vadd.f32 %v3242_v59, %v18791_v40  ;;  %12213 = vmatmul.mubr.msk.f32.gmra.mrb[152].mxu0 %vm561_vm0, %v3456_v32  ;;  %v3458_v39 = vmax.f32 %v15470_v55, 0.0  ;;  %v18795_v32 = vld [vmem:[#allocation19_spill] sm:$0xff]  ;;  %v18796_v40 = vld [vmem:[#allocation18_spill] sm:$0xff] }
 0x432   : > { %18790 = vst [vmem:[#allocation40_spill] sm:$0xff] %v15474_v13  ;;  %v3457_v33 = vmax.f32 %v15474_v13, 0.0  ;;  %v3315_v25 = vadd.f32 %v3237_v28, %v18792_v23  ;;  %v12111_v5 = vpop.f32.mrb[158].mxu1 }
 0x433   : > { %v15484_v3 = vadd.f32 %v15387_v30, %v3316_v43  ;;  %v3252_v45 = vadd.f32 %v12111_v5, %v15043_v44  ;;  %v3246_v6 = vpop.f32.mrb[159].mxu1 }
 0x434   : > { %v15488_v58 = vadd.f32 %v15387_v30, %v3315_v25  ;;  %v3247_v18 = vadd.f32 %v15043_v44, %v3246_v6  ;;  %12215 = vmatprep.mubr.msk.f32.mxu0 %vm561_vm0, %v3457_v33 }
 0x435   : > { %18793 = vst [vmem:[#allocation46_spill] sm:$0xff] %v15484_v3  ;;  %v3318_v59 = vadd.f32 %v3252_v45, %v18795_v32  ;;  %12216 = vmatmul.mubr.msk.f32.gmra.mrb[154].mxu0 %vm561_vm0, %v3458_v39  ;;  %v3460_v43 = vmax.f32 %v15484_v3, 0.0  ;;  %v10518_v39 = vld [vmem:[%s18499_s2 + $0xc0] sm:$0xff] }
 0x436   : > { %18794 = vst [vmem:[#allocation44_spill] sm:$0xff] %v15488_v58  ;;  %v3459_v28 = vmax.f32 %v15488_v58, 0.0  ;;  %v3317_v23 = vadd.f32 %v3247_v18, %v18796_v40  ;;  %v15518_v45 = vld [vmem:[%s18500_s3 + $0x2] ss:$0 sm:$0xff]  ;;  %v10520_v40 = vld [vmem:[%s18499_s2 + $0xd0] sm:$0xff]  ;;  %v10525_v58 = vld [vmem:[%s18499_s2 + $0xf8] sm:$0xff] }
 0x437   : > { %v15498_v5 = vadd.f32 %v15387_v30, %v3318_v59 }
 0x438   : > { %v15501_v25 = vadd.f32 %v15387_v30, %v3317_v23  ;;  %12218 = vmatprep.mubr.msk.f32.mxu0 %vm561_vm0, %v3459_v28  ;;  %v10519_v30 = vld [vmem:[%s18499_s2 + $0xc8] sm:$0xff]  ;;  %v10521_v23 = vld [vmem:[%s18499_s2 + $0xd8] sm:$0xff] }
 0x439   : > { %18797 = vst [vmem:[#allocation48_spill] sm:$0xff] %v15498_v5  ;;  %12219 = vmatmul.mubr.msk.f32.gmra.mrb[156].mxu0 %vm561_vm0, %v3460_v43  ;;  %v3462_v6 = vmax.f32 %v15498_v5, 0.0  ;;  %v12992_v33 = vpack.c.bf16 %v10519_v30, %v10518_v39  ;;  %v10522_v43 = vld [vmem:[%s18499_s2 + $0xe0] sm:$0xff]  ;;  %v12996_v39 = vpack.c.bf16 %v10521_v23, %v10520_v40  ;;  %v10523_v30 = vld [vmem:[%s18499_s2 + $0xe8] sm:$0xff]  ;;  %v10524_v5 = vld [vmem:[%s18499_s2 + $0xf0] sm:$0xff] }
 0x43a   : > { %18798 = vst [vmem:[#allocation47_spill] sm:$0xff] %v15501_v25  ;;  %v3461_v44 = vmax.f32 %v15501_v25, 0.0  ;;  %v13000_v25 = vpack.c.bf16 %v10523_v30, %v10522_v43  ;;  %v13004_v23 = vpack.c.bf16 %v10525_v58, %v10524_v5 }
 0x43b   : > { %12993 = vmatprep.subr.bf16.mxu0 %v12992_v33 }
 0x43c   : > { %12221 = vmatprep.mubr.msk.f32.mxu0 %vm561_vm0, %v3461_v44  ;;  %12995 = vmatpush3.bf16.msra.mxu0 %v12992_v33 }
 0x43d   : > { %12222 = vmatmul.mubr.msk.f32.gmra.mrb[158].mxu0 %vm561_vm0, %v3462_v6  ;;  %12997 = vmatprep.subr.bf16.mxu0 %v12996_v39 }
 0x440   : > { %12999 = vmatpush3.bf16.msra.mxu0 %v12996_v39 }
 0x441   : > { %13001 = vmatprep.subr.bf16.mxu0 %v13000_v25 }
 0x444   : > { %13003 = vmatpush3.bf16.msra.mxu0 %v13000_v25 }
 0x445   : > { %13005 = vmatprep.subr.bf16.mxu0 %v13004_v23 }
 0x448   : > { %13007 = vmatpush3.bf16.msra.mxu0 %v13004_v23 }
 0x494   : > { %v12130_v18 = vpop.f32.mrb[96].mxu0 }
 0x495   : > { %v3744_v32 = vadd.f32 %v12130_v18, %v15518_v45  ;;  %v3738_v59 = vpop.f32.mrb[97].mxu0 }
 0x496   : > { %v3739_v28 = vadd.f32 %v15518_v45, %v3738_v59 }
 0x497   : > { %v4058_v33 = vmax.f32 %v3744_v32, 0.0 }
 0x498   : > { %v4057_v44 = vmax.f32 %v3739_v28, 0.0  ;;  %v12133_v6 = vpop.f32.mrb[98].mxu0 }
 0x499   : > { %v3754_v18 = vadd.f32 %v12133_v6, %v15518_v45  ;;  %v3748_v59 = vpop.f32.mrb[99].mxu0 }
 0x49a   : > { %v3749_v28 = vadd.f32 %v15518_v45, %v3748_v59  ;;  %12240 = vmatprep.mubr.msk.f32.mxu1 %vm561_vm0, %v4057_v44 }
 0x49b   : > { %12241 = vmatmul.mubr.msk.f32.vlgmr.msra.gmra.mrb[160].mxu1 %vm561_vm0, %v4058_v33  ;;  %v4060_v43 = vmax.f32 %v3754_v18, 0.0 }
 0x49c   : > { %v4059_v32 = vmax.f32 %v3749_v28, 0.0  ;;  %v12136_v40 = vpop.f32.mrb[100].mxu0 }
 0x49d   : > { %v3764_v6 = vadd.f32 %v12136_v40, %v15518_v45  ;;  %v3758_v30 = vpop.f32.mrb[101].mxu0 }
 0x49e   : > { %v3759_v3 = vadd.f32 %v15518_v45, %v3758_v30  ;;  %12243 = vmatprep.mubr.msk.f32.mxu1 %vm561_vm0, %v4059_v32 }
 0x49f   : > { %12244 = vmatmul.mubr.msk.f32.gmra.mrb[162].mxu1 %vm561_vm0, %v4060_v43  ;;  %v4062_v33 = vmax.f32 %v3764_v6, 0.0 }
 0x4a0   : > { %v4061_v44 = vmax.f32 %v3759_v3, 0.0  ;;  %v12139_v59 = vpop.f32.mrb[102].mxu0 }
 0x4a1   : > { %v3774_v39 = vadd.f32 %v12139_v59, %v15518_v45  ;;  %v3768_v28 = vpop.f32.mrb[103].mxu0 }
 0x4a2   : > { %v3769_v58 = vadd.f32 %v15518_v45, %v3768_v28  ;;  %12246 = vmatprep.mubr.msk.f32.mxu1 %vm561_vm0, %v4061_v44 }
 0x4a3   : > { %12247 = vmatmul.mubr.msk.f32.gmra.mrb[164].mxu1 %vm561_vm0, %v4062_v33  ;;  %v4064_v32 = vmax.f32 %v3774_v39, 0.0 }
 0x4a4   : > { %v4063_v5 = vmax.f32 %v3769_v58, 0.0  ;;  %v12142_v18 = vpop.f32.mrb[104].mxu0 }
 0x4a5   : > { %v3784_v40 = vadd.f32 %v12142_v18, %v15518_v45  ;;  %v3778_v25 = vpop.f32.mrb[105].mxu0 }
 0x4a6   : > { %v3779_v3 = vadd.f32 %v15518_v45, %v3778_v25  ;;  %12249 = vmatprep.mubr.msk.f32.mxu1 %vm561_vm0, %v4063_v5 }
 0x4a7   : > { %12250 = vmatmul.mubr.msk.f32.gmra.mrb[166].mxu1 %vm561_vm0, %v4064_v32  ;;  %v4066_v30 = vmax.f32 %v3784_v40, 0.0 }
 0x4a8   : > { %v4065_v43 = vmax.f32 %v3779_v3, 0.0  ;;  %v12145_v6 = vpop.f32.mrb[106].mxu0 }
 0x4a9   : > { %v3794_v44 = vadd.f32 %v12145_v6, %v15518_v45  ;;  %v3788_v59 = vpop.f32.mrb[107].mxu0 }
 0x4aa   : > { %v3789_v23 = vadd.f32 %v15518_v45, %v3788_v59  ;;  %12252 = vmatprep.mubr.msk.f32.mxu1 %vm561_vm0, %v4065_v43 }
 0x4ab   : > { %12253 = vmatmul.mubr.msk.f32.gmra.mrb[168].mxu1 %vm561_vm0, %v4066_v30  ;;  %v4068_v28 = vmax.f32 %v3794_v44, 0.0 }
 0x4ac   : > { %v4067_v33 = vmax.f32 %v3789_v23, 0.0  ;;  %v12148_v39 = vpop.f32.mrb[108].mxu0 }
 0x4ad   : > { %v3804_v58 = vadd.f32 %v12148_v39, %v15518_v45  ;;  %v3798_v5 = vpop.f32.mrb[109].mxu0 }
 0x4ae   : > { %v3799_v18 = vadd.f32 %v15518_v45, %v3798_v5  ;;  %12255 = vmatprep.mubr.msk.f32.mxu1 %vm561_vm0, %v4067_v33 }
 0x4af   : > { %12256 = vmatmul.mubr.msk.f32.gmra.mrb[170].mxu1 %vm561_vm0, %v4068_v28  ;;  %v4070_v25 = vmax.f32 %v3804_v58, 0.0 }
 0x4b0   : > { %v4069_v32 = vmax.f32 %v3799_v18, 0.0  ;;  %v12151_v40 = vpop.f32.mrb[110].mxu0 }
 0x4b1   : > { %v3814_v3 = vadd.f32 %v12151_v40, %v15518_v45  ;;  %v3808_v43 = vpop.f32.mrb[111].mxu0 }
 0x4b2   : > { %v3809_v6 = vadd.f32 %v15518_v45, %v3808_v43  ;;  %12258 = vmatprep.mubr.msk.f32.mxu1 %vm561_vm0, %v4069_v32 }
 0x4b3   : > { %12259 = vmatmul.mubr.msk.f32.gmra.mrb[172].mxu1 %vm561_vm0, %v4070_v25  ;;  %v4072_v59 = vmax.f32 %v3814_v3, 0.0 }
 0x4b4   : > { %v4071_v30 = vmax.f32 %v3809_v6, 0.0  ;;  %v12154_v44 = vpop.f32.mrb[112].mxu0 }
 0x4b5   : > { %v3824_v23 = vadd.f32 %v12154_v44, %v15518_v45  ;;  %v3818_v33 = vpop.f32.mrb[113].mxu0 }
 0x4b6   : > { %v3819_v39 = vadd.f32 %v15518_v45, %v3818_v33  ;;  %12261 = vmatprep.mubr.msk.f32.mxu1 %vm561_vm0, %v4071_v30 }
 0x4b7   : > { %12262 = vmatmul.mubr.msk.f32.gmra.mrb[174].mxu1 %vm561_vm0, %v4072_v59  ;;  %v4074_v5 = vmax.f32 %v3824_v23, 0.0 }
 0x4b8   : > { %v4073_v28 = vmax.f32 %v3819_v39, 0.0  ;;  %v12157_v58 = vpop.f32.mrb[114].mxu0 }
 0x4b9   : > { %v3834_v18 = vadd.f32 %v12157_v58, %v15518_v45  ;;  %v3828_v32 = vpop.f32.mrb[115].mxu0 }
 0x4ba   : > { %v3829_v40 = vadd.f32 %v15518_v45, %v3828_v32  ;;  %12264 = vmatprep.mubr.msk.f32.mxu1 %vm561_vm0, %v4073_v28 }
 0x4bb   : > { %12265 = vmatmul.mubr.msk.f32.gmra.mrb[176].mxu1 %vm561_vm0, %v4074_v5  ;;  %v4076_v43 = vmax.f32 %v3834_v18, 0.0 }
 0x4bc   : > { %v4075_v25 = vmax.f32 %v3829_v40, 0.0  ;;  %v12160_v3 = vpop.f32.mrb[116].mxu0 }
 0x4bd   : > { %v3844_v6 = vadd.f32 %v12160_v3, %v15518_v45  ;;  %v3838_v30 = vpop.f32.mrb[117].mxu0 }
 0x4be   : > { %v3839_v44 = vadd.f32 %v15518_v45, %v3838_v30  ;;  %12267 = vmatprep.mubr.msk.f32.mxu1 %vm561_vm0, %v4075_v25 }
 0x4bf   : > { %12268 = vmatmul.mubr.msk.f32.gmra.mrb[178].mxu1 %vm561_vm0, %v4076_v43  ;;  %v4078_v33 = vmax.f32 %v3844_v6, 0.0 }
 0x4c0   : > { %v4077_v59 = vmax.f32 %v3839_v44, 0.0  ;;  %v12163_v23 = vpop.f32.mrb[118].mxu0 }
 0x4c1   : > { %v3854_v39 = vadd.f32 %v12163_v23, %v15518_v45  ;;  %v3848_v28 = vpop.f32.mrb[119].mxu0 }
 0x4c2   : > { %v3849_v58 = vadd.f32 %v15518_v45, %v3848_v28  ;;  %12270 = vmatprep.mubr.msk.f32.mxu1 %vm561_vm0, %v4077_v59 }
 0x4c3   : > { %12271 = vmatmul.mubr.msk.f32.gmra.mrb[180].mxu1 %vm561_vm0, %v4078_v33  ;;  %v4080_v32 = vmax.f32 %v3854_v39, 0.0 }
 0x4c4   : > { %v4079_v5 = vmax.f32 %v3849_v58, 0.0  ;;  %v12166_v18 = vpop.f32.mrb[120].mxu0 }
 0x4c5   : > { %v3864_v40 = vadd.f32 %v12166_v18, %v15518_v45  ;;  %v3858_v25 = vpop.f32.mrb[121].mxu0 }
 0x4c6   : > { %v3859_v3 = vadd.f32 %v15518_v45, %v3858_v25  ;;  %12273 = vmatprep.mubr.msk.f32.mxu1 %vm561_vm0, %v4079_v5 }
 0x4c7   : > { %12274 = vmatmul.mubr.msk.f32.gmra.mrb[182].mxu1 %vm561_vm0, %v4080_v32  ;;  %v4082_v30 = vmax.f32 %v3864_v40, 0.0 }
 0x4c8   : > { %v4081_v43 = vmax.f32 %v3859_v3, 0.0  ;;  %v12169_v6 = vpop.f32.mrb[122].mxu0 }
 0x4c9   : > { %v3874_v44 = vadd.f32 %v12169_v6, %v15518_v45  ;;  %v3868_v59 = vpop.f32.mrb[123].mxu0 }
 0x4ca   : > { %v3869_v23 = vadd.f32 %v15518_v45, %v3868_v59  ;;  %12276 = vmatprep.mubr.msk.f32.mxu1 %vm561_vm0, %v4081_v43 }
 0x4cb   : > { %12277 = vmatmul.mubr.msk.f32.gmra.mrb[184].mxu1 %vm561_vm0, %v4082_v30  ;;  %v4084_v28 = vmax.f32 %v3874_v44, 0.0 }
 0x4cc   : > { %v4083_v33 = vmax.f32 %v3869_v23, 0.0  ;;  %v12172_v39 = vpop.f32.mrb[124].mxu0 }
 0x4cd   : > { %v3884_v58 = vadd.f32 %v12172_v39, %v15518_v45  ;;  %v3878_v5 = vpop.f32.mrb[125].mxu0 }
 0x4ce   : > { %v3879_v18 = vadd.f32 %v15518_v45, %v3878_v5  ;;  %12279 = vmatprep.mubr.msk.f32.mxu1 %vm561_vm0, %v4083_v33 }
 0x4cf   : > { %12280 = vmatmul.mubr.msk.f32.gmra.mrb[186].mxu1 %vm561_vm0, %v4084_v28  ;;  %v4086_v25 = vmax.f32 %v3884_v58, 0.0 }
 0x4d0   : > { %v4085_v32 = vmax.f32 %v3879_v18, 0.0  ;;  %v12175_v40 = vpop.f32.mrb[126].mxu0 }
 0x4d1   : > { %v3894_v3 = vadd.f32 %v12175_v40, %v15518_v45  ;;  %v3888_v43 = vpop.f32.mrb[127].mxu0 }
 0x4d2   : > { %v3889_v6 = vadd.f32 %v15518_v45, %v3888_v43  ;;  %12282 = vmatprep.mubr.msk.f32.mxu1 %vm561_vm0, %v4085_v32 }
 0x4d3   : > { %12283 = vmatmul.mubr.msk.f32.gmra.mrb[188].mxu1 %vm561_vm0, %v4086_v25  ;;  %v4088_v59 = vmax.f32 %v3894_v3, 0.0 }
 0x4d4   : > { %v4087_v30 = vmax.f32 %v3889_v6, 0.0  ;;  %v12178_v44 = vpop.f32.mrb[128].mxu0 }
 0x4d5   : > { %v3904_v23 = vadd.f32 %v12178_v44, %v15518_v45  ;;  %v3898_v33 = vpop.f32.mrb[129].mxu0 }
 0x4d6   : > { %v3899_v39 = vadd.f32 %v15518_v45, %v3898_v33  ;;  %12285 = vmatprep.mubr.msk.f32.mxu1 %vm561_vm0, %v4087_v30 }
 0x4d7   : > { %12286 = vmatmul.mubr.msk.f32.gmra.mrb[190].mxu1 %vm561_vm0, %v4088_v59  ;;  %v4090_v5 = vmax.f32 %v3904_v23, 0.0 }
 0x4d8   : > { %v4089_v28 = vmax.f32 %v3899_v39, 0.0  ;;  %v12181_v58 = vpop.f32.mrb[130].mxu0 }
 0x4d9   : > { %v3914_v18 = vadd.f32 %v12181_v58, %v15518_v45  ;;  %v3908_v32 = vpop.f32.mrb[131].mxu0 }
 0x4da   : > { %v3909_v40 = vadd.f32 %v15518_v45, %v3908_v32  ;;  %12288 = vmatprep.mubr.msk.f32.mxu1 %vm561_vm0, %v4089_v28 }
 0x4db   : > { %12289 = vmatmul.mubr.msk.f32.gmra.mrb[192].mxu1 %vm561_vm0, %v4090_v5  ;;  %v4092_v43 = vmax.f32 %v3914_v18, 0.0 }
 0x4dc   : > { %v4091_v25 = vmax.f32 %v3909_v40, 0.0  ;;  %v12184_v3 = vpop.f32.mrb[132].mxu0 }
 0x4dd   : > { %v3924_v6 = vadd.f32 %v12184_v3, %v15518_v45  ;;  %v3918_v30 = vpop.f32.mrb[133].mxu0 }
 0x4de   : > { %v3919_v44 = vadd.f32 %v15518_v45, %v3918_v30  ;;  %12291 = vmatprep.mubr.msk.f32.mxu1 %vm561_vm0, %v4091_v25 }
 0x4df   : > { %12292 = vmatmul.mubr.msk.f32.gmra.mrb[194].mxu1 %vm561_vm0, %v4092_v43  ;;  %v4094_v33 = vmax.f32 %v3924_v6, 0.0 }
 0x4e0   : > { %v4093_v59 = vmax.f32 %v3919_v44, 0.0  ;;  %v12187_v23 = vpop.f32.mrb[134].mxu0 }
 0x4e1   : > { %v3934_v39 = vadd.f32 %v12187_v23, %v15518_v45  ;;  %v3928_v28 = vpop.f32.mrb[135].mxu0 }
 0x4e2   : > { %v3929_v58 = vadd.f32 %v15518_v45, %v3928_v28  ;;  %12294 = vmatprep.mubr.msk.f32.mxu1 %vm561_vm0, %v4093_v59 }
 0x4e3   : > { %12295 = vmatmul.mubr.msk.f32.gmra.mrb[196].mxu1 %vm561_vm0, %v4094_v33  ;;  %v4096_v32 = vmax.f32 %v3934_v39, 0.0 }
 0x4e4   : > { %v4095_v5 = vmax.f32 %v3929_v58, 0.0  ;;  %v12190_v18 = vpop.f32.mrb[136].mxu0 }
 0x4e5   : > { %v3944_v40 = vadd.f32 %v12190_v18, %v15518_v45  ;;  %v3938_v25 = vpop.f32.mrb[137].mxu0 }
 0x4e6   : > { %v3939_v3 = vadd.f32 %v15518_v45, %v3938_v25  ;;  %12297 = vmatprep.mubr.msk.f32.mxu1 %vm561_vm0, %v4095_v5 }
 0x4e7   : > { %12298 = vmatmul.mubr.msk.f32.gmra.mrb[198].mxu1 %vm561_vm0, %v4096_v32  ;;  %v4098_v30 = vmax.f32 %v3944_v40, 0.0 }
 0x4e8   : > { %v4097_v43 = vmax.f32 %v3939_v3, 0.0  ;;  %v12193_v6 = vpop.f32.mrb[138].mxu0 }
 0x4e9   : > { %v3954_v44 = vadd.f32 %v12193_v6, %v15518_v45  ;;  %v3948_v59 = vpop.f32.mrb[139].mxu0 }
 0x4ea   : > { %v3949_v23 = vadd.f32 %v15518_v45, %v3948_v59  ;;  %12300 = vmatprep.mubr.msk.f32.mxu1 %vm561_vm0, %v4097_v43 }
 0x4eb   : > { %12301 = vmatmul.mubr.msk.f32.gmra.mrb[200].mxu1 %vm561_vm0, %v4098_v30  ;;  %v4100_v28 = vmax.f32 %v3954_v44, 0.0 }
 0x4ec   : > { %v4099_v33 = vmax.f32 %v3949_v23, 0.0  ;;  %v12196_v39 = vpop.f32.mrb[140].mxu0 }
 0x4ed   : > { %v3964_v58 = vadd.f32 %v12196_v39, %v15518_v45  ;;  %v3958_v5 = vpop.f32.mrb[141].mxu0 }
 0x4ee   : > { %v3959_v18 = vadd.f32 %v15518_v45, %v3958_v5  ;;  %12303 = vmatprep.mubr.msk.f32.mxu1 %vm561_vm0, %v4099_v33 }
 0x4ef   : > { %12304 = vmatmul.mubr.msk.f32.gmra.mrb[202].mxu1 %vm561_vm0, %v4100_v28  ;;  %v4102_v25 = vmax.f32 %v3964_v58, 0.0 }
 0x4f0   : > { %v4101_v32 = vmax.f32 %v3959_v18, 0.0  ;;  %v12199_v40 = vpop.f32.mrb[142].mxu0 }
 0x4f1   : > { %v3974_v3 = vadd.f32 %v12199_v40, %v15518_v45  ;;  %v3968_v43 = vpop.f32.mrb[143].mxu0 }
 0x4f2   : > { %v3969_v6 = vadd.f32 %v15518_v45, %v3968_v43  ;;  %12306 = vmatprep.mubr.msk.f32.mxu1 %vm561_vm0, %v4101_v32 }
 0x4f3   : > { %12307 = vmatmul.mubr.msk.f32.gmra.mrb[204].mxu1 %vm561_vm0, %v4102_v25  ;;  %v4104_v59 = vmax.f32 %v3974_v3, 0.0 }
 0x4f4   : > { %v4103_v30 = vmax.f32 %v3969_v6, 0.0  ;;  %v12202_v44 = vpop.f32.mrb[144].mxu0 }
 0x4f5   : > { %v3984_v23 = vadd.f32 %v12202_v44, %v15518_v45  ;;  %v3978_v33 = vpop.f32.mrb[145].mxu0 }
 0x4f6   : > { %v3979_v39 = vadd.f32 %v15518_v45, %v3978_v33  ;;  %12309 = vmatprep.mubr.msk.f32.mxu1 %vm561_vm0, %v4103_v30 }
 0x4f7   : > { %12310 = vmatmul.mubr.msk.f32.gmra.mrb[206].mxu1 %vm561_vm0, %v4104_v59  ;;  %v4106_v5 = vmax.f32 %v3984_v23, 0.0 }
 0x4f8   : > { %v4105_v28 = vmax.f32 %v3979_v39, 0.0  ;;  %v12205_v58 = vpop.f32.mrb[146].mxu0 }
 0x4f9   : > { %v3994_v18 = vadd.f32 %v12205_v58, %v15518_v45  ;;  %v3988_v32 = vpop.f32.mrb[147].mxu0 }
 0x4fa   : > { %v3989_v40 = vadd.f32 %v15518_v45, %v3988_v32  ;;  %12312 = vmatprep.mubr.msk.f32.mxu1 %vm561_vm0, %v4105_v28 }
 0x4fb   : > { %12313 = vmatmul.mubr.msk.f32.gmra.mrb[208].mxu1 %vm561_vm0, %v4106_v5  ;;  %v4108_v43 = vmax.f32 %v3994_v18, 0.0 }
 0x4fc   : > { %v4107_v25 = vmax.f32 %v3989_v40, 0.0  ;;  %v12208_v3 = vpop.f32.mrb[148].mxu0 }
 0x4fd   : > { %v4004_v6 = vadd.f32 %v12208_v3, %v15518_v45  ;;  %v3998_v30 = vpop.f32.mrb[149].mxu0 }
 0x4fe   : > { %v3999_v44 = vadd.f32 %v15518_v45, %v3998_v30  ;;  %12315 = vmatprep.mubr.msk.f32.mxu1 %vm561_vm0, %v4107_v25 }
 0x4ff   : > { %12316 = vmatmul.mubr.msk.f32.gmra.mrb[210].mxu1 %vm561_vm0, %v4108_v43  ;;  %v4110_v33 = vmax.f32 %v4004_v6, 0.0 }
 0x500   : > { %v4109_v59 = vmax.f32 %v3999_v44, 0.0  ;;  %v12211_v23 = vpop.f32.mrb[150].mxu0 }
 0x501   : > { %v4014_v39 = vadd.f32 %v12211_v23, %v15518_v45  ;;  %v4008_v28 = vpop.f32.mrb[151].mxu0 }
 0x502   : > { %v4009_v58 = vadd.f32 %v15518_v45, %v4008_v28  ;;  %12318 = vmatprep.mubr.msk.f32.mxu1 %vm561_vm0, %v4109_v59 }
 0x503   : > { %12319 = vmatmul.mubr.msk.f32.gmra.mrb[212].mxu1 %vm561_vm0, %v4110_v33  ;;  %v4112_v32 = vmax.f32 %v4014_v39, 0.0 }
 0x504   : > { %v4111_v5 = vmax.f32 %v4009_v58, 0.0  ;;  %v12214_v18 = vpop.f32.mrb[152].mxu0 }
 0x505   : > { %v4024_v40 = vadd.f32 %v12214_v18, %v15518_v45  ;;  %v4018_v25 = vpop.f32.mrb[153].mxu0 }
 0x506   : > { %v4019_v3 = vadd.f32 %v15518_v45, %v4018_v25  ;;  %12321 = vmatprep.mubr.msk.f32.mxu1 %vm561_vm0, %v4111_v5 }
 0x507   : > { %12322 = vmatmul.mubr.msk.f32.gmra.mrb[214].mxu1 %vm561_vm0, %v4112_v32  ;;  %v4114_v30 = vmax.f32 %v4024_v40, 0.0 }
 0x508   : > { %v4113_v43 = vmax.f32 %v4019_v3, 0.0  ;;  %v12217_v6 = vpop.f32.mrb[154].mxu0 }
 0x509   : > { %v4034_v44 = vadd.f32 %v12217_v6, %v15518_v45  ;;  %v4028_v59 = vpop.f32.mrb[155].mxu0 }
 0x50a   : > { %v4029_v23 = vadd.f32 %v15518_v45, %v4028_v59  ;;  %12324 = vmatprep.mubr.msk.f32.mxu1 %vm561_vm0, %v4113_v43  ;;  %v5582_v59 = vld [vmem:[#allocation2 + $0xc0] sm:$0xff] }
 0x50b   : > { %12325 = vmatmul.mubr.msk.f32.gmra.mrb[216].mxu1 %vm561_vm0, %v4114_v30  ;;  %v4116_v28 = vmax.f32 %v4034_v44, 0.0 }
 0x50c   : > { %v4115_v33 = vmax.f32 %v4029_v23, 0.0  ;;  %v12220_v39 = vpop.f32.mrb[156].mxu0  ;;  %v5583_v23 = vld [vmem:[#allocation2 + $0xc8] sm:$0xff] }
 0x50d   : > { %v4044_v58 = vadd.f32 %v12220_v39, %v15518_v45  ;;  %v4038_v5 = vpop.f32.mrb[157].mxu0  ;;  %v18799_v39 = vld [vmem:[#allocation9_spill] sm:$0xff] }
 0x50e   : > { %v4039_v18 = vadd.f32 %v15518_v45, %v4038_v5  ;;  %12327 = vmatprep.mubr.msk.f32.mxu1 %vm561_vm0, %v4115_v33  ;;  %v13008_v33 = vpack.c.bf16 %v5583_v23, %v5582_v59  ;;  %v5585_v59 = vld [vmem:[#allocation2 + $0xd8] sm:$0xff] }
 0x50f   : > { %12328 = vmatmul.mubr.msk.f32.gmra.mrb[218].mxu1 %vm561_vm0, %v4116_v28  ;;  %v4118_v25 = vmax.f32 %v4044_v58, 0.0  ;;  %v15667_v28 = vsub.s32 3, %v18799_v39 }
 0x510   : > { %v4117_v32 = vmax.f32 %v4039_v18, 0.0  ;;  %v12223_v40 = vpop.f32.mrb[158].mxu0  ;;  %13009 = vmatprep.subr.bf16.mxu1 %v13008_v33  ;;  %v13414_v18 = vld [vmem:[%s13687_s28] sm:$0x1f] }
 0x511   : > { %v4054_v3 = vadd.f32 %v12223_v40, %v15518_v45  ;;  %v4048_v43 = vpop.f32.mrb[159].mxu0  ;;  %13011 = vmatpush3.bf16.msra.mxu1 %v13008_v33 }
 0x512   : > { %v4049_v6 = vadd.f32 %v15518_v45, %v4048_v43  ;;  %12330 = vmatprep.mubr.msk.f32.mxu1 %vm561_vm0, %v4117_v32  ;;  %v15672_v45 = vld [vmem:[%s18502_s5 + $0x2] ss:$0 sm:$0xff]  ;;  %v15677_v32 = vrot.slane %v13414_v18, %v15667_v28 }
 0x513   : > { %12331 = vmatmul.mubr.msk.f32.gmra.mrb[220].mxu1 %vm561_vm0, %v4118_v25  ;;  %v4120_v44 = vmax.f32 %v4054_v3, 0.0  ;;  %v18800_v43 = vld [vmem:[#allocation21_spill] sm:$0xff] }
 0x514   : > { %v4119_v30 = vmax.f32 %v4049_v6, 0.0 }
 0x516   : > { %12333 = vmatprep.mubr.msk.f32.mxu1 %vm561_vm0, %v4119_v30 }
 0x517   : > { %12334 = vmatmul.mubr.msk.f32.gmra.mrb[222].mxu1 %vm561_vm0, %v4120_v44  ;;  %v5584_v44 = vld [vmem:[#allocation2 + $0xd0] sm:$0xff] }
 0x518   : > { %v13012_v39 = vpack.c.bf16 %v5585_v59, %v5584_v44 }
 0x51a   : > { %13013 = vmatprep.subr.bf16.mxu1 %v13012_v39 }
 0x51b   : > { %13015 = vmatpush3.bf16.msra.mxu1 %v13012_v39 }
 0x56e   : > { %v12242_v58 = vpop.f32.mrb[160].mxu1 }
 0x56f   : > { %v4402_v5 = vadd.f32 %v12242_v58, %v15672_v45  ;;  %v4396_v40 = vpop.f32.mrb[161].mxu1 }
 0x570   : > { %v4397_v25 = vadd.f32 %v15672_v45, %v4396_v40 }
 0x571   : > { %v4716_v3 = vadd.f32 %v4402_v5, %v15054_v24  ;;  %v5586_v24 = vld [vmem:[#allocation2 + $0xe0] sm:$0xff]  ;;  %v5587_v5 = vld [vmem:[#allocation2 + $0xe8] sm:$0xff] }
 0x572   : > { %v4715_v6 = vadd.f32 %v4397_v25, %v18800_v43  ;;  %v12245_v30 = vpop.f32.mrb[162].mxu1  ;;  %v5588_v25 = vld [vmem:[#allocation2 + $0xf0] sm:$0xff] }
 0x573   : > { %v15683_v23 = vadd.f32 %v15677_v32, %v4716_v3  ;;  %v4412_v33 = vadd.f32 %v12245_v30, %v15672_v45  ;;  %v4406_v58 = vpop.f32.mrb[163].mxu1  ;;  %v13016_v30 = vpack.c.bf16 %v5587_v5, %v5586_v24 }
 0x574   : > { %v15687_v18 = vadd.f32 %v15677_v32, %v4715_v6  ;;  %v4407_v13 = vadd.f32 %v15672_v45, %v4406_v58 }
 0x575   : > { %v4718_v40 = vadd.f32 %v4412_v33, %v15066_v4  ;;  %v4860_v44 = vmax.f32 %v15683_v23, 0.0  ;;  %v13020_v33 = vpack.c.bf16 %v5589_v34, %v5588_v25  ;;  %13017 = vmatprep.subr.bf16.mxu1 %v13016_v30 }
 0x576   : > { %18801 = vst [vmem:[#allocation50_spill] sm:$0xff] %v15687_v18  ;;  %v4859_v43 = vmax.f32 %v15687_v18, 0.0  ;;  %v4717_v3 = vadd.f32 %v4407_v13, %v15070_v53  ;;  %v12248_v55 = vpop.f32.mrb[164].mxu1  ;;  %13019 = vmatpush3.bf16.msra.mxu1 %v13016_v30 }
 0x577   : > { %v15695_v6 = vadd.f32 %v15677_v32, %v4718_v40  ;;  %v4422_v59 = vadd.f32 %v12248_v55, %v15672_v45  ;;  %v4416_v4 = vpop.f32.mrb[165].mxu1  ;;  %13021 = vmatprep.subr.bf16.mxu1 %v13020_v33 }
 0x578   : > { %v15699_v58 = vadd.f32 %v15677_v32, %v4717_v3  ;;  %v4417_v18 = vadd.f32 %v15672_v45, %v4416_v4  ;;  %12352 = vmatprep.mubr.msk.f32.mxu0 %vm561_vm0, %v4859_v43 }
 0x579   : > { %v4720_v53 = vadd.f32 %v4422_v59, %v15080_v62  ;;  %12353 = vmatmul.mubr.msk.f32.vlgmr.msra.gmra.mrb[160].mxu0 %vm561_vm0, %v4860_v44  ;;  %v4862_v34 = vmax.f32 %v15695_v6, 0.0 }
 0x57a   : > { %v4861_v13 = vmax.f32 %v15699_v58, 0.0  ;;  %v4719_v39 = vadd.f32 %v4417_v18, %v15084_v47  ;;  %v12251_v40 = vpop.f32.mrb[166].mxu1  ;;  %13023 = vmatpush3.bf16.msra.mxu1 %v13020_v33 }
 0x57b   : > { %v15709_v55 = vadd.f32 %v15677_v32, %v4720_v53  ;;  %v4432_v24 = vadd.f32 %v12251_v40, %v15672_v45  ;;  %v4426_v5 = vpop.f32.mrb[167].mxu1 }
 0x57c   : > { %v15713_v25 = vadd.f32 %v15677_v32, %v4719_v39  ;;  %v4427_v62 = vadd.f32 %v15672_v45, %v4426_v5  ;;  %12355 = vmatprep.mubr.msk.f32.mxu0 %vm561_vm0, %v4861_v13 }
 0x57d   : > { %v4722_v47 = vadd.f32 %v4432_v24, %v15094_v11  ;;  %12356 = vmatmul.mubr.msk.f32.gmra.mrb[162].mxu0 %vm561_vm0, %v4862_v34  ;;  %v4864_v30 = vmax.f32 %v15709_v55, 0.0 }
 0x57e   : > { %v4863_v18 = vmax.f32 %v15713_v25, 0.0  ;;  %v4721_v43 = vadd.f32 %v4427_v62, %v15098_v10  ;;  %v12254_v3 = vpop.f32.mrb[168].mxu1 }
 0x57f   : > { %v15723_v44 = vadd.f32 %v15677_v32, %v4722_v47  ;;  %v4442_v59 = vadd.f32 %v12254_v3, %v15672_v45  ;;  %v4436_v4 = vpop.f32.mrb[169].mxu1 }
 0x580   : > { %v15727_v53 = vadd.f32 %v15677_v32, %v4721_v43  ;;  %v4437_v11 = vadd.f32 %v15672_v45, %v4436_v4  ;;  %12358 = vmatprep.mubr.msk.f32.mxu0 %vm561_vm0, %v4863_v18 }
 0x581   : > { %v4724_v13 = vadd.f32 %v4442_v59, %v15108_v1  ;;  %12359 = vmatmul.mubr.msk.f32.gmra.mrb[164].mxu0 %vm561_vm0, %v4864_v30  ;;  %v4866_v40 = vmax.f32 %v15723_v44, 0.0 }
 0x582   : > { %v4865_v10 = vmax.f32 %v15727_v53, 0.0  ;;  %v4723_v33 = vadd.f32 %v4437_v11, %v15112_v21  ;;  %v12257_v39 = vpop.f32.mrb[170].mxu1 }
 0x583   : > { %v15737_v34 = vadd.f32 %v15677_v32, %v4724_v13  ;;  %v4452_v24 = vadd.f32 %v12257_v39, %v15672_v45  ;;  %v4446_v5 = vpop.f32.mrb[171].mxu1 }
 0x584   : > { %v15741_v62 = vadd.f32 %v15677_v32, %v4723_v33  ;;  %v4447_v1 = vadd.f32 %v15672_v45, %v4446_v5  ;;  %12361 = vmatprep.mubr.msk.f32.mxu0 %vm561_vm0, %v4865_v10 }
 0x585   : > { %v4726_v47 = vadd.f32 %v4452_v24, %v15122_v8  ;;  %12362 = vmatmul.mubr.msk.f32.gmra.mrb[166].mxu0 %vm561_vm0, %v4866_v40  ;;  %v4868_v3 = vmax.f32 %v15737_v34, 0.0 }
 0x586   : > { %v4867_v21 = vmax.f32 %v15741_v62, 0.0  ;;  %v4725_v18 = vadd.f32 %v4447_v1, %v15126_v20  ;;  %v12260_v43 = vpop.f32.mrb[172].mxu1 }
 0x587   : > { %v15751_v30 = vadd.f32 %v15677_v32, %v4726_v47  ;;  %v4462_v59 = vadd.f32 %v12260_v43, %v15672_v45  ;;  %v4456_v4 = vpop.f32.mrb[173].mxu1 }
 0x588   : > { %v15755_v11 = vadd.f32 %v15677_v32, %v4725_v18  ;;  %v4457_v8 = vadd.f32 %v15672_v45, %v4456_v4  ;;  %12364 = vmatprep.mubr.msk.f32.mxu0 %vm561_vm0, %v4867_v21  ;;  %v13415_v4 = vld [vmem:[%s13687_s28 + $0x8] sm:$0x1f] }
 0x589   : > { %v4728_v13 = vadd.f32 %v4462_v59, %v15136_v19  ;;  %12365 = vmatmul.mubr.msk.f32.gmra.mrb[168].mxu0 %vm561_vm0, %v4868_v3  ;;  %v4870_v39 = vmax.f32 %v15751_v30, 0.0 }
 0x58a   : > { %v4869_v20 = vmax.f32 %v15755_v11, 0.0  ;;  %v4727_v10 = vadd.f32 %v4457_v8, %v15140_v54  ;;  %v12263_v33 = vpop.f32.mrb[174].mxu1  ;;  %v15784_v8 = vrot.slane %v13415_v4, %v15667_v28 }
 0x58b   : > { %v15765_v40 = vadd.f32 %v15677_v32, %v4728_v13  ;;  %v4472_v24 = vadd.f32 %v12263_v33, %v15672_v45  ;;  %v4466_v5 = vpop.f32.mrb[175].mxu1 }
 0x58c   : > { %v15769_v1 = vadd.f32 %v15677_v32, %v4727_v10  ;;  %v4467_v19 = vadd.f32 %v15672_v45, %v4466_v5  ;;  %12367 = vmatprep.mubr.msk.f32.mxu0 %vm561_vm0, %v4869_v20 }
 0x58d   : > { %v4730_v47 = vadd.f32 %v4472_v24, %v15150_v17  ;;  %12368 = vmatmul.mubr.msk.f32.gmra.mrb[170].mxu0 %vm561_vm0, %v4870_v39  ;;  %v4872_v43 = vmax.f32 %v15765_v40, 0.0 }
 0x58e   : > { %v4871_v54 = vmax.f32 %v15769_v1, 0.0  ;;  %v4729_v21 = vadd.f32 %v4467_v19, %v15158_v37  ;;  %v12266_v18 = vpop.f32.mrb[176].mxu1 }
 0x58f   : > { %v15779_v3 = vadd.f32 %v15677_v32, %v4730_v47  ;;  %v4482_v59 = vadd.f32 %v12266_v18, %v15672_v45  ;;  %v4476_v13 = vpop.f32.mrb[177].mxu1 }
 0x590   : > { %v15787_v17 = vadd.f32 %v15677_v32, %v4729_v21  ;;  %v4477_v20 = vadd.f32 %v15672_v45, %v4476_v13  ;;  %12370 = vmatprep.mubr.msk.f32.mxu0 %vm561_vm0, %v4871_v54 }
 0x591   : > { %v4732_v37 = vadd.f32 %v4482_v59, %v15168_v0  ;;  %12371 = vmatmul.mubr.msk.f32.gmra.mrb[172].mxu0 %vm561_vm0, %v4872_v43  ;;  %v4874_v24 = vmax.f32 %v15779_v3, 0.0 }
 0x592   : > { %v4873_v10 = vmax.f32 %v15787_v17, 0.0  ;;  %v4731_v33 = vadd.f32 %v4477_v20, %v15172_v56  ;;  %v12269_v39 = vpop.f32.mrb[178].mxu1 }
 0x593   : > { %v15797_v5 = vadd.f32 %v15784_v8, %v4732_v37  ;;  %v4492_v32 = vadd.f32 %v12269_v39, %v15672_v45  ;;  %v4486_v19 = vpop.f32.mrb[179].mxu1 }
 0x594   : > { %v15801_v47 = vadd.f32 %v15784_v8, %v4731_v33  ;;  %v4487_v0 = vadd.f32 %v15672_v45, %v4486_v19  ;;  %12373 = vmatprep.mubr.msk.f32.mxu0 %vm561_vm0, %v4873_v10 }
 0x595   : > { %v4734_v54 = vadd.f32 %v4492_v32, %v15182_v22  ;;  %12374 = vmatmul.mubr.msk.f32.gmra.mrb[174].mxu0 %vm561_vm0, %v4874_v24  ;;  %v4876_v43 = vmax.f32 %v15797_v5, 0.0 }
 0x596   : > { %v4875_v56 = vmax.f32 %v15801_v47, 0.0  ;;  %v4733_v21 = vadd.f32 %v4487_v0, %v15186_v50  ;;  %v12272_v18 = vpop.f32.mrb[180].mxu1 }
 0x597   : > { %v15811_v59 = vadd.f32 %v15784_v8, %v4734_v54  ;;  %v4502_v4 = vadd.f32 %v12272_v18, %v15672_v45  ;;  %v4496_v13 = vpop.f32.mrb[181].mxu1 }
 0x598   : > { %v15815_v20 = vadd.f32 %v15784_v8, %v4733_v21  ;;  %v4497_v22 = vadd.f32 %v15672_v45, %v4496_v13  ;;  %12376 = vmatprep.mubr.msk.f32.mxu0 %vm561_vm0, %v4875_v56 }
 0x599   : > { %v4736_v37 = vadd.f32 %v4502_v4, %v15196_v36  ;;  %12377 = vmatmul.mubr.msk.f32.gmra.mrb[176].mxu0 %vm561_vm0, %v4876_v43  ;;  %v4878_v39 = vmax.f32 %v15811_v59, 0.0 }
 0x59a   : > { %v4877_v50 = vmax.f32 %v15815_v20, 0.0  ;;  %v4735_v10 = vadd.f32 %v4497_v22, %v15200_v7  ;;  %v12275_v33 = vpop.f32.mrb[182].mxu1 }
 0x59b   : > { %v15825_v24 = vadd.f32 %v15784_v8, %v4736_v37  ;;  %v4512_v32 = vadd.f32 %v12275_v33, %v15672_v45  ;;  %v4506_v19 = vpop.f32.mrb[183].mxu1 }
 0x59c   : > { %v15829_v0 = vadd.f32 %v15784_v8, %v4735_v10  ;;  %v4507_v36 = vadd.f32 %v15672_v45, %v4506_v19  ;;  %12379 = vmatprep.mubr.msk.f32.mxu0 %vm561_vm0, %v4877_v50 }
 0x59d   : > { %v4738_v54 = vadd.f32 %v4512_v32, %v15210_v26  ;;  %12380 = vmatmul.mubr.msk.f32.gmra.mrb[178].mxu0 %vm561_vm0, %v4878_v39  ;;  %v4880_v18 = vmax.f32 %v15825_v24, 0.0 }
 0x59e   : > { %v4879_v7 = vmax.f32 %v15829_v0, 0.0  ;;  %v4737_v56 = vadd.f32 %v4507_v36, %v15214_v46  ;;  %v12278_v21 = vpop.f32.mrb[184].mxu1 }
 0x59f   : > { %v15839_v43 = vadd.f32 %v15784_v8, %v4738_v54  ;;  %v4522_v4 = vadd.f32 %v12278_v21, %v15672_v45  ;;  %v4516_v13 = vpop.f32.mrb[185].mxu1 }
 0x5a0   : > { %v15843_v22 = vadd.f32 %v15784_v8, %v4737_v56  ;;  %v4517_v26 = vadd.f32 %v15672_v45, %v4516_v13  ;;  %12382 = vmatprep.mubr.msk.f32.mxu0 %vm561_vm0, %v4879_v7 }
 0x5a1   : > { %v4740_v37 = vadd.f32 %v4522_v4, %v15224_v15  ;;  %12383 = vmatmul.mubr.msk.f32.gmra.mrb[180].mxu0 %vm561_vm0, %v4880_v18  ;;  %v4882_v33 = vmax.f32 %v15839_v43, 0.0 }
 0x5a2   : > { %v4881_v46 = vmax.f32 %v15843_v22, 0.0  ;;  %v4739_v50 = vadd.f32 %v4517_v26, %v15228_v63  ;;  %v12281_v10 = vpop.f32.mrb[186].mxu1 }
 0x5a3   : > { %v15853_v39 = vadd.f32 %v15784_v8, %v4740_v37  ;;  %v4532_v32 = vadd.f32 %v12281_v10, %v15672_v45  ;;  %v4526_v19 = vpop.f32.mrb[187].mxu1 }
 0x5a4   : > { %v15857_v36 = vadd.f32 %v15784_v8, %v4739_v50  ;;  %v4527_v15 = vadd.f32 %v15672_v45, %v4526_v19  ;;  %12385 = vmatprep.mubr.msk.f32.mxu0 %vm561_vm0, %v4881_v46 }
 0x5a5   : > { %v4742_v54 = vadd.f32 %v4532_v32, %v15238_v9  ;;  %12386 = vmatmul.mubr.msk.f32.gmra.mrb[182].mxu0 %vm561_vm0, %v4882_v33  ;;  %v4884_v21 = vmax.f32 %v15853_v39, 0.0 }
 0x5a6   : > { %v4883_v63 = vmax.f32 %v15857_v36, 0.0  ;;  %v4741_v7 = vadd.f32 %v4527_v15, %v15242_v51  ;;  %v12284_v56 = vpop.f32.mrb[188].mxu1 }
 0x5a7   : > { %v15867_v18 = vadd.f32 %v15784_v8, %v4742_v54  ;;  %v4542_v4 = vadd.f32 %v12284_v56, %v15672_v45  ;;  %v4536_v13 = vpop.f32.mrb[189].mxu1 }
 0x5a8   : > { %v15871_v26 = vadd.f32 %v15784_v8, %v4741_v7  ;;  %v4537_v9 = vadd.f32 %v15672_v45, %v4536_v13  ;;  %12388 = vmatprep.mubr.msk.f32.mxu0 %vm561_vm0, %v4883_v63  ;;  %v13416_v13 = vld [vmem:[%s13687_s28 + $0x10] sm:$0x1f] }
 0x5a9   : > { %v4744_v37 = vadd.f32 %v4542_v4, %v15252_v16  ;;  %12389 = vmatmul.mubr.msk.f32.gmra.mrb[184].mxu0 %vm561_vm0, %v4884_v21  ;;  %v4886_v10 = vmax.f32 %v15867_v18, 0.0 }
 0x5aa   : > { %v4885_v51 = vmax.f32 %v15871_v26, 0.0  ;;  %v4743_v46 = vadd.f32 %v4537_v9, %v15256_v38  ;;  %v12287_v50 = vpop.f32.mrb[190].mxu1  ;;  %v15900_v9 = vrot.slane %v13416_v13, %v15667_v28 }
 0x5ab   : > { %v15881_v33 = vadd.f32 %v15784_v8, %v4744_v37  ;;  %v4552_v32 = vadd.f32 %v12287_v50, %v15672_v45  ;;  %v4546_v19 = vpop.f32.mrb[191].mxu1 }
 0x5ac   : > { %v15885_v15 = vadd.f32 %v15784_v8, %v4743_v46  ;;  %v4547_v16 = vadd.f32 %v15672_v45, %v4546_v19  ;;  %12391 = vmatprep.mubr.msk.f32.mxu0 %vm561_vm0, %v4885_v51 }
 0x5ad   : > { %v4746_v54 = vadd.f32 %v4552_v32, %v15266_v49  ;;  %12392 = vmatmul.mubr.msk.f32.gmra.mrb[186].mxu0 %vm561_vm0, %v4886_v10  ;;  %v4888_v56 = vmax.f32 %v15881_v33, 0.0 }
 0x5ae   : > { %v4887_v38 = vmax.f32 %v15885_v15, 0.0  ;;  %v4745_v63 = vadd.f32 %v4547_v16, %v15274_v61  ;;  %v12290_v7 = vpop.f32.mrb[192].mxu1 }
 0x5af   : > { %v15895_v21 = vadd.f32 %v15784_v8, %v4746_v54  ;;  %v4562_v4 = vadd.f32 %v12290_v7, %v15672_v45  ;;  %v4556_v37 = vpop.f32.mrb[193].mxu1 }
 0x5b0   : > { %v15903_v49 = vadd.f32 %v15784_v8, %v4745_v63  ;;  %v4557_v51 = vadd.f32 %v15672_v45, %v4556_v37  ;;  %12394 = vmatprep.mubr.msk.f32.mxu0 %vm561_vm0, %v4887_v38 }
 0x5b1   : > { %v4748_v61 = vadd.f32 %v4562_v4, %v15284_v48  ;;  %12395 = vmatmul.mubr.msk.f32.gmra.mrb[188].mxu0 %vm561_vm0, %v4888_v56  ;;  %v4890_v32 = vmax.f32 %v15895_v21, 0.0 }
 0x5b2   : > { %v4889_v46 = vmax.f32 %v15903_v49, 0.0  ;;  %v4747_v50 = vadd.f32 %v4557_v51, %v15288_v42  ;;  %v12293_v10 = vpop.f32.mrb[194].mxu1 }
 0x5b3   : > { %v15913_v19 = vadd.f32 %v15900_v9, %v4748_v61  ;;  %v4572_v8 = vadd.f32 %v12293_v10, %v15672_v45  ;;  %v4566_v16 = vpop.f32.mrb[195].mxu1 }
 0x5b4   : > { %v15917_v54 = vadd.f32 %v15900_v9, %v4747_v50  ;;  %v4567_v48 = vadd.f32 %v15672_v45, %v4566_v16  ;;  %12397 = vmatprep.mubr.msk.f32.mxu0 %vm561_vm0, %v4889_v46 }
 0x5b5   : > { %v4750_v38 = vadd.f32 %v4572_v8, %v15298_v27  ;;  %12398 = vmatmul.mubr.msk.f32.gmra.mrb[190].mxu0 %vm561_vm0, %v4890_v32  ;;  %v4892_v56 = vmax.f32 %v15913_v19, 0.0 }
 0x5b6   : > { %v4891_v42 = vmax.f32 %v15917_v54, 0.0  ;;  %v4749_v63 = vadd.f32 %v4567_v48, %v15302_v12  ;;  %v12296_v7 = vpop.f32.mrb[196].mxu1 }
 0x5b7   : > { %v15927_v4 = vadd.f32 %v15900_v9, %v4750_v38  ;;  %v4582_v13 = vadd.f32 %v12296_v7, %v15672_v45  ;;  %v4576_v37 = vpop.f32.mrb[197].mxu1 }
 0x5b8   : > { %v15931_v51 = vadd.f32 %v15900_v9, %v4749_v63  ;;  %v4577_v27 = vadd.f32 %v15672_v45, %v4576_v37  ;;  %12400 = vmatprep.mubr.msk.f32.mxu0 %vm561_vm0, %v4891_v42 }
 0x5b9   : > { %v4752_v61 = vadd.f32 %v4582_v13, %v15312_v52  ;;  %12401 = vmatmul.mubr.msk.f32.gmra.mrb[192].mxu0 %vm561_vm0, %v4892_v56  ;;  %v4894_v10 = vmax.f32 %v15927_v4, 0.0 }
 0x5ba   : > { %v4893_v12 = vmax.f32 %v15931_v51, 0.0  ;;  %v4751_v46 = vadd.f32 %v4577_v27, %v15316_v57  ;;  %v12299_v50 = vpop.f32.mrb[198].mxu1 }
 0x5bb   : > { %v15941_v32 = vadd.f32 %v15900_v9, %v4752_v61  ;;  %v4592_v8 = vadd.f32 %v12299_v50, %v15672_v45  ;;  %v4586_v16 = vpop.f32.mrb[199].mxu1 }
 0x5bc   : > { %v15945_v48 = vadd.f32 %v15900_v9, %v4751_v46  ;;  %v4587_v52 = vadd.f32 %v15672_v45, %v4586_v16  ;;  %12403 = vmatprep.mubr.msk.f32.mxu0 %vm561_vm0, %v4893_v12 }
 0x5bd   : > { %v4754_v38 = vadd.f32 %v4592_v8, %v15326_v2  ;;  %12404 = vmatmul.mubr.msk.f32.gmra.mrb[194].mxu0 %vm561_vm0, %v4894_v10  ;;  %v4896_v7 = vmax.f32 %v15941_v32, 0.0 }
 0x5be   : > { %v4895_v57 = vmax.f32 %v15945_v48, 0.0  ;;  %v4753_v42 = vadd.f32 %v4587_v52, %v15330_v31  ;;  %v12302_v63 = vpop.f32.mrb[200].mxu1 }
 0x5bf   : > { %v15955_v56 = vadd.f32 %v15900_v9, %v4754_v38  ;;  %v4602_v13 = vadd.f32 %v12302_v63, %v15672_v45  ;;  %v4596_v37 = vpop.f32.mrb[201].mxu1 }
 0x5c0   : > { %v15959_v27 = vadd.f32 %v15900_v9, %v4753_v42  ;;  %v4597_v2 = vadd.f32 %v15672_v45, %v4596_v37  ;;  %12406 = vmatprep.mubr.msk.f32.mxu0 %vm561_vm0, %v4895_v57 }
 0x5c1   : > { %v4756_v61 = vadd.f32 %v4602_v13, %v15340_v14  ;;  %12407 = vmatmul.mubr.msk.f32.gmra.mrb[196].mxu0 %vm561_vm0, %v4896_v7  ;;  %v4898_v50 = vmax.f32 %v15955_v56, 0.0 }
 0x5c2   : > { %v4897_v31 = vmax.f32 %v15959_v27, 0.0  ;;  %v4755_v12 = vadd.f32 %v4597_v2, %v15344_v35  ;;  %v12305_v46 = vpop.f32.mrb[202].mxu1 }
 0x5c3   : > { %v15969_v10 = vadd.f32 %v15900_v9, %v4756_v61  ;;  %v4612_v8 = vadd.f32 %v12305_v46, %v15672_v45  ;;  %v4606_v16 = vpop.f32.mrb[203].mxu1 }
 0x5c4   : > { %v15973_v52 = vadd.f32 %v15900_v9, %v4755_v12  ;;  %v4607_v14 = vadd.f32 %v15672_v45, %v4606_v16  ;;  %12409 = vmatprep.mubr.msk.f32.mxu0 %vm561_vm0, %v4897_v31  ;;  %v18802_v31 = vld [vmem:[#allocation20_spill] sm:$0xff] }
 0x5c5   : > { %v4758_v38 = vadd.f32 %v4612_v8, %v15354_v29  ;;  %12410 = vmatmul.mubr.msk.f32.gmra.mrb[198].mxu0 %vm561_vm0, %v4898_v50  ;;  %v4900_v63 = vmax.f32 %v15969_v10, 0.0 }
 0x5c6   : > { %v4899_v35 = vmax.f32 %v15973_v52, 0.0  ;;  %v4757_v57 = vadd.f32 %v4607_v14, %v15358_v60  ;;  %v12308_v42 = vpop.f32.mrb[204].mxu1 }
 0x5c7   : > { %v15983_v7 = vadd.f32 %v15900_v9, %v4758_v38  ;;  %v4622_v13 = vadd.f32 %v12308_v42, %v15672_v45  ;;  %v4616_v37 = vpop.f32.mrb[205].mxu1 }
 0x5c8   : > { %v15987_v2 = vadd.f32 %v15900_v9, %v4757_v57  ;;  %v4617_v29 = vadd.f32 %v15672_v45, %v4616_v37  ;;  %12412 = vmatprep.mubr.msk.f32.mxu0 %vm561_vm0, %v4899_v35  ;;  %v18804_v35 = vld [vmem:[#allocation23_spill] sm:$0xff] }
 0x5c9   : > { %v4760_v61 = vadd.f32 %v4622_v13, %v15368_v41  ;;  %12413 = vmatmul.mubr.msk.f32.gmra.mrb[200].mxu0 %vm561_vm0, %v4900_v63  ;;  %v4902_v50 = vmax.f32 %v15983_v7, 0.0  ;;  %v18805_v63 = vld [vmem:[#allocation22_spill] sm:$0xff] }
 0x5ca   : > { %v4901_v60 = vmax.f32 %v15987_v2, 0.0  ;;  %v4759_v12 = vadd.f32 %v4617_v29, %v18802_v31  ;;  %v12311_v46 = vpop.f32.mrb[206].mxu1 }
 0x5cb   : > { %v15997_v8 = vadd.f32 %v15900_v9, %v4760_v61  ;;  %v4632_v16 = vadd.f32 %v12311_v46, %v15672_v45  ;;  %v4626_v14 = vpop.f32.mrb[207].mxu1 }
 0x5cc   : > { %v16001_v38 = vadd.f32 %v15900_v9, %v4759_v12  ;;  %v4627_v41 = vadd.f32 %v15672_v45, %v4626_v14  ;;  %12415 = vmatprep.mubr.msk.f32.mxu0 %vm561_vm0, %v4901_v60  ;;  %v13417_v12 = vld [vmem:[%s13687_s28 + $0x18] sm:$0x1f]  ;;  %v18808_v14 = vld [vmem:[#allocation25_spill] sm:$0xff] }
 0x5cd   : > { %v4762_v57 = vadd.f32 %v4632_v16, %v18804_v35  ;;  %12416 = vmatmul.mubr.msk.f32.gmra.mrb[202].mxu0 %vm561_vm0, %v4902_v50  ;;  %v4904_v29 = vmax.f32 %v15997_v8, 0.0  ;;  %v16016_v46 = vrot.slane %v13417_v12, %v15667_v28 }
 0x5ce   : > { %18803 = vst [vmem:[#allocation49_spill] sm:$0xff] %v16001_v38  ;;  %v4903_v42 = vmax.f32 %v16001_v38, 0.0  ;;  %v4761_v13 = vadd.f32 %v4627_v41, %v18805_v63  ;;  %v12314_v37 = vpop.f32.mrb[208].mxu1  ;;  %v7049_v38 = vld [vmem:[#allocation2 + $0x138] sm:$0xff] }
 0x5cf   : > { %v16011_v61 = vadd.f32 %v15900_v9, %v4762_v57  ;;  %v4642_v31 = vadd.f32 %v12314_v37, %v15672_v45  ;;  %v4636_v60 = vpop.f32.mrb[209].mxu1  ;;  %v18809_v57 = vld [vmem:[#allocation24_spill] sm:$0xff] }
 0x5d0   : > { %v16019_v16 = vadd.f32 %v15900_v9, %v4761_v13  ;;  %v4637_v50 = vadd.f32 %v15672_v45, %v4636_v60  ;;  %12418 = vmatprep.mubr.msk.f32.mxu0 %vm561_vm0, %v4903_v42 }
 0x5d1   : > { %18806 = vst [vmem:[#allocation27_spill] sm:$0xff] %v16011_v61  ;;  %v4764_v41 = vadd.f32 %v4642_v31, %v18808_v14  ;;  %12419 = vmatmul.mubr.msk.f32.gmra.mrb[204].mxu0 %vm561_vm0, %v4904_v29  ;;  %v4906_v28 = vmax.f32 %v16011_v61, 0.0  ;;  %v18812_v29 = vld [vmem:[#allocation28_spill] sm:$0xff]  ;;  %v18813_v14 = vld [vmem:[#allocation26_spill] sm:$0xff] }
 0x5d2   : > { %18807 = vst [vmem:[#allocation33_spill] sm:$0xff] %v16019_v16  ;;  %v4905_v35 = vmax.f32 %v16019_v16, 0.0  ;;  %v4763_v63 = vadd.f32 %v4637_v50, %v18809_v57  ;;  %v12317_v37 = vpop.f32.mrb[210].mxu1 }
 0x5d3   : > { %v16029_v12 = vadd.f32 %v16016_v46, %v4764_v41  ;;  %v4652_v9 = vadd.f32 %v12317_v37, %v15672_v45  ;;  %v4646_v13 = vpop.f32.mrb[211].mxu1 }
 0x5d4   : > { %v16033_v60 = vadd.f32 %v16016_v46, %v4763_v63  ;;  %v4647_v42 = vadd.f32 %v15672_v45, %v4646_v13  ;;  %12421 = vmatprep.mubr.msk.f32.mxu0 %vm561_vm0, %v4905_v35 }
 0x5d5   : > { %18810 = vst [vmem:[#allocation30_spill] sm:$0xff] %v16029_v12  ;;  %v4766_v31 = vadd.f32 %v4652_v9, %v18812_v29  ;;  %12422 = vmatmul.mubr.msk.f32.gmra.mrb[206].mxu0 %vm561_vm0, %v4906_v28  ;;  %v4908_v16 = vmax.f32 %v16029_v12, 0.0  ;;  %v18816_v28 = vld [vmem:[#allocation31_spill] sm:$0xff]  ;;  %v18817_v29 = vld [vmem:[#allocation29_spill] sm:$0xff] }
 0x5d6   : > { %18811 = vst [vmem:[#allocation37_spill] sm:$0xff] %v16033_v60  ;;  %v4907_v50 = vmax.f32 %v16033_v60, 0.0  ;;  %v4765_v57 = vadd.f32 %v4647_v42, %v18813_v14  ;;  %v12320_v41 = vpop.f32.mrb[212].mxu1 }
 0x5d7   : > { %v16043_v37 = vadd.f32 %v16016_v46, %v4766_v31  ;;  %v4662_v63 = vadd.f32 %v12320_v41, %v15672_v45  ;;  %v4656_v61 = vpop.f32.mrb[213].mxu1 }
 0x5d8   : > { %v16047_v13 = vadd.f32 %v16016_v46, %v4765_v57  ;;  %v4657_v35 = vadd.f32 %v15672_v45, %v4656_v61  ;;  %12424 = vmatprep.mubr.msk.f32.mxu0 %vm561_vm0, %v4907_v50 }
 0x5d9   : > { %18814 = vst [vmem:[#allocation34_spill] sm:$0xff] %v16043_v37  ;;  %v4768_v9 = vadd.f32 %v4662_v63, %v18816_v28  ;;  %12425 = vmatmul.mubr.msk.f32.gmra.mrb[208].mxu0 %vm561_vm0, %v4908_v16  ;;  %v4910_v60 = vmax.f32 %v16043_v37, 0.0  ;;  %v18820_v16 = vld [vmem:[#allocation35_spill] sm:$0xff]  ;;  %v18821_v28 = vld [vmem:[#allocation32_spill] sm:$0xff] }
 0x5da   : > { %18815 = vst [vmem:[#allocation41_spill] sm:$0xff] %v16047_v13  ;;  %v4909_v42 = vmax.f32 %v16047_v13, 0.0  ;;  %v4767_v14 = vadd.f32 %v4657_v35, %v18817_v29  ;;  %v12323_v31 = vpop.f32.mrb[214].mxu1 }
 0x5db   : > { %v16057_v41 = vadd.f32 %v16016_v46, %v4768_v9  ;;  %v4672_v57 = vadd.f32 %v12323_v31, %v15672_v45  ;;  %v4666_v12 = vpop.f32.mrb[215].mxu1 }
 0x5dc   : > { %v16061_v61 = vadd.f32 %v16016_v46, %v4767_v14  ;;  %v4667_v50 = vadd.f32 %v15672_v45, %v4666_v12  ;;  %12427 = vmatprep.mubr.msk.f32.mxu0 %vm561_vm0, %v4909_v42 }
 0x5dd   : > { %18818 = vst [vmem:[#allocation38_spill] sm:$0xff] %v16057_v41  ;;  %v4770_v63 = vadd.f32 %v4672_v57, %v18820_v16  ;;  %12428 = vmatmul.mubr.msk.f32.gmra.mrb[210].mxu0 %vm561_vm0, %v4910_v60  ;;  %v4912_v13 = vmax.f32 %v16057_v41, 0.0  ;;  %v18824_v60 = vld [vmem:[#allocation39_spill] sm:$0xff]  ;;  %v18825_v16 = vld [vmem:[#allocation36_spill] sm:$0xff] }
 0x5de   : > { %18819 = vst [vmem:[#allocation45_spill] sm:$0xff] %v16061_v61  ;;  %v4911_v35 = vmax.f32 %v16061_v61, 0.0  ;;  %v4769_v29 = vadd.f32 %v4667_v50, %v18821_v28  ;;  %v12326_v9 = vpop.f32.mrb[216].mxu1 }
 0x5df   : > { %v16071_v31 = vadd.f32 %v16016_v46, %v4770_v63  ;;  %v4682_v14 = vadd.f32 %v12326_v9, %v15672_v45  ;;  %v4676_v37 = vpop.f32.mrb[217].mxu1 }
 0x5e0   : > { %v16075_v12 = vadd.f32 %v16016_v46, %v4769_v29  ;;  %v4677_v42 = vadd.f32 %v15672_v45, %v4676_v37  ;;  %12430 = vmatprep.mubr.msk.f32.mxu0 %vm561_vm0, %v4911_v35 }
 0x5e1   : > { %18822 = vst [vmem:[#allocation42_spill] sm:$0xff] %v16071_v31  ;;  %v4772_v57 = vadd.f32 %v4682_v14, %v18824_v60  ;;  %12431 = vmatmul.mubr.msk.f32.gmra.mrb[212].mxu0 %vm561_vm0, %v4912_v13  ;;  %v4914_v61 = vmax.f32 %v16071_v31, 0.0  ;;  %v18828_v13 = vld [vmem:[#allocation43_spill] sm:$0xff]  ;;  %v18829_v60 = vld [vmem:[#allocation40_spill] sm:$0xff] }
 0x5e2   : > { %18823 = vst [vmem:[#allocation11_spill] sm:$0xff] %v16075_v12  ;;  %v4913_v50 = vmax.f32 %v16075_v12, 0.0  ;;  %v4771_v28 = vadd.f32 %v4677_v42, %v18825_v16  ;;  %v12329_v63 = vpop.f32.mrb[218].mxu1 }
 0x5e3   : > { %v16085_v9 = vadd.f32 %v16016_v46, %v4772_v57  ;;  %v4692_v29 = vadd.f32 %v12329_v63, %v15672_v45  ;;  %v4686_v41 = vpop.f32.mrb[219].mxu1 }
 0x5e4   : > { %v16089_v37 = vadd.f32 %v16016_v46, %v4771_v28  ;;  %v4687_v35 = vadd.f32 %v15672_v45, %v4686_v41  ;;  %12433 = vmatprep.mubr.msk.f32.mxu0 %vm561_vm0, %v4913_v50 }
 0x5e5   : > { %18826 = vst [vmem:[#allocation10_spill] sm:$0xff] %v16085_v9  ;;  %v4774_v14 = vadd.f32 %v4692_v29, %v18828_v13  ;;  %12434 = vmatmul.mubr.msk.f32.gmra.mrb[214].mxu0 %vm561_vm0, %v4914_v61  ;;  %v4916_v12 = vmax.f32 %v16085_v9, 0.0  ;;  %v18832_v61 = vld [vmem:[#allocation46_spill] sm:$0xff]  ;;  %v18833_v13 = vld [vmem:[#allocation44_spill] sm:$0xff] }
 0x5e6   : > { %18827 = vst [vmem:[#allocation13_spill] sm:$0xff] %v16089_v37  ;;  %v4915_v42 = vmax.f32 %v16089_v37, 0.0  ;;  %v4773_v16 = vadd.f32 %v4687_v35, %v18829_v60  ;;  %v12332_v57 = vpop.f32.mrb[220].mxu1 }
 0x5e7   : > { %v16099_v63 = vadd.f32 %v16016_v46, %v4774_v14  ;;  %v4702_v28 = vadd.f32 %v12332_v57, %v15672_v45  ;;  %v4696_v31 = vpop.f32.mrb[221].mxu1 }
 0x5e8   : > { %v16103_v41 = vadd.f32 %v16016_v46, %v4773_v16  ;;  %v4697_v50 = vadd.f32 %v15672_v45, %v4696_v31  ;;  %12436 = vmatprep.mubr.msk.f32.mxu0 %vm561_vm0, %v4915_v42 }
 0x5e9   : > { %18830 = vst [vmem:[#allocation12_spill] sm:$0xff] %v16099_v63  ;;  %v4776_v29 = vadd.f32 %v4702_v28, %v18832_v61  ;;  %12437 = vmatmul.mubr.msk.f32.gmra.mrb[216].mxu0 %vm561_vm0, %v4916_v12  ;;  %v4918_v37 = vmax.f32 %v16099_v63, 0.0  ;;  %v18836_v12 = vld [vmem:[#allocation48_spill] sm:$0xff]  ;;  %v18837_v61 = vld [vmem:[#allocation47_spill] sm:$0xff] }
 0x5ea   : > { %18831 = vst [vmem:[#allocation15_spill] sm:$0xff] %v16103_v41  ;;  %v4917_v35 = vmax.f32 %v16103_v41, 0.0  ;;  %v4775_v60 = vadd.f32 %v4697_v50, %v18833_v13  ;;  %v12335_v14 = vpop.f32.mrb[222].mxu1 }
 0x5eb   : > { %v16113_v57 = vadd.f32 %v16016_v46, %v4776_v29  ;;  %v4712_v16 = vadd.f32 %v12335_v14, %v15672_v45  ;;  %v4706_v9 = vpop.f32.mrb[223].mxu1 }
 0x5ec   : > { %v16117_v31 = vadd.f32 %v16016_v46, %v4775_v60  ;;  %v4707_v42 = vadd.f32 %v15672_v45, %v4706_v9  ;;  %12439 = vmatprep.mubr.msk.f32.mxu0 %vm561_vm0, %v4917_v35 }
 0x5ed   : > { %18834 = vst [vmem:[#allocation14_spill] sm:$0xff] %v16113_v57  ;;  %v4778_v28 = vadd.f32 %v4712_v16, %v18836_v12  ;;  %12440 = vmatmul.mubr.msk.f32.gmra.mrb[218].mxu0 %vm561_vm0, %v4918_v37  ;;  %v4920_v29 = vmax.f32 %v16113_v57, 0.0  ;;  %v10658_v37 = vld [vmem:[%s18499_s2 + $0x100] sm:$0xff] }
 0x5ee   : > { %18835 = vst [vmem:[#allocation17_spill] sm:$0xff] %v16117_v31  ;;  %v4919_v50 = vmax.f32 %v16117_v31, 0.0  ;;  %v4777_v13 = vadd.f32 %v4707_v42, %v18837_v61  ;;  %v16147_v16 = vld [vmem:[%s18500_s3 + $0x3] ss:$0 sm:$0xff]  ;;  %v10660_v61 = vld [vmem:[%s18499_s2 + $0x110] sm:$0xff]  ;;  %v10665_v31 = vld [vmem:[%s18499_s2 + $0x138] sm:$0xff] }
 0x5ef   : > { %v16127_v14 = vadd.f32 %v16016_v46, %v4778_v28 }
 0x5f0   : > { %v16130_v60 = vadd.f32 %v16016_v46, %v4777_v13  ;;  %12442 = vmatprep.mubr.msk.f32.mxu0 %vm561_vm0, %v4919_v50  ;;  %v10659_v46 = vld [vmem:[%s18499_s2 + $0x108] sm:$0xff]  ;;  %v10661_v13 = vld [vmem:[%s18499_s2 + $0x118] sm:$0xff] }
 0x5f1   : > { %18838 = vst [vmem:[#allocation16_spill] sm:$0xff] %v16127_v14  ;;  %12443 = vmatmul.mubr.msk.f32.gmra.mrb[220].mxu0 %vm561_vm0, %v4920_v29  ;;  %v4922_v9 = vmax.f32 %v16127_v14, 0.0  ;;  %v13024_v35 = vpack.c.bf16 %v10659_v46, %v10658_v37  ;;  %v10662_v29 = vld [vmem:[%s18499_s2 + $0x120] sm:$0xff]  ;;  %v13028_v37 = vpack.c.bf16 %v10661_v13, %v10660_v61  ;;  %v10663_v46 = vld [vmem:[%s18499_s2 + $0x128] sm:$0xff]  ;;  %v10664_v14 = vld [vmem:[%s18499_s2 + $0x130] sm:$0xff] }
 0x5f2   : > { %18839 = vst [vmem:[#allocation19_spill] sm:$0xff] %v16130_v60  ;;  %v4921_v45 = vmax.f32 %v16130_v60, 0.0  ;;  %v13032_v60 = vpack.c.bf16 %v10663_v46, %v10662_v29  ;;  %v13036_v13 = vpack.c.bf16 %v10665_v31, %v10664_v14 }
 0x5f3   : > { %13025 = vmatprep.subr.bf16.mxu0 %v13024_v35 }
 0x5f4   : > { %12445 = vmatprep.mubr.msk.f32.mxu0 %vm561_vm0, %v4921_v45  ;;  %13027 = vmatpush3.bf16.msra.mxu0 %v13024_v35 }
 0x5f5   : > { %12446 = vmatmul.mubr.msk.f32.gmra.mrb[222].mxu0 %vm561_vm0, %v4922_v9  ;;  %13029 = vmatprep.subr.bf16.mxu0 %v13028_v37 }
 0x5f8   : > { %13031 = vmatpush3.bf16.msra.mxu0 %v13028_v37 }
 0x5f9   : > { %13033 = vmatprep.subr.bf16.mxu0 %v13032_v60 }
 0x5fc   : > { %13035 = vmatpush3.bf16.msra.mxu0 %v13032_v60 }
 0x5fd   : > { %13037 = vmatprep.subr.bf16.mxu0 %v13036_v13 }
 0x600   : > { %13039 = vmatpush3.bf16.msra.mxu0 %v13036_v13 }
 0x64c   : > { %v12354_v42 = vpop.f32.mrb[160].mxu0 }
 0x64d   : > { %v5204_v12 = vadd.f32 %v12354_v42, %v16147_v16  ;;  %v5198_v28 = vpop.f32.mrb[161].mxu0 }
 0x64e   : > { %v5199_v50 = vadd.f32 %v16147_v16, %v5198_v28 }
 0x64f   : > { %v5518_v35 = vmax.f32 %v5204_v12, 0.0 }
 0x650   : > { %v5517_v45 = vmax.f32 %v5199_v50, 0.0  ;;  %v12357_v9 = vpop.f32.mrb[162].mxu0 }
 0x651   : > { %v5214_v42 = vadd.f32 %v12357_v9, %v16147_v16  ;;  %v5208_v28 = vpop.f32.mrb[163].mxu0 }
 0x652   : > { %v5209_v50 = vadd.f32 %v16147_v16, %v5208_v28  ;;  %12464 = vmatprep.mubr.msk.f32.mxu1 %vm561_vm0, %v5517_v45 }
 0x653   : > { %12465 = vmatmul.mubr.msk.f32.vlgmr.msra.gmra.mrb[224].mxu1 %vm561_vm0, %v5518_v35  ;;  %v5520_v29 = vmax.f32 %v5214_v42, 0.0 }
 0x654   : > { %v5519_v12 = vmax.f32 %v5209_v50, 0.0  ;;  %v12360_v61 = vpop.f32.mrb[164].mxu0 }
 0x655   : > { %v5224_v9 = vadd.f32 %v12360_v61, %v16147_v16  ;;  %v5218_v46 = vpop.f32.mrb[165].mxu0 }
 0x656   : > { %v5219_v57 = vadd.f32 %v16147_v16, %v5218_v46  ;;  %12467 = vmatprep.mubr.msk.f32.mxu1 %vm561_vm0, %v5519_v12 }
 0x657   : > { %12468 = vmatmul.mubr.msk.f32.gmra.mrb[226].mxu1 %vm561_vm0, %v5520_v29  ;;  %v5522_v35 = vmax.f32 %v5224_v9, 0.0 }
 0x658   : > { %v5521_v45 = vmax.f32 %v5219_v57, 0.0  ;;  %v12363_v28 = vpop.f32.mrb[166].mxu0 }
 0x659   : > { %v5234_v37 = vadd.f32 %v12363_v28, %v16147_v16  ;;  %v5228_v50 = vpop.f32.mrb[167].mxu0 }
 0x65a   : > { %v5229_v31 = vadd.f32 %v16147_v16, %v5228_v50  ;;  %12470 = vmatprep.mubr.msk.f32.mxu1 %vm561_vm0, %v5521_v45 }
 0x65b   : > { %12471 = vmatmul.mubr.msk.f32.gmra.mrb[228].mxu1 %vm561_vm0, %v5522_v35  ;;  %v5524_v12 = vmax.f32 %v5234_v37, 0.0 }
 0x65c   : > { %v5523_v14 = vmax.f32 %v5229_v31, 0.0  ;;  %v12366_v42 = vpop.f32.mrb[168].mxu0 }
 0x65d   : > { %v5244_v61 = vadd.f32 %v12366_v42, %v16147_v16  ;;  %v5238_v60 = vpop.f32.mrb[169].mxu0 }
 0x65e   : > { %v5239_v57 = vadd.f32 %v16147_v16, %v5238_v60  ;;  %12473 = vmatprep.mubr.msk.f32.mxu1 %vm561_vm0, %v5523_v14 }
 0x65f   : > { %12474 = vmatmul.mubr.msk.f32.gmra.mrb[230].mxu1 %vm561_vm0, %v5524_v12  ;;  %v5526_v46 = vmax.f32 %v5244_v61, 0.0 }
 0x660   : > { %v5525_v29 = vmax.f32 %v5239_v57, 0.0  ;;  %v12369_v9 = vpop.f32.mrb[170].mxu0 }
 0x661   : > { %v5254_v45 = vadd.f32 %v12369_v9, %v16147_v16  ;;  %v5248_v28 = vpop.f32.mrb[171].mxu0 }
 0x662   : > { %v5249_v13 = vadd.f32 %v16147_v16, %v5248_v28  ;;  %12476 = vmatprep.mubr.msk.f32.mxu1 %vm561_vm0, %v5525_v29 }
 0x663   : > { %12477 = vmatmul.mubr.msk.f32.gmra.mrb[232].mxu1 %vm561_vm0, %v5526_v46  ;;  %v5528_v50 = vmax.f32 %v5254_v45, 0.0 }
 0x664   : > { %v5527_v35 = vmax.f32 %v5249_v13, 0.0  ;;  %v12372_v37 = vpop.f32.mrb[172].mxu0 }
 0x665   : > { %v5264_v31 = vadd.f32 %v12372_v37, %v16147_v16  ;;  %v5258_v14 = vpop.f32.mrb[173].mxu0 }
 0x666   : > { %v5259_v42 = vadd.f32 %v16147_v16, %v5258_v14  ;;  %12479 = vmatprep.mubr.msk.f32.mxu1 %vm561_vm0, %v5527_v35 }
 0x667   : > { %12480 = vmatmul.mubr.msk.f32.gmra.mrb[234].mxu1 %vm561_vm0, %v5528_v50  ;;  %v5530_v60 = vmax.f32 %v5264_v31, 0.0 }
 0x668   : > { %v5529_v12 = vmax.f32 %v5259_v42, 0.0  ;;  %v12375_v61 = vpop.f32.mrb[174].mxu0 }
 0x669   : > { %v5274_v57 = vadd.f32 %v12375_v61, %v16147_v16  ;;  %v5268_v29 = vpop.f32.mrb[175].mxu0 }
 0x66a   : > { %v5269_v9 = vadd.f32 %v16147_v16, %v5268_v29  ;;  %12482 = vmatprep.mubr.msk.f32.mxu1 %vm561_vm0, %v5529_v12 }
 0x66b   : > { %12483 = vmatmul.mubr.msk.f32.gmra.mrb[236].mxu1 %vm561_vm0, %v5530_v60  ;;  %v5532_v28 = vmax.f32 %v5274_v57, 0.0 }
 0x66c   : > { %v5531_v46 = vmax.f32 %v5269_v9, 0.0  ;;  %v12378_v45 = vpop.f32.mrb[176].mxu0 }
 0x66d   : > { %v5284_v13 = vadd.f32 %v12378_v45, %v16147_v16  ;;  %v5278_v35 = vpop.f32.mrb[177].mxu0 }
 0x66e   : > { %v5279_v37 = vadd.f32 %v16147_v16, %v5278_v35  ;;  %12485 = vmatprep.mubr.msk.f32.mxu1 %vm561_vm0, %v5531_v46 }
 0x66f   : > { %12486 = vmatmul.mubr.msk.f32.gmra.mrb[238].mxu1 %vm561_vm0, %v5532_v28  ;;  %v5534_v14 = vmax.f32 %v5284_v13, 0.0 }
 0x670   : > { %v5533_v50 = vmax.f32 %v5279_v37, 0.0  ;;  %v12381_v31 = vpop.f32.mrb[178].mxu0 }
 0x671   : > { %v5294_v42 = vadd.f32 %v12381_v31, %v16147_v16  ;;  %v5288_v12 = vpop.f32.mrb[179].mxu0 }
 0x672   : > { %v5289_v61 = vadd.f32 %v16147_v16, %v5288_v12  ;;  %12488 = vmatprep.mubr.msk.f32.mxu1 %vm561_vm0, %v5533_v50 }
 0x673   : > { %12489 = vmatmul.mubr.msk.f32.gmra.mrb[240].mxu1 %vm561_vm0, %v5534_v14  ;;  %v5536_v29 = vmax.f32 %v5294_v42, 0.0 }
 0x674   : > { %v5535_v60 = vmax.f32 %v5289_v61, 0.0  ;;  %v12384_v57 = vpop.f32.mrb[180].mxu0 }
 0x675   : > { %v5304_v9 = vadd.f32 %v12384_v57, %v16147_v16  ;;  %v5298_v46 = vpop.f32.mrb[181].mxu0 }
 0x676   : > { %v5299_v45 = vadd.f32 %v16147_v16, %v5298_v46  ;;  %12491 = vmatprep.mubr.msk.f32.mxu1 %vm561_vm0, %v5535_v60 }
 0x677   : > { %12492 = vmatmul.mubr.msk.f32.gmra.mrb[242].mxu1 %vm561_vm0, %v5536_v29  ;;  %v5538_v35 = vmax.f32 %v5304_v9, 0.0 }
 0x678   : > { %v5537_v28 = vmax.f32 %v5299_v45, 0.0  ;;  %v12387_v13 = vpop.f32.mrb[182].mxu0 }
 0x679   : > { %v5314_v37 = vadd.f32 %v12387_v13, %v16147_v16  ;;  %v5308_v50 = vpop.f32.mrb[183].mxu0 }
 0x67a   : > { %v5309_v31 = vadd.f32 %v16147_v16, %v5308_v50  ;;  %12494 = vmatprep.mubr.msk.f32.mxu1 %vm561_vm0, %v5537_v28 }
 0x67b   : > { %12495 = vmatmul.mubr.msk.f32.gmra.mrb[244].mxu1 %vm561_vm0, %v5538_v35  ;;  %v5540_v12 = vmax.f32 %v5314_v37, 0.0 }
 0x67c   : > { %v5539_v14 = vmax.f32 %v5309_v31, 0.0  ;;  %v12390_v42 = vpop.f32.mrb[184].mxu0 }
 0x67d   : > { %v5324_v61 = vadd.f32 %v12390_v42, %v16147_v16  ;;  %v5318_v60 = vpop.f32.mrb[185].mxu0 }
 0x67e   : > { %v5319_v57 = vadd.f32 %v16147_v16, %v5318_v60  ;;  %12497 = vmatprep.mubr.msk.f32.mxu1 %vm561_vm0, %v5539_v14 }
 0x67f   : > { %12498 = vmatmul.mubr.msk.f32.gmra.mrb[246].mxu1 %vm561_vm0, %v5540_v12  ;;  %v5542_v46 = vmax.f32 %v5324_v61, 0.0 }
 0x680   : > { %v5541_v29 = vmax.f32 %v5319_v57, 0.0  ;;  %v12393_v9 = vpop.f32.mrb[186].mxu0 }
 0x681   : > { %v5334_v45 = vadd.f32 %v12393_v9, %v16147_v16  ;;  %v5328_v28 = vpop.f32.mrb[187].mxu0 }
 0x682   : > { %v5329_v13 = vadd.f32 %v16147_v16, %v5328_v28  ;;  %12500 = vmatprep.mubr.msk.f32.mxu1 %vm561_vm0, %v5541_v29 }
 0x683   : > { %12501 = vmatmul.mubr.msk.f32.gmra.mrb[248].mxu1 %vm561_vm0, %v5542_v46  ;;  %v5544_v50 = vmax.f32 %v5334_v45, 0.0 }
 0x684   : > { %v5543_v35 = vmax.f32 %v5329_v13, 0.0  ;;  %v12396_v37 = vpop.f32.mrb[188].mxu0 }
 0x685   : > { %v5344_v31 = vadd.f32 %v12396_v37, %v16147_v16  ;;  %v5338_v14 = vpop.f32.mrb[189].mxu0 }
 0x686   : > { %v5339_v42 = vadd.f32 %v16147_v16, %v5338_v14  ;;  %12503 = vmatprep.mubr.msk.f32.mxu1 %vm561_vm0, %v5543_v35 }
 0x687   : > { %12504 = vmatmul.mubr.msk.f32.gmra.mrb[250].mxu1 %vm561_vm0, %v5544_v50  ;;  %v5546_v60 = vmax.f32 %v5344_v31, 0.0 }
 0x688   : > { %v5545_v12 = vmax.f32 %v5339_v42, 0.0  ;;  %v12399_v61 = vpop.f32.mrb[190].mxu0 }
 0x689   : > { %v5354_v57 = vadd.f32 %v12399_v61, %v16147_v16  ;;  %v5348_v29 = vpop.f32.mrb[191].mxu0 }
 0x68a   : > { %v5349_v9 = vadd.f32 %v16147_v16, %v5348_v29  ;;  %12506 = vmatprep.mubr.msk.f32.mxu1 %vm561_vm0, %v5545_v12 }
 0x68b   : > { %12507 = vmatmul.mubr.msk.f32.gmra.mrb[252].mxu1 %vm561_vm0, %v5546_v60  ;;  %v5548_v28 = vmax.f32 %v5354_v57, 0.0 }
 0x68c   : > { %v5547_v46 = vmax.f32 %v5349_v9, 0.0  ;;  %v12402_v45 = vpop.f32.mrb[192].mxu0 }
 0x68d   : > { %v5364_v13 = vadd.f32 %v12402_v45, %v16147_v16  ;;  %v5358_v35 = vpop.f32.mrb[193].mxu0 }
 0x68e   : > { %v5359_v37 = vadd.f32 %v16147_v16, %v5358_v35  ;;  %12509 = vmatprep.mubr.msk.f32.mxu1 %vm561_vm0, %v5547_v46 }
 0x68f   : > { %12510 = vmatmul.mubr.msk.f32.gmra.mrb[254].mxu1 %vm561_vm0, %v5548_v28  ;;  %v5550_v14 = vmax.f32 %v5364_v13, 0.0 }
 0x690   : > { %v5549_v50 = vmax.f32 %v5359_v37, 0.0  ;;  %v12405_v31 = vpop.f32.mrb[194].mxu0 }
 0x691   : > { %v5374_v42 = vadd.f32 %v12405_v31, %v16147_v16  ;;  %v5368_v12 = vpop.f32.mrb[195].mxu0 }
 0x692   : > { %v5369_v61 = vadd.f32 %v16147_v16, %v5368_v12  ;;  %12512 = vmatprep.mubr.msk.f32.mxu1 %vm561_vm0, %v5549_v50 }
 0x693   : > { %12513 = vmatmul.mubr.msk.f32.gmra.mrb[0].mxu1 %vm561_vm0, %v5550_v14  ;;  %v5552_v29 = vmax.f32 %v5374_v42, 0.0 }
 0x694   : > { %v5551_v60 = vmax.f32 %v5369_v61, 0.0  ;;  %v12408_v57 = vpop.f32.mrb[196].mxu0 }
 0x695   : > { %v5384_v9 = vadd.f32 %v12408_v57, %v16147_v16  ;;  %v5378_v46 = vpop.f32.mrb[197].mxu0 }
 0x696   : > { %v5379_v45 = vadd.f32 %v16147_v16, %v5378_v46  ;;  %12515 = vmatprep.mubr.msk.f32.mxu1 %vm561_vm0, %v5551_v60 }
 0x697   : > { %12516 = vmatmul.mubr.msk.f32.gmra.mrb[2].mxu1 %vm561_vm0, %v5552_v29  ;;  %v5554_v35 = vmax.f32 %v5384_v9, 0.0 }
 0x698   : > { %v5553_v28 = vmax.f32 %v5379_v45, 0.0  ;;  %v12411_v13 = vpop.f32.mrb[198].mxu0 }
 0x699   : > { %v5394_v37 = vadd.f32 %v12411_v13, %v16147_v16  ;;  %v5388_v50 = vpop.f32.mrb[199].mxu0 }
 0x69a   : > { %v5389_v31 = vadd.f32 %v16147_v16, %v5388_v50  ;;  %12518 = vmatprep.mubr.msk.f32.mxu1 %vm561_vm0, %v5553_v28 }
 0x69b   : > { %12519 = vmatmul.mubr.msk.f32.gmra.mrb[4].mxu1 %vm561_vm0, %v5554_v35  ;;  %v5556_v12 = vmax.f32 %v5394_v37, 0.0 }
 0x69c   : > { %v5555_v14 = vmax.f32 %v5389_v31, 0.0  ;;  %v12414_v42 = vpop.f32.mrb[200].mxu0 }
 0x69d   : > { %v5404_v61 = vadd.f32 %v12414_v42, %v16147_v16  ;;  %v5398_v60 = vpop.f32.mrb[201].mxu0 }
 0x69e   : > { %v5399_v57 = vadd.f32 %v16147_v16, %v5398_v60  ;;  %12521 = vmatprep.mubr.msk.f32.mxu1 %vm561_vm0, %v5555_v14 }
 0x69f   : > { %12522 = vmatmul.mubr.msk.f32.gmra.mrb[6].mxu1 %vm561_vm0, %v5556_v12  ;;  %v5558_v46 = vmax.f32 %v5404_v61, 0.0 }
 0x6a0   : > { %v5557_v29 = vmax.f32 %v5399_v57, 0.0  ;;  %v12417_v9 = vpop.f32.mrb[202].mxu0 }
 0x6a1   : > { %v5414_v45 = vadd.f32 %v12417_v9, %v16147_v16  ;;  %v5408_v28 = vpop.f32.mrb[203].mxu0 }
 0x6a2   : > { %v5409_v13 = vadd.f32 %v16147_v16, %v5408_v28  ;;  %12524 = vmatprep.mubr.msk.f32.mxu1 %vm561_vm0, %v5557_v29 }
 0x6a3   : > { %12525 = vmatmul.mubr.msk.f32.gmra.mrb[8].mxu1 %vm561_vm0, %v5558_v46  ;;  %v5560_v50 = vmax.f32 %v5414_v45, 0.0 }
 0x6a4   : > { %v5559_v35 = vmax.f32 %v5409_v13, 0.0  ;;  %v12420_v37 = vpop.f32.mrb[204].mxu0 }
 0x6a5   : > { %v5424_v31 = vadd.f32 %v12420_v37, %v16147_v16  ;;  %v5418_v14 = vpop.f32.mrb[205].mxu0 }
 0x6a6   : > { %v5419_v42 = vadd.f32 %v16147_v16, %v5418_v14  ;;  %12527 = vmatprep.mubr.msk.f32.mxu1 %vm561_vm0, %v5559_v35 }
 0x6a7   : > { %12528 = vmatmul.mubr.msk.f32.gmra.mrb[10].mxu1 %vm561_vm0, %v5560_v50  ;;  %v5562_v60 = vmax.f32 %v5424_v31, 0.0 }
 0x6a8   : > { %v5561_v12 = vmax.f32 %v5419_v42, 0.0  ;;  %v12423_v61 = vpop.f32.mrb[206].mxu0 }
 0x6a9   : > { %v5434_v57 = vadd.f32 %v12423_v61, %v16147_v16  ;;  %v5428_v29 = vpop.f32.mrb[207].mxu0 }
 0x6aa   : > { %v5429_v9 = vadd.f32 %v16147_v16, %v5428_v29  ;;  %12530 = vmatprep.mubr.msk.f32.mxu1 %vm561_vm0, %v5561_v12 }
 0x6ab   : > { %12531 = vmatmul.mubr.msk.f32.gmra.mrb[12].mxu1 %vm561_vm0, %v5562_v60  ;;  %v5564_v28 = vmax.f32 %v5434_v57, 0.0 }
 0x6ac   : > { %v5563_v46 = vmax.f32 %v5429_v9, 0.0  ;;  %v12426_v45 = vpop.f32.mrb[208].mxu0 }
 0x6ad   : > { %v5444_v13 = vadd.f32 %v12426_v45, %v16147_v16  ;;  %v5438_v35 = vpop.f32.mrb[209].mxu0 }
 0x6ae   : > { %v5439_v37 = vadd.f32 %v16147_v16, %v5438_v35  ;;  %12533 = vmatprep.mubr.msk.f32.mxu1 %vm561_vm0, %v5563_v46 }
 0x6af   : > { %12534 = vmatmul.mubr.msk.f32.gmra.mrb[14].mxu1 %vm561_vm0, %v5564_v28  ;;  %v5566_v14 = vmax.f32 %v5444_v13, 0.0 }
 0x6b0   : > { %v5565_v50 = vmax.f32 %v5439_v37, 0.0  ;;  %v12429_v31 = vpop.f32.mrb[210].mxu0 }
 0x6b1   : > { %v5454_v42 = vadd.f32 %v12429_v31, %v16147_v16  ;;  %v5448_v12 = vpop.f32.mrb[211].mxu0 }
 0x6b2   : > { %v5449_v61 = vadd.f32 %v16147_v16, %v5448_v12  ;;  %12536 = vmatprep.mubr.msk.f32.mxu1 %vm561_vm0, %v5565_v50 }
 0x6b3   : > { %12537 = vmatmul.mubr.msk.f32.gmra.mrb[16].mxu1 %vm561_vm0, %v5566_v14  ;;  %v5568_v29 = vmax.f32 %v5454_v42, 0.0 }
 0x6b4   : > { %v5567_v60 = vmax.f32 %v5449_v61, 0.0  ;;  %v12432_v57 = vpop.f32.mrb[212].mxu0 }
 0x6b5   : > { %v5464_v9 = vadd.f32 %v12432_v57, %v16147_v16  ;;  %v5458_v46 = vpop.f32.mrb[213].mxu0 }
 0x6b6   : > { %v5459_v45 = vadd.f32 %v16147_v16, %v5458_v46  ;;  %12539 = vmatprep.mubr.msk.f32.mxu1 %vm561_vm0, %v5567_v60 }
 0x6b7   : > { %12540 = vmatmul.mubr.msk.f32.gmra.mrb[18].mxu1 %vm561_vm0, %v5568_v29  ;;  %v5570_v35 = vmax.f32 %v5464_v9, 0.0 }
 0x6b8   : > { %v5569_v28 = vmax.f32 %v5459_v45, 0.0  ;;  %v12435_v13 = vpop.f32.mrb[214].mxu0 }
 0x6b9   : > { %v5474_v37 = vadd.f32 %v12435_v13, %v16147_v16  ;;  %v5468_v50 = vpop.f32.mrb[215].mxu0 }
 0x6ba   : > { %v5469_v31 = vadd.f32 %v16147_v16, %v5468_v50  ;;  %12542 = vmatprep.mubr.msk.f32.mxu1 %vm561_vm0, %v5569_v28 }
 0x6bb   : > { %12543 = vmatmul.mubr.msk.f32.gmra.mrb[20].mxu1 %vm561_vm0, %v5570_v35  ;;  %v5572_v12 = vmax.f32 %v5474_v37, 0.0 }
 0x6bc   : > { %v5571_v14 = vmax.f32 %v5469_v31, 0.0  ;;  %v12438_v42 = vpop.f32.mrb[216].mxu0 }
 0x6bd   : > { %v5484_v61 = vadd.f32 %v12438_v42, %v16147_v16  ;;  %v5478_v60 = vpop.f32.mrb[217].mxu0 }
 0x6be   : > { %v5479_v57 = vadd.f32 %v16147_v16, %v5478_v60  ;;  %12545 = vmatprep.mubr.msk.f32.mxu1 %vm561_vm0, %v5571_v14 }
 0x6bf   : > { %12546 = vmatmul.mubr.msk.f32.gmra.mrb[22].mxu1 %vm561_vm0, %v5572_v12  ;;  %v5574_v46 = vmax.f32 %v5484_v61, 0.0 }
 0x6c0   : > { %v5573_v29 = vmax.f32 %v5479_v57, 0.0  ;;  %v12441_v9 = vpop.f32.mrb[218].mxu0 }
 0x6c1   : > { %v5494_v45 = vadd.f32 %v12441_v9, %v16147_v16  ;;  %v5488_v28 = vpop.f32.mrb[219].mxu0 }
 0x6c2   : > { %v5489_v13 = vadd.f32 %v16147_v16, %v5488_v28  ;;  %12548 = vmatprep.mubr.msk.f32.mxu1 %vm561_vm0, %v5573_v29  ;;  %v7042_v28 = vld [vmem:[#allocation2 + $0x100] sm:$0xff] }
 0x6c3   : > { %12549 = vmatmul.mubr.msk.f32.gmra.mrb[24].mxu1 %vm561_vm0, %v5574_v46  ;;  %v5576_v50 = vmax.f32 %v5494_v45, 0.0 }
 0x6c4   : > { %v5575_v35 = vmax.f32 %v5489_v13, 0.0  ;;  %v12444_v37 = vpop.f32.mrb[220].mxu0  ;;  %v7043_v13 = vld [vmem:[#allocation2 + $0x108] sm:$0xff] }
 0x6c5   : > { %v5504_v31 = vadd.f32 %v12444_v37, %v16147_v16  ;;  %v5498_v14 = vpop.f32.mrb[221].mxu0  ;;  %v18840_v37 = vld [vmem:[#allocation9_spill] sm:$0xff] }
 0x6c6   : > { %v5499_v42 = vadd.f32 %v16147_v16, %v5498_v14  ;;  %12551 = vmatprep.mubr.msk.f32.mxu1 %vm561_vm0, %v5575_v35  ;;  %v13040_v35 = vpack.c.bf16 %v7043_v13, %v7042_v28  ;;  %v7045_v28 = vld [vmem:[#allocation2 + $0x118] sm:$0xff] }
 0x6c7   : > { %12552 = vmatmul.mubr.msk.f32.gmra.mrb[26].mxu1 %vm561_vm0, %v5576_v50  ;;  %v5578_v60 = vmax.f32 %v5504_v31, 0.0  ;;  %v16296_v50 = vsub.s32 4, %v18840_v37 }
 0x6c8   : > { %v5577_v12 = vmax.f32 %v5499_v42, 0.0  ;;  %v12447_v61 = vpop.f32.mrb[222].mxu0  ;;  %13041 = vmatprep.subr.bf16.mxu1 %v13040_v35  ;;  %v13418_v42 = vld [vmem:[%s13687_s28] sm:$0x1f] }
 0x6c9   : > { %v5514_v57 = vadd.f32 %v12447_v61, %v16147_v16  ;;  %v5508_v29 = vpop.f32.mrb[223].mxu0  ;;  %13043 = vmatpush3.bf16.msra.mxu1 %v13040_v35 }
 0x6ca   : > { %v5509_v9 = vadd.f32 %v16147_v16, %v5508_v29  ;;  %12554 = vmatprep.mubr.msk.f32.mxu1 %vm561_vm0, %v5577_v12  ;;  %v16301_v16 = vld [vmem:[%s18502_s5 + $0x3] ss:$0 sm:$0xff]  ;;  %v16306_v12 = vrot.slane %v13418_v42, %v16296_v50  ;;  %v18841_v29 = vld [vmem:[#allocation50_spill] sm:$0xff] }
 0x6cb   : > { %12555 = vmatmul.mubr.msk.f32.gmra.mrb[28].mxu1 %vm561_vm0, %v5578_v60  ;;  %v5580_v45 = vmax.f32 %v5514_v57, 0.0 }
 0x6cc   : > { %v5579_v46 = vmax.f32 %v5509_v9, 0.0 }
 0x6ce   : > { %12557 = vmatprep.mubr.msk.f32.mxu1 %vm561_vm0, %v5579_v46 }
 0x6cf   : > { %12558 = vmatmul.mubr.msk.f32.gmra.mrb[30].mxu1 %vm561_vm0, %v5580_v45  ;;  %v7044_v45 = vld [vmem:[#allocation2 + $0x110] sm:$0xff] }
 0x726   : > { %v12466_v31 = vpop.f32.mrb[224].mxu1 }
 0x727   : > { %v5862_v14 = vadd.f32 %v12466_v31, %v16301_v16  ;;  %v5856_v61 = vpop.f32.mrb[225].mxu1  ;;  %v13044_v31 = vpack.c.bf16 %v7045_v28, %v7044_v45 }
 0x728   : > { %v5857_v60 = vadd.f32 %v16301_v16, %v5856_v61 }
 0x729   : > { %v6176_v57 = vadd.f32 %v5862_v14, %v15683_v23  ;;  %13045 = vmatprep.subr.bf16.mxu1 %v13044_v31  ;;  %v7046_v23 = vld [vmem:[#allocation2 + $0x120] sm:$0xff]  ;;  %v7047_v14 = vld [vmem:[#allocation2 + $0x128] sm:$0xff] }
 0x72a   : > { %v6175_v9 = vadd.f32 %v5857_v60, %v18841_v29  ;;  %v12469_v46 = vpop.f32.mrb[226].mxu1  ;;  %v7048_v60 = vld [vmem:[#allocation2 + $0x130] sm:$0xff]  ;;  %13047 = vmatpush3.bf16.msra.mxu1 %v13044_v31 }
 0x72b   : > { %v16312_v13 = vadd.f32 %v16306_v12, %v6176_v57  ;;  %v5872_v35 = vadd.f32 %v12469_v46, %v16301_v16  ;;  %v5866_v37 = vpop.f32.mrb[227].mxu1  ;;  %v13048_v46 = vpack.c.bf16 %v7047_v14, %v7046_v23 }
 0x72c   : > { %v16316_v42 = vadd.f32 %v16306_v12, %v6175_v9  ;;  %v5867_v41 = vadd.f32 %v16301_v16, %v5866_v37 }
 0x72d   : > { %v6178_v61 = vadd.f32 %v5872_v35, %v15695_v6  ;;  %v6320_v45 = vmax.f32 %v16312_v13, 0.0  ;;  %v13052_v35 = vpack.c.bf16 %v7049_v38, %v7048_v60  ;;  %13049 = vmatprep.subr.bf16.mxu1 %v13048_v46 }
 0x72e   : > { %18842 = vst [vmem:[#allocation18_spill] sm:$0xff] %v16316_v42  ;;  %v6319_v29 = vmax.f32 %v16316_v42, 0.0  ;;  %v6177_v57 = vadd.f32 %v5867_v41, %v15699_v58  ;;  %v12472_v63 = vpop.f32.mrb[228].mxu1  ;;  %13051 = vmatpush3.bf16.msra.mxu1 %v13048_v46 }
 0x72f   : > { %v16324_v9 = vadd.f32 %v16306_v12, %v6178_v61  ;;  %v5882_v28 = vadd.f32 %v12472_v63, %v16301_v16  ;;  %v5876_v6 = vpop.f32.mrb[229].mxu1  ;;  %13053 = vmatprep.subr.bf16.mxu1 %v13052_v35 }
 0x730   : > { %v16328_v37 = vadd.f32 %v16306_v12, %v6177_v57  ;;  %v5877_v42 = vadd.f32 %v16301_v16, %v5876_v6  ;;  %12576 = vmatprep.mubr.msk.f32.mxu0 %vm561_vm0, %v6319_v29 }
 0x731   : > { %v6180_v58 = vadd.f32 %v5882_v28, %v15709_v55  ;;  %12577 = vmatmul.mubr.msk.f32.vlgmr.msra.gmra.mrb[224].mxu0 %vm561_vm0, %v6320_v45  ;;  %v6322_v38 = vmax.f32 %v16324_v9, 0.0 }
 0x732   : > { %v6321_v41 = vmax.f32 %v16328_v37, 0.0  ;;  %v6179_v31 = vadd.f32 %v5877_v42, %v15713_v25  ;;  %v12475_v61 = vpop.f32.mrb[230].mxu1  ;;  %13055 = vmatpush3.bf16.msra.mxu1 %v13052_v35 }
 0x733   : > { %v16338_v63 = vadd.f32 %v16306_v12, %v6180_v58  ;;  %v5892_v23 = vadd.f32 %v12475_v61, %v16301_v16  ;;  %v5886_v14 = vpop.f32.mrb[231].mxu1 }
 0x734   : > { %v16342_v60 = vadd.f32 %v16306_v12, %v6179_v31  ;;  %v5887_v55 = vadd.f32 %v16301_v16, %v5886_v14  ;;  %12579 = vmatprep.mubr.msk.f32.mxu0 %vm561_vm0, %v6321_v41 }
 0x735   : > { %v6182_v25 = vadd.f32 %v5892_v23, %v15723_v44  ;;  %12580 = vmatmul.mubr.msk.f32.gmra.mrb[226].mxu0 %vm561_vm0, %v6322_v38  ;;  %v6324_v46 = vmax.f32 %v16338_v63, 0.0 }
 0x736   : > { %v6323_v42 = vmax.f32 %v16342_v60, 0.0  ;;  %v6181_v29 = vadd.f32 %v5887_v55, %v15727_v53  ;;  %v12478_v57 = vpop.f32.mrb[232].mxu1 }
 0x737   : > { %v16352_v45 = vadd.f32 %v16306_v12, %v6182_v25  ;;  %v5902_v28 = vadd.f32 %v12478_v57, %v16301_v16  ;;  %v5896_v6 = vpop.f32.mrb[233].mxu1 }
 0x738   : > { %v16356_v58 = vadd.f32 %v16306_v12, %v6181_v29  ;;  %v5897_v44 = vadd.f32 %v16301_v16, %v5896_v6  ;;  %12582 = vmatprep.mubr.msk.f32.mxu0 %vm561_vm0, %v6323_v42 }
 0x739   : > { %v6184_v41 = vadd.f32 %v5902_v28, %v15737_v34  ;;  %12583 = vmatmul.mubr.msk.f32.gmra.mrb[228].mxu0 %vm561_vm0, %v6324_v46  ;;  %v6326_v61 = vmax.f32 %v16352_v45, 0.0 }
 0x73a   : > { %v6325_v53 = vmax.f32 %v16356_v58, 0.0  ;;  %v6183_v35 = vadd.f32 %v5897_v44, %v15741_v62  ;;  %v12481_v31 = vpop.f32.mrb[234].mxu1 }
 0x73b   : > { %v16366_v38 = vadd.f32 %v16306_v12, %v6184_v41  ;;  %v5912_v23 = vadd.f32 %v12481_v31, %v16301_v16  ;;  %v5906_v14 = vpop.f32.mrb[235].mxu1 }
 0x73c   : > { %v16370_v55 = vadd.f32 %v16306_v12, %v6183_v35  ;;  %v5907_v34 = vadd.f32 %v16301_v16, %v5906_v14  ;;  %12585 = vmatprep.mubr.msk.f32.mxu0 %vm561_vm0, %v6325_v53 }
 0x73d   : > { %v6186_v25 = vadd.f32 %v5912_v23, %v15751_v30  ;;  %12586 = vmatmul.mubr.msk.f32.gmra.mrb[230].mxu0 %vm561_vm0, %v6326_v61  ;;  %v6328_v57 = vmax.f32 %v16366_v38, 0.0 }
 0x73e   : > { %v6327_v62 = vmax.f32 %v16370_v55, 0.0  ;;  %v6185_v42 = vadd.f32 %v5907_v34, %v15755_v11  ;;  %v12484_v29 = vpop.f32.mrb[236].mxu1 }
 0x73f   : > { %v16380_v46 = vadd.f32 %v16306_v12, %v6186_v25  ;;  %v5922_v28 = vadd.f32 %v12484_v29, %v16301_v16  ;;  %v5916_v6 = vpop.f32.mrb[237].mxu1 }
 0x740   : > { %v16384_v44 = vadd.f32 %v16306_v12, %v6185_v42  ;;  %v5917_v30 = vadd.f32 %v16301_v16, %v5916_v6  ;;  %12588 = vmatprep.mubr.msk.f32.mxu0 %vm561_vm0, %v6327_v62  ;;  %v13419_v6 = vld [vmem:[%s13687_s28 + $0x8] sm:$0x1f] }
 0x741   : > { %v6188_v41 = vadd.f32 %v5922_v28, %v15765_v40  ;;  %12589 = vmatmul.mubr.msk.f32.gmra.mrb[232].mxu0 %vm561_vm0, %v6328_v57  ;;  %v6330_v31 = vmax.f32 %v16380_v46, 0.0 }
 0x742   : > { %v6329_v11 = vmax.f32 %v16384_v44, 0.0  ;;  %v6187_v53 = vadd.f32 %v5917_v30, %v15769_v1  ;;  %v12487_v35 = vpop.f32.mrb[238].mxu1  ;;  %v16413_v30 = vrot.slane %v13419_v6, %v16296_v50 }
 0x743   : > { %v16394_v61 = vadd.f32 %v16306_v12, %v6188_v41  ;;  %v5932_v23 = vadd.f32 %v12487_v35, %v16301_v16  ;;  %v5926_v14 = vpop.f32.mrb[239].mxu1 }
 0x744   : > { %v16398_v34 = vadd.f32 %v16306_v12, %v6187_v53  ;;  %v5927_v40 = vadd.f32 %v16301_v16, %v5926_v14  ;;  %12591 = vmatprep.mubr.msk.f32.mxu0 %vm561_vm0, %v6329_v11 }
 0x745   : > { %v6190_v25 = vadd.f32 %v5932_v23, %v15779_v3  ;;  %12592 = vmatmul.mubr.msk.f32.gmra.mrb[234].mxu0 %vm561_vm0, %v6330_v31  ;;  %v6332_v29 = vmax.f32 %v16394_v61, 0.0 }
 0x746   : > { %v6331_v1 = vmax.f32 %v16398_v34, 0.0  ;;  %v6189_v62 = vadd.f32 %v5927_v40, %v15787_v17  ;;  %v12490_v42 = vpop.f32.mrb[240].mxu1 }
 0x747   : > { %v16408_v57 = vadd.f32 %v16306_v12, %v6190_v25  ;;  %v5942_v28 = vadd.f32 %v12490_v42, %v16301_v16  ;;  %v5936_v41 = vpop.f32.mrb[241].mxu1 }
 0x748   : > { %v16416_v3 = vadd.f32 %v16306_v12, %v6189_v62  ;;  %v5937_v11 = vadd.f32 %v16301_v16, %v5936_v41  ;;  %12594 = vmatprep.mubr.msk.f32.mxu0 %vm561_vm0, %v6331_v1 }
 0x749   : > { %v6192_v17 = vadd.f32 %v5942_v28, %v15797_v5  ;;  %12595 = vmatmul.mubr.msk.f32.gmra.mrb[236].mxu0 %vm561_vm0, %v6332_v29  ;;  %v6334_v23 = vmax.f32 %v16408_v57, 0.0 }
 0x74a   : > { %v6333_v53 = vmax.f32 %v16416_v3, 0.0  ;;  %v6191_v35 = vadd.f32 %v5937_v11, %v15801_v47  ;;  %v12493_v31 = vpop.f32.mrb[242].mxu1 }
 0x74b   : > { %v16426_v14 = vadd.f32 %v16413_v30, %v6192_v17  ;;  %v5952_v12 = vadd.f32 %v12493_v31, %v16301_v16  ;;  %v5946_v40 = vpop.f32.mrb[243].mxu1 }
 0x74c   : > { %v16430_v25 = vadd.f32 %v16413_v30, %v6191_v35  ;;  %v5947_v5 = vadd.f32 %v16301_v16, %v5946_v40  ;;  %12597 = vmatprep.mubr.msk.f32.mxu0 %vm561_vm0, %v6333_v53 }
 0x74d   : > { %v6194_v1 = vadd.f32 %v5952_v12, %v15811_v59  ;;  %12598 = vmatmul.mubr.msk.f32.gmra.mrb[238].mxu0 %vm561_vm0, %v6334_v23  ;;  %v6336_v29 = vmax.f32 %v16426_v14, 0.0 }
 0x74e   : > { %v6335_v47 = vmax.f32 %v16430_v25, 0.0  ;;  %v6193_v62 = vadd.f32 %v5947_v5, %v15815_v20  ;;  %v12496_v42 = vpop.f32.mrb[244].mxu1 }
 0x74f   : > { %v16440_v28 = vadd.f32 %v16413_v30, %v6194_v1  ;;  %v5962_v6 = vadd.f32 %v12496_v42, %v16301_v16  ;;  %v5956_v41 = vpop.f32.mrb[245].mxu1 }
 0x750   : > { %v16444_v11 = vadd.f32 %v16413_v30, %v6193_v62  ;;  %v5957_v59 = vadd.f32 %v16301_v16, %v5956_v41  ;;  %12600 = vmatprep.mubr.msk.f32.mxu0 %vm561_vm0, %v6335_v47 }
 0x751   : > { %v6196_v17 = vadd.f32 %v5962_v6, %v15825_v24  ;;  %12601 = vmatmul.mubr.msk.f32.gmra.mrb[240].mxu0 %vm561_vm0, %v6336_v29  ;;  %v6338_v31 = vmax.f32 %v16440_v28, 0.0 }
 0x752   : > { %v6337_v20 = vmax.f32 %v16444_v11, 0.0  ;;  %v6195_v53 = vadd.f32 %v5957_v59, %v15829_v0  ;;  %v12499_v35 = vpop.f32.mrb[246].mxu1 }
 0x753   : > { %v16454_v23 = vadd.f32 %v16413_v30, %v6196_v17  ;;  %v5972_v12 = vadd.f32 %v12499_v35, %v16301_v16  ;;  %v5966_v40 = vpop.f32.mrb[247].mxu1 }
 0x754   : > { %v16458_v5 = vadd.f32 %v16413_v30, %v6195_v53  ;;  %v5967_v24 = vadd.f32 %v16301_v16, %v5966_v40  ;;  %12603 = vmatprep.mubr.msk.f32.mxu0 %vm561_vm0, %v6337_v20 }
 0x755   : > { %v6198_v1 = vadd.f32 %v5972_v12, %v15839_v43  ;;  %12604 = vmatmul.mubr.msk.f32.gmra.mrb[242].mxu0 %vm561_vm0, %v6338_v31  ;;  %v6340_v42 = vmax.f32 %v16454_v23, 0.0 }
 0x756   : > { %v6339_v0 = vmax.f32 %v16458_v5, 0.0  ;;  %v6197_v47 = vadd.f32 %v5967_v24, %v15843_v22  ;;  %v12502_v62 = vpop.f32.mrb[248].mxu1 }
 0x757   : > { %v16468_v29 = vadd.f32 %v16413_v30, %v6198_v1  ;;  %v5982_v6 = vadd.f32 %v12502_v62, %v16301_v16  ;;  %v5976_v41 = vpop.f32.mrb[249].mxu1 }
 0x758   : > { %v16472_v59 = vadd.f32 %v16413_v30, %v6197_v47  ;;  %v5977_v43 = vadd.f32 %v16301_v16, %v5976_v41  ;;  %12606 = vmatprep.mubr.msk.f32.mxu0 %vm561_vm0, %v6339_v0 }
 0x759   : > { %v6200_v17 = vadd.f32 %v5982_v6, %v15853_v39  ;;  %12607 = vmatmul.mubr.msk.f32.gmra.mrb[244].mxu0 %vm561_vm0, %v6340_v42  ;;  %v6342_v35 = vmax.f32 %v16468_v29, 0.0 }
 0x75a   : > { %v6341_v22 = vmax.f32 %v16472_v59, 0.0  ;;  %v6199_v20 = vadd.f32 %v5977_v43, %v15857_v36  ;;  %v12505_v53 = vpop.f32.mrb[250].mxu1 }
 0x75b   : > { %v16482_v31 = vadd.f32 %v16413_v30, %v6200_v17  ;;  %v5992_v12 = vadd.f32 %v12505_v53, %v16301_v16  ;;  %v5986_v40 = vpop.f32.mrb[251].mxu1 }
 0x75c   : > { %v16486_v24 = vadd.f32 %v16413_v30, %v6199_v20  ;;  %v5987_v39 = vadd.f32 %v16301_v16, %v5986_v40  ;;  %12609 = vmatprep.mubr.msk.f32.mxu0 %vm561_vm0, %v6341_v22 }
 0x75d   : > { %v6202_v1 = vadd.f32 %v5992_v12, %v15867_v18  ;;  %12610 = vmatmul.mubr.msk.f32.gmra.mrb[246].mxu0 %vm561_vm0, %v6342_v35  ;;  %v6344_v62 = vmax.f32 %v16482_v31, 0.0 }
 0x75e   : > { %v6343_v36 = vmax.f32 %v16486_v24, 0.0  ;;  %v6201_v0 = vadd.f32 %v5987_v39, %v15871_v26  ;;  %v12508_v47 = vpop.f32.mrb[252].mxu1 }
 0x75f   : > { %v16496_v42 = vadd.f32 %v16413_v30, %v6202_v1  ;;  %v6002_v6 = vadd.f32 %v12508_v47, %v16301_v16  ;;  %v5996_v41 = vpop.f32.mrb[253].mxu1 }
 0x760   : > { %v16500_v43 = vadd.f32 %v16413_v30, %v6201_v0  ;;  %v5997_v18 = vadd.f32 %v16301_v16, %v5996_v41  ;;  %12612 = vmatprep.mubr.msk.f32.mxu0 %vm561_vm0, %v6343_v36  ;;  %v13420_v41 = vld [vmem:[%s13687_s28 + $0x10] sm:$0x1f] }
 0x761   : > { %v6204_v17 = vadd.f32 %v6002_v6, %v15881_v33  ;;  %12613 = vmatmul.mubr.msk.f32.gmra.mrb[248].mxu0 %vm561_vm0, %v6344_v62  ;;  %v6346_v53 = vmax.f32 %v16496_v42, 0.0 }
 0x762   : > { %v6345_v26 = vmax.f32 %v16500_v43, 0.0  ;;  %v6203_v22 = vadd.f32 %v5997_v18, %v15885_v15  ;;  %v12511_v20 = vpop.f32.mrb[254].mxu1  ;;  %v16529_v18 = vrot.slane %v13420_v41, %v16296_v50 }
 0x763   : > { %v16510_v35 = vadd.f32 %v16413_v30, %v6204_v17  ;;  %v6012_v12 = vadd.f32 %v12511_v20, %v16301_v16  ;;  %v6006_v40 = vpop.f32.mrb[255].mxu1 }
 0x764   : > { %v16514_v39 = vadd.f32 %v16413_v30, %v6203_v22  ;;  %v6007_v33 = vadd.f32 %v16301_v16, %v6006_v40  ;;  %12615 = vmatprep.mubr.msk.f32.mxu0 %vm561_vm0, %v6345_v26 }
 0x765   : > { %v6206_v1 = vadd.f32 %v6012_v12, %v15895_v21  ;;  %12616 = vmatmul.mubr.msk.f32.gmra.mrb[250].mxu0 %vm561_vm0, %v6346_v53  ;;  %v6348_v47 = vmax.f32 %v16510_v35, 0.0 }
 0x766   : > { %v6347_v15 = vmax.f32 %v16514_v39, 0.0  ;;  %v6205_v36 = vadd.f32 %v6007_v33, %v15903_v49  ;;  %v12514_v0 = vpop.f32.mrb[0].mxu1 }
 0x767   : > { %v16524_v62 = vadd.f32 %v16413_v30, %v6206_v1  ;;  %v6022_v6 = vadd.f32 %v12514_v0, %v16301_v16  ;;  %v6016_v17 = vpop.f32.mrb[1].mxu1 }
 0x768   : > { %v16532_v21 = vadd.f32 %v16413_v30, %v6205_v36  ;;  %v6017_v26 = vadd.f32 %v16301_v16, %v6016_v17  ;;  %12618 = vmatprep.mubr.msk.f32.mxu0 %vm561_vm0, %v6347_v15 }
 0x769   : > { %v6208_v49 = vadd.f32 %v6022_v6, %v15913_v19  ;;  %12619 = vmatmul.mubr.msk.f32.gmra.mrb[252].mxu0 %vm561_vm0, %v6348_v47  ;;  %v6350_v12 = vmax.f32 %v16524_v62, 0.0 }
 0x76a   : > { %v6349_v22 = vmax.f32 %v16532_v21, 0.0  ;;  %v6207_v20 = vadd.f32 %v6017_v26, %v15917_v54  ;;  %v12517_v53 = vpop.f32.mrb[2].mxu1 }
 0x76b   : > { %v16542_v40 = vadd.f32 %v16529_v18, %v6208_v49  ;;  %v6032_v30 = vadd.f32 %v12517_v53, %v16301_v16  ;;  %v6026_v33 = vpop.f32.mrb[3].mxu1 }
 0x76c   : > { %v16546_v1 = vadd.f32 %v16529_v18, %v6207_v20  ;;  %v6027_v19 = vadd.f32 %v16301_v16, %v6026_v33  ;;  %12621 = vmatprep.mubr.msk.f32.mxu0 %vm561_vm0, %v6349_v22 }
 0x76d   : > { %v6210_v15 = vadd.f32 %v6032_v30, %v15927_v4  ;;  %12622 = vmatmul.mubr.msk.f32.gmra.mrb[254].mxu0 %vm561_vm0, %v6350_v12  ;;  %v6352_v47 = vmax.f32 %v16542_v40, 0.0 }
 0x76e   : > { %v6351_v54 = vmax.f32 %v16546_v1, 0.0  ;;  %v6209_v36 = vadd.f32 %v6027_v19, %v15931_v51  ;;  %v12520_v0 = vpop.f32.mrb[4].mxu1 }
 0x76f   : > { %v16556_v6 = vadd.f32 %v16529_v18, %v6210_v15  ;;  %v6042_v41 = vadd.f32 %v12520_v0, %v16301_v16  ;;  %v6036_v17 = vpop.f32.mrb[5].mxu1 }
 0x770   : > { %v16560_v26 = vadd.f32 %v16529_v18, %v6209_v36  ;;  %v6037_v4 = vadd.f32 %v16301_v16, %v6036_v17  ;;  %12624 = vmatprep.mubr.msk.f32.mxu0 %vm561_vm0, %v6351_v54 }
 0x771   : > { %v6212_v49 = vadd.f32 %v6042_v41, %v15941_v32  ;;  %12625 = vmatmul.mubr.msk.f32.gmra.mrb[0].mxu0 %vm561_vm0, %v6352_v47  ;;  %v6354_v53 = vmax.f32 %v16556_v6, 0.0 }
 0x772   : > { %v6353_v51 = vmax.f32 %v16560_v26, 0.0  ;;  %v6211_v22 = vadd.f32 %v6037_v4, %v15945_v48  ;;  %v12523_v20 = vpop.f32.mrb[6].mxu1 }
 0x773   : > { %v16570_v12 = vadd.f32 %v16529_v18, %v6212_v49  ;;  %v6052_v30 = vadd.f32 %v12523_v20, %v16301_v16  ;;  %v6046_v33 = vpop.f32.mrb[7].mxu1 }
 0x774   : > { %v16574_v19 = vadd.f32 %v16529_v18, %v6211_v22  ;;  %v6047_v32 = vadd.f32 %v16301_v16, %v6046_v33  ;;  %12627 = vmatprep.mubr.msk.f32.mxu0 %vm561_vm0, %v6353_v51 }
 0x775   : > { %v6214_v15 = vadd.f32 %v6052_v30, %v15955_v56  ;;  %12628 = vmatmul.mubr.msk.f32.gmra.mrb[2].mxu0 %vm561_vm0, %v6354_v53  ;;  %v6356_v0 = vmax.f32 %v16570_v12, 0.0 }
 0x776   : > { %v6355_v48 = vmax.f32 %v16574_v19, 0.0  ;;  %v6213_v54 = vadd.f32 %v6047_v32, %v15959_v27  ;;  %v12526_v36 = vpop.f32.mrb[8].mxu1 }
 0x777   : > { %v16584_v47 = vadd.f32 %v16529_v18, %v6214_v15  ;;  %v6062_v41 = vadd.f32 %v12526_v36, %v16301_v16  ;;  %v6056_v17 = vpop.f32.mrb[9].mxu1 }
 0x778   : > { %v16588_v4 = vadd.f32 %v16529_v18, %v6213_v54  ;;  %v6057_v56 = vadd.f32 %v16301_v16, %v6056_v17  ;;  %12630 = vmatprep.mubr.msk.f32.mxu0 %vm561_vm0, %v6355_v48 }
 0x779   : > { %v6216_v49 = vadd.f32 %v6062_v41, %v15969_v10  ;;  %12631 = vmatmul.mubr.msk.f32.gmra.mrb[4].mxu0 %vm561_vm0, %v6356_v0  ;;  %v6358_v20 = vmax.f32 %v16584_v47, 0.0 }
 0x77a   : > { %v6357_v27 = vmax.f32 %v16588_v4, 0.0  ;;  %v6215_v51 = vadd.f32 %v6057_v56, %v15973_v52  ;;  %v12529_v22 = vpop.f32.mrb[10].mxu1 }
 0x77b   : > { %v16598_v53 = vadd.f32 %v16529_v18, %v6216_v49  ;;  %v6072_v30 = vadd.f32 %v12529_v22, %v16301_v16  ;;  %v6066_v33 = vpop.f32.mrb[11].mxu1 }
 0x77c   : > { %v16602_v32 = vadd.f32 %v16529_v18, %v6215_v51  ;;  %v6067_v10 = vadd.f32 %v16301_v16, %v6066_v33  ;;  %12633 = vmatprep.mubr.msk.f32.mxu0 %vm561_vm0, %v6357_v27  ;;  %v18843_v27 = vld [vmem:[#allocation49_spill] sm:$0xff] }
 0x77d   : > { %v6218_v15 = vadd.f32 %v6072_v30, %v15983_v7  ;;  %12634 = vmatmul.mubr.msk.f32.gmra.mrb[6].mxu0 %vm561_vm0, %v6358_v20  ;;  %v6360_v36 = vmax.f32 %v16598_v53, 0.0 }
 0x77e   : > { %v6359_v52 = vmax.f32 %v16602_v32, 0.0  ;;  %v6217_v48 = vadd.f32 %v6067_v10, %v15987_v2  ;;  %v12532_v54 = vpop.f32.mrb[12].mxu1 }
 0x77f   : > { %v16612_v0 = vadd.f32 %v16529_v18, %v6218_v15  ;;  %v6082_v41 = vadd.f32 %v12532_v54, %v16301_v16  ;;  %v6076_v17 = vpop.f32.mrb[13].mxu1 }
 0x780   : > { %v16616_v56 = vadd.f32 %v16529_v18, %v6217_v48  ;;  %v6077_v7 = vadd.f32 %v16301_v16, %v6076_v17  ;;  %12636 = vmatprep.mubr.msk.f32.mxu0 %vm561_vm0, %v6359_v52  ;;  %v18844_v52 = vld [vmem:[#allocation27_spill] sm:$0xff] }
 0x781   : > { %v6220_v49 = vadd.f32 %v6082_v41, %v15997_v8  ;;  %12637 = vmatmul.mubr.msk.f32.gmra.mrb[8].mxu0 %vm561_vm0, %v6360_v36  ;;  %v6362_v20 = vmax.f32 %v16612_v0, 0.0  ;;  %v18845_v36 = vld [vmem:[#allocation33_spill] sm:$0xff] }
 0x782   : > { %v6361_v2 = vmax.f32 %v16616_v56, 0.0  ;;  %v6219_v51 = vadd.f32 %v6077_v7, %v18843_v27  ;;  %v12535_v22 = vpop.f32.mrb[14].mxu1 }
 0x783   : > { %v16626_v30 = vadd.f32 %v16529_v18, %v6220_v49  ;;  %v6092_v33 = vadd.f32 %v12535_v22, %v16301_v16  ;;  %v6086_v10 = vpop.f32.mrb[15].mxu1 }
 0x784   : > { %v16630_v15 = vadd.f32 %v16529_v18, %v6219_v51  ;;  %v6087_v8 = vadd.f32 %v16301_v16, %v6086_v10  ;;  %12639 = vmatprep.mubr.msk.f32.mxu0 %vm561_vm0, %v6361_v2  ;;  %v13421_v51 = vld [vmem:[%s13687_s28 + $0x18] sm:$0x1f]  ;;  %v18848_v10 = vld [vmem:[#allocation30_spill] sm:$0xff] }
 0x785   : > { %v6222_v48 = vadd.f32 %v6092_v33, %v18844_v52  ;;  %12640 = vmatmul.mubr.msk.f32.gmra.mrb[10].mxu0 %vm561_vm0, %v6362_v20  ;;  %v6364_v7 = vmax.f32 %v16626_v30, 0.0  ;;  %v16645_v22 = vrot.slane %v13421_v51, %v16296_v50 }
 0x786   : > { %v6363_v54 = vmax.f32 %v16630_v15, 0.0  ;;  %v6221_v41 = vadd.f32 %v6087_v8, %v18845_v36  ;;  %v12538_v17 = vpop.f32.mrb[16].mxu1 }
 0x787   : > { %v16640_v49 = vadd.f32 %v16529_v18, %v6222_v48  ;;  %v6102_v27 = vadd.f32 %v12538_v17, %v16301_v16  ;;  %v6096_v2 = vpop.f32.mrb[17].mxu1  ;;  %v18849_v48 = vld [vmem:[#allocation37_spill] sm:$0xff] }
 0x788   : > { %v16648_v33 = vadd.f32 %v16529_v18, %v6221_v41  ;;  %v6097_v20 = vadd.f32 %v16301_v16, %v6096_v2  ;;  %12642 = vmatprep.mubr.msk.f32.mxu0 %vm561_vm0, %v6363_v54 }
 0x789   : > { %18846 = vst [vmem:[#allocation21_spill] sm:$0xff] %v16640_v49  ;;  %v6224_v8 = vadd.f32 %v6102_v27, %v18848_v10  ;;  %12643 = vmatmul.mubr.msk.f32.gmra.mrb[12].mxu0 %vm561_vm0, %v6364_v7  ;;  %v6366_v50 = vmax.f32 %v16640_v49, 0.0  ;;  %v18852_v7 = vld [vmem:[#allocation34_spill] sm:$0xff]  ;;  %v18853_v10 = vld [vmem:[#allocation41_spill] sm:$0xff] }
 0x78a   : > { %18847 = vst [vmem:[#allocation20_spill] sm:$0xff] %v16648_v33  ;;  %v6365_v52 = vmax.f32 %v16648_v33, 0.0  ;;  %v6223_v36 = vadd.f32 %v6097_v20, %v18849_v48  ;;  %v12541_v17 = vpop.f32.mrb[18].mxu1 }
 0x78b   : > { %v16658_v51 = vadd.f32 %v16645_v22, %v6224_v8  ;;  %v6112_v18 = vadd.f32 %v12541_v17, %v16301_v16  ;;  %v6106_v41 = vpop.f32.mrb[19].mxu1 }
 0x78c   : > { %v16662_v2 = vadd.f32 %v16645_v22, %v6223_v36  ;;  %v6107_v54 = vadd.f32 %v16301_v16, %v6106_v41  ;;  %12645 = vmatprep.mubr.msk.f32.mxu0 %vm561_vm0, %v6365_v52 }
 0x78d   : > { %18850 = vst [vmem:[#allocation23_spill] sm:$0xff] %v16658_v51  ;;  %v6226_v27 = vadd.f32 %v6112_v18, %v18852_v7  ;;  %12646 = vmatmul.mubr.msk.f32.gmra.mrb[14].mxu0 %vm561_vm0, %v6366_v50  ;;  %v6368_v33 = vmax.f32 %v16658_v51, 0.0  ;;  %v18856_v50 = vld [vmem:[#allocation38_spill] sm:$0xff]  ;;  %v18857_v7 = vld [vmem:[#allocation45_spill] sm:$0xff] }
 0x78e   : > { %18851 = vst [vmem:[#allocation22_spill] sm:$0xff] %v16662_v2  ;;  %v6367_v20 = vmax.f32 %v16662_v2, 0.0  ;;  %v6225_v48 = vadd.f32 %v6107_v54, %v18853_v10  ;;  %v12544_v8 = vpop.f32.mrb[20].mxu1 }
 0x78f   : > { %v16672_v17 = vadd.f32 %v16645_v22, %v6226_v27  ;;  %v6122_v36 = vadd.f32 %v12544_v8, %v16301_v16  ;;  %v6116_v49 = vpop.f32.mrb[21].mxu1 }
 0x790   : > { %v16676_v41 = vadd.f32 %v16645_v22, %v6225_v48  ;;  %v6117_v52 = vadd.f32 %v16301_v16, %v6116_v49  ;;  %12648 = vmatprep.mubr.msk.f32.mxu0 %vm561_vm0, %v6367_v20 }
 0x791   : > { %18854 = vst [vmem:[#allocation25_spill] sm:$0xff] %v16672_v17  ;;  %v6228_v18 = vadd.f32 %v6122_v36, %v18856_v50  ;;  %12649 = vmatmul.mubr.msk.f32.gmra.mrb[16].mxu0 %vm561_vm0, %v6368_v33  ;;  %v6370_v2 = vmax.f32 %v16672_v17, 0.0  ;;  %v18860_v33 = vld [vmem:[#allocation42_spill] sm:$0xff]  ;;  %v18861_v50 = vld [vmem:[#allocation11_spill] sm:$0xff] }
 0x792   : > { %18855 = vst [vmem:[#allocation24_spill] sm:$0xff] %v16676_v41  ;;  %v6369_v54 = vmax.f32 %v16676_v41, 0.0  ;;  %v6227_v10 = vadd.f32 %v6117_v52, %v18857_v7  ;;  %v12547_v27 = vpop.f32.mrb[22].mxu1 }
 0x793   : > { %v16686_v8 = vadd.f32 %v16645_v22, %v6228_v18  ;;  %v6132_v48 = vadd.f32 %v12547_v27, %v16301_v16  ;;  %v6126_v51 = vpop.f32.mrb[23].mxu1 }
 0x794   : > { %v16690_v49 = vadd.f32 %v16645_v22, %v6227_v10  ;;  %v6127_v20 = vadd.f32 %v16301_v16, %v6126_v51  ;;  %12651 = vmatprep.mubr.msk.f32.mxu0 %vm561_vm0, %v6369_v54 }
 0x795   : > { %18858 = vst [vmem:[#allocation28_spill] sm:$0xff] %v16686_v8  ;;  %v6230_v36 = vadd.f32 %v6132_v48, %v18860_v33  ;;  %12652 = vmatmul.mubr.msk.f32.gmra.mrb[18].mxu0 %vm561_vm0, %v6370_v2  ;;  %v6372_v41 = vmax.f32 %v16686_v8, 0.0  ;;  %v18864_v2 = vld [vmem:[#allocation10_spill] sm:$0xff]  ;;  %v18865_v33 = vld [vmem:[#allocation13_spill] sm:$0xff] }
 0x796   : > { %18859 = vst [vmem:[#allocation26_spill] sm:$0xff] %v16690_v49  ;;  %v6371_v52 = vmax.f32 %v16690_v49, 0.0  ;;  %v6229_v7 = vadd.f32 %v6127_v20, %v18861_v50  ;;  %v12550_v18 = vpop.f32.mrb[24].mxu1 }
 0x797   : > { %v16700_v27 = vadd.f32 %v16645_v22, %v6230_v36  ;;  %v6142_v10 = vadd.f32 %v12550_v18, %v16301_v16  ;;  %v6136_v17 = vpop.f32.mrb[25].mxu1 }
 0x798   : > { %v16704_v51 = vadd.f32 %v16645_v22, %v6229_v7  ;;  %v6137_v54 = vadd.f32 %v16301_v16, %v6136_v17  ;;  %12654 = vmatprep.mubr.msk.f32.mxu0 %vm561_vm0, %v6371_v52 }
 0x799   : > { %18862 = vst [vmem:[#allocation31_spill] sm:$0xff] %v16700_v27  ;;  %v6232_v48 = vadd.f32 %v6142_v10, %v18864_v2  ;;  %12655 = vmatmul.mubr.msk.f32.gmra.mrb[20].mxu0 %vm561_vm0, %v6372_v41  ;;  %v6374_v49 = vmax.f32 %v16700_v27, 0.0  ;;  %v18868_v41 = vld [vmem:[#allocation12_spill] sm:$0xff]  ;;  %v18869_v2 = vld [vmem:[#allocation15_spill] sm:$0xff] }
 0x79a   : > { %18863 = vst [vmem:[#allocation29_spill] sm:$0xff] %v16704_v51  ;;  %v6373_v20 = vmax.f32 %v16704_v51, 0.0  ;;  %v6231_v50 = vadd.f32 %v6137_v54, %v18865_v33  ;;  %v12553_v36 = vpop.f32.mrb[26].mxu1 }
 0x79b   : > { %v16714_v18 = vadd.f32 %v16645_v22, %v6232_v48  ;;  %v6152_v7 = vadd.f32 %v12553_v36, %v16301_v16  ;;  %v6146_v8 = vpop.f32.mrb[27].mxu1 }
 0x79c   : > { %v16718_v17 = vadd.f32 %v16645_v22, %v6231_v50  ;;  %v6147_v52 = vadd.f32 %v16301_v16, %v6146_v8  ;;  %12657 = vmatprep.mubr.msk.f32.mxu0 %vm561_vm0, %v6373_v20 }
 0x79d   : > { %18866 = vst [vmem:[#allocation35_spill] sm:$0xff] %v16714_v18  ;;  %v6234_v10 = vadd.f32 %v6152_v7, %v18868_v41  ;;  %12658 = vmatmul.mubr.msk.f32.gmra.mrb[22].mxu0 %vm561_vm0, %v6374_v49  ;;  %v6376_v51 = vmax.f32 %v16714_v18, 0.0  ;;  %v18871_v49 = vld [vmem:[#allocation14_spill] sm:$0xff]  ;;  %v18872_v41 = vld [vmem:[#allocation17_spill] sm:$0xff] }
 0x79e   : > { %18867 = vst [vmem:[#allocation32_spill] sm:$0xff] %v16718_v17  ;;  %v6375_v54 = vmax.f32 %v16718_v17, 0.0  ;;  %v6233_v33 = vadd.f32 %v6147_v52, %v18869_v2  ;;  %v12556_v48 = vpop.f32.mrb[28].mxu1 }
 0x79f   : > { %v16728_v36 = vadd.f32 %v16645_v22, %v6234_v10  ;;  %v6162_v50 = vadd.f32 %v12556_v48, %v16301_v16  ;;  %v6156_v27 = vpop.f32.mrb[29].mxu1 }
 0x7a0   : > { %v16732_v8 = vadd.f32 %v16645_v22, %v6233_v33  ;;  %v6157_v20 = vadd.f32 %v16301_v16, %v6156_v27  ;;  %12660 = vmatprep.mubr.msk.f32.mxu0 %vm561_vm0, %v6375_v54 }
 0x7a1   : > { %v6236_v7 = vadd.f32 %v6162_v50, %v18871_v49  ;;  %12661 = vmatmul.mubr.msk.f32.gmra.mrb[24].mxu0 %vm561_vm0, %v6376_v51  ;;  %v6378_v17 = vmax.f32 %v16728_v36, 0.0  ;;  %v18875_v51 = vld [vmem:[#allocation16_spill] sm:$0xff]  ;;  %v18876_v49 = vld [vmem:[#allocation19_spill] sm:$0xff] }
 0x7a2   : > { %18870 = vst [vmem:[#allocation39_spill] sm:$0xff] %v16732_v8  ;;  %v6377_v52 = vmax.f32 %v16732_v8, 0.0  ;;  %v6235_v2 = vadd.f32 %v6157_v20, %v18872_v41  ;;  %v12559_v10 = vpop.f32.mrb[30].mxu1 }
 0x7a3   : > { %v16742_v48 = vadd.f32 %v16645_v22, %v6236_v7  ;;  %v6172_v33 = vadd.f32 %v12559_v10, %v16301_v16  ;;  %v6166_v18 = vpop.f32.mrb[31].mxu1 }
 0x7a4   : > { %v16746_v27 = vadd.f32 %v16645_v22, %v6235_v2  ;;  %v6167_v54 = vadd.f32 %v16301_v16, %v6166_v18  ;;  %12663 = vmatprep.mubr.msk.f32.mxu0 %vm561_vm0, %v6377_v52 }
 0x7a5   : > { %18873 = vst [vmem:[#allocation36_spill] sm:$0xff] %v16742_v48  ;;  %v6238_v50 = vadd.f32 %v6172_v33, %v18875_v51  ;;  %12664 = vmatmul.mubr.msk.f32.gmra.mrb[26].mxu0 %vm561_vm0, %v6378_v17  ;;  %v6380_v7 = vmax.f32 %v16742_v48, 0.0  ;;  %v7763_v17 = vld [vmem:[%s18503_s6] sm:$0xff] }
 0x7a6   : > { %18874 = vst [vmem:[#allocation43_spill] sm:$0xff] %v16746_v27  ;;  %v6379_v20 = vmax.f32 %v16746_v27, 0.0  ;;  %v6237_v41 = vadd.f32 %v6167_v54, %v18876_v49  ;;  %v16776_v33 = vld [vmem:[%s18500_s3 + $0x4] ss:$0 sm:$0xff]  ;;  %v7765_v49 = vld [vmem:[%s18503_s6 + $0x10] sm:$0xff] }
 0x7a7   : > { %v16756_v10 = vadd.f32 %v16645_v22, %v6238_v50 }
 0x7a8   : > { %v16759_v2 = vadd.f32 %v16645_v22, %v6237_v41  ;;  %12666 = vmatprep.mubr.msk.f32.mxu0 %vm561_vm0, %v6379_v20  ;;  %v7764_v22 = vld [vmem:[%s18503_s6 + $0x8] sm:$0xff]  ;;  %v7766_v41 = vld [vmem:[%s18503_s6 + $0x18] sm:$0xff] }
 0x7a9   : > { %18877 = vst [vmem:[#allocation40_spill] sm:$0xff] %v16756_v10  ;;  %12667 = vmatmul.mubr.msk.f32.gmra.mrb[28].mxu0 %vm561_vm0, %v6380_v7  ;;  %v6382_v18 = vmax.f32 %v16756_v10, 0.0  ;;  %v13056_v52 = vpack.c.bf16 %v7764_v22, %v7763_v17  ;;  %v13060_v7 = vpack.c.bf16 %v7766_v41, %v7765_v49 }
 0x7aa   : > { %18878 = vst [vmem:[#allocation46_spill] sm:$0xff] %v16759_v2  ;;  %v6381_v16 = vmax.f32 %v16759_v2, 0.0 }
 0x7ab   : > { %13057 = vmatprep.subr.bf16.mxu0 %v13056_v52 }
 0x7ac   : > { %12669 = vmatprep.mubr.msk.f32.mxu0 %vm561_vm0, %v6381_v16  ;;  %13059 = vmatpush3.bf16.msra.mxu0 %v13056_v52  ;;  %v7767_v16 = vld [vmem:[%s18503_s6 + $0x20] sm:$0xff] }
 0x7ad   : > { %12670 = vmatmul.mubr.msk.f32.gmra.mrb[30].mxu0 %vm561_vm0, %v6382_v18  ;;  %v7768_v18 = vld [vmem:[%s18503_s6 + $0x28] sm:$0xff]  ;;  %13061 = vmatprep.subr.bf16.mxu0 %v13060_v7 }
 0x7ae   : > { %v13064_v52 = vpack.c.bf16 %v7768_v18, %v7767_v16 }
 0x7b0   : > { %13063 = vmatpush3.bf16.msra.mxu0 %v13060_v7 }
 0x7b1   : > { %13065 = vmatprep.subr.bf16.mxu0 %v13064_v52 }
 0x7b4   : > { %13067 = vmatpush3.bf16.msra.mxu0 %v13064_v52 }
 0x804   : > { %v12578_v54 = vpop.f32.mrb[224].mxu0 }
 0x805   : > { %v6664_v51 = vadd.f32 %v12578_v54, %v16776_v33  ;;  %v6658_v50 = vpop.f32.mrb[225].mxu0  ;;  %v7769_v54 = vld [vmem:[%s18503_s6 + $0x30] sm:$0xff] }
 0x806   : > { %v6659_v20 = vadd.f32 %v16776_v33, %v6658_v50  ;;  %v7770_v50 = vld [vmem:[%s18503_s6 + $0x38] sm:$0xff] }
 0x807   : > { %v6978_v49 = vmax.f32 %v6664_v51, 0.0 }
 0x808   : > { %v6977_v17 = vmax.f32 %v6659_v20, 0.0  ;;  %v12581_v22 = vpop.f32.mrb[226].mxu0  ;;  %v13068_v20 = vpack.c.bf16 %v7770_v50, %v7769_v54 }
 0x809   : > { %v6674_v41 = vadd.f32 %v12581_v22, %v16776_v33  ;;  %v6668_v2 = vpop.f32.mrb[227].mxu0 }
 0x80a   : > { %v6669_v10 = vadd.f32 %v16776_v33, %v6668_v2  ;;  %12688 = vmatprep.mubr.msk.f32.mxu1 %vm561_vm0, %v6977_v17  ;;  %13069 = vmatprep.subr.bf16.mxu0 %v13068_v20 }
 0x80b   : > { %12689 = vmatmul.mubr.msk.f32.vlgmr.msra.gmra.mrb[32].mxu1 %vm561_vm0, %v6978_v49  ;;  %v6980_v27 = vmax.f32 %v6674_v41, 0.0  ;;  %13071 = vmatpush3.bf16.msra.mxu0 %v13068_v20 }
 0x80c   : > { %v6979_v16 = vmax.f32 %v6669_v10, 0.0  ;;  %v12584_v18 = vpop.f32.mrb[228].mxu0 }
 0x80d   : > { %v6684_v48 = vadd.f32 %v12584_v18, %v16776_v33  ;;  %v6678_v8 = vpop.f32.mrb[229].mxu0 }
 0x80e   : > { %v6679_v51 = vadd.f32 %v16776_v33, %v6678_v8  ;;  %12691 = vmatprep.mubr.msk.f32.mxu1 %vm561_vm0, %v6979_v16 }
 0x80f   : > { %12692 = vmatmul.mubr.msk.f32.gmra.mrb[34].mxu1 %vm561_vm0, %v6980_v27  ;;  %v6982_v17 = vmax.f32 %v6684_v48, 0.0 }
 0x810   : > { %v6981_v2 = vmax.f32 %v6679_v51, 0.0  ;;  %v12587_v7 = vpop.f32.mrb[230].mxu0 }
 0x811   : > { %v6694_v22 = vadd.f32 %v12587_v7, %v16776_v33  ;;  %v6688_v54 = vpop.f32.mrb[231].mxu0 }
 0x812   : > { %v6689_v10 = vadd.f32 %v16776_v33, %v6688_v54  ;;  %12694 = vmatprep.mubr.msk.f32.mxu1 %vm561_vm0, %v6981_v2 }
 0x813   : > { %12695 = vmatmul.mubr.msk.f32.gmra.mrb[36].mxu1 %vm561_vm0, %v6982_v17  ;;  %v6984_v49 = vmax.f32 %v6694_v22, 0.0 }
 0x814   : > { %v6983_v8 = vmax.f32 %v6689_v10, 0.0  ;;  %v12590_v50 = vpop.f32.mrb[232].mxu0 }
 0x815   : > { %v6704_v52 = vadd.f32 %v12590_v50, %v16776_v33  ;;  %v6698_v27 = vpop.f32.mrb[233].mxu0 }
 0x816   : > { %v6699_v41 = vadd.f32 %v16776_v33, %v6698_v27  ;;  %12697 = vmatprep.mubr.msk.f32.mxu1 %vm561_vm0, %v6983_v8 }
 0x817   : > { %12698 = vmatmul.mubr.msk.f32.gmra.mrb[38].mxu1 %vm561_vm0, %v6984_v49  ;;  %v6986_v18 = vmax.f32 %v6704_v52, 0.0 }
 0x818   : > { %v6985_v48 = vmax.f32 %v6699_v41, 0.0  ;;  %v12593_v16 = vpop.f32.mrb[234].mxu0 }
 0x819   : > { %v6714_v51 = vadd.f32 %v12593_v16, %v16776_v33  ;;  %v6708_v20 = vpop.f32.mrb[235].mxu0 }
 0x81a   : > { %v6709_v2 = vadd.f32 %v16776_v33, %v6708_v20  ;;  %12700 = vmatprep.mubr.msk.f32.mxu1 %vm561_vm0, %v6985_v48 }
 0x81b   : > { %12701 = vmatmul.mubr.msk.f32.gmra.mrb[40].mxu1 %vm561_vm0, %v6986_v18  ;;  %v6988_v22 = vmax.f32 %v6714_v51, 0.0 }
 0x81c   : > { %v6987_v7 = vmax.f32 %v6709_v2, 0.0  ;;  %v12596_v17 = vpop.f32.mrb[236].mxu0 }
 0x81d   : > { %v6724_v54 = vadd.f32 %v12596_v17, %v16776_v33  ;;  %v6718_v10 = vpop.f32.mrb[237].mxu0 }
 0x81e   : > { %v6719_v8 = vadd.f32 %v16776_v33, %v6718_v10  ;;  %12703 = vmatprep.mubr.msk.f32.mxu1 %vm561_vm0, %v6987_v7 }
 0x81f   : > { %12704 = vmatmul.mubr.msk.f32.gmra.mrb[42].mxu1 %vm561_vm0, %v6988_v22  ;;  %v6990_v52 = vmax.f32 %v6724_v54, 0.0 }
 0x820   : > { %v6989_v50 = vmax.f32 %v6719_v8, 0.0  ;;  %v12599_v49 = vpop.f32.mrb[238].mxu0 }
 0x821   : > { %v6734_v27 = vadd.f32 %v12599_v49, %v16776_v33  ;;  %v6728_v41 = vpop.f32.mrb[239].mxu0 }
 0x822   : > { %v6729_v48 = vadd.f32 %v16776_v33, %v6728_v41  ;;  %12706 = vmatprep.mubr.msk.f32.mxu1 %vm561_vm0, %v6989_v50 }
 0x823   : > { %12707 = vmatmul.mubr.msk.f32.gmra.mrb[44].mxu1 %vm561_vm0, %v6990_v52  ;;  %v6992_v51 = vmax.f32 %v6734_v27, 0.0 }
 0x824   : > { %v6991_v16 = vmax.f32 %v6729_v48, 0.0  ;;  %v12602_v18 = vpop.f32.mrb[240].mxu0 }
 0x825   : > { %v6744_v20 = vadd.f32 %v12602_v18, %v16776_v33  ;;  %v6738_v2 = vpop.f32.mrb[241].mxu0 }
 0x826   : > { %v6739_v7 = vadd.f32 %v16776_v33, %v6738_v2  ;;  %12709 = vmatprep.mubr.msk.f32.mxu1 %vm561_vm0, %v6991_v16 }
 0x827   : > { %12710 = vmatmul.mubr.msk.f32.gmra.mrb[46].mxu1 %vm561_vm0, %v6992_v51  ;;  %v6994_v54 = vmax.f32 %v6744_v20, 0.0 }
 0x828   : > { %v6993_v17 = vmax.f32 %v6739_v7, 0.0  ;;  %v12605_v22 = vpop.f32.mrb[242].mxu0 }
 0x829   : > { %v6754_v10 = vadd.f32 %v12605_v22, %v16776_v33  ;;  %v6748_v8 = vpop.f32.mrb[243].mxu0 }
 0x82a   : > { %v6749_v50 = vadd.f32 %v16776_v33, %v6748_v8  ;;  %12712 = vmatprep.mubr.msk.f32.mxu1 %vm561_vm0, %v6993_v17 }
 0x82b   : > { %12713 = vmatmul.mubr.msk.f32.gmra.mrb[48].mxu1 %vm561_vm0, %v6994_v54  ;;  %v6996_v27 = vmax.f32 %v6754_v10, 0.0 }
 0x82c   : > { %v6995_v49 = vmax.f32 %v6749_v50, 0.0  ;;  %v12608_v52 = vpop.f32.mrb[244].mxu0 }
 0x82d   : > { %v6764_v41 = vadd.f32 %v12608_v52, %v16776_v33  ;;  %v6758_v48 = vpop.f32.mrb[245].mxu0 }
 0x82e   : > { %v6759_v16 = vadd.f32 %v16776_v33, %v6758_v48  ;;  %12715 = vmatprep.mubr.msk.f32.mxu1 %vm561_vm0, %v6995_v49 }
 0x82f   : > { %12716 = vmatmul.mubr.msk.f32.gmra.mrb[50].mxu1 %vm561_vm0, %v6996_v27  ;;  %v6998_v20 = vmax.f32 %v6764_v41, 0.0 }
 0x830   : > { %v6997_v18 = vmax.f32 %v6759_v16, 0.0  ;;  %v12611_v51 = vpop.f32.mrb[246].mxu0 }
 0x831   : > { %v6774_v2 = vadd.f32 %v12611_v51, %v16776_v33  ;;  %v6768_v7 = vpop.f32.mrb[247].mxu0 }
 0x832   : > { %v6769_v17 = vadd.f32 %v16776_v33, %v6768_v7  ;;  %12718 = vmatprep.mubr.msk.f32.mxu1 %vm561_vm0, %v6997_v18 }
 0x833   : > { %12719 = vmatmul.mubr.msk.f32.gmra.mrb[52].mxu1 %vm561_vm0, %v6998_v20  ;;  %v7000_v10 = vmax.f32 %v6774_v2, 0.0 }
 0x834   : > { %v6999_v22 = vmax.f32 %v6769_v17, 0.0  ;;  %v12614_v54 = vpop.f32.mrb[248].mxu0 }
 0x835   : > { %v6784_v8 = vadd.f32 %v12614_v54, %v16776_v33  ;;  %v6778_v50 = vpop.f32.mrb[249].mxu0 }
 0x836   : > { %v6779_v49 = vadd.f32 %v16776_v33, %v6778_v50  ;;  %12721 = vmatprep.mubr.msk.f32.mxu1 %vm561_vm0, %v6999_v22 }
 0x837   : > { %12722 = vmatmul.mubr.msk.f32.gmra.mrb[54].mxu1 %vm561_vm0, %v7000_v10  ;;  %v7002_v41 = vmax.f32 %v6784_v8, 0.0 }
 0x838   : > { %v7001_v52 = vmax.f32 %v6779_v49, 0.0  ;;  %v12617_v27 = vpop.f32.mrb[250].mxu0 }
 0x839   : > { %v6794_v48 = vadd.f32 %v12617_v27, %v16776_v33  ;;  %v6788_v16 = vpop.f32.mrb[251].mxu0 }
 0x83a   : > { %v6789_v18 = vadd.f32 %v16776_v33, %v6788_v16  ;;  %12724 = vmatprep.mubr.msk.f32.mxu1 %vm561_vm0, %v7001_v52 }
 0x83b   : > { %12725 = vmatmul.mubr.msk.f32.gmra.mrb[56].mxu1 %vm561_vm0, %v7002_v41  ;;  %v7004_v2 = vmax.f32 %v6794_v48, 0.0 }
 0x83c   : > { %v7003_v51 = vmax.f32 %v6789_v18, 0.0  ;;  %v12620_v20 = vpop.f32.mrb[252].mxu0 }
 0x83d   : > { %v6804_v7 = vadd.f32 %v12620_v20, %v16776_v33  ;;  %v6798_v17 = vpop.f32.mrb[253].mxu0 }
 0x83e   : > { %v6799_v22 = vadd.f32 %v16776_v33, %v6798_v17  ;;  %12727 = vmatprep.mubr.msk.f32.mxu1 %vm561_vm0, %v7003_v51 }
 0x83f   : > { %12728 = vmatmul.mubr.msk.f32.gmra.mrb[58].mxu1 %vm561_vm0, %v7004_v2  ;;  %v7006_v8 = vmax.f32 %v6804_v7, 0.0 }
 0x840   : > { %v7005_v54 = vmax.f32 %v6799_v22, 0.0  ;;  %v12623_v10 = vpop.f32.mrb[254].mxu0 }
 0x841   : > { %v6814_v50 = vadd.f32 %v12623_v10, %v16776_v33  ;;  %v6808_v49 = vpop.f32.mrb[255].mxu0 }
 0x842   : > { %v6809_v52 = vadd.f32 %v16776_v33, %v6808_v49  ;;  %12730 = vmatprep.mubr.msk.f32.mxu1 %vm561_vm0, %v7005_v54 }
 0x843   : > { %12731 = vmatmul.mubr.msk.f32.gmra.mrb[60].mxu1 %vm561_vm0, %v7006_v8  ;;  %v7008_v48 = vmax.f32 %v6814_v50, 0.0 }
 0x844   : > { %v7007_v27 = vmax.f32 %v6809_v52, 0.0  ;;  %v12626_v41 = vpop.f32.mrb[0].mxu0 }
 0x845   : > { %v6824_v16 = vadd.f32 %v12626_v41, %v16776_v33  ;;  %v6818_v18 = vpop.f32.mrb[1].mxu0 }
 0x846   : > { %v6819_v51 = vadd.f32 %v16776_v33, %v6818_v18  ;;  %12733 = vmatprep.mubr.msk.f32.mxu1 %vm561_vm0, %v7007_v27 }
 0x847   : > { %12734 = vmatmul.mubr.msk.f32.gmra.mrb[62].mxu1 %vm561_vm0, %v7008_v48  ;;  %v7010_v7 = vmax.f32 %v6824_v16, 0.0 }
 0x848   : > { %v7009_v20 = vmax.f32 %v6819_v51, 0.0  ;;  %v12629_v2 = vpop.f32.mrb[2].mxu0 }
 0x849   : > { %v6834_v17 = vadd.f32 %v12629_v2, %v16776_v33  ;;  %v6828_v22 = vpop.f32.mrb[3].mxu0 }
 0x84a   : > { %v6829_v54 = vadd.f32 %v16776_v33, %v6828_v22  ;;  %12736 = vmatprep.mubr.msk.f32.mxu1 %vm561_vm0, %v7009_v20 }
 0x84b   : > { %12737 = vmatmul.mubr.msk.f32.gmra.mrb[64].mxu1 %vm561_vm0, %v7010_v7  ;;  %v7012_v50 = vmax.f32 %v6834_v17, 0.0 }
 0x84c   : > { %v7011_v10 = vmax.f32 %v6829_v54, 0.0  ;;  %v12632_v8 = vpop.f32.mrb[4].mxu0 }
 0x84d   : > { %v6844_v49 = vadd.f32 %v12632_v8, %v16776_v33  ;;  %v6838_v52 = vpop.f32.mrb[5].mxu0 }
 0x84e   : > { %v6839_v27 = vadd.f32 %v16776_v33, %v6838_v52  ;;  %12739 = vmatprep.mubr.msk.f32.mxu1 %vm561_vm0, %v7011_v10 }
 0x84f   : > { %12740 = vmatmul.mubr.msk.f32.gmra.mrb[66].mxu1 %vm561_vm0, %v7012_v50  ;;  %v7014_v16 = vmax.f32 %v6844_v49, 0.0 }
 0x850   : > { %v7013_v41 = vmax.f32 %v6839_v27, 0.0  ;;  %v12635_v48 = vpop.f32.mrb[6].mxu0 }
 0x851   : > { %v6854_v18 = vadd.f32 %v12635_v48, %v16776_v33  ;;  %v6848_v51 = vpop.f32.mrb[7].mxu0 }
 0x852   : > { %v6849_v20 = vadd.f32 %v16776_v33, %v6848_v51  ;;  %12742 = vmatprep.mubr.msk.f32.mxu1 %vm561_vm0, %v7013_v41 }
 0x853   : > { %12743 = vmatmul.mubr.msk.f32.gmra.mrb[68].mxu1 %vm561_vm0, %v7014_v16  ;;  %v7016_v17 = vmax.f32 %v6854_v18, 0.0 }
 0x854   : > { %v7015_v2 = vmax.f32 %v6849_v20, 0.0  ;;  %v12638_v7 = vpop.f32.mrb[8].mxu0 }
 0x855   : > { %v6864_v22 = vadd.f32 %v12638_v7, %v16776_v33  ;;  %v6858_v54 = vpop.f32.mrb[9].mxu0 }
 0x856   : > { %v6859_v10 = vadd.f32 %v16776_v33, %v6858_v54  ;;  %12745 = vmatprep.mubr.msk.f32.mxu1 %vm561_vm0, %v7015_v2 }
 0x857   : > { %12746 = vmatmul.mubr.msk.f32.gmra.mrb[70].mxu1 %vm561_vm0, %v7016_v17  ;;  %v7018_v49 = vmax.f32 %v6864_v22, 0.0 }
 0x858   : > { %v7017_v8 = vmax.f32 %v6859_v10, 0.0  ;;  %v12641_v50 = vpop.f32.mrb[10].mxu0 }
 0x859   : > { %v6874_v52 = vadd.f32 %v12641_v50, %v16776_v33  ;;  %v6868_v27 = vpop.f32.mrb[11].mxu0 }
 0x85a   : > { %v6869_v41 = vadd.f32 %v16776_v33, %v6868_v27  ;;  %12748 = vmatprep.mubr.msk.f32.mxu1 %vm561_vm0, %v7017_v8 }
 0x85b   : > { %12749 = vmatmul.mubr.msk.f32.gmra.mrb[72].mxu1 %vm561_vm0, %v7018_v49  ;;  %v7020_v18 = vmax.f32 %v6874_v52, 0.0 }
 0x85c   : > { %v7019_v48 = vmax.f32 %v6869_v41, 0.0  ;;  %v12644_v16 = vpop.f32.mrb[12].mxu0 }
 0x85d   : > { %v6884_v51 = vadd.f32 %v12644_v16, %v16776_v33  ;;  %v6878_v20 = vpop.f32.mrb[13].mxu0 }
 0x85e   : > { %v6879_v2 = vadd.f32 %v16776_v33, %v6878_v20  ;;  %12751 = vmatprep.mubr.msk.f32.mxu1 %vm561_vm0, %v7019_v48 }
 0x85f   : > { %12752 = vmatmul.mubr.msk.f32.gmra.mrb[74].mxu1 %vm561_vm0, %v7020_v18  ;;  %v7022_v22 = vmax.f32 %v6884_v51, 0.0 }
 0x860   : > { %v7021_v7 = vmax.f32 %v6879_v2, 0.0  ;;  %v12647_v17 = vpop.f32.mrb[14].mxu0 }
 0x861   : > { %v6894_v54 = vadd.f32 %v12647_v17, %v16776_v33  ;;  %v6888_v10 = vpop.f32.mrb[15].mxu0 }
 0x862   : > { %v6889_v8 = vadd.f32 %v16776_v33, %v6888_v10  ;;  %12754 = vmatprep.mubr.msk.f32.mxu1 %vm561_vm0, %v7021_v7 }
 0x863   : > { %12755 = vmatmul.mubr.msk.f32.gmra.mrb[76].mxu1 %vm561_vm0, %v7022_v22  ;;  %v7024_v52 = vmax.f32 %v6894_v54, 0.0 }
 0x864   : > { %v7023_v50 = vmax.f32 %v6889_v8, 0.0  ;;  %v12650_v49 = vpop.f32.mrb[16].mxu0 }
 0x865   : > { %v6904_v27 = vadd.f32 %v12650_v49, %v16776_v33  ;;  %v6898_v41 = vpop.f32.mrb[17].mxu0 }
 0x866   : > { %v6899_v48 = vadd.f32 %v16776_v33, %v6898_v41  ;;  %12757 = vmatprep.mubr.msk.f32.mxu1 %vm561_vm0, %v7023_v50 }
 0x867   : > { %12758 = vmatmul.mubr.msk.f32.gmra.mrb[78].mxu1 %vm561_vm0, %v7024_v52  ;;  %v7026_v51 = vmax.f32 %v6904_v27, 0.0 }
 0x868   : > { %v7025_v16 = vmax.f32 %v6899_v48, 0.0  ;;  %v12653_v18 = vpop.f32.mrb[18].mxu0 }
 0x869   : > { %v6914_v20 = vadd.f32 %v12653_v18, %v16776_v33  ;;  %v6908_v2 = vpop.f32.mrb[19].mxu0 }
 0x86a   : > { %v6909_v7 = vadd.f32 %v16776_v33, %v6908_v2  ;;  %12760 = vmatprep.mubr.msk.f32.mxu1 %vm561_vm0, %v7025_v16 }
 0x86b   : > { %12761 = vmatmul.mubr.msk.f32.gmra.mrb[80].mxu1 %vm561_vm0, %v7026_v51  ;;  %v7028_v54 = vmax.f32 %v6914_v20, 0.0 }
 0x86c   : > { %v7027_v17 = vmax.f32 %v6909_v7, 0.0  ;;  %v12656_v22 = vpop.f32.mrb[20].mxu0 }
 0x86d   : > { %v6924_v10 = vadd.f32 %v12656_v22, %v16776_v33  ;;  %v6918_v8 = vpop.f32.mrb[21].mxu0 }
 0x86e   : > { %v6919_v50 = vadd.f32 %v16776_v33, %v6918_v8  ;;  %12763 = vmatprep.mubr.msk.f32.mxu1 %vm561_vm0, %v7027_v17 }
 0x86f   : > { %12764 = vmatmul.mubr.msk.f32.gmra.mrb[82].mxu1 %vm561_vm0, %v7028_v54  ;;  %v7030_v27 = vmax.f32 %v6924_v10, 0.0 }
 0x870   : > { %v7029_v49 = vmax.f32 %v6919_v50, 0.0  ;;  %v12659_v52 = vpop.f32.mrb[22].mxu0 }
 0x871   : > { %v6934_v41 = vadd.f32 %v12659_v52, %v16776_v33  ;;  %v6928_v48 = vpop.f32.mrb[23].mxu0 }
 0x872   : > { %v6929_v16 = vadd.f32 %v16776_v33, %v6928_v48  ;;  %12766 = vmatprep.mubr.msk.f32.mxu1 %vm561_vm0, %v7029_v49 }
 0x873   : > { %12767 = vmatmul.mubr.msk.f32.gmra.mrb[84].mxu1 %vm561_vm0, %v7030_v27  ;;  %v7032_v20 = vmax.f32 %v6934_v41, 0.0 }
 0x874   : > { %v7031_v18 = vmax.f32 %v6929_v16, 0.0  ;;  %v12662_v51 = vpop.f32.mrb[24].mxu0 }
 0x875   : > { %v6944_v2 = vadd.f32 %v12662_v51, %v16776_v33  ;;  %v6938_v7 = vpop.f32.mrb[25].mxu0 }
 0x876   : > { %v6939_v17 = vadd.f32 %v16776_v33, %v6938_v7  ;;  %12769 = vmatprep.mubr.msk.f32.mxu1 %vm561_vm0, %v7031_v18 }
 0x877   : > { %12770 = vmatmul.mubr.msk.f32.gmra.mrb[86].mxu1 %vm561_vm0, %v7032_v20  ;;  %v7034_v10 = vmax.f32 %v6944_v2, 0.0 }
 0x878   : > { %v7033_v22 = vmax.f32 %v6939_v17, 0.0  ;;  %v12665_v54 = vpop.f32.mrb[26].mxu0 }
 0x879   : > { %v6954_v8 = vadd.f32 %v12665_v54, %v16776_v33  ;;  %v6948_v50 = vpop.f32.mrb[27].mxu0 }
 0x87a   : > { %v6949_v49 = vadd.f32 %v16776_v33, %v6948_v50  ;;  %12772 = vmatprep.mubr.msk.f32.mxu1 %vm561_vm0, %v7033_v22 }
 0x87b   : > { %12773 = vmatmul.mubr.msk.f32.gmra.mrb[88].mxu1 %vm561_vm0, %v7034_v10  ;;  %v7036_v41 = vmax.f32 %v6954_v8, 0.0  ;;  %v16927_v8 = vld [vmem:[%s18502_s5 + $0x4] ss:$0 sm:$0xff] }
 0x87c   : > { %v7035_v52 = vmax.f32 %v6949_v49, 0.0  ;;  %v12668_v27 = vpop.f32.mrb[28].mxu0 }
 0x87d   : > { %v6964_v48 = vadd.f32 %v12668_v27, %v16776_v33  ;;  %v6958_v16 = vpop.f32.mrb[29].mxu0 }
 0x87e   : > { %v6959_v18 = vadd.f32 %v16776_v33, %v6958_v16  ;;  %12775 = vmatprep.mubr.msk.f32.mxu1 %vm561_vm0, %v7035_v52 }
 0x87f   : > { %12776 = vmatmul.mubr.msk.f32.gmra.mrb[90].mxu1 %vm561_vm0, %v7036_v41  ;;  %v7038_v2 = vmax.f32 %v6964_v48, 0.0  ;;  %v18879_v41 = vld [vmem:[#allocation18_spill] sm:$0xff] }
 0x880   : > { %v7037_v51 = vmax.f32 %v6959_v18, 0.0  ;;  %v12671_v20 = vpop.f32.mrb[30].mxu0 }
 0x881   : > { %v6974_v7 = vadd.f32 %v12671_v20, %v16776_v33  ;;  %v6968_v17 = vpop.f32.mrb[31].mxu0 }
 0x882   : > { %v6969_v22 = vadd.f32 %v16776_v33, %v6968_v17  ;;  %12778 = vmatprep.mubr.msk.f32.mxu1 %vm561_vm0, %v7037_v51 }
 0x883   : > { %12779 = vmatmul.mubr.msk.f32.gmra.mrb[92].mxu1 %vm561_vm0, %v7038_v2  ;;  %v7040_v10 = vmax.f32 %v6974_v7, 0.0 }
 0x884   : > { %v7039_v54 = vmax.f32 %v6969_v22, 0.0 }
 0x886   : > { %12781 = vmatprep.mubr.msk.f32.mxu1 %vm561_vm0, %v7039_v54 }
 0x887   : > { %12782 = vmatmul.mubr.msk.f32.gmra.mrb[94].mxu1 %vm561_vm0, %v7040_v10 }
 0x8de   : > { %v12690_v50 = vpop.f32.mrb[32].mxu1 }
 0x8df   : > { %v7322_v49 = vadd.f32 %v12690_v50, %v16927_v8  ;;  %v7316_v52 = vpop.f32.mrb[33].mxu1 }
 0x8e0   : > { %v7317_v33 = vadd.f32 %v16927_v8, %v7316_v52 }
 0x8e1   : > { %v7636_v27 = vadd.f32 %v7322_v49, %v16312_v13 }
 0x8e2   : > { %v7635_v48 = vadd.f32 %v7317_v33, %v18879_v41  ;;  %v12693_v16 = vpop.f32.mrb[34].mxu1 }
 0x8e3   : > { %v7332_v18 = vadd.f32 %v12693_v16, %v16927_v8  ;;  %v7326_v51 = vpop.f32.mrb[35].mxu1  ;;  %v7700_v7 = vmax.f32 %v7636_v27, 0.0 }
 0x8e4   : > { %v7699_v20 = vmax.f32 %v7635_v48, 0.0  ;;  %v7327_v2 = vadd.f32 %v16927_v8, %v7326_v51 }
 0x8e5   : > { %v7638_v17 = vadd.f32 %v7332_v18, %v16324_v9 }
 0x8e6   : > { %v7637_v22 = vadd.f32 %v7327_v2, %v16328_v37  ;;  %v12696_v54 = vpop.f32.mrb[36].mxu1  ;;  %12800 = vmatprep.mubr.msk.f32.mxu0 %vm561_vm0, %v7699_v20 }
 0x8e7   : > { %v7342_v10 = vadd.f32 %v12696_v54, %v16927_v8  ;;  %v7336_v13 = vpop.f32.mrb[37].mxu1  ;;  %12801 = vmatmul.mubr.msk.f32.vlgmr.msra.gmra.mrb[32].mxu0 %vm561_vm0, %v7700_v7  ;;  %v7702_v52 = vmax.f32 %v7638_v17, 0.0 }
 0x8e8   : > { %v7701_v50 = vmax.f32 %v7637_v22, 0.0  ;;  %v7337_v49 = vadd.f32 %v16927_v8, %v7336_v13 }
 0x8e9   : > { %v7640_v33 = vadd.f32 %v7342_v10, %v16338_v63 }
 0x8ea   : > { %v7639_v27 = vadd.f32 %v7337_v49, %v16342_v60  ;;  %v12699_v41 = vpop.f32.mrb[38].mxu1  ;;  %12803 = vmatprep.mubr.msk.f32.mxu0 %vm561_vm0, %v7701_v50 }
 0x8eb   : > { %v7352_v9 = vadd.f32 %v12699_v41, %v16927_v8  ;;  %v7346_v37 = vpop.f32.mrb[39].mxu1  ;;  %12804 = vmatmul.mubr.msk.f32.gmra.mrb[34].mxu0 %vm561_vm0, %v7702_v52  ;;  %v7704_v18 = vmax.f32 %v7640_v33, 0.0 }
 0x8ec   : > { %v7703_v48 = vmax.f32 %v7639_v27, 0.0  ;;  %v7347_v16 = vadd.f32 %v16927_v8, %v7346_v37 }
 0x8ed   : > { %v7642_v51 = vadd.f32 %v7352_v9, %v16352_v45 }
 0x8ee   : > { %v7641_v20 = vadd.f32 %v7347_v16, %v16356_v58  ;;  %v12702_v2 = vpop.f32.mrb[40].mxu1  ;;  %12806 = vmatprep.mubr.msk.f32.mxu0 %vm561_vm0, %v7703_v48 }
 0x8ef   : > { %v7362_v63 = vadd.f32 %v12702_v2, %v16927_v8  ;;  %v7356_v60 = vpop.f32.mrb[41].mxu1  ;;  %12807 = vmatmul.mubr.msk.f32.gmra.mrb[36].mxu0 %vm561_vm0, %v7704_v18  ;;  %v7706_v22 = vmax.f32 %v7642_v51, 0.0 }
 0x8f0   : > { %v7705_v7 = vmax.f32 %v7641_v20, 0.0  ;;  %v7357_v17 = vadd.f32 %v16927_v8, %v7356_v60 }
 0x8f1   : > { %v7644_v54 = vadd.f32 %v7362_v63, %v16366_v38 }
 0x8f2   : > { %v7643_v10 = vadd.f32 %v7357_v17, %v16370_v55  ;;  %v12705_v13 = vpop.f32.mrb[42].mxu1  ;;  %12809 = vmatprep.mubr.msk.f32.mxu0 %vm561_vm0, %v7705_v7 }
 0x8f3   : > { %v7372_v45 = vadd.f32 %v12705_v13, %v16927_v8  ;;  %v7366_v58 = vpop.f32.mrb[43].mxu1  ;;  %12810 = vmatmul.mubr.msk.f32.gmra.mrb[38].mxu0 %vm561_vm0, %v7706_v22  ;;  %v7708_v52 = vmax.f32 %v7644_v54, 0.0 }
 0x8f4   : > { %v7707_v50 = vmax.f32 %v7643_v10, 0.0  ;;  %v7367_v49 = vadd.f32 %v16927_v8, %v7366_v58 }
 0x8f5   : > { %v7646_v33 = vadd.f32 %v7372_v45, %v16380_v46 }
 0x8f6   : > { %v7645_v27 = vadd.f32 %v7367_v49, %v16384_v44  ;;  %v12708_v41 = vpop.f32.mrb[44].mxu1  ;;  %12812 = vmatprep.mubr.msk.f32.mxu0 %vm561_vm0, %v7707_v50 }
 0x8f7   : > { %v7382_v38 = vadd.f32 %v12708_v41, %v16927_v8  ;;  %v7376_v55 = vpop.f32.mrb[45].mxu1  ;;  %12813 = vmatmul.mubr.msk.f32.gmra.mrb[40].mxu0 %vm561_vm0, %v7708_v52  ;;  %v7710_v48 = vmax.f32 %v7646_v33, 0.0 }
 0x8f8   : > { %v7709_v9 = vmax.f32 %v7645_v27, 0.0  ;;  %v7377_v37 = vadd.f32 %v16927_v8, %v7376_v55 }
 0x8f9   : > { %v7648_v16 = vadd.f32 %v7382_v38, %v16394_v61 }
 0x8fa   : > { %v7647_v18 = vadd.f32 %v7377_v37, %v16398_v34  ;;  %v12711_v51 = vpop.f32.mrb[46].mxu1  ;;  %12815 = vmatprep.mubr.msk.f32.mxu0 %vm561_vm0, %v7709_v9 }
 0x8fb   : > { %v7392_v46 = vadd.f32 %v12711_v51, %v16927_v8  ;;  %v7386_v44 = vpop.f32.mrb[47].mxu1  ;;  %12816 = vmatmul.mubr.msk.f32.gmra.mrb[42].mxu0 %vm561_vm0, %v7710_v48  ;;  %v7712_v63 = vmax.f32 %v7648_v16, 0.0 }
 0x8fc   : > { %v7711_v20 = vmax.f32 %v7647_v18, 0.0  ;;  %v7387_v2 = vadd.f32 %v16927_v8, %v7386_v44 }
 0x8fd   : > { %v7650_v60 = vadd.f32 %v7392_v46, %v16408_v57 }
 0x8fe   : > { %v7649_v7 = vadd.f32 %v7387_v2, %v16416_v3  ;;  %v12714_v17 = vpop.f32.mrb[48].mxu1  ;;  %12818 = vmatprep.mubr.msk.f32.mxu0 %vm561_vm0, %v7711_v20 }
 0x8ff   : > { %v7402_v61 = vadd.f32 %v12714_v17, %v16927_v8  ;;  %v7396_v34 = vpop.f32.mrb[49].mxu1  ;;  %12819 = vmatmul.mubr.msk.f32.gmra.mrb[44].mxu0 %vm561_vm0, %v7712_v63  ;;  %v7714_v10 = vmax.f32 %v7650_v60, 0.0 }
 0x900   : > { %v7713_v22 = vmax.f32 %v7649_v7, 0.0  ;;  %v7397_v54 = vadd.f32 %v16927_v8, %v7396_v34 }
 0x901   : > { %v7652_v13 = vadd.f32 %v7402_v61, %v16426_v14 }
 0x902   : > { %v7651_v45 = vadd.f32 %v7397_v54, %v16430_v25  ;;  %v12717_v58 = vpop.f32.mrb[50].mxu1  ;;  %12821 = vmatprep.mubr.msk.f32.mxu0 %vm561_vm0, %v7713_v22 }
 0x903   : > { %v7412_v57 = vadd.f32 %v12717_v58, %v16927_v8  ;;  %v7406_v3 = vpop.f32.mrb[51].mxu1  ;;  %12822 = vmatmul.mubr.msk.f32.gmra.mrb[46].mxu0 %vm561_vm0, %v7714_v10  ;;  %v7716_v52 = vmax.f32 %v7652_v13, 0.0 }
 0x904   : > { %v7715_v50 = vmax.f32 %v7651_v45, 0.0  ;;  %v7407_v49 = vadd.f32 %v16927_v8, %v7406_v3 }
 0x905   : > { %v7654_v33 = vadd.f32 %v7412_v57, %v16440_v28 }
 0x906   : > { %v7653_v27 = vadd.f32 %v7407_v49, %v16444_v11  ;;  %v12720_v41 = vpop.f32.mrb[52].mxu1  ;;  %12824 = vmatprep.mubr.msk.f32.mxu0 %vm561_vm0, %v7715_v50 }
 0x907   : > { %v7422_v14 = vadd.f32 %v12720_v41, %v16927_v8  ;;  %v7416_v25 = vpop.f32.mrb[53].mxu1  ;;  %12825 = vmatmul.mubr.msk.f32.gmra.mrb[48].mxu0 %vm561_vm0, %v7716_v52  ;;  %v7718_v9 = vmax.f32 %v7654_v33, 0.0 }
 0x908   : > { %v7717_v38 = vmax.f32 %v7653_v27, 0.0  ;;  %v7417_v55 = vadd.f32 %v16927_v8, %v7416_v25 }
 0x909   : > { %v7656_v37 = vadd.f32 %v7422_v14, %v16454_v23 }
 0x90a   : > { %v7655_v48 = vadd.f32 %v7417_v55, %v16458_v5  ;;  %v12723_v16 = vpop.f32.mrb[54].mxu1  ;;  %12827 = vmatprep.mubr.msk.f32.mxu0 %vm561_vm0, %v7717_v38 }
 0x90b   : > { %v7432_v28 = vadd.f32 %v12723_v16, %v16927_v8  ;;  %v7426_v11 = vpop.f32.mrb[55].mxu1  ;;  %12828 = vmatmul.mubr.msk.f32.gmra.mrb[50].mxu0 %vm561_vm0, %v7718_v9  ;;  %v7720_v46 = vmax.f32 %v7656_v37, 0.0 }
 0x90c   : > { %v7719_v18 = vmax.f32 %v7655_v48, 0.0  ;;  %v7427_v51 = vadd.f32 %v16927_v8, %v7426_v11 }
 0x90d   : > { %v7658_v44 = vadd.f32 %v7432_v28, %v16468_v29 }
 0x90e   : > { %v7657_v20 = vadd.f32 %v7427_v51, %v16472_v59  ;;  %v12726_v2 = vpop.f32.mrb[56].mxu1  ;;  %12830 = vmatprep.mubr.msk.f32.mxu0 %vm561_vm0, %v7719_v18 }
 0x90f   : > { %v7442_v23 = vadd.f32 %v12726_v2, %v16927_v8  ;;  %v7436_v5 = vpop.f32.mrb[57].mxu1  ;;  %12831 = vmatmul.mubr.msk.f32.gmra.mrb[52].mxu0 %vm561_vm0, %v7720_v46  ;;  %v7722_v7 = vmax.f32 %v7658_v44, 0.0 }
 0x910   : > { %v7721_v63 = vmax.f32 %v7657_v20, 0.0  ;;  %v7437_v60 = vadd.f32 %v16927_v8, %v7436_v5 }
 0x911   : > { %v7660_v17 = vadd.f32 %v7442_v23, %v16482_v31 }
 0x912   : > { %v7659_v61 = vadd.f32 %v7437_v60, %v16486_v24  ;;  %v12729_v34 = vpop.f32.mrb[58].mxu1  ;;  %12833 = vmatprep.mubr.msk.f32.mxu0 %vm561_vm0, %v7721_v63 }
 0x913   : > { %v7452_v29 = vadd.f32 %v12729_v34, %v16927_v8  ;;  %v7446_v59 = vpop.f32.mrb[59].mxu1  ;;  %12834 = vmatmul.mubr.msk.f32.gmra.mrb[54].mxu0 %vm561_vm0, %v7722_v7  ;;  %v7724_v10 = vmax.f32 %v7660_v17, 0.0 }
 0x914   : > { %v7723_v22 = vmax.f32 %v7659_v61, 0.0  ;;  %v7447_v54 = vadd.f32 %v16927_v8, %v7446_v59 }
 0x915   : > { %v7662_v13 = vadd.f32 %v7452_v29, %v16496_v42 }
 0x916   : > { %v7661_v45 = vadd.f32 %v7447_v54, %v16500_v43  ;;  %v12732_v58 = vpop.f32.mrb[60].mxu1  ;;  %12836 = vmatprep.mubr.msk.f32.mxu0 %vm561_vm0, %v7723_v22 }
 0x917   : > { %v7462_v31 = vadd.f32 %v12732_v58, %v16927_v8  ;;  %v7456_v24 = vpop.f32.mrb[61].mxu1  ;;  %12837 = vmatmul.mubr.msk.f32.gmra.mrb[56].mxu0 %vm561_vm0, %v7724_v10  ;;  %v7726_v50 = vmax.f32 %v7662_v13, 0.0 }
 0x918   : > { %v7725_v57 = vmax.f32 %v7661_v45, 0.0  ;;  %v7457_v3 = vadd.f32 %v16927_v8, %v7456_v24 }
 0x919   : > { %v7664_v49 = vadd.f32 %v7462_v31, %v16510_v35 }
 0x91a   : > { %v7663_v52 = vadd.f32 %v7457_v3, %v16514_v39  ;;  %v12735_v33 = vpop.f32.mrb[62].mxu1  ;;  %12839 = vmatprep.mubr.msk.f32.mxu0 %vm561_vm0, %v7725_v57 }
 0x91b   : > { %v7472_v42 = vadd.f32 %v12735_v33, %v16927_v8  ;;  %v7466_v43 = vpop.f32.mrb[63].mxu1  ;;  %12840 = vmatmul.mubr.msk.f32.gmra.mrb[58].mxu0 %vm561_vm0, %v7726_v50  ;;  %v7728_v14 = vmax.f32 %v7664_v49, 0.0 }
 0x91c   : > { %v7727_v27 = vmax.f32 %v7663_v52, 0.0  ;;  %v7467_v41 = vadd.f32 %v16927_v8, %v7466_v43 }
 0x91d   : > { %v7666_v25 = vadd.f32 %v7472_v42, %v16524_v62 }
 0x91e   : > { %v7665_v38 = vadd.f32 %v7467_v41, %v16532_v21  ;;  %v12738_v55 = vpop.f32.mrb[64].mxu1  ;;  %12842 = vmatprep.mubr.msk.f32.mxu0 %vm561_vm0, %v7727_v27 }
 0x91f   : > { %v7482_v35 = vadd.f32 %v12738_v55, %v16927_v8  ;;  %v7476_v39 = vpop.f32.mrb[65].mxu1  ;;  %12843 = vmatmul.mubr.msk.f32.gmra.mrb[60].mxu0 %vm561_vm0, %v7728_v14  ;;  %v7730_v48 = vmax.f32 %v7666_v25, 0.0 }
 0x920   : > { %v7729_v9 = vmax.f32 %v7665_v38, 0.0  ;;  %v7477_v37 = vadd.f32 %v16927_v8, %v7476_v39  ;;  %v18880_v39 = vld [vmem:[#allocation21_spill] sm:$0xff] }
 0x921   : > { %v7668_v16 = vadd.f32 %v7482_v35, %v16542_v40 }
 0x922   : > { %v7667_v28 = vadd.f32 %v7477_v37, %v16546_v1  ;;  %v12741_v11 = vpop.f32.mrb[66].mxu1  ;;  %12845 = vmatprep.mubr.msk.f32.mxu0 %vm561_vm0, %v7729_v9  ;;  %v18881_v37 = vld [vmem:[#allocation20_spill] sm:$0xff] }
 0x923   : > { %v7492_v62 = vadd.f32 %v12741_v11, %v16927_v8  ;;  %v7486_v21 = vpop.f32.mrb[67].mxu1  ;;  %12846 = vmatmul.mubr.msk.f32.gmra.mrb[62].mxu0 %vm561_vm0, %v7730_v48  ;;  %v7732_v46 = vmax.f32 %v7668_v16, 0.0 }
 0x924   : > { %v7731_v18 = vmax.f32 %v7667_v28, 0.0  ;;  %v7487_v51 = vadd.f32 %v16927_v8, %v7486_v21  ;;  %v18882_v21 = vld [vmem:[#allocation23_spill] sm:$0xff] }
 0x925   : > { %v7670_v44 = vadd.f32 %v7492_v62, %v16556_v6 }
 0x926   : > { %v7669_v20 = vadd.f32 %v7487_v51, %v16560_v26  ;;  %v12744_v2 = vpop.f32.mrb[68].mxu1  ;;  %12848 = vmatprep.mubr.msk.f32.mxu0 %vm561_vm0, %v7731_v18  ;;  %v18883_v51 = vld [vmem:[#allocation22_spill] sm:$0xff] }
 0x927   : > { %v7502_v40 = vadd.f32 %v12744_v2, %v16927_v8  ;;  %v7496_v1 = vpop.f32.mrb[69].mxu1  ;;  %12849 = vmatmul.mubr.msk.f32.gmra.mrb[64].mxu0 %vm561_vm0, %v7732_v46  ;;  %v7734_v63 = vmax.f32 %v7670_v44, 0.0 }
 0x928   : > { %v7733_v23 = vmax.f32 %v7669_v20, 0.0  ;;  %v7497_v5 = vadd.f32 %v16927_v8, %v7496_v1 }
 0x929   : > { %v7672_v60 = vadd.f32 %v7502_v40, %v16570_v12 }
 0x92a   : > { %v7671_v7 = vadd.f32 %v7497_v5, %v16574_v19  ;;  %v12747_v17 = vpop.f32.mrb[70].mxu1  ;;  %12851 = vmatprep.mubr.msk.f32.mxu0 %vm561_vm0, %v7733_v23  ;;  %v18884_v5 = vld [vmem:[#allocation25_spill] sm:$0xff] }
 0x92b   : > { %v7512_v6 = vadd.f32 %v12747_v17, %v16927_v8  ;;  %v7506_v26 = vpop.f32.mrb[71].mxu1  ;;  %12852 = vmatmul.mubr.msk.f32.gmra.mrb[66].mxu0 %vm561_vm0, %v7734_v63  ;;  %v7736_v29 = vmax.f32 %v7672_v60, 0.0  ;;  %v18885_v60 = vld [vmem:[#allocation24_spill] sm:$0xff] }
 0x92c   : > { %v7735_v61 = vmax.f32 %v7671_v7, 0.0  ;;  %v7507_v34 = vadd.f32 %v16927_v8, %v7506_v26 }
 0x92d   : > { %v7674_v59 = vadd.f32 %v7512_v6, %v16584_v47 }
 0x92e   : > { %v7673_v22 = vadd.f32 %v7507_v34, %v16588_v4  ;;  %v12750_v54 = vpop.f32.mrb[72].mxu1  ;;  %12854 = vmatprep.mubr.msk.f32.mxu0 %vm561_vm0, %v7735_v61 }
 0x92f   : > { %v7522_v12 = vadd.f32 %v12750_v54, %v16927_v8  ;;  %v7516_v19 = vpop.f32.mrb[73].mxu1  ;;  %12855 = vmatmul.mubr.msk.f32.gmra.mrb[68].mxu0 %vm561_vm0, %v7736_v29  ;;  %v7738_v45 = vmax.f32 %v7674_v59, 0.0  ;;  %v18886_v59 = vld [vmem:[#allocation28_spill] sm:$0xff]  ;;  %v18887_v54 = vld [vmem:[#allocation26_spill] sm:$0xff] }
 0x930   : > { %v7737_v10 = vmax.f32 %v7673_v22, 0.0  ;;  %v7517_v13 = vadd.f32 %v16927_v8, %v7516_v19 }
 0x931   : > { %v7676_v58 = vadd.f32 %v7522_v12, %v16598_v53 }
 0x932   : > { %v7675_v31 = vadd.f32 %v7517_v13, %v16602_v32  ;;  %v12753_v24 = vpop.f32.mrb[74].mxu1  ;;  %12857 = vmatprep.mubr.msk.f32.mxu0 %vm561_vm0, %v7737_v10 }
 0x933   : > { %v7532_v47 = vadd.f32 %v12753_v24, %v16927_v8  ;;  %v7526_v4 = vpop.f32.mrb[75].mxu1  ;;  %12858 = vmatmul.mubr.msk.f32.gmra.mrb[70].mxu0 %vm561_vm0, %v7738_v45  ;;  %v7740_v50 = vmax.f32 %v7676_v58, 0.0  ;;  %v18888_v24 = vld [vmem:[#allocation31_spill] sm:$0xff] }
 0x934   : > { %v7739_v57 = vmax.f32 %v7675_v31, 0.0  ;;  %v7527_v3 = vadd.f32 %v16927_v8, %v7526_v4  ;;  %v18889_v4 = vld [vmem:[#allocation29_spill] sm:$0xff] }
 0x935   : > { %v7678_v49 = vadd.f32 %v7532_v47, %v16612_v0 }
 0x936   : > { %v7677_v52 = vadd.f32 %v7527_v3, %v16616_v56  ;;  %v12756_v33 = vpop.f32.mrb[76].mxu1  ;;  %12860 = vmatprep.mubr.msk.f32.mxu0 %vm561_vm0, %v7739_v57 }
 0x937   : > { %v7542_v53 = vadd.f32 %v12756_v33, %v16927_v8  ;;  %v7536_v32 = vpop.f32.mrb[77].mxu1  ;;  %12861 = vmatmul.mubr.msk.f32.gmra.mrb[72].mxu0 %vm561_vm0, %v7740_v50  ;;  %v7742_v27 = vmax.f32 %v7678_v49, 0.0 }
 0x938   : > { %v7741_v42 = vmax.f32 %v7677_v52, 0.0  ;;  %v7537_v43 = vadd.f32 %v16927_v8, %v7536_v32  ;;  %v18890_v32 = vld [vmem:[#allocation35_spill] sm:$0xff] }
 0x939   : > { %v7680_v41 = vadd.f32 %v7542_v53, %v16626_v30 }
 0x93a   : > { %v7679_v14 = vadd.f32 %v7537_v43, %v16630_v15  ;;  %v12759_v25 = vpop.f32.mrb[78].mxu1  ;;  %12863 = vmatprep.mubr.msk.f32.mxu0 %vm561_vm0, %v7741_v42  ;;  %v18891_v43 = vld [vmem:[#allocation32_spill] sm:$0xff] }
 0x93b   : > { %v7552_v0 = vadd.f32 %v12759_v25, %v16927_v8  ;;  %v7546_v56 = vpop.f32.mrb[79].mxu1  ;;  %12864 = vmatmul.mubr.msk.f32.gmra.mrb[74].mxu0 %vm561_vm0, %v7742_v27  ;;  %v7744_v35 = vmax.f32 %v7680_v41, 0.0 }
 0x93c   : > { %v7743_v38 = vmax.f32 %v7679_v14, 0.0  ;;  %v7547_v55 = vadd.f32 %v16927_v8, %v7546_v56 }
 0x93d   : > { %v7682_v9 = vadd.f32 %v7552_v0, %v18880_v39 }
 0x93e   : > { %v7681_v48 = vadd.f32 %v7547_v55, %v18881_v37  ;;  %v12762_v16 = vpop.f32.mrb[80].mxu1  ;;  %12866 = vmatprep.mubr.msk.f32.mxu0 %vm561_vm0, %v7743_v38 }
 0x93f   : > { %v7562_v30 = vadd.f32 %v12762_v16, %v16927_v8  ;;  %v7556_v15 = vpop.f32.mrb[81].mxu1  ;;  %12867 = vmatmul.mubr.msk.f32.gmra.mrb[76].mxu0 %vm561_vm0, %v7744_v35  ;;  %v7746_v62 = vmax.f32 %v7682_v9, 0.0  ;;  %v18892_v35 = vld [vmem:[#allocation39_spill] sm:$0xff] }
 0x940   : > { %v7745_v28 = vmax.f32 %v7681_v48, 0.0  ;;  %v7557_v11 = vadd.f32 %v16927_v8, %v7556_v15 }
 0x941   : > { %v7684_v18 = vadd.f32 %v7562_v30, %v18882_v21 }
 0x942   : > { %v7683_v46 = vadd.f32 %v7557_v11, %v18883_v51  ;;  %v12765_v44 = vpop.f32.mrb[82].mxu1  ;;  %12869 = vmatprep.mubr.msk.f32.mxu0 %vm561_vm0, %v7745_v28  ;;  %v18893_v28 = vld [vmem:[#allocation36_spill] sm:$0xff] }
 0x943   : > { %v7572_v20 = vadd.f32 %v12765_v44, %v16927_v8  ;;  %v7566_v2 = vpop.f32.mrb[83].mxu1  ;;  %12870 = vmatmul.mubr.msk.f32.gmra.mrb[78].mxu0 %vm561_vm0, %v7746_v62  ;;  %v7748_v23 = vmax.f32 %v7684_v18, 0.0  ;;  %v18894_v62 = vld [vmem:[#allocation43_spill] sm:$0xff] }
 0x944   : > { %v7747_v40 = vmax.f32 %v7683_v46, 0.0  ;;  %v7567_v1 = vadd.f32 %v16927_v8, %v7566_v2  ;;  %v18895_v2 = vld [vmem:[#allocation40_spill] sm:$0xff] }
 0x945   : > { %v7686_v63 = vadd.f32 %v7572_v20, %v18884_v5 }
 0x946   : > { %v7685_v7 = vadd.f32 %v7567_v1, %v18885_v60  ;;  %v12768_v17 = vpop.f32.mrb[84].mxu1  ;;  %12872 = vmatprep.mubr.msk.f32.mxu0 %vm561_vm0, %v7747_v40  ;;  %v18896_v1 = vld [vmem:[#allocation46_spill] sm:$0xff] }
 0x947   : > { %v7582_v6 = vadd.f32 %v12768_v17, %v16927_v8  ;;  %v7576_v26 = vpop.f32.mrb[85].mxu1  ;;  %12873 = vmatmul.mubr.msk.f32.gmra.mrb[80].mxu0 %vm561_vm0, %v7748_v23  ;;  %v7750_v29 = vmax.f32 %v7686_v63, 0.0 }
 0x948   : > { %v7749_v61 = vmax.f32 %v7685_v7, 0.0  ;;  %v7577_v34 = vadd.f32 %v16927_v8, %v7576_v26 }
 0x949   : > { %v7688_v22 = vadd.f32 %v7582_v6, %v18886_v59 }
 0x94a   : > { %v7687_v12 = vadd.f32 %v7577_v34, %v18887_v54  ;;  %v12771_v19 = vpop.f32.mrb[86].mxu1  ;;  %12875 = vmatprep.mubr.msk.f32.mxu0 %vm561_vm0, %v7749_v61 }
 0x94b   : > { %v7592_v10 = vadd.f32 %v12771_v19, %v16927_v8  ;;  %v7586_v13 = vpop.f32.mrb[87].mxu1  ;;  %12876 = vmatmul.mubr.msk.f32.gmra.mrb[82].mxu0 %vm561_vm0, %v7750_v29  ;;  %v7752_v31 = vmax.f32 %v7688_v22, 0.0 }
 0x94c   : > { %v7751_v45 = vmax.f32 %v7687_v12, 0.0  ;;  %v7587_v58 = vadd.f32 %v16927_v8, %v7586_v13 }
 0x94d   : > { %v7690_v47 = vadd.f32 %v7592_v10, %v18888_v24 }
 0x94e   : > { %v7689_v57 = vadd.f32 %v7587_v58, %v18889_v4  ;;  %v12774_v3 = vpop.f32.mrb[88].mxu1  ;;  %12878 = vmatprep.mubr.msk.f32.mxu0 %vm561_vm0, %v7751_v45 }
 0x94f   : > { %v7602_v50 = vadd.f32 %v12774_v3, %v16927_v8  ;;  %v7596_v49 = vpop.f32.mrb[89].mxu1  ;;  %12879 = vmatmul.mubr.msk.f32.gmra.mrb[84].mxu0 %vm561_vm0, %v7752_v31  ;;  %v7754_v53 = vmax.f32 %v7690_v47, 0.0 }
 0x950   : > { %v7753_v52 = vmax.f32 %v7689_v57, 0.0  ;;  %v7597_v33 = vadd.f32 %v16927_v8, %v7596_v49 }
 0x951   : > { %v7692_v42 = vadd.f32 %v7602_v50, %v18890_v32 }
 0x952   : > { %v7691_v27 = vadd.f32 %v7597_v33, %v18891_v43  ;;  %v12777_v41 = vpop.f32.mrb[90].mxu1  ;;  %12881 = vmatprep.mubr.msk.f32.mxu0 %vm561_vm0, %v7753_v52 }
 0x953   : > { %v7612_v14 = vadd.f32 %v12777_v41, %v16927_v8  ;;  %v7606_v25 = vpop.f32.mrb[91].mxu1  ;;  %12882 = vmatmul.mubr.msk.f32.gmra.mrb[86].mxu0 %vm561_vm0, %v7754_v53  ;;  %v7756_v38 = vmax.f32 %v7692_v42, 0.0 }
 0x954   : > { %v7755_v0 = vmax.f32 %v7691_v27, 0.0  ;;  %v7607_v56 = vadd.f32 %v16927_v8, %v7606_v25 }
 0x955   : > { %v7694_v55 = vadd.f32 %v7612_v14, %v16728_v36 }
 0x956   : > { %v7693_v39 = vadd.f32 %v7607_v56, %v18892_v35  ;;  %v12780_v9 = vpop.f32.mrb[92].mxu1  ;;  %12884 = vmatprep.mubr.msk.f32.mxu0 %vm561_vm0, %v7755_v0 }
 0x957   : > { %v7622_v37 = vadd.f32 %v12780_v9, %v16927_v8  ;;  %v7616_v48 = vpop.f32.mrb[93].mxu1  ;;  %12885 = vmatmul.mubr.msk.f32.gmra.mrb[88].mxu0 %vm561_vm0, %v7756_v38  ;;  %v7758_v15 = vmax.f32 %v7694_v55, 0.0 }
 0x958   : > { %v7757_v16 = vmax.f32 %v7693_v39, 0.0  ;;  %v7617_v30 = vadd.f32 %v16927_v8, %v7616_v48 }
 0x959   : > { %v7696_v11 = vadd.f32 %v7622_v37, %v18893_v28 }
 0x95a   : > { %v7695_v21 = vadd.f32 %v7617_v30, %v18894_v62  ;;  %v12783_v18 = vpop.f32.mrb[94].mxu1  ;;  %12887 = vmatprep.mubr.msk.f32.mxu0 %vm561_vm0, %v7757_v16 }
 0x95b   : > { %v7632_v36 = vadd.f32 %v12783_v18, %v16927_v8  ;;  %v7626_v51 = vpop.f32.mrb[95].mxu1  ;;  %12888 = vmatmul.mubr.msk.f32.gmra.mrb[90].mxu0 %vm561_vm0, %v7758_v15  ;;  %v7760_v20 = vmax.f32 %v7696_v11, 0.0 }
 0x95c   : > { %v7759_v46 = vmax.f32 %v7695_v21, 0.0  ;;  %v7627_v44 = vadd.f32 %v16927_v8, %v7626_v51  ;;  %v17125_v8 = vld [vmem:[%s18504_s7] ss:$0 sm:$0xff] }
 0x95d   : > { %v7698_v40 = vadd.f32 %v7632_v36, %v18895_v2 }
 0x95e   : > { %v7697_v23 = vadd.f32 %v7627_v44, %v18896_v1  ;;  %12890 = vmatprep.mubr.msk.f32.mxu0 %vm561_vm0, %v7759_v46 }
 0x95f   : > { %12891 = vmatmul.mubr.msk.f32.gmra.mrb[92].mxu0 %vm561_vm0, %v7760_v20  ;;  %v7762_v63 = vmax.f32 %v7698_v40, 0.0 }
 0x960   : > { %v7761_v5 = vmax.f32 %v7697_v23, 0.0 }
 0x962   : > { %12893 = vmatprep.mubr.msk.f32.mxu0 %vm561_vm0, %v7761_v5 }
 0x963   : > { %12894 = vmatmul.mubr.msk.f32.gmra.mrb[94].mxu0 %vm561_vm0, %v7762_v63 }
 0x9ba   : > { %v12802_v60 = vpop.f32.mrb[32].mxu0 }
 0x9bb   : > { %v17128_v7 = vadd.f32 %v12802_v60, %v17125_v8  ;;  %v8036_v17 = vpop.f32.mrb[33].mxu0 }
 0x9bc   : > { %v17131_v6 = vadd.f32 %v17125_v8, %v8036_v17 }
 0x9bd   : > { %9582 = vst.msk [vmem:[%s17133_s14 + $0x8] sm:$0xff] %vm9580_vm1, %v17128_v7  ;;  %v8359_v26 = vsel %vm8355_vm2, %v17128_v7, -inf }
 0x9be   : > { %9581 = vst.msk [vmem:[%s17133_s14] sm:$0xff] %vm9580_vm1, %v17131_v6  ;;  %8360 = vmax.xlane.f32.xlu0 %v8359_v26  ;;  %v12805_v61 = vpop.f32.mrb[34].mxu0  ;;  %v8356_v54 = vsel %vm8355_vm2, %v17131_v6, -inf }
 0x9bf   : > { %v17144_v34 = vadd.f32 %v12805_v61, %v17125_v8  ;;  %v8046_v29 = vpop.f32.mrb[35].mxu0 }
 0x9c0   : > { %v17147_v59 = vadd.f32 %v17125_v8, %v8046_v29 }
 0x9c1   : > { %9584 = vst.msk [vmem:[%s17133_s14 + $0x18] sm:$0xff] %vm9580_vm1, %v17144_v34  ;;  %v8365_v22 = vsel %vm8355_vm2, %v17144_v34, -inf }
 0x9c2   : > { %9583 = vst.msk [vmem:[%s17133_s14 + $0x10] sm:$0xff] %vm9580_vm1, %v17147_v59  ;;  %8366 = vmax.xlane.f32.xlu1 %v8365_v22  ;;  %v12808_v12 = vpop.f32.mrb[36].mxu0  ;;  %8357 = vmax.xlane.f32.xlu0 %v8356_v54  ;;  %v8362_v45 = vsel %vm8355_vm2, %v17147_v59, -inf }
 0x9c3   : > { %v17160_v19 = vadd.f32 %v12808_v12, %v17125_v8  ;;  %v8056_v10 = vpop.f32.mrb[37].mxu0 }
 0x9c4   : > { %v17163_v13 = vadd.f32 %v17125_v8, %v8056_v10 }
 0x9c5   : > { %9586 = vst.msk [vmem:[%s17133_s14 + $0x28] sm:$0xff] %vm9580_vm1, %v17160_v19  ;;  %v8371_v57 = vsel %vm8355_vm2, %v17160_v19, -inf }
 0x9c6   : > { %9585 = vst.msk [vmem:[%s17133_s14 + $0x20] sm:$0xff] %vm9580_vm1, %v17163_v13  ;;  %v12811_v58 = vpop.f32.mrb[38].mxu0  ;;  %8363 = vmax.xlane.f32.xlu1 %v8362_v45  ;;  %v8368_v31 = vsel %vm8355_vm2, %v17163_v13, -inf }
 0x9c7   : > { %v17176_v24 = vadd.f32 %v12811_v58, %v17125_v8  ;;  %v8066_v47 = vpop.f32.mrb[39].mxu0  ;;  %8369 = vmax.xlane.f32.xlu0 %v8368_v31 }
 0x9c8   : > { %v17179_v4 = vadd.f32 %v17125_v8, %v8066_v47 }
 0x9c9   : > { %9588 = vst.msk [vmem:[%s17133_s14 + $0x38] sm:$0xff] %vm9580_vm1, %v17176_v24  ;;  %v8377_v53 = vsel %vm8355_vm2, %v17176_v24, -inf }
 0x9ca   : > { %9587 = vst.msk [vmem:[%s17133_s14 + $0x30] sm:$0xff] %vm9580_vm1, %v17179_v4  ;;  %v12814_v3 = vpop.f32.mrb[40].mxu0  ;;  %8372 = vmax.xlane.f32.xlu1 %v8371_v57  ;;  %v8374_v50 = vsel %vm8355_vm2, %v17179_v4, -inf }
 0x9cb   : > { %v17192_v49 = vadd.f32 %v12814_v3, %v17125_v8  ;;  %v8076_v52 = vpop.f32.mrb[41].mxu0  ;;  %8375 = vmax.xlane.f32.xlu0 %v8374_v50 }
 0x9cc   : > { %v17195_v33 = vadd.f32 %v17125_v8, %v8076_v52 }
 0x9cd   : > { %9590 = vst.msk [vmem:[%s17133_s14 + $0x48] sm:$0xff] %vm9580_vm1, %v17192_v49  ;;  %v8383_v14 = vsel %vm8355_vm2, %v17192_v49, -inf }
 0x9ce   : > { %9589 = vst.msk [vmem:[%s17133_s14 + $0x40] sm:$0xff] %vm9580_vm1, %v17195_v33  ;;  %v12817_v32 = vpop.f32.mrb[42].mxu0  ;;  %8378 = vmax.xlane.f32.xlu1 %v8377_v53  ;;  %v8380_v42 = vsel %vm8355_vm2, %v17195_v33, -inf }
 0x9cf   : > { %v17208_v43 = vadd.f32 %v12817_v32, %v17125_v8  ;;  %v8086_v27 = vpop.f32.mrb[43].mxu0  ;;  %8381 = vmax.xlane.f32.xlu0 %v8380_v42 }
 0x9d0   : > { %v17211_v41 = vadd.f32 %v17125_v8, %v8086_v27 }
 0x9d1   : > { %9592 = vst.msk [vmem:[%s17133_s14 + $0x58] sm:$0xff] %vm9580_vm1, %v17208_v43  ;;  %v8389_v35 = vsel %vm8355_vm2, %v17208_v43, -inf }
 0x9d2   : > { %9591 = vst.msk [vmem:[%s17133_s14 + $0x50] sm:$0xff] %vm9580_vm1, %v17211_v41  ;;  %v12820_v25 = vpop.f32.mrb[44].mxu0  ;;  %8384 = vmax.xlane.f32.xlu1 %v8383_v14  ;;  %v8386_v0 = vsel %vm8355_vm2, %v17211_v41, -inf }
 0x9d3   : > { %v17224_v56 = vadd.f32 %v12820_v25, %v17125_v8  ;;  %v8096_v38 = vpop.f32.mrb[45].mxu0  ;;  %8387 = vmax.xlane.f32.xlu0 %v8386_v0 }
 0x9d4   : > { %v17227_v55 = vadd.f32 %v17125_v8, %v8096_v38 }
 0x9d5   : > { %9594 = vst.msk [vmem:[%s17133_s14 + $0x68] sm:$0xff] %vm9580_vm1, %v17224_v56  ;;  %v8395_v30 = vsel %vm8355_vm2, %v17224_v56, -inf }
 0x9d6   : > { %9593 = vst.msk [vmem:[%s17133_s14 + $0x60] sm:$0xff] %vm9580_vm1, %v17227_v55  ;;  %v12823_v39 = vpop.f32.mrb[46].mxu0  ;;  %8390 = vmax.xlane.f32.xlu1 %v8389_v35  ;;  %v8392_v9 = vsel %vm8355_vm2, %v17227_v55, -inf }
 0x9d7   : > { %v17240_v37 = vadd.f32 %v12823_v39, %v17125_v8  ;;  %v8106_v48 = vpop.f32.mrb[47].mxu0  ;;  %8393 = vmax.xlane.f32.xlu0 %v8392_v9 }
 0x9d8   : > { %v17243_v16 = vadd.f32 %v17125_v8, %v8106_v48 }
 0x9d9   : > { %9596 = vst.msk [vmem:[%s17133_s14 + $0x78] sm:$0xff] %vm9580_vm1, %v17240_v37  ;;  %v8401_v18 = vsel %vm8355_vm2, %v17240_v37, -inf }
 0x9da   : > { %9595 = vst.msk [vmem:[%s17133_s14 + $0x70] sm:$0xff] %vm9580_vm1, %v17243_v16  ;;  %v12826_v15 = vpop.f32.mrb[48].mxu0  ;;  %8396 = vmax.xlane.f32.xlu1 %v8395_v30  ;;  %v8398_v28 = vsel %vm8355_vm2, %v17243_v16, -inf }
 0x9db   : > { %v17256_v11 = vadd.f32 %v12826_v15, %v17125_v8  ;;  %v8116_v62 = vpop.f32.mrb[49].mxu0  ;;  %8399 = vmax.xlane.f32.xlu0 %v8398_v28 }
 0x9dc   : > { %v17259_v21 = vadd.f32 %v17125_v8, %v8116_v62 }
 0x9dd   : > { %9598 = vst.msk [vmem:[%s17133_s14 + $0x88] sm:$0xff] %vm9580_vm1, %v17256_v11  ;;  %v8407_v2 = vsel %vm8355_vm2, %v17256_v11, -inf }
 0x9de   : > { %9597 = vst.msk [vmem:[%s17133_s14 + $0x80] sm:$0xff] %vm9580_vm1, %v17259_v21  ;;  %v12829_v36 = vpop.f32.mrb[50].mxu0  ;;  %8402 = vmax.xlane.f32.xlu1 %v8401_v18  ;;  %v8404_v51 = vsel %vm8355_vm2, %v17259_v21, -inf }
 0x9df   : > { %v17272_v46 = vadd.f32 %v12829_v36, %v17125_v8  ;;  %v8126_v44 = vpop.f32.mrb[51].mxu0  ;;  %8405 = vmax.xlane.f32.xlu0 %v8404_v51 }
 0x9e0   : > { %v17275_v20 = vadd.f32 %v17125_v8, %v8126_v44 }
 0x9e1   : > { %9600 = vst.msk [vmem:[%s17133_s14 + $0x98] sm:$0xff] %vm9580_vm1, %v17272_v46  ;;  %v8413_v60 = vsel %vm8355_vm2, %v17272_v46, -inf }
 0x9e2   : > { %9599 = vst.msk [vmem:[%s17133_s14 + $0x90] sm:$0xff] %vm9580_vm1, %v17275_v20  ;;  %v12832_v40 = vpop.f32.mrb[52].mxu0  ;;  %8408 = vmax.xlane.f32.xlu1 %v8407_v2  ;;  %v8410_v1 = vsel %vm8355_vm2, %v17275_v20, -inf }
 0x9e3   : > { %v17288_v23 = vadd.f32 %v12832_v40, %v17125_v8  ;;  %v8136_v5 = vpop.f32.mrb[53].mxu0  ;;  %8411 = vmax.xlane.f32.xlu0 %v8410_v1 }
 0x9e4   : > { %v17291_v63 = vadd.f32 %v17125_v8, %v8136_v5 }
 0x9e5   : > { %9602 = vst.msk [vmem:[%s17133_s14 + $0xa8] sm:$0xff] %vm9580_vm1, %v17288_v23  ;;  %v8419_v54 = vsel %vm8355_vm2, %v17288_v23, -inf }
 0x9e6   : > { %9601 = vst.msk [vmem:[%s17133_s14 + $0xa0] sm:$0xff] %vm9580_vm1, %v17291_v63  ;;  %v12835_v17 = vpop.f32.mrb[54].mxu0  ;;  %8414 = vmax.xlane.f32.xlu1 %v8413_v60  ;;  %v8416_v26 = vsel %vm8355_vm2, %v17291_v63, -inf }
 0x9e7   : > { %v17304_v61 = vadd.f32 %v12835_v17, %v17125_v8  ;;  %v8146_v29 = vpop.f32.mrb[55].mxu0  ;;  %8417 = vmax.xlane.f32.xlu0 %v8416_v26 }
 0x9e8   : > { %v17307_v22 = vadd.f32 %v17125_v8, %v8146_v29 }
 0x9e9   : > { %9604 = vst.msk [vmem:[%s17133_s14 + $0xb8] sm:$0xff] %vm9580_vm1, %v17304_v61  ;;  %v8425_v47 = vsel %vm8355_vm2, %v17304_v61, -inf }
 0x9ea   : > { %9603 = vst.msk [vmem:[%s17133_s14 + $0xb0] sm:$0xff] %vm9580_vm1, %v17307_v22  ;;  %v12838_v12 = vpop.f32.mrb[56].mxu0  ;;  %8420 = vmax.xlane.f32.xlu1 %v8419_v54  ;;  %v8422_v10 = vsel %vm8355_vm2, %v17307_v22, -inf }
 0x9eb   : > { %v17320_v45 = vadd.f32 %v12838_v12, %v17125_v8  ;;  %v8156_v58 = vpop.f32.mrb[57].mxu0  ;;  %8423 = vmax.xlane.f32.xlu0 %v8422_v10 }
 0x9ec   : > { %v17323_v31 = vadd.f32 %v17125_v8, %v8156_v58 }
 0x9ed   : > { %9606 = vst.msk [vmem:[%s17133_s14 + $0xc8] sm:$0xff] %vm9580_vm1, %v17320_v45  ;;  %v8431_v32 = vsel %vm8355_vm2, %v17320_v45, -inf }
 0x9ee   : > { %9605 = vst.msk [vmem:[%s17133_s14 + $0xc0] sm:$0xff] %vm9580_vm1, %v17323_v31  ;;  %v12841_v57 = vpop.f32.mrb[58].mxu0  ;;  %8426 = vmax.xlane.f32.xlu1 %v8425_v47  ;;  %v8428_v3 = vsel %vm8355_vm2, %v17323_v31, -inf }
 0x9ef   : > { %v17336_v50 = vadd.f32 %v12841_v57, %v17125_v8  ;;  %v8166_v52 = vpop.f32.mrb[59].mxu0  ;;  %8429 = vmax.xlane.f32.xlu0 %v8428_v3 }
 0x9f0   : > { %v17339_v53 = vadd.f32 %v17125_v8, %v8166_v52 }
 0x9f1   : > { %9608 = vst.msk [vmem:[%s17133_s14 + $0xd8] sm:$0xff] %vm9580_vm1, %v17336_v50  ;;  %v8437_v38 = vsel %vm8355_vm2, %v17336_v50, -inf }
 0x9f2   : > { %9607 = vst.msk [vmem:[%s17133_s14 + $0xd0] sm:$0xff] %vm9580_vm1, %v17339_v53  ;;  %v12844_v42 = vpop.f32.mrb[60].mxu0  ;;  %8432 = vmax.xlane.f32.xlu1 %v8431_v32  ;;  %v8434_v27 = vsel %vm8355_vm2, %v17339_v53, -inf }
 0x9f3   : > { %v17352_v14 = vadd.f32 %v12844_v42, %v17125_v8  ;;  %v8176_v25 = vpop.f32.mrb[61].mxu0  ;;  %8435 = vmax.xlane.f32.xlu0 %v8434_v27 }
 0x9f4   : > { %v17355_v0 = vadd.f32 %v17125_v8, %v8176_v25 }
 0x9f5   : > { %9610 = vst.msk [vmem:[%s17133_s14 + $0xe8] sm:$0xff] %vm9580_vm1, %v17352_v14  ;;  %v8443_v15 = vsel %vm8355_vm2, %v17352_v14, -inf }
 0x9f6   : > { %9609 = vst.msk [vmem:[%s17133_s14 + $0xe0] sm:$0xff] %vm9580_vm1, %v17355_v0  ;;  %v12847_v35 = vpop.f32.mrb[62].mxu0  ;;  %8438 = vmax.xlane.f32.xlu1 %v8437_v38  ;;  %v8440_v39 = vsel %vm8355_vm2, %v17355_v0, -inf }
 0x9f7   : > { %v17368_v9 = vadd.f32 %v12847_v35, %v17125_v8  ;;  %v8186_v48 = vpop.f32.mrb[63].mxu0  ;;  %8441 = vmax.xlane.f32.xlu0 %v8440_v39 }
 0x9f8   : > { %v17371_v30 = vadd.f32 %v17125_v8, %v8186_v48 }
 0x9f9   : > { %9612 = vst.msk [vmem:[%s17133_s14 + $0xf8] sm:$0xff] %vm9580_vm1, %v17368_v9  ;;  %v8449_v44 = vsel %vm8355_vm2, %v17368_v9, -inf }
 0x9fa   : > { %9611 = vst.msk [vmem:[%s17133_s14 + $0xf0] sm:$0xff] %vm9580_vm1, %v17371_v30  ;;  %v12850_v28 = vpop.f32.mrb[64].mxu0  ;;  %8444 = vmax.xlane.f32.xlu1 %v8443_v15  ;;  %v8446_v62 = vsel %vm8355_vm2, %v17371_v30, -inf }
 0x9fb   : > { %v17384_v18 = vadd.f32 %v12850_v28, %v17125_v8  ;;  %v8196_v36 = vpop.f32.mrb[65].mxu0  ;;  %8447 = vmax.xlane.f32.xlu0 %v8446_v62 }
 0x9fc   : > { %v17387_v51 = vadd.f32 %v17125_v8, %v8196_v36 }
 0x9fd   : > { %9614 = vst.msk [vmem:[%s17133_s14 + $0x108] sm:$0xff] %vm9580_vm1, %v17384_v18  ;;  %v8455_v17 = vsel %vm8355_vm2, %v17384_v18, -inf }
 0x9fe   : > { %9613 = vst.msk [vmem:[%s17133_s14 + $0x100] sm:$0xff] %vm9580_vm1, %v17387_v51  ;;  %v12853_v2 = vpop.f32.mrb[66].mxu0  ;;  %8450 = vmax.xlane.f32.xlu1 %v8449_v44  ;;  %v8452_v40 = vsel %vm8355_vm2, %v17387_v51, -inf }
 0x9ff   : > { %v17400_v1 = vadd.f32 %v12853_v2, %v17125_v8  ;;  %v8206_v5 = vpop.f32.mrb[67].mxu0  ;;  %8453 = vmax.xlane.f32.xlu0 %v8452_v40 }
 0xa00   : > { %v17403_v60 = vadd.f32 %v17125_v8, %v8206_v5 }
 0xa01   : > { %9616 = vst.msk [vmem:[%s17133_s14 + $0x118] sm:$0xff] %vm9580_vm1, %v17400_v1  ;;  %v8461_v58 = vsel %vm8355_vm2, %v17400_v1, -inf }
 0xa02   : > { %9615 = vst.msk [vmem:[%s17133_s14 + $0x110] sm:$0xff] %vm9580_vm1, %v17403_v60  ;;  %v12856_v26 = vpop.f32.mrb[68].mxu0  ;;  %8456 = vmax.xlane.f32.xlu1 %v8455_v17  ;;  %v8458_v29 = vsel %vm8355_vm2, %v17403_v60, -inf }
 0xa03   : > { %v17416_v54 = vadd.f32 %v12856_v26, %v17125_v8  ;;  %v8216_v12 = vpop.f32.mrb[69].mxu0  ;;  %8459 = vmax.xlane.f32.xlu0 %v8458_v29 }
 0xa04   : > { %v17419_v10 = vadd.f32 %v17125_v8, %v8216_v12 }
 0xa05   : > { %9618 = vst.msk [vmem:[%s17133_s14 + $0x128] sm:$0xff] %vm9580_vm1, %v17416_v54  ;;  %v8467_v42 = vsel %vm8355_vm2, %v17416_v54, -inf }
 0xa06   : > { %9617 = vst.msk [vmem:[%s17133_s14 + $0x120] sm:$0xff] %vm9580_vm1, %v17419_v10  ;;  %v12859_v47 = vpop.f32.mrb[70].mxu0  ;;  %8462 = vmax.xlane.f32.xlu1 %v8461_v58  ;;  %v8464_v57 = vsel %vm8355_vm2, %v17419_v10, -inf }
 0xa07   : > { %v17432_v3 = vadd.f32 %v12859_v47, %v17125_v8  ;;  %v8226_v52 = vpop.f32.mrb[71].mxu0  ;;  %8465 = vmax.xlane.f32.xlu0 %v8464_v57 }
 0xa08   : > { %v17435_v32 = vadd.f32 %v17125_v8, %v8226_v52 }
 0xa09   : > { %9620 = vst.msk [vmem:[%s17133_s14 + $0x138] sm:$0xff] %vm9580_vm1, %v17432_v3  ;;  %v8473_v48 = vsel %vm8355_vm2, %v17432_v3, -inf }
 0xa0a   : > { %9619 = vst.msk [vmem:[%s17133_s14 + $0x130] sm:$0xff] %vm9580_vm1, %v17435_v32  ;;  %v12862_v27 = vpop.f32.mrb[72].mxu0  ;;  %8468 = vmax.xlane.f32.xlu1 %v8467_v42  ;;  %v8470_v25 = vsel %vm8355_vm2, %v17435_v32, -inf }
 0xa0b   : > { %v17448_v38 = vadd.f32 %v12862_v27, %v17125_v8  ;;  %v8236_v35 = vpop.f32.mrb[73].mxu0  ;;  %8471 = vmax.xlane.f32.xlu0 %v8470_v25 }
 0xa0c   : > { %v17451_v39 = vadd.f32 %v17125_v8, %v8236_v35 }
 0xa0d   : > { %9622 = vst.msk [vmem:[%s17133_s14 + $0x148] sm:$0xff] %vm9580_vm1, %v17448_v38  ;;  %v8479_v2 = vsel %vm8355_vm2, %v17448_v38, -inf }
 0xa0e   : > { %9621 = vst.msk [vmem:[%s17133_s14 + $0x140] sm:$0xff] %vm9580_vm1, %v17451_v39  ;;  %v12865_v15 = vpop.f32.mrb[74].mxu0  ;;  %8474 = vmax.xlane.f32.xlu1 %v8473_v48  ;;  %v8476_v28 = vsel %vm8355_vm2, %v17451_v39, -inf }
 0xa0f   : > { %v17464_v62 = vadd.f32 %v12865_v15, %v17125_v8  ;;  %v8246_v36 = vpop.f32.mrb[75].mxu0  ;;  %8477 = vmax.xlane.f32.xlu0 %v8476_v28 }
 0xa10   : > { %v17467_v44 = vadd.f32 %v17125_v8, %v8246_v36 }
 0xa11   : > { %9624 = vst.msk [vmem:[%s17133_s14 + $0x158] sm:$0xff] %vm9580_vm1, %v17464_v62  ;;  %v8485_v12 = vsel %vm8355_vm2, %v17464_v62, -inf }
 0xa12   : > { %9623 = vst.msk [vmem:[%s17133_s14 + $0x150] sm:$0xff] %vm9580_vm1, %v17467_v44  ;;  %v12868_v40 = vpop.f32.mrb[76].mxu0  ;;  %8480 = vmax.xlane.f32.xlu1 %v8479_v2  ;;  %v8482_v5 = vsel %vm8355_vm2, %v17467_v44, -inf }
 0xa13   : > { %v17480_v17 = vadd.f32 %v12868_v40, %v17125_v8  ;;  %v8256_v26 = vpop.f32.mrb[77].mxu0  ;;  %8483 = vmax.xlane.f32.xlu0 %v8482_v5 }
 0xa14   : > { %v17483_v29 = vadd.f32 %v17125_v8, %v8256_v26 }
 0xa15   : > { %9626 = vst.msk [vmem:[%s17133_s14 + $0x168] sm:$0xff] %vm9580_vm1, %v17480_v17  ;;  %v8491_v27 = vsel %vm8355_vm2, %v17480_v17, -inf }
 0xa16   : > { %9625 = vst.msk [vmem:[%s17133_s14 + $0x160] sm:$0xff] %vm9580_vm1, %v17483_v29  ;;  %v12871_v58 = vpop.f32.mrb[78].mxu0  ;;  %8486 = vmax.xlane.f32.xlu1 %v8485_v12  ;;  %v8488_v47 = vsel %vm8355_vm2, %v17483_v29, -inf }
 0xa17   : > { %v17496_v57 = vadd.f32 %v12871_v58, %v17125_v8  ;;  %v8266_v52 = vpop.f32.mrb[79].mxu0  ;;  %8489 = vmax.xlane.f32.xlu0 %v8488_v47 }
 0xa18   : > { %v17499_v42 = vadd.f32 %v17125_v8, %v8266_v52 }
 0xa19   : > { %9628 = vst.msk [vmem:[%s17133_s14 + $0x178] sm:$0xff] %vm9580_vm1, %v17496_v57  ;;  %v8497_v36 = vsel %vm8355_vm2, %v17496_v57, -inf }
 0xa1a   : > { %9627 = vst.msk [vmem:[%s17133_s14 + $0x170] sm:$0xff] %vm9580_vm1, %v17499_v42  ;;  %v12874_v25 = vpop.f32.mrb[80].mxu0  ;;  %8492 = vmax.xlane.f32.xlu1 %v8491_v27  ;;  %v8494_v35 = vsel %vm8355_vm2, %v17499_v42, -inf }
 0xa1b   : > { %v17512_v48 = vadd.f32 %v12874_v25, %v17125_v8  ;;  %v8276_v15 = vpop.f32.mrb[81].mxu0  ;;  %8495 = vmax.xlane.f32.xlu0 %v8494_v35 }
 0xa1c   : > { %v17515_v28 = vadd.f32 %v17125_v8, %v8276_v15 }
 0xa1d   : > { %9630 = vst.msk [vmem:[%s17133_s14 + $0x188] sm:$0xff] %vm9580_vm1, %v17512_v48  ;;  %v8503_v58 = vsel %vm8355_vm2, %v17512_v48, -inf }
 0xa1e   : > { %9629 = vst.msk [vmem:[%s17133_s14 + $0x180] sm:$0xff] %vm9580_vm1, %v17515_v28  ;;  %v12877_v2 = vpop.f32.mrb[82].mxu0  ;;  %8498 = vmax.xlane.f32.xlu1 %v8497_v36  ;;  %v8500_v40 = vsel %vm8355_vm2, %v17515_v28, -inf }
 0xa1f   : > { %v17528_v5 = vadd.f32 %v12877_v2, %v17125_v8  ;;  %v8286_v26 = vpop.f32.mrb[83].mxu0  ;;  %8501 = vmax.xlane.f32.xlu0 %v8500_v40 }
 0xa20   : > { %v17531_v12 = vadd.f32 %v17125_v8, %v8286_v26 }
 0xa21   : > { %18897 = vst [vmem:[#allocation44_spill] sm:$0xff] %v17528_v5  ;;  %9632 = vst.msk [vmem:[%s17133_s14 + $0x198] sm:$0xff] %vm9580_vm1, %v17528_v5  ;;  %v8509_v15 = vsel %vm8355_vm2, %v17528_v5, -inf }
 0xa22   : > { %18898 = vst [vmem:[#allocation48_spill] sm:$0xff] %v17531_v12  ;;  %9631 = vst.msk [vmem:[%s17133_s14 + $0x190] sm:$0xff] %vm9580_vm1, %v17531_v12  ;;  %v12880_v47 = vpop.f32.mrb[84].mxu0  ;;  %8504 = vmax.xlane.f32.xlu1 %v8503_v58  ;;  %v8506_v52 = vsel %vm8355_vm2, %v17531_v12, -inf }
 0xa23   : > { %v17544_v27 = vadd.f32 %v12880_v47, %v17125_v8  ;;  %v8296_v25 = vpop.f32.mrb[85].mxu0  ;;  %8507 = vmax.xlane.f32.xlu0 %v8506_v52 }
 0xa24   : > { %v17547_v35 = vadd.f32 %v17125_v8, %v8296_v25 }
 0xa25   : > { %18899 = vst [vmem:[#allocation47_spill] sm:$0xff] %v17544_v27  ;;  %9634 = vst.msk [vmem:[%s17133_s14 + $0x1a8] sm:$0xff] %vm9580_vm1, %v17544_v27  ;;  %v8515_v47 = vsel %vm8355_vm2, %v17544_v27, -inf }
 0xa26   : > { %18900 = vst [vmem:[#allocation9_spill] sm:$0xff] %v17547_v35  ;;  %9633 = vst.msk [vmem:[%s17133_s14 + $0x1a0] sm:$0xff] %vm9580_vm1, %v17547_v35  ;;  %v12883_v36 = vpop.f32.mrb[86].mxu0  ;;  %8510 = vmax.xlane.f32.xlu1 %v8509_v15  ;;  %v8512_v2 = vsel %vm8355_vm2, %v17547_v35, -inf }
 0xa27   : > { %v17560_v40 = vadd.f32 %v12883_v36, %v17125_v8  ;;  %v8306_v26 = vpop.f32.mrb[87].mxu0  ;;  %8513 = vmax.xlane.f32.xlu0 %v8512_v2 }
 0xa28   : > { %v17563_v58 = vadd.f32 %v17125_v8, %v8306_v26 }
 0xa29   : > { %18901 = vst [vmem:[#allocation50_spill] sm:$0xff] %v17560_v40  ;;  %9636 = vst.msk [vmem:[%s17133_s14 + $0x1b8] sm:$0xff] %vm9580_vm1, %v17560_v40  ;;  %v8521_v26 = vsel %vm8355_vm2, %v17560_v40, -inf }
 0xa2a   : > { %18902 = vst [vmem:[#allocation49_spill] sm:$0xff] %v17563_v58  ;;  %9635 = vst.msk [vmem:[%s17133_s14 + $0x1b0] sm:$0xff] %vm9580_vm1, %v17563_v58  ;;  %v12886_v52 = vpop.f32.mrb[88].mxu0  ;;  %8516 = vmax.xlane.f32.xlu1 %v8515_v47  ;;  %v8518_v25 = vsel %vm8355_vm2, %v17563_v58, -inf }
 0xa2b   : > { %v17576_v15 = vadd.f32 %v12886_v52, %v17125_v8  ;;  %v8316_v36 = vpop.f32.mrb[89].mxu0  ;;  %8519 = vmax.xlane.f32.xlu0 %v8518_v25 }
 0xa2c   : > { %v17579_v2 = vadd.f32 %v17125_v8, %v8316_v36 }
 0xa2d   : > { %18903 = vst [vmem:[#allocation27_spill] sm:$0xff] %v17576_v15  ;;  %9638 = vst.msk [vmem:[%s17133_s14 + $0x1c8] sm:$0xff] %vm9580_vm1, %v17576_v15  ;;  %v8527_v40 = vsel %vm8355_vm2, %v17576_v15, -inf }
 0xa2e   : > { %18904 = vst [vmem:[#allocation33_spill] sm:$0xff] %v17579_v2  ;;  %9637 = vst.msk [vmem:[%s17133_s14 + $0x1c0] sm:$0xff] %vm9580_vm1, %v17579_v2  ;;  %v12889_v47 = vpop.f32.mrb[90].mxu0  ;;  %8522 = vmax.xlane.f32.xlu1 %v8521_v26  ;;  %v8524_v52 = vsel %vm8355_vm2, %v17579_v2, -inf }
 0xa2f   : > { %v17592_v25 = vadd.f32 %v12889_v47, %v17125_v8  ;;  %v8326_v36 = vpop.f32.mrb[91].mxu0  ;;  %8525 = vmax.xlane.f32.xlu0 %v8524_v52 }
 0xa30   : > { %v17595_v58 = vadd.f32 %v17125_v8, %v8326_v36 }
 0xa31   : > { %18905 = vst [vmem:[#allocation30_spill] sm:$0xff] %v17592_v25  ;;  %9640 = vst.msk [vmem:[%s17133_s14 + $0x1d8] sm:$0xff] %vm9580_vm1, %v17592_v25  ;;  %v8533_v15 = vsel %vm8355_vm2, %v17592_v25, -inf }
 0xa32   : > { %18906 = vst [vmem:[#allocation37_spill] sm:$0xff] %v17595_v58  ;;  %9639 = vst.msk [vmem:[%s17133_s14 + $0x1d0] sm:$0xff] %vm9580_vm1, %v17595_v58  ;;  %v12892_v26 = vpop.f32.mrb[92].mxu0  ;;  %8528 = vmax.xlane.f32.xlu1 %v8527_v40  ;;  %v8530_v47 = vsel %vm8355_vm2, %v17595_v58, -inf }
 0xa33   : > { %v17608_v52 = vadd.f32 %v12892_v26, %v17125_v8  ;;  %v8336_v36 = vpop.f32.mrb[93].mxu0  ;;  %8531 = vmax.xlane.f32.xlu0 %v8530_v47 }
 0xa34   : > { %v17611_v2 = vadd.f32 %v17125_v8, %v8336_v36 }
 0xa35   : > { %18907 = vst [vmem:[#allocation34_spill] sm:$0xff] %v17608_v52  ;;  %9642 = vst.msk [vmem:[%s17133_s14 + $0x1e8] sm:$0xff] %vm9580_vm1, %v17608_v52  ;;  %v8539_v25 = vsel %vm8355_vm2, %v17608_v52, -inf }
 0xa36   : > { %18908 = vst [vmem:[#allocation41_spill] sm:$0xff] %v17611_v2  ;;  %9641 = vst.msk [vmem:[%s17133_s14 + $0x1e0] sm:$0xff] %vm9580_vm1, %v17611_v2  ;;  %v12895_v40 = vpop.f32.mrb[94].mxu0  ;;  %8534 = vmax.xlane.f32.xlu1 %v8533_v15  ;;  %v8536_v26 = vsel %vm8355_vm2, %v17611_v2, -inf }
 0xa37   : > { %v17624_v58 = vadd.f32 %v12895_v40, %v17125_v8  ;;  %v8346_v47 = vpop.f32.mrb[95].mxu0  ;;  %8537 = vmax.xlane.f32.xlu0 %v8536_v26 }
 0xa38   : > { %v17627_v36 = vadd.f32 %v17125_v8, %v8346_v47 }
 0xa39   : > { %18909 = vst [vmem:[#allocation38_spill] sm:$0xff] %v17624_v58  ;;  %9644 = vst.msk [vmem:[%s17133_s14 + $0x1f8] sm:$0xff] %vm9580_vm1, %v17624_v58  ;;  %v8545_v40 = vsel %vm8355_vm2, %v17624_v58, -inf }
 0xa3a   : > { %18910 = vst [vmem:[#allocation45_spill] sm:$0xff] %v17627_v36  ;;  %9643 = vst.msk [vmem:[%s17133_s14 + $0x1f0] sm:$0xff] %vm9580_vm1, %v17627_v36  ;;  %8540 = vmax.xlane.f32.xlu1 %v8539_v25  ;;  %v8542_v15 = vsel %vm8355_vm2, %v17627_v36, -inf }
 0xa3b   : > { %8543 = vmax.xlane.f32.xlu0 %v8542_v15 }
 0xa3e   : > { %8546 = vmax.xlane.f32.xlu1 %v8545_v40 }
 0xa4b   : > { %v8361_v8 = vpop.xlane.xlu0 %8360 }
 0xa4c   : > { %v8549_v26 = vsub.f32 %v17128_v7, %v8361_v8 }
 0xa4e   : > { %v8614_v47 = vmul.f32 1.442695, %v8549_v26 }
 0xa4f   : > { %v8367_v2 = vpop.xlane.xlu1 %8366  ;;  %v8358_v27 = vpop.xlane.xlu0 %8357 }
 0xa50   : > { %13150 = vpow2.f32 %v8614_v47  ;;  %v8551_v52 = vsub.f32 %v17144_v34, %v8367_v2  ;;  %v8548_v35 = vsub.f32 %v17131_v6, %v8358_v27 }
 0xa52   : > { %v8618_v25 = vmul.f32 1.442695, %v8551_v52  ;;  %v8612_v5 = vmul.f32 1.442695, %v8548_v35 }
 0xa53   : > { %v8364_v12 = vpop.xlane.xlu1 %8363 }
 0xa54   : > { %13152 = vpow2.f32 %v8618_v25  ;;  %v8550_v15 = vsub.f32 %v17147_v59, %v8364_v12  ;;  %v8370_v36 = vpop.xlane.xlu0 %8369 }
 0xa55   : > { %13154 = vpow2.f32 %v8612_v5  ;;  %v8552_v40 = vsub.f32 %v17163_v13, %v8370_v36 }
 0xa56   : > { %v8616_v58 = vmul.f32 1.442695, %v8550_v15 }
 0xa57   : > { %v8620_v7 = vmul.f32 1.442695, %v8552_v40  ;;  %v8373_v8 = vpop.xlane.xlu1 %8372 }
 0xa58   : > { %13156 = vpow2.f32 %v8616_v58  ;;  %v8553_v26 = vsub.f32 %v17160_v19, %v8373_v8  ;;  %v8376_v47 = vpop.xlane.xlu0 %8375 }
 0xa59   : > { %13158 = vpow2.f32 %v8620_v7  ;;  %v8554_v6 = vsub.f32 %v17179_v4, %v8376_v47 }
 0xa5a   : > { %v13151_v34 = vpop.eup %13150  ;;  %v8622_v27 = vmul.f32 1.442695, %v8553_v26 }
 0xa5b   : > { %v8624_v35 = vmul.f32 1.442695, %v8554_v6  ;;  %8813 = vrot.lane.b32.xlu1 %v13151_v34, %s13514_s30  ;;  %v8379_v59 = vpop.xlane.xlu1 %8378 }
 0xa5c   : > { %13160 = vpow2.f32 %v8622_v27  ;;  %v8555_v13 = vsub.f32 %v17176_v24, %v8379_v59  ;;  %v8382_v5 = vpop.xlane.xlu0 %8381 }
 0xa5d   : > { %13162 = vpow2.f32 %v8624_v35  ;;  %v8556_v12 = vsub.f32 %v17195_v33, %v8382_v5 }
 0xa5e   : > { %v13153_v58 = vpop.eup %13152  ;;  %v8626_v19 = vmul.f32 1.442695, %v8555_v13 }
 0xa5f   : > { %v13155_v2 = vpop.eup %13154  ;;  %v8628_v52 = vmul.f32 1.442695, %v8556_v12  ;;  %8817 = vrot.lane.b32.xlu1 %v13153_v58, %s13514_s30  ;;  %v8385_v4 = vpop.xlane.xlu1 %8384 }
 0xa60   : > { %13164 = vpow2.f32 %v8626_v19  ;;  %v8557_v36 = vsub.f32 %v17192_v49, %v8385_v4  ;;  %8811 = vrot.lane.b32.xlu0 %v13155_v2, %s13514_s30  ;;  %v8388_v25 = vpop.xlane.xlu0 %8387 }
 0xa61   : > { %13166 = vpow2.f32 %v8628_v52  ;;  %v8558_v24 = vsub.f32 %v17211_v41, %v8388_v25 }
 0xa62   : > { %v13157_v15 = vpop.eup %13156  ;;  %v8630_v40 = vmul.f32 1.442695, %v8557_v36 }
 0xa63   : > { %v13159_v7 = vpop.eup %13158  ;;  %v8632_v33 = vmul.f32 1.442695, %v8558_v24  ;;  %8815 = vrot.lane.b32.xlu1 %v13157_v15, %s13514_s30  ;;  %v8391_v8 = vpop.xlane.xlu1 %8390 }
 0xa64   : > { %13168 = vpow2.f32 %v8630_v40  ;;  %v8559_v26 = vsub.f32 %v17208_v43, %v8391_v8  ;;  %8819 = vrot.lane.b32.xlu0 %v13159_v7, %s13514_s30  ;;  %v8394_v47 = vpop.xlane.xlu0 %8393 }
 0xa65   : > { %13170 = vpow2.f32 %v8632_v33  ;;  %v8560_v49 = vsub.f32 %v17227_v55, %v8394_v47 }
 0xa66   : > { %v13161_v6 = vpop.eup %13160  ;;  %v8634_v34 = vmul.f32 1.442695, %v8559_v26 }
 0xa67   : > { %v13163_v27 = vpop.eup %13162  ;;  %v8636_v41 = vmul.f32 1.442695, %v8560_v49  ;;  %8821 = vrot.lane.b32.xlu1 %v13161_v6, %s13514_s30  ;;  %v8397_v35 = vpop.xlane.xlu1 %8396 }
 0xa68   : > { %13172 = vpow2.f32 %v8634_v34  ;;  %v8561_v59 = vsub.f32 %v17224_v56, %v8397_v35  ;;  %8823 = vrot.lane.b32.xlu0 %v13163_v27, %s13514_s30  ;;  %v8400_v13 = vpop.xlane.xlu0 %8399 }
 0xa69   : > { %13174 = vpow2.f32 %v8636_v41  ;;  %v8562_v43 = vsub.f32 %v17243_v16, %v8400_v13 }
 0xa6a   : > { %v13165_v5 = vpop.eup %13164  ;;  %v8638_v12 = vmul.f32 1.442695, %v8561_v59 }
 0xa6b   : > { %v13167_v58 = vpop.eup %13166  ;;  %v8640_v55 = vmul.f32 1.442695, %v8562_v43  ;;  %8825 = vrot.lane.b32.xlu1 %v13165_v5, %s13514_s30  ;;  %v8403_v19 = vpop.xlane.xlu1 %8402 }
 0xa6c   : > { %13176 = vpow2.f32 %v8638_v12  ;;  %v8563_v2 = vsub.f32 %v17240_v37, %v8403_v19  ;;  %8827 = vrot.lane.b32.xlu0 %v13167_v58, %s13514_s30  ;;  %v8406_v52 = vpop.xlane.xlu0 %8405 }
 0xa6d   : > { %13178 = vpow2.f32 %v8640_v55  ;;  %v8564_v56 = vsub.f32 %v17259_v21, %v8406_v52 }
 0xa6e   : > { %v13169_v4 = vpop.eup %13168  ;;  %v8642_v36 = vmul.f32 1.442695, %v8563_v2 }
 0xa6f   : > { %v13171_v25 = vpop.eup %13170  ;;  %v8644_v16 = vmul.f32 1.442695, %v8564_v56  ;;  %8829 = vrot.lane.b32.xlu1 %v13169_v4, %s13514_s30  ;;  %v8409_v24 = vpop.xlane.xlu1 %8408 }
 0xa70   : > { %13180 = vpow2.f32 %v8642_v36  ;;  %v8565_v15 = vsub.f32 %v17256_v11, %v8409_v24  ;;  %8831 = vrot.lane.b32.xlu0 %v13171_v25, %s13514_s30  ;;  %v8412_v40 = vpop.xlane.xlu0 %8411 }
 0xa71   : > { %13182 = vpow2.f32 %v8644_v16  ;;  %v8566_v37 = vsub.f32 %v17275_v20, %v8412_v40 }
 0xa72   : > { %v13173_v7 = vpop.eup %13172  ;;  %v8646_v33 = vmul.f32 1.442695, %v8565_v15 }
 0xa73   : > { %v13175_v8 = vpop.eup %13174  ;;  %v8648_v21 = vmul.f32 1.442695, %v8566_v37  ;;  %8833 = vrot.lane.b32.xlu1 %v13173_v7, %s13514_s30  ;;  %v8415_v26 = vpop.xlane.xlu1 %8414 }
 0xa74   : > { %13184 = vpow2.f32 %v8646_v33  ;;  %v8567_v47 = vsub.f32 %v17272_v46, %v8415_v26  ;;  %8835 = vrot.lane.b32.xlu0 %v13175_v8, %s13514_s30  ;;  %v8418_v49 = vpop.xlane.xlu0 %8417 }
 0xa75   : > { %13186 = vpow2.f32 %v8648_v21  ;;  %v8568_v11 = vsub.f32 %v17291_v63, %v8418_v49 }
 0xa76   : > { %v13177_v6 = vpop.eup %13176  ;;  %v8650_v34 = vmul.f32 1.442695, %v8567_v47 }
 0xa77   : > { %v13179_v27 = vpop.eup %13178  ;;  %v8652_v20 = vmul.f32 1.442695, %v8568_v11  ;;  %8837 = vrot.lane.b32.xlu1 %v13177_v6, %s13514_s30  ;;  %v8421_v41 = vpop.xlane.xlu1 %8420 }
 0xa78   : > { %13188 = vpow2.f32 %v8650_v34  ;;  %v8569_v35 = vsub.f32 %v17288_v23, %v8421_v41  ;;  %8839 = vrot.lane.b32.xlu0 %v13179_v27, %s13514_s30  ;;  %v8424_v59 = vpop.xlane.xlu0 %8423 }
 0xa79   : > { %13190 = vpow2.f32 %v8652_v20  ;;  %v8570_v46 = vsub.f32 %v17307_v22, %v8424_v59 }
 0xa7a   : > { %v13181_v13 = vpop.eup %13180  ;;  %v8654_v43 = vmul.f32 1.442695, %v8569_v35 }
 0xa7b   : > { %v13183_v5 = vpop.eup %13182  ;;  %v8656_v63 = vmul.f32 1.442695, %v8570_v46  ;;  %8841 = vrot.lane.b32.xlu1 %v13181_v13, %s13514_s30  ;;  %v8427_v12 = vpop.xlane.xlu1 %8426 }
 0xa7c   : > { %13192 = vpow2.f32 %v8654_v43  ;;  %v8571_v58 = vsub.f32 %v17304_v61, %v8427_v12  ;;  %8843 = vrot.lane.b32.xlu0 %v13183_v5, %s13514_s30  ;;  %v8430_v55 = vpop.xlane.xlu0 %8429 }
 0xa7d   : > { %13194 = vpow2.f32 %v8656_v63  ;;  %v8572_v23 = vsub.f32 %v17323_v31, %v8430_v55 }
 0xa7e   : > { %v13185_v19 = vpop.eup %13184  ;;  %v8658_v2 = vmul.f32 1.442695, %v8571_v58 }
 0xa7f   : > { %v13187_v52 = vpop.eup %13186  ;;  %v8660_v22 = vmul.f32 1.442695, %v8572_v23  ;;  %8845 = vrot.lane.b32.xlu1 %v13185_v19, %s13514_s30  ;;  %v8433_v56 = vpop.xlane.xlu1 %8432 }
 0xa80   : > { %13196 = vpow2.f32 %v8658_v2  ;;  %v8573_v4 = vsub.f32 %v17320_v45, %v8433_v56  ;;  %8847 = vrot.lane.b32.xlu0 %v13187_v52, %s13514_s30  ;;  %v8436_v36 = vpop.xlane.xlu0 %8435 }
 0xa81   : > { %13198 = vpow2.f32 %v8660_v22  ;;  %v8574_v61 = vsub.f32 %v17339_v53, %v8436_v36 }
 0xa82   : > { %v13189_v25 = vpop.eup %13188  ;;  %v8662_v16 = vmul.f32 1.442695, %v8573_v4 }
 0xa83   : > { %v13191_v24 = vpop.eup %13190  ;;  %v8664_v31 = vmul.f32 1.442695, %v8574_v61  ;;  %8849 = vrot.lane.b32.xlu1 %v13189_v25, %s13514_s30  ;;  %v8439_v15 = vpop.xlane.xlu1 %8438 }
 0xa84   : > { %13200 = vpow2.f32 %v8662_v16  ;;  %v8575_v40 = vsub.f32 %v17336_v50, %v8439_v15  ;;  %8851 = vrot.lane.b32.xlu0 %v13191_v24, %s13514_s30  ;;  %v8442_v37 = vpop.xlane.xlu0 %8441 }
 0xa85   : > { %13202 = vpow2.f32 %v8664_v31  ;;  %v8576_v45 = vsub.f32 %v17355_v0, %v8442_v37 }
 0xa86   : > { %v13193_v7 = vpop.eup %13192  ;;  %v8666_v33 = vmul.f32 1.442695, %v8575_v40 }
 0xa87   : > { %v13195_v8 = vpop.eup %13194  ;;  %v8668_v53 = vmul.f32 1.442695, %v8576_v45  ;;  %8853 = vrot.lane.b32.xlu1 %v13193_v7, %s13514_s30  ;;  %v8445_v21 = vpop.xlane.xlu1 %8444 }
 0xa88   : > { %13204 = vpow2.f32 %v8666_v33  ;;  %v8577_v26 = vsub.f32 %v17352_v14, %v8445_v21  ;;  %8855 = vrot.lane.b32.xlu0 %v13195_v8, %s13514_s30  ;;  %v8448_v47 = vpop.xlane.xlu0 %8447 }
 0xa89   : > { %13206 = vpow2.f32 %v8668_v53  ;;  %v8578_v50 = vsub.f32 %v17371_v30, %v8448_v47 }
 0xa8a   : > { %v13197_v49 = vpop.eup %13196  ;;  %v8670_v11 = vmul.f32 1.442695, %v8577_v26 }
 0xa8b   : > { %v13199_v6 = vpop.eup %13198  ;;  %v8672_v0 = vmul.f32 1.442695, %v8578_v50  ;;  %8857 = vrot.lane.b32.xlu1 %v13197_v49, %s13514_s30  ;;  %v8451_v34 = vpop.xlane.xlu1 %8450 }
 0xa8c   : > { %13208 = vpow2.f32 %v8670_v11  ;;  %v8579_v27 = vsub.f32 %v17368_v9, %v8451_v34  ;;  %8859 = vrot.lane.b32.xlu0 %v13199_v6, %s13514_s30  ;;  %v8454_v20 = vpop.xlane.xlu0 %8453 }
 0xa8d   : > { %13210 = vpow2.f32 %v8672_v0  ;;  %v8580_v14 = vsub.f32 %v17387_v51, %v8454_v20 }
 0xa8e   : > { %v13201_v41 = vpop.eup %13200  ;;  %v8674_v35 = vmul.f32 1.442695, %v8579_v27 }
 0xa8f   : > { %v13203_v59 = vpop.eup %13202  ;;  %v8676_v30 = vmul.f32 1.442695, %v8580_v14  ;;  %8861 = vrot.lane.b32.xlu1 %v13201_v41, %s13514_s30  ;;  %v8457_v46 = vpop.xlane.xlu1 %8456 }
 0xa90   : > { %13212 = vpow2.f32 %v8674_v35  ;;  %v8581_v13 = vsub.f32 %v17384_v18, %v8457_v46  ;;  %8863 = vrot.lane.b32.xlu0 %v13203_v59, %s13514_s30  ;;  %v8460_v43 = vpop.xlane.xlu0 %8459 }
 0xa91   : > { %13214 = vpow2.f32 %v8676_v30  ;;  %v8582_v9 = vsub.f32 %v17403_v60, %v8460_v43 }
 0xa92   : > { %v13205_v5 = vpop.eup %13204  ;;  %v8678_v63 = vmul.f32 1.442695, %v8581_v13 }
 0xa93   : > { %v13207_v12 = vpop.eup %13206  ;;  %v8680_v51 = vmul.f32 1.442695, %v8582_v9  ;;  %8865 = vrot.lane.b32.xlu1 %v13205_v5, %s13514_s30  ;;  %v8463_v58 = vpop.xlane.xlu1 %8462 }
 0xa94   : > { %13216 = vpow2.f32 %v8678_v63  ;;  %v8583_v55 = vsub.f32 %v17400_v1, %v8463_v58  ;;  %8867 = vrot.lane.b32.xlu0 %v13207_v12, %s13514_s30  ;;  %v8466_v23 = vpop.xlane.xlu0 %8465 }
 0xa95   : > { %13218 = vpow2.f32 %v8680_v51  ;;  %v8584_v18 = vsub.f32 %v17419_v10, %v8466_v23 }
 0xa96   : > { %v13209_v19 = vpop.eup %13208  ;;  %v8682_v2 = vmul.f32 1.442695, %v8583_v55 }
 0xa97   : > { %v13211_v52 = vpop.eup %13210  ;;  %v8684_v60 = vmul.f32 1.442695, %v8584_v18  ;;  %8869 = vrot.lane.b32.xlu1 %v13209_v19, %s13514_s30  ;;  %v8469_v22 = vpop.xlane.xlu1 %8468  ;;  %v18912_v18 = vld [vmem:[#allocation44_spill] sm:$0xff] }
 0xa98   : > { %13220 = vpow2.f32 %v8682_v2  ;;  %v8585_v56 = vsub.f32 %v17416_v54, %v8469_v22  ;;  %8871 = vrot.lane.b32.xlu0 %v13211_v52, %s13514_s30  ;;  %v8472_v4 = vpop.xlane.xlu0 %8471 }
 0xa99   : > { %13222 = vpow2.f32 %v8684_v60  ;;  %v8586_v1 = vsub.f32 %v17435_v32, %v8472_v4 }
 0xa9a   : > { %v13213_v36 = vpop.eup %13212  ;;  %v8686_v61 = vmul.f32 1.442695, %v8585_v56 }
 0xa9b   : > { %v13215_v25 = vpop.eup %13214  ;;  %v8688_v10 = vmul.f32 1.442695, %v8586_v1  ;;  %8873 = vrot.lane.b32.xlu1 %v13213_v36, %s13514_s30  ;;  %v8475_v16 = vpop.xlane.xlu1 %8474  ;;  %v18914_v36 = vld [vmem:[#allocation47_spill] sm:$0xff] }
 0xa9c   : > { %13224 = vpow2.f32 %v8686_v61  ;;  %v8587_v24 = vsub.f32 %v17432_v3, %v8475_v16  ;;  %8875 = vrot.lane.b32.xlu0 %v13215_v25, %s13514_s30  ;;  %v8478_v31 = vpop.xlane.xlu0 %8477 }
 0xa9d   : > { %13226 = vpow2.f32 %v8688_v10  ;;  %v8588_v54 = vsub.f32 %v17451_v39, %v8478_v31  ;;  %v18915_v10 = vld [vmem:[#allocation49_spill] sm:$0xff] }
 0xa9e   : > { %v13217_v15 = vpop.eup %13216  ;;  %v8690_v40 = vmul.f32 1.442695, %v8587_v24 }
 0xa9f   : > { %v13219_v37 = vpop.eup %13218  ;;  %v8692_v32 = vmul.f32 1.442695, %v8588_v54  ;;  %8877 = vrot.lane.b32.xlu1 %v13217_v15, %s13514_s30  ;;  %v8481_v45 = vpop.xlane.xlu1 %8480 }
 0xaa0   : > { %13228 = vpow2.f32 %v8690_v40  ;;  %v8589_v7 = vsub.f32 %v17448_v38, %v8481_v45  ;;  %8879 = vrot.lane.b32.xlu0 %v13219_v37, %s13514_s30  ;;  %v8484_v33 = vpop.xlane.xlu0 %8483  ;;  %v18916_v37 = vld [vmem:[#allocation50_spill] sm:$0xff] }
 0xaa1   : > { %13230 = vpow2.f32 %v8692_v32  ;;  %v8590_v3 = vsub.f32 %v17467_v44, %v8484_v33 }
 0xaa2   : > { %v13221_v8 = vpop.eup %13220  ;;  %v8694_v53 = vmul.f32 1.442695, %v8589_v7  ;;  %v18917_v7 = vld [vmem:[#allocation33_spill] sm:$0xff] }
 0xaa3   : > { %v13223_v21 = vpop.eup %13222  ;;  %v8696_v39 = vmul.f32 1.442695, %v8590_v3  ;;  %8881 = vrot.lane.b32.xlu1 %v13221_v8, %s13514_s30  ;;  %v8487_v26 = vpop.xlane.xlu1 %8486 }
 0xaa4   : > { %13232 = vpow2.f32 %v8694_v53  ;;  %v8591_v47 = vsub.f32 %v17464_v62, %v8487_v26  ;;  %8883 = vrot.lane.b32.xlu0 %v13223_v21, %s13514_s30  ;;  %v8490_v50 = vpop.xlane.xlu0 %8489  ;;  %v18918_v26 = vld [vmem:[#allocation27_spill] sm:$0xff] }
 0xaa5   : > { %13234 = vpow2.f32 %v8696_v39  ;;  %v8592_v38 = vsub.f32 %v17483_v29, %v8490_v50 }
 0xaa6   : > { %v13225_v49 = vpop.eup %13224  ;;  %v8698_v11 = vmul.f32 1.442695, %v8591_v47 }
 0xaa7   : > { %v13227_v6 = vpop.eup %13226  ;;  %v8700_v44 = vmul.f32 1.442695, %v8592_v38  ;;  %8885 = vrot.lane.b32.xlu1 %v13225_v49, %s13514_s30  ;;  %v8493_v0 = vpop.xlane.xlu1 %8492  ;;  %v18919_v38 = vld [vmem:[#allocation37_spill] sm:$0xff] }
 0xaa8   : > { %13236 = vpow2.f32 %v8698_v11  ;;  %v8593_v34 = vsub.f32 %v17480_v17, %v8493_v0  ;;  %8887 = vrot.lane.b32.xlu0 %v13227_v6, %s13514_s30  ;;  %v8496_v27 = vpop.xlane.xlu0 %8495 }
 0xaa9   : > { %13238 = vpow2.f32 %v8700_v44  ;;  %v8594_v62 = vsub.f32 %v17499_v42, %v8496_v27  ;;  %v18920_v27 = vld [vmem:[#allocation30_spill] sm:$0xff] }
 0xaaa   : > { %v13229_v20 = vpop.eup %13228  ;;  %v8702_v14 = vmul.f32 1.442695, %v8593_v34 }
 0xaab   : > { %v13231_v41 = vpop.eup %13230  ;;  %v8704_v29 = vmul.f32 1.442695, %v8594_v62  ;;  %8889 = vrot.lane.b32.xlu1 %v13229_v20, %s13514_s30  ;;  %v8499_v35 = vpop.xlane.xlu1 %8498 }
 0xaac   : > { %13240 = vpow2.f32 %v8702_v14  ;;  %v8595_v59 = vsub.f32 %v17496_v57, %v8499_v35  ;;  %8891 = vrot.lane.b32.xlu0 %v13231_v41, %s13514_s30  ;;  %v8502_v30 = vpop.xlane.xlu0 %8501  ;;  %v18911_v57 = vld [vmem:[#allocation48_spill] sm:$0xff] }
 0xaad   : > { %13242 = vpow2.f32 %v8704_v29  ;;  %v8596_v17 = vsub.f32 %v17515_v28, %v8502_v30 }
 0xaae   : > { %v13233_v46 = vpop.eup %13232  ;;  %v8706_v13 = vmul.f32 1.442695, %v8595_v59 }
 0xaaf   : > { %v13235_v43 = vpop.eup %13234  ;;  %v8708_v42 = vmul.f32 1.442695, %v8596_v17  ;;  %8893 = vrot.lane.b32.xlu1 %v13233_v46, %s13514_s30  ;;  %v8505_v9 = vpop.xlane.xlu1 %8504 }
 0xab0   : > { %13244 = vpow2.f32 %v8706_v13  ;;  %v8597_v5 = vsub.f32 %v17512_v48, %v8505_v9  ;;  %8895 = vrot.lane.b32.xlu0 %v13235_v43, %s13514_s30  ;;  %v8508_v63 = vpop.xlane.xlu0 %8507  ;;  %v18913_v48 = vld [vmem:[#allocation9_spill] sm:$0xff] }
 0xab1   : > { %13246 = vpow2.f32 %v8708_v42  ;;  %v8598_v12 = vsub.f32 %v18911_v57, %v8508_v63 }
 0xab2   : > { %v13237_v51 = vpop.eup %13236  ;;  %v8710_v58 = vmul.f32 1.442695, %v8597_v5 }
 0xab3   : > { %v13239_v55 = vpop.eup %13238  ;;  %v8712_v28 = vmul.f32 1.442695, %v8598_v12  ;;  %8897 = vrot.lane.b32.xlu1 %v13237_v51, %s13514_s30  ;;  %v8511_v23 = vpop.xlane.xlu1 %8510 }
 0xab4   : > { %13248 = vpow2.f32 %v8710_v58  ;;  %v8599_v19 = vsub.f32 %v18912_v18, %v8511_v23  ;;  %8899 = vrot.lane.b32.xlu0 %v13239_v55, %s13514_s30  ;;  %v8514_v2 = vpop.xlane.xlu0 %8513 }
 0xab5   : > { %13250 = vpow2.f32 %v8712_v28  ;;  %v8600_v52 = vsub.f32 %v18913_v48, %v8514_v2 }
 0xab6   : > { %v13241_v60 = vpop.eup %13240  ;;  %v8714_v22 = vmul.f32 1.442695, %v8599_v19  ;;  %v17782_v19 = vld [vmem:[%s18505_s8] ss:$0 sm:$0xff] }
 0xab7   : > { %v13243_v56 = vpop.eup %13242  ;;  %v8716_v4 = vmul.f32 1.442695, %v8600_v52  ;;  %8901 = vrot.lane.b32.xlu1 %v13241_v60, %s13514_s30  ;;  %v8517_v1 = vpop.xlane.xlu1 %8516 }
 0xab8   : > { %13252 = vpow2.f32 %v8714_v22  ;;  %v8601_v61 = vsub.f32 %v18914_v36, %v8517_v1  ;;  %8903 = vrot.lane.b32.xlu0 %v13243_v56, %s13514_s30  ;;  %v8520_v25 = vpop.xlane.xlu0 %8519 }
 0xab9   : > { %13254 = vpow2.f32 %v8716_v4  ;;  %v8602_v16 = vsub.f32 %v18915_v10, %v8520_v25  ;;  %v18921_v4 = vld [vmem:[#allocation41_spill] sm:$0xff]  ;;  %v18922_v10 = vld [vmem:[#allocation34_spill] sm:$0xff] }
 0xaba   : > { %v13245_v24 = vpop.eup %13244  ;;  %v8718_v31 = vmul.f32 1.442695, %v8601_v61 }
 0xabb   : > { %v13247_v54 = vpop.eup %13246  ;;  %v8720_v15 = vmul.f32 1.442695, %v8602_v16  ;;  %8905 = vrot.lane.b32.xlu1 %v13245_v24, %s13514_s30  ;;  %v8523_v40 = vpop.xlane.xlu1 %8522 }
 0xabc   : > { %13256 = vpow2.f32 %v8718_v31  ;;  %v8603_v32 = vsub.f32 %v18916_v37, %v8523_v40  ;;  %8907 = vrot.lane.b32.xlu0 %v13247_v54, %s13514_s30  ;;  %v8526_v45 = vpop.xlane.xlu0 %8525 }
 0xabd   : > { %13258 = vpow2.f32 %v8720_v15  ;;  %v8604_v33 = vsub.f32 %v18917_v7, %v8526_v45 }
 0xabe   : > { %v13249_v3 = vpop.eup %13248  ;;  %v8722_v8 = vmul.f32 1.442695, %v8603_v32 }
 0xabf   : > { %v13251_v53 = vpop.eup %13250  ;;  %v8724_v21 = vmul.f32 1.442695, %v8604_v33  ;;  %8909 = vrot.lane.b32.xlu1 %v13249_v3, %s13514_s30  ;;  %v8529_v39 = vpop.xlane.xlu1 %8528 }
 0xac0   : > { %13260 = vpow2.f32 %v8722_v8  ;;  %v8605_v47 = vsub.f32 %v18918_v26, %v8529_v39  ;;  %8911 = vrot.lane.b32.xlu0 %v13251_v53, %s13514_s30  ;;  %v8532_v50 = vpop.xlane.xlu0 %8531 }
 0xac1   : > { %13262 = vpow2.f32 %v8724_v21  ;;  %v8606_v49 = vsub.f32 %v18919_v38, %v8532_v50 }
 0xac2   : > { %v13253_v11 = vpop.eup %13252  ;;  %v8726_v6 = vmul.f32 1.442695, %v8605_v47 }
 0xac3   : > { %v13255_v44 = vpop.eup %13254  ;;  %v8728_v0 = vmul.f32 1.442695, %v8606_v49  ;;  %8913 = vrot.lane.b32.xlu1 %v13253_v11, %s13514_s30  ;;  %v8535_v34 = vpop.xlane.xlu1 %8534 }
 0xac4   : > { %13264 = vpow2.f32 %v8726_v6  ;;  %v8607_v62 = vsub.f32 %v18920_v27, %v8535_v34  ;;  %8915 = vrot.lane.b32.xlu0 %v13255_v44, %s13514_s30  ;;  %v8538_v35 = vpop.xlane.xlu0 %8537 }
 0xac5   : > { %13266 = vpow2.f32 %v8728_v0  ;;  %v8608_v1 = vsub.f32 %v18921_v4, %v8538_v35 }
 0xac6   : > { %v13257_v20 = vpop.eup %13256  ;;  %v8730_v14 = vmul.f32 1.442695, %v8607_v62 }
 0xac7   : > { %v13259_v41 = vpop.eup %13258  ;;  %8917 = vrot.lane.b32.xlu1 %v13257_v20, %s13514_s30  ;;  %v8541_v29 = vpop.xlane.xlu1 %8540  ;;  %v8732_v24 = vmul.f32 1.442695, %v8608_v1  ;;  %v18923_v20 = vld [vmem:[#allocation38_spill] sm:$0xff] }
 0xac8   : > { %13268 = vpow2.f32 %v8730_v14  ;;  %8919 = vrot.lane.b32.xlu0 %v13259_v41, %s13514_s30  ;;  %v17760_v13 = vpop.xlane.xlu0 %8543  ;;  %v8609_v16 = vsub.f32 %v18922_v10, %v8541_v29 }
 0xac9   : > { %13270 = vpow2.f32 %v8732_v24 }
 0xaca   : > { %v13261_v59 = vpop.eup %13260  ;;  %v8734_v40 = vmul.f32 1.442695, %v8609_v16 }
 0xacb   : > { %v13263_v30 = vpop.eup %13262  ;;  %8921 = vrot.lane.b32.xlu1 %v13261_v59, %s13514_s30  ;;  %v17757_v17 = vpop.xlane.xlu1 %8546 }
 0xacc   : > { %8923 = vrot.lane.b32.xlu0 %v13263_v30, %s13514_s30  ;;  %13272 = vpow2.f32 %v8734_v40  ;;  %v8611_v14 = vsub.f32 %v18923_v20, %v17757_v17 }
 0xace   : > { %v13265_v46 = vpop.eup %13264  ;;  %v8738_v59 = vmul.f32 1.442695, %v8611_v14 }
 0xacf   : > { %v13267_v43 = vpop.eup %13266  ;;  %8925 = vrot.lane.b32.xlu1 %v13265_v46, %s13514_s30  ;;  %v8814_v42 = vpop.permute.xlu1 %8813  ;;  %v18924_v46 = vld [vmem:[#allocation45_spill] sm:$0xff] }
 0xad0   : > { %8927 = vrot.lane.b32.xlu0 %v13267_v43, %s13514_s30  ;;  %v9004_v36 = vmul.f32 %v17782_v19, %v8814_v42  ;;  %v9263_v25 = vsel %vm9067_vm3, %v8814_v42, 0.0  ;;  %v8610_v43 = vsub.f32 %v18924_v46, %v17760_v13  ;;  %13274 = vpow2.f32 %v8738_v59 }
 0xad2   : > { %v13269_v9 = vpop.eup %13268  ;;  %v8812_v5 = vpop.permute.xlu0 %8811  ;;  %v9071_v54 = vsel %vm9067_vm3, %v9004_v36, 0.0 }
 0xad3   : > { %8929 = vrot.lane.b32.xlu1 %v13269_v9, %s13514_s30  ;;  %v8818_v63 = vpop.permute.xlu1 %8817  ;;  %v9003_v2 = vmul.f32 %v17782_v19, %v8812_v5  ;;  %v9260_v52 = vsel %vm9067_vm3, %v8812_v5, 0.0  ;;  %v13271_v7 = vpop.eup %13270  ;;  %v8736_v9 = vmul.f32 1.442695, %v8610_v43 }
 0xad4   : > { %v9006_v6 = vmul.f32 %v17782_v19, %v8818_v63  ;;  %v9269_v41 = vsel %vm9067_vm3, %v8818_v63, 0.0 }
 0xad5   : > { %v9068_v22 = vsel %vm9067_vm3, %v9003_v2, 0.0  ;;  %13276 = vpow2.f32 %v8736_v9 }
 0xad6   : > { %v17765_v57 = vpop.permute.xlu0 %8819  ;;  %v13273_v3 = vpop.eup %13272  ;;  %v9077_v27 = vsel %vm9067_vm3, %v9006_v6, 0.0 }
 0xad7   : > { %v8816_v12 = vpop.permute.xlu1 %8815 }
 0xad8   : > { %v9266_v44 = vsel %vm9067_vm3, %v8816_v12, 0.0  ;;  %v9005_v34 = vmul.f32 %v17782_v19, %v8816_v12 }
 0xada   : > { %v17767_v51 = vpop.permute.xlu0 %8823  ;;  %v9074_v29 = vsel %vm9067_vm3, %v9005_v34, 0.0  ;;  %v13275_v12 = vpop.eup %13274 }
 0xadb   : > { %v17769_v58 = vpop.permute.xlu1 %8821  ;;  %v9278_v59 = vsel %vm9067_vm3, %v17767_v51, 0.0 }
 0xadc   : > { %v9275_v6 = vsel %vm9067_vm3, %v17769_v58, 0.0 }
 0xade   : > { %v17771_v55 = vpop.permute.xlu0 %8827 }
 0xadf   : > { %v17773_v28 = vpop.permute.xlu1 %8825 }
 0xae2   : > { %v17775_v23 = vpop.permute.xlu0 %8831 }
 0xae3   : > { %v17777_v18 = vpop.permute.xlu1 %8829 }
 0xae6   : > { %v17785_v48 = vpop.permute.xlu0 %8835 }
 0xae7   : > { %v17788_v60 = vpop.permute.xlu1 %8833 }
 0xaea   : > { %v17791_v56 = vpop.permute.xlu0 %8839 }
 0xaeb   : > { %v17795_v61 = vpop.permute.xlu1 %8837 }
 0xaee   : > { %v17799_v31 = vpop.permute.xlu0 %8843 }
 0xaef   : > { %9261 = vadd.xlane.f32.xlu0 %v9260_v52  ;;  %v17802_v15 = vpop.permute.xlu1 %8841 }
 0xaf2   : > { %v17804_v37 = vpop.permute.xlu0 %8847 }
 0xaf3   : > { %9069 = vadd.xlane.f32.xlu0 %v9068_v22  ;;  %v17806_v32 = vpop.permute.xlu1 %8845  ;;  %v13277_v22 = vpop.eup %13276 }
 0xaf6   : > { %v17808_v45 = vpop.permute.xlu0 %8851 }
 0xaf7   : > { %9264 = vadd.xlane.f32.xlu1 %v9263_v25  ;;  %v17810_v33 = vpop.permute.xlu1 %8849 }
 0xafa   : > { %v17813_v8 = vpop.permute.xlu0 %8855 }
 0xafb   : > { %9072 = vadd.xlane.f32.xlu1 %v9071_v54  ;;  %v17816_v53 = vpop.permute.xlu1 %8853 }
 0xafe   : > { %v17818_v21 = vpop.permute.xlu0 %8859 }
 0xaff   : > { %v17820_v39 = vpop.permute.xlu1 %8857 }
 0xb02   : > { %v17822_v26 = vpop.permute.xlu0 %8863 }
 0xb03   : > { %v17824_v47 = vpop.permute.xlu1 %8861 }
 0xb06   : > { %v17826_v50 = vpop.permute.xlu0 %8867 }
 0xb07   : > { %v17828_v38 = vpop.permute.xlu1 %8865 }
 0xb09   : > { %8931 = vrot.lane.b32.xlu0 %v13271_v7, %s13514_s30  ;;  %v9007_v7 = vmul.f32 %v17782_v19, %v17765_v57 }
 0xb0a   : > { %v17830_v49 = vpop.permute.xlu0 %8871 }
 0xb0b   : > { %v17832_v11 = vpop.permute.xlu1 %8869  ;;  %v9080_v14 = vsel %vm9067_vm3, %v9007_v7, 0.0 }
 0xb0c   : > { %8933 = vrot.lane.b32.xlu1 %v13273_v3, %s13514_s30  ;;  %v9008_v3 = vmul.f32 %v17782_v19, %v17769_v58  ;;  %v9010_v58 = vmul.f32 %v17782_v19, %v17773_v28 }
 0xb0e   : > { %v17836_v0 = vpop.permute.xlu0 %8875  ;;  %v9083_v20 = vsel %vm9067_vm3, %v9008_v3, 0.0  ;;  %v9089_v43 = vsel %vm9067_vm3, %v9010_v58, 0.0  ;;  %v9284_v3 = vsel %vm9067_vm3, %v17771_v55, 0.0 }
 0xb0f   : > { %v17840_v62 = vpop.permute.xlu1 %8873 }
 0xb12   : > { %v17846_v35 = vpop.permute.xlu0 %8879 }
 0xb13   : > { %v17848_v30 = vpop.permute.xlu1 %8877 }
 0xb16   : > { %v17852_v42 = vpop.permute.xlu0 %8883 }
 0xb17   : > { %v17854_v5 = vpop.permute.xlu1 %8881 }
 0xb1a   : > { %v17856_v17 = vpop.permute.xlu0 %8887 }
 0xb1b   : > { %v17858_v63 = vpop.permute.xlu1 %8885 }
 0xb1e   : > { %v17861_v2 = vpop.permute.xlu0 %8891 }
 0xb1f   : > { %v17863_v52 = vpop.permute.xlu1 %8889 }
 0xb22   : > { %v17866_v13 = vpop.permute.xlu0 %8895 }
 0xb23   : > { %v17868_v4 = vpop.permute.xlu1 %8893 }
 0xb26   : > { %v17870_v1 = vpop.permute.xlu0 %8899 }
 0xb27   : > { %v17872_v36 = vpop.permute.xlu1 %8897 }
 0xb28   : > { %9267 = vadd.xlane.f32.xlu0 %v9266_v44  ;;  %v9272_v44 = vsel %vm9067_vm3, %v17765_v57, 0.0  ;;  %v9281_v57 = vsel %vm9067_vm3, %v17773_v28, 0.0  ;;  %v9012_v28 = vmul.f32 %v17782_v19, %v17777_v18 }
 0xb2a   : > { %v17874_v25 = vpop.permute.xlu0 %8903 }
 0xb2b   : > { %v17876_v10 = vpop.permute.xlu1 %8901 }
 0xb2c   : > { %9078 = vadd.xlane.f32.xlu0 %v9077_v27 }
 0xb2e   : > { %v17878_v16 = vpop.permute.xlu0 %8907 }
 0xb2f   : > { %v17880_v24 = vpop.permute.xlu1 %8905 }
 0xb30   : > { %9270 = vadd.xlane.f32.xlu1 %v9269_v41  ;;  %9075 = vadd.xlane.f32.xlu0 %v9074_v29  ;;  %v9009_v41 = vmul.f32 %v17782_v19, %v17767_v51  ;;  %v9287_v51 = vsel %vm9067_vm3, %v17777_v18, 0.0  ;;  %v9014_v18 = vmul.f32 %v17782_v19, %v17788_v60 }
 0xb32   : > { %v17882_v54 = vpop.permute.xlu0 %8911  ;;  %v9086_v9 = vsel %vm9067_vm3, %v9009_v41, 0.0  ;;  %v9013_v41 = vmul.f32 %v17782_v19, %v17775_v23 }
 0xb33   : > { %v17884_v40 = vpop.permute.xlu1 %8909 }
 0xb36   : > { %v17894_v34 = vpop.permute.xlu0 %8915 }
 0xb37   : > { %v17896_v27 = vpop.permute.xlu1 %8913 }
 0xb3a   : > { %v17904_v29 = vpop.permute.xlu0 %8919 }
 0xb3b   : > { %v17910_v46 = vpop.permute.xlu1 %8917 }
 0xb3f   : > { %v17920_v7 = vpop.permute.xlu1 %8921 }
 0xb41   : > { %8937 = vrot.lane.b32.xlu1 %v13275_v12, %s13514_s30  ;;  %v17914_v12 = vpop.permute.xlu0 %8923 }
 0xb46   : > { %8935 = vrot.lane.b32.xlu0 %v13277_v22, %s13514_s30  ;;  %v9011_v22 = vmul.f32 %v17782_v19, %v17771_v55  ;;  %v9293_v55 = vsel %vm9067_vm3, %v17788_v60, 0.0  ;;  %v9016_v60 = vmul.f32 %v17782_v19, %v17795_v61 }
 0xb65   : > { %9276 = vadd.xlane.f32.xlu1 %v9275_v6  ;;  %9273 = vadd.xlane.f32.xlu0 %v9272_v44  ;;  %v17926_v6 = vpop.permute.xlu0 %8927  ;;  %v9095_v44 = vsel %vm9067_vm3, %v9012_v28, 0.0 }
 0xb69   : > { %9084 = vadd.xlane.f32.xlu1 %v9083_v20  ;;  %9081 = vadd.xlane.f32.xlu0 %v9080_v14  ;;  %v9092_v20 = vsel %vm9067_vm3, %v9011_v22, 0.0  ;;  %v17930_v14 = vpop.permute.xlu1 %8925  ;;  %v9015_v22 = vmul.f32 %v17782_v19, %v17785_v48 }
 0xb6d   : > { %9282 = vadd.xlane.f32.xlu1 %v9281_v57  ;;  %9279 = vadd.xlane.f32.xlu0 %v9278_v59  ;;  %v9290_v57 = vsel %vm9067_vm3, %v17775_v23, 0.0  ;;  %v17940_v59 = vpop.permute.xlu1 %8929  ;;  %v9299_v23 = vsel %vm9067_vm3, %v17795_v61, 0.0  ;;  %v9017_v61 = vmul.f32 %v17782_v19, %v17791_v56 }
 0xb71   : > { %9090 = vadd.xlane.f32.xlu1 %v9089_v43  ;;  %9087 = vadd.xlane.f32.xlu0 %v9086_v9  ;;  %v9101_v43 = vsel %vm9067_vm3, %v9014_v18, 0.0  ;;  %v9098_v9 = vsel %vm9067_vm3, %v9013_v41, 0.0  ;;  %v9107_v41 = vsel %vm9067_vm3, %v9016_v60, 0.0  ;;  %v9104_v18 = vsel %vm9067_vm3, %v9015_v22, 0.0 }
 0xb72   : > { %v9110_v60 = vsel %vm9067_vm3, %v9017_v61, 0.0  ;;  %v9023_v61 = vmul.f32 %v17782_v19, %v17808_v45 }
 0xb75   : > { %9288 = vadd.xlane.f32.xlu1 %v9287_v51  ;;  %9285 = vadd.xlane.f32.xlu0 %v9284_v3  ;;  %v9296_v51 = vsel %vm9067_vm3, %v17785_v48, 0.0  ;;  %v9018_v48 = vmul.f32 %v17782_v19, %v17802_v15 }
 0xb77   : > { %v9113_v22 = vsel %vm9067_vm3, %v9018_v48, 0.0  ;;  %v9024_v48 = vmul.f32 %v17782_v19, %v17816_v53 }
 0xb79   : > { %9096 = vadd.xlane.f32.xlu1 %v9095_v44  ;;  %9093 = vadd.xlane.f32.xlu0 %v9092_v20 }
 0xb7c   : > { %v9262_v58 = vpop.xlane.xlu0 %9261 }
 0xb7d   : > { %13278 = vrcp.f32 %v9262_v58  ;;  %9294 = vadd.xlane.f32.xlu1 %v9293_v55  ;;  %9291 = vadd.xlane.f32.xlu0 %v9290_v57  ;;  %v9305_v58 = vsel %vm9067_vm3, %v17802_v15, 0.0  ;;  %v9302_v55 = vsel %vm9067_vm3, %v17791_v56, 0.0  ;;  %v9020_v15 = vmul.f32 %v17782_v19, %v17806_v32 }
 0xb7e   : > { %v9311_v56 = vsel %vm9067_vm3, %v17806_v32, 0.0  ;;  %v9317_v32 = vsel %vm9067_vm3, %v17810_v33, 0.0 }
 0xb80   : > { %v9070_v44 = vpop.xlane.xlu0 %9069 }
 0xb81   : > { %9102 = vadd.xlane.f32.xlu1 %v9101_v43  ;;  %9099 = vadd.xlane.f32.xlu0 %v9098_v9 }
 0xb84   : > { %v9265_v28 = vpop.xlane.xlu1 %9264 }
 0xb85   : > { %13280 = vrcp.f32 %v9265_v28  ;;  %9300 = vadd.xlane.f32.xlu1 %v9299_v23  ;;  %9297 = vadd.xlane.f32.xlu0 %v9296_v51  ;;  %v9019_v28 = vmul.f32 %v17782_v19, %v17799_v31  ;;  %v9308_v23 = vsel %vm9067_vm3, %v17799_v31, 0.0  ;;  %v9119_v51 = vsel %vm9067_vm3, %v9020_v15, 0.0 }
 0xb86   : > { %v9314_v31 = vsel %vm9067_vm3, %v17804_v37, 0.0  ;;  %v9028_v15 = vmul.f32 %v17782_v19, %v17824_v47 }
 0xb87   : > { %v13279_v3 = vpop.eup %13278 }
 0xb88   : > { %v9453_v20 = vmul.f32 %v13279_v3, %v9070_v44  ;;  %v9073_v43 = vpop.xlane.xlu1 %9072  ;;  %v9116_v3 = vsel %vm9067_vm3, %v9019_v28, 0.0  ;;  %v9021_v44 = vmul.f32 %v17782_v19, %v17804_v37  ;;  %v9320_v37 = vsel %vm9067_vm3, %v17808_v45, 0.0 }
 0xb89   : > { %9108 = vadd.xlane.f32.xlu1 %v9107_v41  ;;  %9105 = vadd.xlane.f32.xlu0 %v9104_v18  ;;  %v9326_v45 = vsel %vm9067_vm3, %v17813_v8, 0.0  ;;  %v9027_v28 = vmul.f32 %v17782_v19, %v17818_v21 }
 0xb8a   : > { %9646 = vst.msk [vmem:[%s17133_s14] sm:$0xff] %vm9645_vm4, %v9453_v20  ;;  %v9022_v20 = vmul.f32 %v17782_v19, %v17810_v33  ;;  %v9122_v18 = vsel %vm9067_vm3, %v9021_v44, 0.0  ;;  %v9323_v33 = vsel %vm9067_vm3, %v17816_v53, 0.0  ;;  %v9329_v53 = vsel %vm9067_vm3, %v17820_v39, 0.0 }
 0xb8c   : > { %v9125_v41 = vsel %vm9067_vm3, %v9022_v20, 0.0  ;;  %v9341_v20 = vsel %vm9067_vm3, %v17828_v38, 0.0 }
 0xb8d   : > { %9306 = vadd.xlane.f32.xlu1 %v9305_v58  ;;  %9303 = vadd.xlane.f32.xlu0 %v9302_v55  ;;  %v9131_v58 = vsel %vm9067_vm3, %v9024_v48, 0.0  ;;  %v9128_v55 = vsel %vm9067_vm3, %v9023_v61, 0.0 }
 0xb8f   : > { %v13281_v57 = vpop.eup %13280 }
 0xb90   : > { %v9455_v9 = vmul.f32 %v13281_v57, %v9073_v43  ;;  %v9025_v57 = vmul.f32 %v17782_v19, %v17813_v8  ;;  %v9026_v43 = vmul.f32 %v17782_v19, %v17820_v39  ;;  %v9335_v39 = vsel %vm9067_vm3, %v17824_v47, 0.0 }
 0xb91   : > { %9114 = vadd.xlane.f32.xlu1 %v9113_v22  ;;  %9111 = vadd.xlane.f32.xlu0 %v9110_v60  ;;  %v18008_v60 = vpop.permute.xlu0 %8931  ;;  %v9332_v8 = vsel %vm9067_vm3, %v17818_v21, 0.0  ;;  %v9029_v47 = vmul.f32 %v17782_v19, %v17822_v26  ;;  %v9030_v21 = vmul.f32 %v17782_v19, %v17828_v38  ;;  %v9031_v38 = vmul.f32 %v17782_v19, %v17826_v50 }
 0xb92   : > { %9647 = vst.msk [vmem:[%s17133_s14 + $0x8] sm:$0xff] %vm9645_vm4, %v9455_v9  ;;  %v9137_v9 = vsel %vm9067_vm3, %v9026_v43, 0.0  ;;  %v9134_v22 = vsel %vm9067_vm3, %v9025_v57, 0.0 }
 0xb93   : > { %v9149_v61 = vsel %vm9067_vm3, %v9030_v21, 0.0  ;;  %v9146_v48 = vsel %vm9067_vm3, %v9029_v47, 0.0  ;;  %v9152_v43 = vsel %vm9067_vm3, %v9031_v38, 0.0  ;;  %v9039_v21 = vmul.f32 %v17782_v19, %v17852_v42 }
 0xb95   : > { %9312 = vadd.xlane.f32.xlu1 %v9311_v56  ;;  %9309 = vadd.xlane.f32.xlu0 %v9308_v23  ;;  %v9143_v23 = vsel %vm9067_vm3, %v9028_v15, 0.0  ;;  %v9035_v15 = vmul.f32 %v17782_v19, %v17836_v0 }
 0xb99   : > { %9120 = vadd.xlane.f32.xlu1 %v9119_v51  ;;  %9117 = vadd.xlane.f32.xlu0 %v9116_v3  ;;  %v9140_v51 = vsel %vm9067_vm3, %v9027_v28, 0.0  ;;  %v18020_v3 = vpop.permute.xlu1 %8933 }
 0xb9d   : > { %9318 = vadd.xlane.f32.xlu1 %v9317_v32  ;;  %9315 = vadd.xlane.f32.xlu0 %v9314_v31  ;;  %v9338_v32 = vsel %vm9067_vm3, %v17822_v26, 0.0  ;;  %v9032_v26 = vmul.f32 %v17782_v19, %v17832_v11 }
 0xb9f   : > { %v9155_v57 = vsel %vm9067_vm3, %v9032_v26, 0.0 }
 0xba1   : > { %9126 = vadd.xlane.f32.xlu1 %v9125_v41  ;;  %9123 = vadd.xlane.f32.xlu0 %v9122_v18 }
 0xba5   : > { %9324 = vadd.xlane.f32.xlu1 %v9323_v33  ;;  %9321 = vadd.xlane.f32.xlu0 %v9320_v37  ;;  %v9347_v37 = vsel %vm9067_vm3, %v17832_v11, 0.0  ;;  %v9034_v11 = vmul.f32 %v17782_v19, %v17840_v62 }
 0xba9   : > { %9132 = vadd.xlane.f32.xlu1 %v9131_v58  ;;  %9129 = vadd.xlane.f32.xlu0 %v9128_v55  ;;  %v9344_v58 = vsel %vm9067_vm3, %v17826_v50, 0.0  ;;  %v9353_v50 = vsel %vm9067_vm3, %v17840_v62, 0.0  ;;  %v9359_v62 = vsel %vm9067_vm3, %v17848_v30, 0.0 }
 0xbad   : > { %9330 = vadd.xlane.f32.xlu1 %v9329_v53  ;;  %9327 = vadd.xlane.f32.xlu0 %v9326_v45  ;;  %v9033_v45 = vmul.f32 %v17782_v19, %v17830_v49 }
 0xbaf   : > { %v9158_v28 = vsel %vm9067_vm3, %v9033_v45, 0.0 }
 0xbb1   : > { %9138 = vadd.xlane.f32.xlu1 %v9137_v9  ;;  %9135 = vadd.xlane.f32.xlu0 %v9134_v22  ;;  %v9350_v9 = vsel %vm9067_vm3, %v17830_v49, 0.0  ;;  %v9161_v22 = vsel %vm9067_vm3, %v9034_v11, 0.0  ;;  %v9356_v49 = vsel %vm9067_vm3, %v17836_v0, 0.0  ;;  %v9362_v0 = vsel %vm9067_vm3, %v17846_v35, 0.0 }
 0xbb5   : > { %9336 = vadd.xlane.f32.xlu1 %v9335_v39  ;;  %9333 = vadd.xlane.f32.xlu0 %v9332_v8  ;;  %v9268_v56 = vpop.xlane.xlu0 %9267  ;;  %v9036_v39 = vmul.f32 %v17782_v19, %v17848_v30  ;;  %v9365_v30 = vsel %vm9067_vm3, %v17854_v5, 0.0 }
 0xbb6   : > { %13282 = vrcp.f32 %v9268_v56  ;;  %v9164_v56 = vsel %vm9067_vm3, %v9035_v15, 0.0 }
 0xbb7   : > { %v9167_v8 = vsel %vm9067_vm3, %v9036_v39, 0.0 }
 0xbb9   : > { %9144 = vadd.xlane.f32.xlu1 %v9143_v23  ;;  %9141 = vadd.xlane.f32.xlu0 %v9140_v51  ;;  %v9079_v44 = vpop.xlane.xlu0 %9078  ;;  %v9037_v23 = vmul.f32 %v17782_v19, %v17846_v35  ;;  %v9038_v51 = vmul.f32 %v17782_v19, %v17854_v5  ;;  %v9371_v5 = vsel %vm9067_vm3, %v17858_v63, 0.0  ;;  %v9368_v35 = vsel %vm9067_vm3, %v17852_v42, 0.0 }
 0xbba   : > { %v9374_v42 = vsel %vm9067_vm3, %v17856_v17, 0.0 }
 0xbbb   : > { %v9170_v47 = vsel %vm9067_vm3, %v9037_v23, 0.0 }
 0xbbd   : > { %9342 = vadd.xlane.f32.xlu1 %v9341_v20  ;;  %v9271_v31 = vpop.xlane.xlu1 %9270  ;;  %9339 = vadd.xlane.f32.xlu0 %v9338_v32  ;;  %v9076_v18 = vpop.xlane.xlu0 %9075  ;;  %v9040_v20 = vmul.f32 %v17782_v19, %v17858_v63  ;;  %v9377_v63 = vsel %vm9067_vm3, %v17863_v52, 0.0 }
 0xbbe   : > { %13284 = vrcp.f32 %v9271_v31  ;;  %v9176_v31 = vsel %vm9067_vm3, %v9039_v21, 0.0 }
 0xbbf   : > { %v9179_v32 = vsel %vm9067_vm3, %v9040_v20, 0.0 }
 0xbc0   : > { %v13283_v41 = vpop.eup %13282 }
 0xbc1   : > { %v9457_v33 = vmul.f32 %v13283_v41, %v9076_v18  ;;  %9150 = vadd.xlane.f32.xlu1 %v9149_v61  ;;  %9147 = vadd.xlane.f32.xlu0 %v9146_v48  ;;  %v9041_v41 = vmul.f32 %v17782_v19, %v17856_v17  ;;  %v9042_v18 = vmul.f32 %v17782_v19, %v17863_v52  ;;  %v18094_v61 = vpop.permute.xlu1 %8937  ;;  %v18096_v48 = vpop.permute.xlu0 %8935 }
 0xbc2   : > { %v9043_v52 = vmul.f32 %v17782_v19, %v17861_v2  ;;  %v9044_v17 = vmul.f32 %v17782_v19, %v17868_v4 }
 0xbc3   : > { %9648 = vst.msk [vmem:[%s17133_s14 + $0x10] sm:$0xff] %vm9645_vm4, %v9457_v33  ;;  %v9185_v33 = vsel %vm9067_vm3, %v9042_v18, 0.0  ;;  %v9182_v38 = vsel %vm9067_vm3, %v9041_v41, 0.0  ;;  %v9049_v18 = vmul.f32 %v17782_v19, %v17874_v25 }
 0xbc4   : > { %v9188_v45 = vsel %vm9067_vm3, %v9043_v52, 0.0 }
 0xbc5   : > { %9348 = vadd.xlane.f32.xlu1 %v9347_v37  ;;  %9345 = vadd.xlane.f32.xlu0 %v9344_v58  ;;  %v9383_v58 = vsel %vm9067_vm3, %v17868_v4, 0.0  ;;  %v9389_v4 = vsel %vm9067_vm3, %v17872_v36, 0.0 }
 0xbc8   : > { %v13285_v55 = vpop.eup %13284 }
 0xbc9   : > { %v9459_v53 = vmul.f32 %v13285_v55, %v9079_v44  ;;  %9156 = vadd.xlane.f32.xlu1 %v9155_v57  ;;  %9153 = vadd.xlane.f32.xlu0 %v9152_v43  ;;  %v9173_v44 = vsel %vm9067_vm3, %v9038_v51, 0.0  ;;  %v9380_v55 = vsel %vm9067_vm3, %v17861_v2, 0.0  ;;  %v9046_v2 = vmul.f32 %v17782_v19, %v17872_v36 }
 0xbca   : > { %v9047_v51 = vmul.f32 %v17782_v19, %v17870_v1 }
 0xbcb   : > { %9649 = vst.msk [vmem:[%s17133_s14 + $0x18] sm:$0xff] %vm9645_vm4, %v9459_v53  ;;  %v9191_v53 = vsel %vm9067_vm3, %v9044_v17, 0.0 }
 0xbcc   : > { %v9200_v41 = vsel %vm9067_vm3, %v9047_v51, 0.0 }
 0xbcd   : > { %9354 = vadd.xlane.f32.xlu1 %v9353_v50  ;;  %9351 = vadd.xlane.f32.xlu0 %v9350_v9  ;;  %v9045_v9 = vmul.f32 %v17782_v19, %v17866_v13 }
 0xbcf   : > { %v9194_v23 = vsel %vm9067_vm3, %v9045_v9, 0.0 }
 0xbd1   : > { %9162 = vadd.xlane.f32.xlu1 %v9161_v22  ;;  %9159 = vadd.xlane.f32.xlu0 %v9158_v28  ;;  %v9386_v22 = vsel %vm9067_vm3, %v17866_v13, 0.0 }
 0xbd5   : > { %9360 = vadd.xlane.f32.xlu1 %v9359_v62  ;;  %9357 = vadd.xlane.f32.xlu0 %v9356_v49 }
 0xbd9   : > { %9168 = vadd.xlane.f32.xlu1 %v9167_v8  ;;  %9165 = vadd.xlane.f32.xlu0 %v9164_v56  ;;  %v9197_v56 = vsel %vm9067_vm3, %v9046_v2, 0.0 }
 0xbdd   : > { %9366 = vadd.xlane.f32.xlu1 %v9365_v30  ;;  %9363 = vadd.xlane.f32.xlu0 %v9362_v0  ;;  %v9048_v30 = vmul.f32 %v17782_v19, %v17876_v10  ;;  %v9395_v0 = vsel %vm9067_vm3, %v17876_v10, 0.0 }
 0xbe1   : > { %9174 = vadd.xlane.f32.xlu1 %v9173_v44  ;;  %9171 = vadd.xlane.f32.xlu0 %v9170_v47  ;;  %v9392_v44 = vsel %vm9067_vm3, %v17870_v1, 0.0 }
 0xbe5   : > { %9372 = vadd.xlane.f32.xlu1 %v9371_v5  ;;  %9369 = vadd.xlane.f32.xlu0 %v9368_v35 }
 0xbe9   : > { %9180 = vadd.xlane.f32.xlu1 %v9179_v32  ;;  %9177 = vadd.xlane.f32.xlu0 %v9176_v31  ;;  %v9203_v31 = vsel %vm9067_vm3, %v9048_v30, 0.0 }
 0xbed   : > { %9378 = vadd.xlane.f32.xlu1 %v9377_v63  ;;  %9375 = vadd.xlane.f32.xlu0 %v9374_v42  ;;  %v9050_v63 = vmul.f32 %v17782_v19, %v17880_v24  ;;  %v9401_v42 = vsel %vm9067_vm3, %v17880_v24, 0.0 }
 0xbf1   : > { %9186 = vadd.xlane.f32.xlu1 %v9185_v33  ;;  %9183 = vadd.xlane.f32.xlu0 %v9182_v38  ;;  %v9398_v33 = vsel %vm9067_vm3, %v17874_v25, 0.0 }
 0xbf2   : > { %v9277_v26 = vpop.xlane.xlu1 %9276  ;;  %v9274_v37 = vpop.xlane.xlu0 %9273 }
 0xbf3   : > { %13286 = vrcp.f32 %v9277_v26 }
 0xbf4   : > { %13288 = vrcp.f32 %v9274_v37 }
 0xbf5   : > { %9384 = vadd.xlane.f32.xlu1 %v9383_v58  ;;  %9381 = vadd.xlane.f32.xlu0 %v9380_v55  ;;  %v9209_v55 = vsel %vm9067_vm3, %v9050_v63, 0.0 }
 0xbf6   : > { %v9085_v57 = vpop.xlane.xlu1 %9084  ;;  %v9082_v43 = vpop.xlane.xlu0 %9081 }
 0xbf9   : > { %9192 = vadd.xlane.f32.xlu1 %v9191_v53  ;;  %9189 = vadd.xlane.f32.xlu0 %v9188_v45  ;;  %v9052_v53 = vmul.f32 %v17782_v19, %v17884_v40  ;;  %v9407_v45 = vsel %vm9067_vm3, %v17884_v40, 0.0 }
 0xbfa   : > { %v9283_v11 = vpop.xlane.xlu1 %9282  ;;  %v9280_v50 = vpop.xlane.xlu0 %9279 }
 0xbfb   : > { %13290 = vrcp.f32 %v9283_v11  ;;  %v9404_v11 = vsel %vm9067_vm3, %v17878_v16, 0.0 }
 0xbfc   : > { %13292 = vrcp.f32 %v9280_v50 }
 0xbfd   : > { %v13287_v28 = vpop.eup %13286  ;;  %9390 = vadd.xlane.f32.xlu1 %v9389_v4  ;;  %9387 = vadd.xlane.f32.xlu0 %v9386_v22 }
 0xbfe   : > { %v13289_v15 = vpop.eup %13288  ;;  %v9463_v39 = vmul.f32 %v13287_v28, %v9085_v57  ;;  %v9091_v62 = vpop.xlane.xlu1 %9090  ;;  %v9206_v57 = vsel %vm9067_vm3, %v9049_v18, 0.0 }
 0xbff   : > { %v9088_v49 = vpop.xlane.xlu0 %9087  ;;  %v9461_v8 = vmul.f32 %v13289_v15, %v9082_v43  ;;  %v9051_v43 = vmul.f32 %v17782_v19, %v17878_v16  ;;  %v9215_v15 = vsel %vm9067_vm3, %v9052_v53, 0.0  ;;  %v9059_v53 = vmul.f32 %v17782_v19, %v17914_v12 }
 0xc00   : > { %9651 = vst.msk [vmem:[%s17133_s14 + $0x28] sm:$0xff] %vm9645_vm4, %v9463_v39 }
 0xc01   : > { %9650 = vst.msk [vmem:[%s17133_s14 + $0x20] sm:$0xff] %vm9645_vm4, %v9461_v8  ;;  %9198 = vadd.xlane.f32.xlu1 %v9197_v56  ;;  %9195 = vadd.xlane.f32.xlu0 %v9194_v23  ;;  %v9212_v39 = vsel %vm9067_vm3, %v9051_v43, 0.0  ;;  %v9413_v8 = vsel %vm9067_vm3, %v17896_v27, 0.0  ;;  %v9410_v56 = vsel %vm9067_vm3, %v17882_v54, 0.0 }
 0xc02   : > { %v9289_v36 = vpop.xlane.xlu1 %9288 }
 0xc03   : > { %v9286_v13 = vpop.xlane.xlu0 %9285  ;;  %13294 = vrcp.f32 %v9289_v36 }
 0xc04   : > { %13296 = vrcp.f32 %v9286_v13 }
 0xc05   : > { %v13291_v47 = vpop.eup %13290  ;;  %9396 = vadd.xlane.f32.xlu1 %v9395_v0  ;;  %9393 = vadd.xlane.f32.xlu0 %v9392_v44 }
 0xc06   : > { %v13293_v21 = vpop.eup %13292  ;;  %v9467_v20 = vmul.f32 %v13291_v47, %v9091_v62  ;;  %v9097_v5 = vpop.xlane.xlu1 %9096  ;;  %v9053_v62 = vmul.f32 %v17782_v19, %v17882_v54 }
 0xc07   : > { %v9094_v35 = vpop.xlane.xlu0 %9093  ;;  %v9465_v32 = vmul.f32 %v13293_v21, %v9088_v49  ;;  %v9054_v49 = vmul.f32 %v17782_v19, %v17896_v27  ;;  %v9055_v21 = vmul.f32 %v17782_v19, %v17894_v34 }
 0xc08   : > { %9653 = vst.msk [vmem:[%s17133_s14 + $0x38] sm:$0xff] %vm9645_vm4, %v9467_v20  ;;  %v9218_v47 = vsel %vm9067_vm3, %v9053_v62, 0.0  ;;  %v9056_v20 = vmul.f32 %v17782_v19, %v17910_v46  ;;  %v9062_v62 = vmul.f32 %v17782_v19, %v17940_v59 }
 0xc09   : > { %9652 = vst.msk [vmem:[%s17133_s14 + $0x30] sm:$0xff] %vm9645_vm4, %v9465_v32  ;;  %9204 = vadd.xlane.f32.xlu1 %v9203_v31  ;;  %9201 = vadd.xlane.f32.xlu0 %v9200_v41  ;;  %v9221_v44 = vsel %vm9067_vm3, %v9054_v49, 0.0  ;;  %v9437_v49 = vsel %vm9067_vm3, %v17940_v59, 0.0 }
 0xc0a   : > { %v9295_v10 = vpop.xlane.xlu1 %9294  ;;  %v9227_v63 = vsel %vm9067_vm3, %v9056_v20, 0.0 }
 0xc0b   : > { %v9292_v1 = vpop.xlane.xlu0 %9291  ;;  %13298 = vrcp.f32 %v9295_v10 }
 0xc0c   : > { %13300 = vrcp.f32 %v9292_v1 }
 0xc0d   : > { %v13295_v38 = vpop.eup %13294  ;;  %9402 = vadd.xlane.f32.xlu1 %v9401_v42  ;;  %9399 = vadd.xlane.f32.xlu0 %v9398_v33  ;;  %v9224_v42 = vsel %vm9067_vm3, %v9055_v21, 0.0  ;;  %v9057_v33 = vmul.f32 %v17782_v19, %v17904_v29  ;;  %v9440_v21 = vsel %vm9067_vm3, %v18008_v60, 0.0 }
 0xc0e   : > { %v13297_v26 = vpop.eup %13296  ;;  %v9471_v37 = vmul.f32 %v13295_v38, %v9097_v5  ;;  %v9103_v52 = vpop.xlane.xlu1 %9102  ;;  %v9419_v5 = vsel %vm9067_vm3, %v17910_v46, 0.0  ;;  %v9058_v38 = vmul.f32 %v17782_v19, %v17920_v7 }
 0xc0f   : > { %v9100_v17 = vpop.xlane.xlu0 %9099  ;;  %v9469_v58 = vmul.f32 %v13297_v26, %v9094_v35  ;;  %v9416_v35 = vsel %vm9067_vm3, %v17894_v34, 0.0  ;;  %v9425_v26 = vsel %vm9067_vm3, %v17920_v7, 0.0  ;;  %v9230_v43 = vsel %vm9067_vm3, %v9057_v33, 0.0 }
 0xc10   : > { %9655 = vst.msk [vmem:[%s17133_s14 + $0x48] sm:$0xff] %vm9645_vm4, %v9471_v37  ;;  %v9422_v37 = vsel %vm9067_vm3, %v17904_v29, 0.0 }
 0xc11   : > { %9654 = vst.msk [vmem:[%s17133_s14 + $0x40] sm:$0xff] %vm9645_vm4, %v9469_v58  ;;  %9210 = vadd.xlane.f32.xlu1 %v9209_v55  ;;  %9207 = vadd.xlane.f32.xlu0 %v9206_v57 }
 0xc12   : > { %v9301_v24 = vpop.xlane.xlu1 %9300 }
 0xc13   : > { %v9298_v25 = vpop.xlane.xlu0 %9297  ;;  %13302 = vrcp.f32 %v9301_v24 }
 0xc14   : > { %13304 = vrcp.f32 %v9298_v25  ;;  %v9233_v25 = vsel %vm9067_vm3, %v9058_v38, 0.0 }
 0xc15   : > { %v13299_v50 = vpop.eup %13298  ;;  %9408 = vadd.xlane.f32.xlu1 %v9407_v45  ;;  %9405 = vadd.xlane.f32.xlu0 %v9404_v11  ;;  %v9060_v45 = vmul.f32 %v17782_v19, %v17930_v14  ;;  %v9431_v11 = vsel %vm9067_vm3, %v17930_v14, 0.0 }
 0xc16   : > { %v13301_v9 = vpop.eup %13300  ;;  %v9475_v2 = vmul.f32 %v13299_v50, %v9103_v52  ;;  %v9109_v4 = vpop.xlane.xlu1 %9108  ;;  %v9428_v50 = vsel %vm9067_vm3, %v17914_v12, 0.0 }
 0xc17   : > { %v9106_v22 = vpop.xlane.xlu0 %9105  ;;  %v9473_v28 = vmul.f32 %v13301_v9, %v9100_v17 }
 0xc18   : > { %9657 = vst.msk [vmem:[%s17133_s14 + $0x58] sm:$0xff] %vm9645_vm4, %v9475_v2 }
 0xc19   : > { %9656 = vst.msk [vmem:[%s17133_s14 + $0x50] sm:$0xff] %vm9645_vm4, %v9473_v28  ;;  %9216 = vadd.xlane.f32.xlu1 %v9215_v15  ;;  %9213 = vadd.xlane.f32.xlu0 %v9212_v39  ;;  %v9239_v39 = vsel %vm9067_vm3, %v9060_v45, 0.0 }
 0xc1a   : > { %v9307_v40 = vpop.xlane.xlu1 %9306 }
 0xc1b   : > { %v9304_v16 = vpop.xlane.xlu0 %9303  ;;  %13306 = vrcp.f32 %v9307_v40  ;;  %v9236_v40 = vsel %vm9067_vm3, %v9059_v53, 0.0 }
 0xc1c   : > { %13308 = vrcp.f32 %v9304_v16  ;;  %v9061_v16 = vmul.f32 %v17782_v19, %v17926_v6 }
 0xc1d   : > { %v13303_v23 = vpop.eup %13302  ;;  %9414 = vadd.xlane.f32.xlu1 %v9413_v8  ;;  %9411 = vadd.xlane.f32.xlu0 %v9410_v56  ;;  %v9434_v8 = vsel %vm9067_vm3, %v17926_v6, 0.0 }
 0xc1e   : > { %v13305_v36 = vpop.eup %13304  ;;  %v9479_v13 = vmul.f32 %v13303_v23, %v9109_v4  ;;  %v9115_v51 = vpop.xlane.xlu1 %9114  ;;  %v9242_v19 = vsel %vm9067_vm3, %v9061_v16, 0.0 }
 0xc1f   : > { %v9112_v30 = vpop.xlane.xlu0 %9111  ;;  %v9477_v0 = vmul.f32 %v13305_v36, %v9106_v22 }
 0xc20   : > { %9659 = vst.msk [vmem:[%s17133_s14 + $0x68] sm:$0xff] %vm9645_vm4, %v9479_v13 }
 0xc21   : > { %9658 = vst.msk [vmem:[%s17133_s14 + $0x60] sm:$0xff] %vm9645_vm4, %v9477_v0  ;;  %9222 = vadd.xlane.f32.xlu1 %v9221_v44  ;;  %9219 = vadd.xlane.f32.xlu0 %v9218_v47  ;;  %v9245_v0 = vsel %vm9067_vm3, %v9062_v62, 0.0  ;;  %v13422_v44 = vld [vmem:[%s18505_s8] ss:$0 sm:$0xff] }
 0xc22   : > { %v9313_v27 = vpop.xlane.xlu1 %9312  ;;  %v9063_v47 = vmul.f32 %v13422_v44, %v18008_v60 }
 0xc23   : > { %v9310_v54 = vpop.xlane.xlu0 %9309  ;;  %13310 = vrcp.f32 %v9313_v27  ;;  %v9064_v27 = vmul.f32 %v13422_v44, %v18020_v3 }
 0xc24   : > { %13312 = vrcp.f32 %v9310_v54  ;;  %v9443_v54 = vsel %vm9067_vm3, %v18020_v3, 0.0  ;;  %v9248_v3 = vsel %vm9067_vm3, %v9063_v47, 0.0 }
 0xc25   : > { %v13307_v32 = vpop.eup %13306  ;;  %9420 = vadd.xlane.f32.xlu1 %v9419_v5  ;;  %9417 = vadd.xlane.f32.xlu0 %v9416_v35 }
 0xc26   : > { %v13309_v31 = vpop.eup %13308  ;;  %v9483_v41 = vmul.f32 %v13307_v32, %v9115_v51  ;;  %v9121_v10 = vpop.xlane.xlu1 %9120 }
 0xc27   : > { %v9118_v1 = vpop.xlane.xlu0 %9117  ;;  %v9481_v18 = vmul.f32 %v13309_v31, %v9112_v30 }
 0xc28   : > { %9661 = vst.msk [vmem:[%s17133_s14 + $0x78] sm:$0xff] %vm9645_vm4, %v9483_v41 }
 0xc29   : > { %9660 = vst.msk [vmem:[%s17133_s14 + $0x70] sm:$0xff] %vm9645_vm4, %v9481_v18  ;;  %9228 = vadd.xlane.f32.xlu1 %v9227_v63  ;;  %9225 = vadd.xlane.f32.xlu0 %v9224_v42  ;;  %v9251_v18 = vsel %vm9067_vm3, %v9064_v27, 0.0 }
 0xc2a   : > { %v9319_v46 = vpop.xlane.xlu1 %9318 }
 0xc2b   : > { %v9316_v34 = vpop.xlane.xlu0 %9315  ;;  %13314 = vrcp.f32 %v9319_v46 }
 0xc2c   : > { %13316 = vrcp.f32 %v9316_v34 }
 0xc2d   : > { %v13311_v52 = vpop.eup %13310  ;;  %9426 = vadd.xlane.f32.xlu1 %v9425_v26  ;;  %9423 = vadd.xlane.f32.xlu0 %v9422_v37 }
 0xc2e   : > { %v13313_v17 = vpop.eup %13312  ;;  %v9487_v58 = vmul.f32 %v13311_v52, %v9121_v10  ;;  %v9127_v55 = vpop.xlane.xlu1 %9126  ;;  %v9066_v10 = vmul.f32 %v13422_v44, %v18094_v61 }
 0xc2f   : > { %v9124_v57 = vpop.xlane.xlu0 %9123  ;;  %v9485_v24 = vmul.f32 %v13313_v17, %v9118_v1  ;;  %v9065_v1 = vmul.f32 %v13422_v44, %v18096_v48  ;;  %v9449_v17 = vsel %vm9067_vm3, %v18094_v61, 0.0 }
 0xc30   : > { %9663 = vst.msk [vmem:[%s17133_s14 + $0x88] sm:$0xff] %vm9645_vm4, %v9487_v58  ;;  %v9257_v42 = vsel %vm9067_vm3, %v9066_v10, 0.0  ;;  %v9446_v58 = vsel %vm9067_vm3, %v18096_v48, 0.0 }
 0xc31   : > { %9662 = vst.msk [vmem:[%s17133_s14 + $0x80] sm:$0xff] %vm9645_vm4, %v9485_v24  ;;  %9234 = vadd.xlane.f32.xlu1 %v9233_v25  ;;  %9231 = vadd.xlane.f32.xlu0 %v9230_v43  ;;  %v9254_v46 = vsel %vm9067_vm3, %v9065_v1, 0.0 }
 0xc32   : > { %v9325_v7 = vpop.xlane.xlu1 %9324 }
 0xc33   : > { %v9322_v29 = vpop.xlane.xlu0 %9321  ;;  %13318 = vrcp.f32 %v9325_v7 }
 0xc34   : > { %13320 = vrcp.f32 %v9322_v29 }
 0xc35   : > { %v13315_v9 = vpop.eup %13314  ;;  %9432 = vadd.xlane.f32.xlu1 %v9431_v11  ;;  %9429 = vadd.xlane.f32.xlu0 %v9428_v50 }
 0xc36   : > { %v13317_v2 = vpop.eup %13316  ;;  %v9491_v4 = vmul.f32 %v13315_v9, %v9127_v55  ;;  %v9133_v22 = vpop.xlane.xlu1 %9132 }
 0xc37   : > { %v9130_v28 = vpop.xlane.xlu0 %9129  ;;  %v9489_v15 = vmul.f32 %v13317_v2, %v9124_v57 }
 0xc38   : > { %9665 = vst.msk [vmem:[%s17133_s14 + $0x98] sm:$0xff] %vm9645_vm4, %v9491_v4 }
 0xc39   : > { %9664 = vst.msk [vmem:[%s17133_s14 + $0x90] sm:$0xff] %vm9645_vm4, %v9489_v15  ;;  %9240 = vadd.xlane.f32.xlu1 %v9239_v39  ;;  %9237 = vadd.xlane.f32.xlu0 %v9236_v40 }
 0xc3a   : > { %v9331_v14 = vpop.xlane.xlu1 %9330 }
 0xc3b   : > { %v9328_v12 = vpop.xlane.xlu0 %9327  ;;  %13322 = vrcp.f32 %v9331_v14 }
 0xc3c   : > { %13324 = vrcp.f32 %v9328_v12 }
 0xc3d   : > { %v13319_v56 = vpop.eup %13318  ;;  %9438 = vadd.xlane.f32.xlu1 %v9437_v49  ;;  %9435 = vadd.xlane.f32.xlu0 %v9434_v8 }
 0xc3e   : > { %v13321_v23 = vpop.eup %13320  ;;  %v9495_v36 = vmul.f32 %v13319_v56, %v9133_v22  ;;  %v9139_v13 = vpop.xlane.xlu1 %9138 }
 0xc3f   : > { %v9136_v51 = vpop.xlane.xlu0 %9135  ;;  %v9493_v30 = vmul.f32 %v13321_v23, %v9130_v28 }
 0xc40   : > { %9667 = vst.msk [vmem:[%s17133_s14 + $0xa8] sm:$0xff] %vm9645_vm4, %v9495_v36 }
 0xc41   : > { %9666 = vst.msk [vmem:[%s17133_s14 + $0xa0] sm:$0xff] %vm9645_vm4, %v9493_v30  ;;  %9246 = vadd.xlane.f32.xlu1 %v9245_v0  ;;  %9243 = vadd.xlane.f32.xlu0 %v9242_v19 }
 0xc42   : > { %v9337_v59 = vpop.xlane.xlu1 %9336 }
 0xc43   : > { %v9334_v6 = vpop.xlane.xlu0 %9333  ;;  %13326 = vrcp.f32 %v9337_v59 }
 0xc44   : > { %13328 = vrcp.f32 %v9334_v6 }
 0xc45   : > { %v13323_v20 = vpop.eup %13322  ;;  %9444 = vadd.xlane.f32.xlu1 %v9443_v54  ;;  %9441 = vadd.xlane.f32.xlu0 %v9440_v21 }
 0xc46   : > { %v13325_v5 = vpop.eup %13324  ;;  %v9499_v35 = vmul.f32 %v13323_v20, %v9139_v13  ;;  %v9145_v32 = vpop.xlane.xlu1 %9144 }
 0xc47   : > { %v9142_v31 = vpop.xlane.xlu0 %9141  ;;  %v9497_v41 = vmul.f32 %v13325_v5, %v9136_v51 }
 0xc48   : > { %9669 = vst.msk [vmem:[%s17133_s14 + $0xb8] sm:$0xff] %vm9645_vm4, %v9499_v35 }
 0xc49   : > { %9668 = vst.msk [vmem:[%s17133_s14 + $0xb0] sm:$0xff] %vm9645_vm4, %v9497_v41  ;;  %9252 = vadd.xlane.f32.xlu1 %v9251_v18  ;;  %9249 = vadd.xlane.f32.xlu0 %v9248_v3 }
 0xc4a   : > { %v9343_v60 = vpop.xlane.xlu1 %9342 }
 0xc4b   : > { %v9340_v63 = vpop.xlane.xlu0 %9339  ;;  %13330 = vrcp.f32 %v9343_v60 }
 0xc4c   : > { %13332 = vrcp.f32 %v9340_v63 }
 0xc4d   : > { %v13327_v34 = vpop.eup %13326  ;;  %9258 = vadd.xlane.f32.xlu1 %v9257_v42  ;;  %9255 = vadd.xlane.f32.xlu0 %v9254_v46 }
 0xc4e   : > { %v13329_v33 = vpop.eup %13328  ;;  %v9503_v38 = vmul.f32 %v13327_v34, %v9145_v32  ;;  %v9151_v26 = vpop.xlane.xlu1 %9150 }
 0xc4f   : > { %v9148_v37 = vpop.xlane.xlu0 %9147  ;;  %v9501_v52 = vmul.f32 %v13329_v33, %v9142_v31 }
 0xc50   : > { %9671 = vst.msk [vmem:[%s17133_s14 + $0xc8] sm:$0xff] %vm9645_vm4, %v9503_v38 }
 0xc51   : > { %9670 = vst.msk [vmem:[%s17133_s14 + $0xc0] sm:$0xff] %vm9645_vm4, %v9501_v52  ;;  %9450 = vadd.xlane.f32.xlu1 %v9449_v17  ;;  %9447 = vadd.xlane.f32.xlu0 %v9446_v58 }
 0xc52   : > { %v9349_v55 = vpop.xlane.xlu1 %9348 }
 0xc53   : > { %v9346_v57 = vpop.xlane.xlu0 %9345  ;;  %13334 = vrcp.f32 %v9349_v55 }
 0xc54   : > { %13336 = vrcp.f32 %v9346_v57 }
 0xc55   : > { %v13331_v24 = vpop.eup %13330 }
 0xc56   : > { %v13333_v25 = vpop.eup %13332  ;;  %v9507_v43 = vmul.f32 %v13331_v24, %v9151_v26  ;;  %v9157_v7 = vpop.xlane.xlu1 %9156 }
 0xc57   : > { %v9154_v29 = vpop.xlane.xlu0 %9153  ;;  %v9505_v61 = vmul.f32 %v13333_v25, %v9148_v37 }
 0xc58   : > { %9673 = vst.msk [vmem:[%s17133_s14 + $0xd8] sm:$0xff] %vm9645_vm4, %v9507_v43 }
 0xc59   : > { %9672 = vst.msk [vmem:[%s17133_s14 + $0xd0] sm:$0xff] %vm9645_vm4, %v9505_v61 }
 0xc5a   : > { %v9355_v48 = vpop.xlane.xlu1 %9354 }
 0xc5b   : > { %v9352_v53 = vpop.xlane.xlu0 %9351  ;;  %13338 = vrcp.f32 %v9355_v48 }
 0xc5c   : > { %13340 = vrcp.f32 %v9352_v53 }
 0xc5d   : > { %v13335_v45 = vpop.eup %13334 }
 0xc5e   : > { %v13337_v11 = vpop.eup %13336  ;;  %v9511_v50 = vmul.f32 %v13335_v45, %v9157_v7  ;;  %v9163_v9 = vpop.xlane.xlu1 %9162 }
 0xc5f   : > { %v9160_v2 = vpop.xlane.xlu0 %9159  ;;  %v9509_v4 = vmul.f32 %v13337_v11, %v9154_v29 }
 0xc60   : > { %9675 = vst.msk [vmem:[%s17133_s14 + $0xe8] sm:$0xff] %vm9645_vm4, %v9511_v50 }
 0xc61   : > { %9674 = vst.msk [vmem:[%s17133_s14 + $0xe0] sm:$0xff] %vm9645_vm4, %v9509_v4 }
 0xc62   : > { %v9361_v22 = vpop.xlane.xlu1 %9360 }
 0xc63   : > { %v9358_v28 = vpop.xlane.xlu0 %9357  ;;  %13342 = vrcp.f32 %v9361_v22 }
 0xc64   : > { %13344 = vrcp.f32 %v9358_v28 }
 0xc65   : > { %v13339_v15 = vpop.eup %13338 }
 0xc66   : > { %v13341_v39 = vpop.eup %13340  ;;  %v9515_v40 = vmul.f32 %v13339_v15, %v9163_v9  ;;  %v9169_v14 = vpop.xlane.xlu1 %9168 }
 0xc67   : > { %v9166_v12 = vpop.xlane.xlu0 %9165  ;;  %v9513_v16 = vmul.f32 %v13341_v39, %v9160_v2 }
 0xc68   : > { %9677 = vst.msk [vmem:[%s17133_s14 + $0xf8] sm:$0xff] %vm9645_vm4, %v9515_v40 }
 0xc69   : > { %9676 = vst.msk [vmem:[%s17133_s14 + $0xf0] sm:$0xff] %vm9645_vm4, %v9513_v16 }
 0xc6a   : > { %v9367_v62 = vpop.xlane.xlu1 %9366 }
 0xc6b   : > { %v9364_v49 = vpop.xlane.xlu0 %9363  ;;  %13346 = vrcp.f32 %v9367_v62 }
 0xc6c   : > { %13348 = vrcp.f32 %v9364_v49 }
 0xc6d   : > { %v13343_v8 = vpop.eup %13342 }
 0xc6e   : > { %v13345_v56 = vpop.eup %13344  ;;  %v9519_v23 = vmul.f32 %v13343_v8, %v9169_v14  ;;  %v9175_v36 = vpop.xlane.xlu1 %9174 }
 0xc6f   : > { %v9172_v13 = vpop.xlane.xlu0 %9171  ;;  %v9517_v51 = vmul.f32 %v13345_v56, %v9166_v12 }
 0xc70   : > { %9679 = vst.msk [vmem:[%s17133_s14 + $0x108] sm:$0xff] %vm9645_vm4, %v9519_v23 }
 0xc71   : > { %9678 = vst.msk [vmem:[%s17133_s14 + $0x100] sm:$0xff] %vm9645_vm4, %v9517_v51 }
 0xc72   : > { %v9373_v30 = vpop.xlane.xlu1 %9372 }
 0xc73   : > { %v9370_v0 = vpop.xlane.xlu0 %9369  ;;  %13350 = vrcp.f32 %v9373_v30 }
 0xc74   : > { %13352 = vrcp.f32 %v9370_v0 }
 0xc75   : > { %v13347_v19 = vpop.eup %13346 }
 0xc76   : > { %v13349_v59 = vpop.eup %13348  ;;  %v9523_v6 = vmul.f32 %v13347_v19, %v9175_v36  ;;  %v9181_v44 = vpop.xlane.xlu1 %9180 }
 0xc77   : > { %v9178_v47 = vpop.xlane.xlu0 %9177  ;;  %v9521_v27 = vmul.f32 %v13349_v59, %v9172_v13 }
 0xc78   : > { %9681 = vst.msk [vmem:[%s17133_s14 + $0x118] sm:$0xff] %vm9645_vm4, %v9523_v6 }
 0xc79   : > { %9680 = vst.msk [vmem:[%s17133_s14 + $0x110] sm:$0xff] %vm9645_vm4, %v9521_v27 }
 0xc7a   : > { %v9379_v54 = vpop.xlane.xlu1 %9378 }
 0xc7b   : > { %v9376_v21 = vpop.xlane.xlu0 %9375  ;;  %13354 = vrcp.f32 %v9379_v54 }
 0xc7c   : > { %13356 = vrcp.f32 %v9376_v21 }
 0xc7d   : > { %v13351_v20 = vpop.eup %13350 }
 0xc7e   : > { %v13353_v5 = vpop.eup %13352  ;;  %v9527_v35 = vmul.f32 %v13351_v20, %v9181_v44  ;;  %v9187_v32 = vpop.xlane.xlu1 %9186 }
 0xc7f   : > { %v9184_v31 = vpop.xlane.xlu0 %9183  ;;  %v9525_v41 = vmul.f32 %v13353_v5, %v9178_v47 }
 0xc80   : > { %9683 = vst.msk [vmem:[%s17133_s14 + $0x128] sm:$0xff] %vm9645_vm4, %v9527_v35 }
 0xc81   : > { %9682 = vst.msk [vmem:[%s17133_s14 + $0x120] sm:$0xff] %vm9645_vm4, %v9525_v41 }
 0xc82   : > { %v9385_v10 = vpop.xlane.xlu1 %9384 }
 0xc83   : > { %v9382_v1 = vpop.xlane.xlu0 %9381  ;;  %13358 = vrcp.f32 %v9385_v10 }
 0xc84   : > { %13360 = vrcp.f32 %v9382_v1 }
 0xc85   : > { %v13355_v18 = vpop.eup %13354 }
 0xc86   : > { %v13357_v3 = vpop.eup %13356  ;;  %v9531_v60 = vmul.f32 %v13355_v18, %v9187_v32  ;;  %v9193_v63 = vpop.xlane.xlu1 %9192 }
 0xc87   : > { %v9190_v42 = vpop.xlane.xlu0 %9189  ;;  %v9529_v46 = vmul.f32 %v13357_v3, %v9184_v31 }
 0xc88   : > { %9685 = vst.msk [vmem:[%s17133_s14 + $0x138] sm:$0xff] %vm9645_vm4, %v9531_v60 }
 0xc89   : > { %9684 = vst.msk [vmem:[%s17133_s14 + $0x130] sm:$0xff] %vm9645_vm4, %v9529_v46 }
 0xc8a   : > { %v9391_v34 = vpop.xlane.xlu1 %9390 }
 0xc8b   : > { %v9388_v33 = vpop.xlane.xlu0 %9387  ;;  %13362 = vrcp.f32 %v9391_v34 }
 0xc8c   : > { %13364 = vrcp.f32 %v9388_v33 }
 0xc8d   : > { %v13359_v38 = vpop.eup %13358 }
 0xc8e   : > { %v13361_v26 = vpop.eup %13360  ;;  %v9535_v37 = vmul.f32 %v13359_v38, %v9193_v63  ;;  %v9199_v52 = vpop.xlane.xlu1 %9198 }
 0xc8f   : > { %v9196_v17 = vpop.xlane.xlu0 %9195  ;;  %v9533_v58 = vmul.f32 %v13361_v26, %v9190_v42 }
 0xc90   : > { %9687 = vst.msk [vmem:[%s17133_s14 + $0x148] sm:$0xff] %vm9645_vm4, %v9535_v37 }
 0xc91   : > { %9686 = vst.msk [vmem:[%s17133_s14 + $0x140] sm:$0xff] %vm9645_vm4, %v9533_v58 }
 0xc92   : > { %v9397_v55 = vpop.xlane.xlu1 %9396 }
 0xc93   : > { %v9394_v57 = vpop.xlane.xlu0 %9393  ;;  %13366 = vrcp.f32 %v9397_v55 }
 0xc94   : > { %13368 = vrcp.f32 %v9394_v57 }
 0xc95   : > { %v13363_v24 = vpop.eup %13362 }
 0xc96   : > { %v13365_v25 = vpop.eup %13364  ;;  %v9539_v43 = vmul.f32 %v13363_v24, %v9199_v52  ;;  %v9205_v7 = vpop.xlane.xlu1 %9204 }
 0xc97   : > { %v9202_v29 = vpop.xlane.xlu0 %9201  ;;  %v9537_v61 = vmul.f32 %v13365_v25, %v9196_v17 }
 0xc98   : > { %9689 = vst.msk [vmem:[%s17133_s14 + $0x158] sm:$0xff] %vm9645_vm4, %v9539_v43 }
 0xc99   : > { %9688 = vst.msk [vmem:[%s17133_s14 + $0x150] sm:$0xff] %vm9645_vm4, %v9537_v61 }
 0xc9a   : > { %v9403_v48 = vpop.xlane.xlu1 %9402 }
 0xc9b   : > { %v9400_v53 = vpop.xlane.xlu0 %9399  ;;  %13370 = vrcp.f32 %v9403_v48 }
 0xc9c   : > { %13372 = vrcp.f32 %v9400_v53 }
 0xc9d   : > { %v13367_v45 = vpop.eup %13366 }
 0xc9e   : > { %v13369_v11 = vpop.eup %13368  ;;  %v9543_v50 = vmul.f32 %v13367_v45, %v9205_v7  ;;  %v9211_v9 = vpop.xlane.xlu1 %9210 }
 0xc9f   : > { %v9208_v2 = vpop.xlane.xlu0 %9207  ;;  %v9541_v4 = vmul.f32 %v13369_v11, %v9202_v29 }
 0xca0   : > { %9691 = vst.msk [vmem:[%s17133_s14 + $0x168] sm:$0xff] %vm9645_vm4, %v9543_v50 }
 0xca1   : > { %9690 = vst.msk [vmem:[%s17133_s14 + $0x160] sm:$0xff] %vm9645_vm4, %v9541_v4 }
 0xca2   : > { %v9409_v22 = vpop.xlane.xlu1 %9408 }
 0xca3   : > { %v9406_v28 = vpop.xlane.xlu0 %9405  ;;  %13374 = vrcp.f32 %v9409_v22 }
 0xca4   : > { %13376 = vrcp.f32 %v9406_v28 }
 0xca5   : > { %v13371_v15 = vpop.eup %13370 }
 0xca6   : > { %v13373_v39 = vpop.eup %13372  ;;  %v9547_v40 = vmul.f32 %v13371_v15, %v9211_v9  ;;  %v9217_v14 = vpop.xlane.xlu1 %9216 }
 0xca7   : > { %v9214_v12 = vpop.xlane.xlu0 %9213  ;;  %v9545_v16 = vmul.f32 %v13373_v39, %v9208_v2 }
 0xca8   : > { %9693 = vst.msk [vmem:[%s17133_s14 + $0x178] sm:$0xff] %vm9645_vm4, %v9547_v40  ;;  %v9876_v40 = vld [vmem:[%s17133_s14] sm:$0xff] (%p18925_p8) }
 0xca9   : > { %9692 = vst.msk [vmem:[%s17133_s14 + $0x170] sm:$0xff] %vm9645_vm4, %v9545_v16  ;;  %v9882_v16 = vld [vmem:[%s17133_s14 + $0x18] sm:$0xff] (%p18925_p8)  ;;  %9877 = vst [vmem:[%s18355_s19] sm:$0xff] (%p18925_p8), %v9876_v40 }
 0xcaa   : > { %v9415_v62 = vpop.xlane.xlu1 %9414  ;;  %9883 = vst [vmem:[%s18355_s19 + $0x18] sm:$0xff] (%p18925_p8), %v9882_v16 }
 0xcab   : > { %v9412_v49 = vpop.xlane.xlu0 %9411  ;;  %13378 = vrcp.f32 %v9415_v62  ;;  %v9884_v62 = vld [vmem:[%s17133_s14 + $0x20] sm:$0xff] (%p18925_p8) }
 0xcac   : > { %13380 = vrcp.f32 %v9412_v49  ;;  %v9886_v49 = vld [vmem:[%s17133_s14 + $0x28] sm:$0xff] (%p18925_p8)  ;;  %9885 = vst [vmem:[%s18355_s19 + $0x20] sm:$0xff] (%p18925_p8), %v9884_v62 }
 0xcad   : > { %v13375_v8 = vpop.eup %13374  ;;  %9887 = vst [vmem:[%s18355_s19 + $0x28] sm:$0xff] (%p18925_p8), %v9886_v49 }
 0xcae   : > { %v13377_v56 = vpop.eup %13376  ;;  %v9551_v23 = vmul.f32 %v13375_v8, %v9217_v14  ;;  %v9223_v36 = vpop.xlane.xlu1 %9222  ;;  %v9878_v14 = vld [vmem:[%s17133_s14 + $0x8] sm:$0xff] (%p18925_p8)  ;;  %v9888_v8 = vld [vmem:[%s17133_s14 + $0x30] sm:$0xff] (%p18925_p8) }
 0xcaf   : > { %v9220_v13 = vpop.xlane.xlu0 %9219  ;;  %v9549_v51 = vmul.f32 %v13377_v56, %v9214_v12  ;;  %v9880_v12 = vld [vmem:[%s17133_s14 + $0x10] sm:$0xff] (%p18925_p8)  ;;  %v9890_v56 = vld [vmem:[%s17133_s14 + $0x38] sm:$0xff] (%p18925_p8)  ;;  %9879 = vst [vmem:[%s18355_s19 + $0x8] sm:$0xff] (%p18925_p8), %v9878_v14  ;;  %9889 = vst [vmem:[%s18355_s19 + $0x30] sm:$0xff] (%p18925_p8), %v9888_v8 }
 0xcb0   : > { %9695 = vst.msk [vmem:[%s17133_s14 + $0x188] sm:$0xff] %vm9645_vm4, %v9551_v23  ;;  %v9892_v23 = vld [vmem:[%s17133_s14 + $0x40] sm:$0xff] (%p18925_p8)  ;;  %9881 = vst [vmem:[%s18355_s19 + $0x10] sm:$0xff] (%p18925_p8), %v9880_v12 }
 0xcb1   : > { %9694 = vst.msk [vmem:[%s17133_s14 + $0x180] sm:$0xff] %vm9645_vm4, %v9549_v51  ;;  %v9898_v51 = vld [vmem:[%s17133_s14 + $0x58] sm:$0xff] (%p18925_p8)  ;;  %9891 = vst [vmem:[%s18355_s19 + $0x38] sm:$0xff] (%p18925_p8), %v9890_v56 }
 0xcb2   : > { %v9421_v30 = vpop.xlane.xlu1 %9420  ;;  %9893 = vst [vmem:[%s18355_s19 + $0x40] sm:$0xff] (%p18925_p8), %v9892_v23  ;;  %9899 = vst [vmem:[%s18355_s19 + $0x58] sm:$0xff] (%p18925_p8), %v9898_v51 }
 0xcb3   : > { %v9418_v0 = vpop.xlane.xlu0 %9417  ;;  %13382 = vrcp.f32 %v9421_v30  ;;  %v9900_v30 = vld [vmem:[%s17133_s14 + $0x60] sm:$0xff] (%p18925_p8) }
 0xcb4   : > { %13384 = vrcp.f32 %v9418_v0  ;;  %v9902_v0 = vld [vmem:[%s17133_s14 + $0x68] sm:$0xff] (%p18925_p8)  ;;  %9901 = vst [vmem:[%s18355_s19 + $0x60] sm:$0xff] (%p18925_p8), %v9900_v30 }
 0xcb5   : > { %v13379_v19 = vpop.eup %13378  ;;  %9903 = vst [vmem:[%s18355_s19 + $0x68] sm:$0xff] (%p18925_p8), %v9902_v0 }
 0xcb6   : > { %v13381_v59 = vpop.eup %13380  ;;  %v9555_v6 = vmul.f32 %v13379_v19, %v9223_v36  ;;  %v9229_v44 = vpop.xlane.xlu1 %9228  ;;  %v9894_v36 = vld [vmem:[%s17133_s14 + $0x48] sm:$0xff] (%p18925_p8)  ;;  %v9904_v19 = vld [vmem:[%s17133_s14 + $0x70] sm:$0xff] (%p18925_p8) }
 0xcb7   : > { %v9226_v47 = vpop.xlane.xlu0 %9225  ;;  %v9553_v27 = vmul.f32 %v13381_v59, %v9220_v13  ;;  %v9896_v13 = vld [vmem:[%s17133_s14 + $0x50] sm:$0xff] (%p18925_p8)  ;;  %9895 = vst [vmem:[%s18355_s19 + $0x48] sm:$0xff] (%p18925_p8), %v9894_v36  ;;  %9905 = vst [vmem:[%s18355_s19 + $0x70] sm:$0xff] (%p18925_p8), %v9904_v19  ;;  %v9906_v59 = vld [vmem:[%s17133_s14 + $0x78] sm:$0xff] (%p18925_p8) }
 0xcb8   : > { %9697 = vst.msk [vmem:[%s17133_s14 + $0x198] sm:$0xff] %vm9645_vm4, %v9555_v6  ;;  %9897 = vst [vmem:[%s18355_s19 + $0x50] sm:$0xff] (%p18925_p8), %v9896_v13  ;;  %v9908_v6 = vld [vmem:[%s17133_s14 + $0x80] sm:$0xff] (%p18925_p8) }
 0xcb9   : > { %9696 = vst.msk [vmem:[%s17133_s14 + $0x190] sm:$0xff] %vm9645_vm4, %v9553_v27  ;;  %9907 = vst [vmem:[%s18355_s19 + $0x78] sm:$0xff] (%p18925_p8), %v9906_v59  ;;  %v9914_v27 = vld [vmem:[%s17133_s14 + $0x98] sm:$0xff] (%p18925_p8) }
 0xcba   : > { %v9427_v54 = vpop.xlane.xlu1 %9426  ;;  %9909 = vst [vmem:[%s18355_s19 + $0x100] sm:$0xff] (%p18925_p8), %v9908_v6  ;;  %9915 = vst [vmem:[%s18355_s19 + $0x118] sm:$0xff] (%p18925_p8), %v9914_v27 }
 0xcbb   : > { %v9424_v21 = vpop.xlane.xlu0 %9423  ;;  %13386 = vrcp.f32 %v9427_v54  ;;  %v9916_v54 = vld [vmem:[%s17133_s14 + $0xa0] sm:$0xff] (%p18925_p8) }
 0xcbc   : > { %13388 = vrcp.f32 %v9424_v21  ;;  %9917 = vst [vmem:[%s18355_s19 + $0x120] sm:$0xff] (%p18925_p8), %v9916_v54  ;;  %v9918_v21 = vld [vmem:[%s17133_s14 + $0xa8] sm:$0xff] (%p18925_p8) }
 0xcbd   : > { %v13383_v20 = vpop.eup %13382  ;;  %9919 = vst [vmem:[%s18355_s19 + $0x128] sm:$0xff] (%p18925_p8), %v9918_v21 }
 0xcbe   : > { %v13385_v5 = vpop.eup %13384  ;;  %v9559_v35 = vmul.f32 %v13383_v20, %v9229_v44  ;;  %v9235_v32 = vpop.xlane.xlu1 %9234  ;;  %v9910_v44 = vld [vmem:[%s17133_s14 + $0x88] sm:$0xff] (%p18925_p8)  ;;  %v9920_v20 = vld [vmem:[%s17133_s14 + $0xb0] sm:$0xff] (%p18925_p8) }
 0xcbf   : > { %v9232_v31 = vpop.xlane.xlu0 %9231  ;;  %v9557_v41 = vmul.f32 %v13385_v5, %v9226_v47  ;;  %9911 = vst [vmem:[%s18355_s19 + $0x108] sm:$0xff] (%p18925_p8), %v9910_v44  ;;  %v9912_v47 = vld [vmem:[%s17133_s14 + $0x90] sm:$0xff] (%p18925_p8)  ;;  %v9922_v5 = vld [vmem:[%s17133_s14 + $0xb8] sm:$0xff] (%p18925_p8)  ;;  %9921 = vst [vmem:[%s18355_s19 + $0x130] sm:$0xff] (%p18925_p8), %v9920_v20 }
 0xcc0   : > { %9699 = vst.msk [vmem:[%s17133_s14 + $0x1a8] sm:$0xff] %vm9645_vm4, %v9559_v35  ;;  %9913 = vst [vmem:[%s18355_s19 + $0x110] sm:$0xff] (%p18925_p8), %v9912_v47  ;;  %v9924_v35 = vld [vmem:[%s17133_s14 + $0xc0] sm:$0xff] (%p18925_p8) }
 0xcc1   : > { %9698 = vst.msk [vmem:[%s17133_s14 + $0x1a0] sm:$0xff] %vm9645_vm4, %v9557_v41  ;;  %9923 = vst [vmem:[%s18355_s19 + $0x138] sm:$0xff] (%p18925_p8), %v9922_v5  ;;  %v9930_v41 = vld [vmem:[%s17133_s14 + $0xd8] sm:$0xff] (%p18925_p8) }
 0xcc2   : > { %v9433_v10 = vpop.xlane.xlu1 %9432  ;;  %9925 = vst [vmem:[%s18355_s19 + $0x140] sm:$0xff] (%p18925_p8), %v9924_v35  ;;  %9931 = vst [vmem:[%s18355_s19 + $0x158] sm:$0xff] (%p18925_p8), %v9930_v41 }
 0xcc3   : > { %v9430_v1 = vpop.xlane.xlu0 %9429  ;;  %13390 = vrcp.f32 %v9433_v10  ;;  %v9932_v10 = vld [vmem:[%s17133_s14 + $0xe0] sm:$0xff] (%p18925_p8) }
 0xcc4   : > { %13392 = vrcp.f32 %v9430_v1  ;;  %v9934_v1 = vld [vmem:[%s17133_s14 + $0xe8] sm:$0xff] (%p18925_p8)  ;;  %9933 = vst [vmem:[%s18355_s19 + $0x160] sm:$0xff] (%p18925_p8), %v9932_v10 }
 0xcc5   : > { %v13387_v18 = vpop.eup %13386  ;;  %9935 = vst [vmem:[%s18355_s19 + $0x168] sm:$0xff] (%p18925_p8), %v9934_v1 }
 0xcc6   : > { %v13389_v3 = vpop.eup %13388  ;;  %v9563_v60 = vmul.f32 %v13387_v18, %v9235_v32  ;;  %v9241_v63 = vpop.xlane.xlu1 %9240  ;;  %v9926_v32 = vld [vmem:[%s17133_s14 + $0xc8] sm:$0xff] (%p18925_p8)  ;;  %v9936_v18 = vld [vmem:[%s17133_s14 + $0xf0] sm:$0xff] (%p18925_p8) }
 0xcc7   : > { %v9238_v42 = vpop.xlane.xlu0 %9237  ;;  %v9561_v46 = vmul.f32 %v13389_v3, %v9232_v31  ;;  %v9928_v31 = vld [vmem:[%s17133_s14 + $0xd0] sm:$0xff] (%p18925_p8)  ;;  %9927 = vst [vmem:[%s18355_s19 + $0x148] sm:$0xff] (%p18925_p8), %v9926_v32  ;;  %v9938_v3 = vld [vmem:[%s17133_s14 + $0xf8] sm:$0xff] (%p18925_p8)  ;;  %9937 = vst [vmem:[%s18355_s19 + $0x170] sm:$0xff] (%p18925_p8), %v9936_v18 }
 0xcc8   : > { %9701 = vst.msk [vmem:[%s17133_s14 + $0x1b8] sm:$0xff] %vm9645_vm4, %v9563_v60  ;;  %9929 = vst [vmem:[%s18355_s19 + $0x150] sm:$0xff] (%p18925_p8), %v9928_v31  ;;  %v9940_v60 = vld [vmem:[%s17133_s14 + $0x100] sm:$0xff] (%p18925_p8) }
 0xcc9   : > { %9700 = vst.msk [vmem:[%s17133_s14 + $0x1b0] sm:$0xff] %vm9645_vm4, %v9561_v46  ;;  %9939 = vst [vmem:[%s18355_s19 + $0x178] sm:$0xff] (%p18925_p8), %v9938_v3  ;;  %v9946_v46 = vld [vmem:[%s17133_s14 + $0x118] sm:$0xff] (%p18925_p8) }
 0xcca   : > { %v9439_v34 = vpop.xlane.xlu1 %9438  ;;  %9941 = vst [vmem:[%s18355_s19 + $0x200] sm:$0xff] (%p18925_p8), %v9940_v60  ;;  %9947 = vst [vmem:[%s18355_s19 + $0x218] sm:$0xff] (%p18925_p8), %v9946_v46 }
 0xccb   : > { %v9436_v33 = vpop.xlane.xlu0 %9435  ;;  %13394 = vrcp.f32 %v9439_v34  ;;  %v9948_v34 = vld [vmem:[%s17133_s14 + $0x120] sm:$0xff] (%p18925_p8) }
 0xccc   : > { %13396 = vrcp.f32 %v9436_v33  ;;  %v9950_v33 = vld [vmem:[%s17133_s14 + $0x128] sm:$0xff] (%p18925_p8)  ;;  %9949 = vst [vmem:[%s18355_s19 + $0x220] sm:$0xff] (%p18925_p8), %v9948_v34 }
 0xccd   : > { %v13391_v38 = vpop.eup %13390  ;;  %9951 = vst [vmem:[%s18355_s19 + $0x228] sm:$0xff] (%p18925_p8), %v9950_v33 }
 0xcce   : > { %v13393_v26 = vpop.eup %13392  ;;  %v9567_v37 = vmul.f32 %v13391_v38, %v9241_v63  ;;  %v9247_v52 = vpop.xlane.xlu1 %9246  ;;  %v9942_v63 = vld [vmem:[%s17133_s14 + $0x108] sm:$0xff] (%p18925_p8)  ;;  %v9952_v38 = vld [vmem:[%s17133_s14 + $0x130] sm:$0xff] (%p18925_p8) }
 0xccf   : > { %v9244_v17 = vpop.xlane.xlu0 %9243  ;;  %v9565_v58 = vmul.f32 %v13393_v26, %v9238_v42  ;;  %v9944_v42 = vld [vmem:[%s17133_s14 + $0x110] sm:$0xff] (%p18925_p8)  ;;  %9943 = vst [vmem:[%s18355_s19 + $0x208] sm:$0xff] (%p18925_p8), %v9942_v63  ;;  %9953 = vst [vmem:[%s18355_s19 + $0x230] sm:$0xff] (%p18925_p8), %v9952_v38  ;;  %v9954_v26 = vld [vmem:[%s17133_s14 + $0x138] sm:$0xff] (%p18925_p8) }
 0xcd0   : > { %9703 = vst.msk [vmem:[%s17133_s14 + $0x1c8] sm:$0xff] %vm9645_vm4, %v9567_v37  ;;  %9945 = vst [vmem:[%s18355_s19 + $0x210] sm:$0xff] (%p18925_p8), %v9944_v42  ;;  %v9956_v37 = vld [vmem:[%s17133_s14 + $0x140] sm:$0xff] (%p18925_p8) }
 0xcd1   : > { %9702 = vst.msk [vmem:[%s17133_s14 + $0x1c0] sm:$0xff] %vm9645_vm4, %v9565_v58  ;;  %9955 = vst [vmem:[%s18355_s19 + $0x238] sm:$0xff] (%p18925_p8), %v9954_v26  ;;  %v9962_v58 = vld [vmem:[%s17133_s14 + $0x158] sm:$0xff] (%p18925_p8) }
 0xcd2   : > { %v9445_v55 = vpop.xlane.xlu1 %9444  ;;  %9957 = vst [vmem:[%s18355_s19 + $0x240] sm:$0xff] (%p18925_p8), %v9956_v37  ;;  %9963 = vst [vmem:[%s18355_s19 + $0x258] sm:$0xff] (%p18925_p8), %v9962_v58 }
 0xcd3   : > { %v9442_v57 = vpop.xlane.xlu0 %9441  ;;  %13398 = vrcp.f32 %v9445_v55  ;;  %v9964_v55 = vld [vmem:[%s17133_s14 + $0x160] sm:$0xff] (%p18925_p8) }
 0xcd4   : > { %13400 = vrcp.f32 %v9442_v57  ;;  %9965 = vst [vmem:[%s18355_s19 + $0x260] sm:$0xff] (%p18925_p8), %v9964_v55  ;;  %v9966_v57 = vld [vmem:[%s17133_s14 + $0x168] sm:$0xff] (%p18925_p8) }
 0xcd5   : > { %v13395_v24 = vpop.eup %13394  ;;  %9967 = vst [vmem:[%s18355_s19 + $0x268] sm:$0xff] (%p18925_p8), %v9966_v57 }
 0xcd6   : > { %v13397_v25 = vpop.eup %13396  ;;  %v9571_v43 = vmul.f32 %v13395_v24, %v9247_v52  ;;  %v9253_v7 = vpop.xlane.xlu1 %9252  ;;  %v9958_v52 = vld [vmem:[%s17133_s14 + $0x148] sm:$0xff] (%p18925_p8)  ;;  %v9968_v24 = vld [vmem:[%s17133_s14 + $0x170] sm:$0xff] (%p18925_p8) }
 0xcd7   : > { %v9250_v29 = vpop.xlane.xlu0 %9249  ;;  %v9569_v61 = vmul.f32 %v13397_v25, %v9244_v17  ;;  %9959 = vst [vmem:[%s18355_s19 + $0x248] sm:$0xff] (%p18925_p8), %v9958_v52  ;;  %v9960_v17 = vld [vmem:[%s17133_s14 + $0x150] sm:$0xff] (%p18925_p8)  ;;  %v9970_v25 = vld [vmem:[%s17133_s14 + $0x178] sm:$0xff] (%p18925_p8)  ;;  %9969 = vst [vmem:[%s18355_s19 + $0x270] sm:$0xff] (%p18925_p8), %v9968_v24 }
 0xcd8   : > { %9705 = vst.msk [vmem:[%s17133_s14 + $0x1d8] sm:$0xff] %vm9645_vm4, %v9571_v43  ;;  %9961 = vst [vmem:[%s18355_s19 + $0x250] sm:$0xff] (%p18925_p8), %v9960_v17  ;;  %v9972_v43 = vld [vmem:[%s17133_s14 + $0x180] sm:$0xff] (%p18925_p8) }
 0xcd9   : > { %9704 = vst.msk [vmem:[%s17133_s14 + $0x1d0] sm:$0xff] %vm9645_vm4, %v9569_v61  ;;  %9971 = vst [vmem:[%s18355_s19 + $0x278] sm:$0xff] (%p18925_p8), %v9970_v25  ;;  %v9978_v61 = vld [vmem:[%s17133_s14 + $0x198] sm:$0xff] (%p18925_p8) }
 0xcda   : > { %v9259_v48 = vpop.xlane.xlu1 %9258  ;;  %9973 = vst [vmem:[%s18355_s19 + $0x300] sm:$0xff] (%p18925_p8), %v9972_v43  ;;  %9979 = vst [vmem:[%s18355_s19 + $0x318] sm:$0xff] (%p18925_p8), %v9978_v61 }
 0xcdb   : > { %v9256_v53 = vpop.xlane.xlu0 %9255 }
 0xcdd   : > { %v13399_v45 = vpop.eup %13398 }
 0xcde   : > { %v13401_v11 = vpop.eup %13400  ;;  %v9575_v50 = vmul.f32 %v13399_v45, %v9253_v7  ;;  %v9451_v9 = vpop.xlane.xlu1 %9450  ;;  %v9974_v7 = vld [vmem:[%s17133_s14 + $0x188] sm:$0xff] (%p18925_p8)  ;;  %v9984_v45 = vld [vmem:[%s17133_s14 + $0x1b0] sm:$0xff] (%p18925_p8) }
 0xcdf   : > { %v9448_v2 = vpop.xlane.xlu0 %9447  ;;  %v9573_v4 = vmul.f32 %v13401_v11, %v9250_v29  ;;  %13402 = vrcp.f32 %v9451_v9  ;;  %v9976_v29 = vld [vmem:[%s17133_s14 + $0x190] sm:$0xff] (%p18925_p8)  ;;  %9975 = vst [vmem:[%s18355_s19 + $0x308] sm:$0xff] (%p18925_p8), %v9974_v7  ;;  %v9986_v11 = vld [vmem:[%s17133_s14 + $0x1b8] sm:$0xff] (%p18925_p8)  ;;  %9985 = vst [vmem:[%s18355_s19 + $0x330] sm:$0xff] (%p18925_p8), %v9984_v45 }
 0xce0   : > { %9707 = vst.msk [vmem:[%s17133_s14 + $0x1e8] sm:$0xff] %vm9645_vm4, %v9575_v50  ;;  %13404 = vrcp.f32 %v9448_v2  ;;  %9977 = vst [vmem:[%s18355_s19 + $0x310] sm:$0xff] (%p18925_p8), %v9976_v29  ;;  %v9988_v50 = vld [vmem:[%s17133_s14 + $0x1c0] sm:$0xff] (%p18925_p8)  ;;  %v9990_v9 = vld [vmem:[%s17133_s14 + $0x1c8] sm:$0xff] (%p18925_p8) }
 0xce1   : > { %9706 = vst.msk [vmem:[%s17133_s14 + $0x1e0] sm:$0xff] %vm9645_vm4, %v9573_v4  ;;  %9987 = vst [vmem:[%s18355_s19 + $0x338] sm:$0xff] (%p18925_p8), %v9986_v11  ;;  %v9992_v2 = vld [vmem:[%s17133_s14 + $0x1d0] sm:$0xff] (%p18925_p8)  ;;  %v9994_v4 = vld [vmem:[%s17133_s14 + $0x1d8] sm:$0xff] (%p18925_p8) }
 0xce2   : > { %9989 = vst [vmem:[%s18355_s19 + $0x340] sm:$0xff] (%p18925_p8), %v9988_v50  ;;  %9991 = vst [vmem:[%s18355_s19 + $0x348] sm:$0xff] (%p18925_p8), %v9990_v9 }
 0xce3   : > { %9993 = vst [vmem:[%s18355_s19 + $0x350] sm:$0xff] (%p18925_p8), %v9992_v2  ;;  %9995 = vst [vmem:[%s18355_s19 + $0x358] sm:$0xff] (%p18925_p8), %v9994_v4 }
 0xce7   : > { %9716 = sbr.rel (!%p18925_p8) target bundleno = 3318 (0xcf6), region = 64 }
 0xce9   : > { %v13403_v22 = vpop.eup %13402 }
 0xcea   : > { %v13405_v28 = vpop.eup %13404  ;;  %v9579_v15 = vmul.f32 %v13403_v22, %v9259_v48  ;;  %v9980_v48 = vld [vmem:[%s17133_s14 + $0x1a0] sm:$0xff] (%p18925_p8) }
 0xceb   : > { %v9577_v39 = vmul.f32 %v13405_v28, %v9256_v53  ;;  %v9982_v53 = vld [vmem:[%s17133_s14 + $0x1a8] sm:$0xff] (%p18925_p8)  ;;  %9981 = vst [vmem:[%s18355_s19 + $0x320] sm:$0xff] (%p18925_p8), %v9980_v48  ;;  %v9996_v22 = vld [vmem:[%s17133_s14 + $0x1e0] sm:$0xff] (%p18925_p8) }
 0xcec   : > { %9709 = vst.msk [vmem:[%s17133_s14 + $0x1f8] sm:$0xff] %vm9645_vm4, %v9579_v15  ;;  %9983 = vst [vmem:[%s18355_s19 + $0x328] sm:$0xff] (%p18925_p8), %v9982_v53  ;;  %v9998_v28 = vld [vmem:[%s17133_s14 + $0x1e8] sm:$0xff] (%p18925_p8) }
 0xced   : > { %9708 = vst.msk [vmem:[%s17133_s14 + $0x1f0] sm:$0xff] %vm9645_vm4, %v9577_v39  ;;  %9997 = vst [vmem:[%s18355_s19 + $0x360] sm:$0xff] (%p18925_p8), %v9996_v22 }
 0xcee   : > { %9999 = vst [vmem:[%s18355_s19 + $0x368] sm:$0xff] %v9998_v28 }
 0xcf3   : > { %v10002_v39 = vld [vmem:[%s17133_s14 + $0x1f8] sm:$0xff] }
 0xcf4   : > { %v10000_v15 = vld [vmem:[%s17133_s14 + $0x1f0] sm:$0xff]  ;;  %10003 = vst [vmem:[%s18355_s19 + $0x378] sm:$0xff] %v10002_v39 }
 0xcf5   : > { %10001 = vst [vmem:[%s18355_s19 + $0x370] sm:$0xff] %v10000_v15 }
 0xcf6 PF: > { %s20_s15 = sadd.s32 1, %s13509_s15   ;;  %s18926_s12 = sld [smem:[#allocation6_spill]] }
 0xcf7   : > { %p17_p11 = scmp.ge.s32.totalorder %s20_s15, 6   ;;  %s18927_s17 = sld [smem:[#allocation7_spill]] }
 0xcf8   : > { %s18928_s14 = sld [smem:[#allocation8_spill]]  ;;  %s18929_s30 = smov %s13489_s10 }
 0xcf9   : > { %s18930_s10 = smov %s13638_s29  ;;  %s18931_s11 = smov %s13501_s13 }
 0xcfa   :  { %19 = sbr.rel (!%p17_p11) target bundleno = 6 (0x6), region = 148 }
 0xcfd   : > { %s18932_s13 = smov %s18927_s17 }
 0xd01   :  { %10019 = vsyncpa [#allocation3], 1 }
 0xd02   :  { %10021 = vsyncpa [#allocation3 + $0x1], 1 }

</bundles_post_ra>
